<compile_context>
chip_gen: v7x
topology: tpu7x:2x2x1
jax: 0.10.0
libtpu: 0.0.40
codegen_flags: <defaults>
</compile_context>

<pallas_src>
import functools

import numpy as np

import jax
import jax.numpy as jnp
from jax.experimental import pallas as pl
from jax.experimental.pallas import tpu as pltpu


def _round_up(x, m):
    return (x + m - 1) // m * m


def _fused_net_kernel(mask_ref, x_ref, w_ref, b_ref, alpha_ref, o_ref,
                      xbuf_ref, *, num_layers, KH, KW, Wp, P, M, Cmax,
                      Cout_final):
    """Runs the entire conv chain for one image.

    mask_ref  : (1, P)                    VMEM  1.0 at interior pixels, 0.0 on pad ring
    x_ref     : (1, Cmax, L)              VMEM  flat padded input (+ lane margins M)
    w_ref     : (num_layers, KH*KW, Cmax, Cmax) VMEM  w[l, tap, cout, cin]
    b_ref     : (num_layers, Cmax, 1)     VMEM
    alpha_ref : (num_layers,)             SMEM  PReLU slope (1.0 => identity)
    o_ref     : (1, Cout_final, P)        VMEM  final activation, flat padded layout
    xbuf_ref  : (Cmax, L)                 VMEM scratch, activation between layers
    """
    ph, pw = KH // 2, KW // 2

    # Margins and pad ring of the activation scratch must be zero.
    xbuf_ref[...] = jnp.zeros_like(xbuf_ref)

    mask = mask_ref[...]                                   # (1, P)

    for l in range(num_layers):
        acc = jnp.zeros((Cmax, P), jnp.float32)
        for kh in range(KH):
            for kw in range(KW):
                t = kh * KW + kw
                start = M + (kh - ph) * Wp + (kw - pw)     # static lane offset
                if l == 0:
                    patch = x_ref[0, :, pl.ds(start, P)]   # (Cmax, P)
                else:
                    patch = xbuf_ref[:, pl.ds(start, P)]   # (Cmax, P)
                acc = acc + jnp.dot(w_ref[l, t], patch,
                                    preferred_element_type=jnp.float32)
        acc = acc + b_ref[l]                               # (Cmax, 1) broadcast
        alpha = alpha_ref[l]                               # scalar from SMEM
        acc = jnp.where(acc >= 0.0, acc, alpha * acc)      # PReLU (alpha=1 -> id)
        acc = jnp.where(mask > 0.5, acc, 0.0)              # keep pad ring at 0

        if l == num_layers - 1:
            o_ref[0] = acc[:Cout_final, :]
        else:
            xbuf_ref[:, pl.ds(M, P)] = acc                 # resident in VMEM


def shallow_feature_extraction(x_nchw, params):
    """Forward pass.  x_nchw: (N, Cin, H, W) -> (N, 32, H, W)."""
    N, Cin, H, W = x_nchw.shape
    KH, KW = params[0]["w"].shape[0], params[0]["w"].shape[1]
    # 'same' padding via k//2 is only correct for odd kernel sizes (matches
    # the PyTorch module, which also uses kernel_size // 2).
    assert KH % 2 == 1 and KW % 2 == 1, "kernel_size must be odd"
    ph, pw = KH // 2, KW // 2
    Hp, Wp = H + 2 * ph, W + 2 * pw
    P = Hp * Wp                           # flat padded spatial size (lane dim)
    M = 128                               # lane margin so shifted reads stay in-bounds
    assert M >= ph * Wp + pw
    L = P + 2 * M

    num_layers = len(params)
    Cout_final = params[-1]["w"].shape[-1]
    cmax = max([Cin, Cout_final] + [p["w"].shape[-1] for p in params])
    Cmax = _round_up(cmax, 8)
    KK = KH * KW

    # ---- pack all layer parameters once (zero padded to Cmax channels) ----
    w_packed = jnp.zeros((num_layers, KK, Cmax, Cmax), jnp.float32)
    b_packed = jnp.zeros((num_layers, Cmax, 1), jnp.float32)
    alphas = []
    for l, layer in enumerate(params):
        w = layer["w"]                                     # (KH, KW, cin, cout)
        cin, cout = w.shape[2], w.shape[3]
        w_oi = jnp.transpose(w, (0, 1, 3, 2)).reshape(KK, cout, cin)
        w_packed = w_packed.at[l, :, :cout, :cin].set(w_oi)
        b_packed = b_packed.at[l, :cout, 0].set(layer["b"])
        # Single shared alpha (PyTorch nn.PReLU() default, num_parameters=1).
        alphas.append(float(layer["alpha"]) if layer["prelu"] else 1.0)
    alphas = jnp.asarray(alphas, jnp.float32)

    # ---- one-time input prep: channel pad, spatial 'same' pad, flatten, margins ----
    xp = jnp.pad(x_nchw, ((0, 0), (0, Cmax - Cin), (ph, ph), (pw, pw)))
    x_prep = jnp.pad(xp.reshape(N, Cmax, P), ((0, 0), (0, 0), (M, M)))

    mask2d = np.zeros((Hp, Wp), np.float32)
    mask2d[ph:ph + H, pw:pw + W] = 1.0
    mask = jnp.asarray(mask2d.reshape(1, P))

    kernel = functools.partial(
        _fused_net_kernel, num_layers=num_layers, KH=KH, KW=KW, Wp=Wp,
        P=P, M=M, Cmax=Cmax, Cout_final=Cout_final)

    out_flat = pl.pallas_call(
        kernel,
        out_shape=jax.ShapeDtypeStruct((N, Cout_final, P), jnp.float32),
        grid=(N,),
        in_specs=[
            pl.BlockSpec((1, P), lambda n: (0, 0)),                       # mask
            pl.BlockSpec((1, Cmax, L), lambda n: (n, 0, 0)),              # input
            pl.BlockSpec((num_layers, KK, Cmax, Cmax),
                         lambda n: (0, 0, 0, 0)),                         # weights
            pl.BlockSpec((num_layers, Cmax, 1), lambda n: (0, 0, 0)),     # biases
            pl.BlockSpec(memory_space=pltpu.SMEM),                        # alphas
        ],
        out_specs=pl.BlockSpec((1, Cout_final, P), lambda n: (n, 0, 0)),
        scratch_shapes=[pltpu.VMEM((Cmax, L), jnp.float32)],
        compiler_params=pltpu.CompilerParams(
            dimension_semantics=("parallel",)),
    )(mask, x_prep, w_packed, b_packed, alphas)

    # Un-pad the flat NCHW-layout output (cheap slice, no transpose).
    out = out_flat.reshape(N, Cout_final, Hp, Wp)[:, :, ph:ph + H, pw:pw + W]
    return out


def init_params(key, in_channels, num_res_layers, kernel_size, channel_size):
    """Deterministic synthetic parameters mirroring the PyTorch module:
    init conv+PReLU, num_res_layers x (conv+PReLU, conv+PReLU), final conv."""
    layers = []

    def conv(key, cin, cout, prelu):
        kw_key, b_key = jax.random.split(key)
        fan_in = cin * kernel_size * kernel_size
        w = jax.random.normal(kw_key,
                              (kernel_size, kernel_size, cin, cout),
                              jnp.float32) * (1.0 / jnp.sqrt(fan_in))
        b = jax.random.normal(b_key, (cout,), jnp.float32) * 0.01
        return {"w": w, "b": b, "alpha": 0.25, "prelu": prelu}

    keys = jax.random.split(key, 2 + 2 * num_res_layers)
    ki = 0
    layers.append(conv(keys[ki], in_channels, channel_size, True)); ki += 1
    for _ in range(num_res_layers):
        layers.append(conv(keys[ki], channel_size, channel_size, True)); ki += 1
        layers.append(conv(keys[ki], channel_size, channel_size, True)); ki += 1
    layers.append(conv(keys[ki], channel_size, 32, False)); ki += 1
    return layers


def _reference_forward(x_nchw, params):
    """Pure-JAX reference (lax conv) for correctness checking."""
    x = x_nchw
    for layer in params:
        w = jnp.transpose(layer["w"], (3, 2, 0, 1))        # -> OIHW
        p = w.shape[-1] // 2
        x = jax.lax.conv_general_dilated(
            x, w, window_strides=(1, 1), padding=((p, p), (p, p)),
            dimension_numbers=("NCHW", "OIHW", "NCHW"))
        x = x + layer["b"][None, :, None, None]
        if layer["prelu"]:
            x = jnp.where(x >= 0, x, layer["alpha"] * x)
    return x


if __name__ == "__main__":
    # in_channels=4, num_res_layers=2, kernel_size=3, channel_size=8
    in_channels, num_res_layers, kernel_size, channel_size = 4, 2, 3, 8
    N, H, W = 2, 16, 16

    key = jax.random.PRNGKey(0)
    pkey, xkey = jax.random.split(key)
    params = init_params(pkey, in_channels, num_res_layers, kernel_size,
                         channel_size)
    x = jax.random.normal(xkey, (N, in_channels, H, W), jnp.float32)

    out = jax.block_until_ready(shallow_feature_extraction(x, params))
    assert out.shape == (N, 32, H, W), out.shape

    ref = jax.block_until_ready(_reference_forward(x, params))
    err = float(jnp.max(jnp.abs(out - ref)))
    assert jnp.allclose(out, ref, rtol=1e-3, atol=1e-3), err

    print("KERNEL_OK")
</pallas_src>

<mosaic_0001>
module attributes {stable_mosaic.version = 11 : i64} {
  func.func @_fused_net_kernel(%arg0: i32, %arg1: memref<1x324xf32, #tpu.memory_space<vmem>>, %arg2: memref<1x32x580xf32, #tpu.memory_space<vmem>>, %arg3: memref<6x9x32x32xf32, #tpu.memory_space<vmem>>, %arg4: memref<6x32x1xf32, #tpu.memory_space<vmem>>, %arg5: memref<6xf32, #tpu.memory_space<smem>>, %arg6: memref<1x32x324xf32, #tpu.memory_space<vmem>>, %arg7: memref<32x580xf32, #tpu.memory_space<vmem>>) attributes {dimension_semantics = [#tpu.dimension_semantics<parallel>], iteration_bounds = array<i64: 2>, scalar_prefetch = 0 : i64, scratch_operands = 1 : i64, tpu.core_type = #tpu.core_type<tc>, window_params = [{pipeline_mode = #tpu.pipeline_mode<synchronous>, transform_indices = @transform_0, window_bounds = array<i64: 1, 324>}, {transform_indices = @transform_1, window_bounds = array<i64: 1, 32, 580>}, {pipeline_mode = #tpu.pipeline_mode<synchronous>, transform_indices = @transform_2, window_bounds = array<i64: 6, 9, 32, 32>}, {pipeline_mode = #tpu.pipeline_mode<synchronous>, transform_indices = @transform_3, window_bounds = array<i64: 6, 32, 1>}, {transform_indices = @transform_4, window_bounds = array<i64: 6>}, {transform_indices = @transform_5, window_bounds = array<i64: 1, 32, 324>}]} {
    %cst = arith.constant 0.000000e+00 : f32
    %0 = vector.broadcast %cst : f32 to vector<32x580xf32>
    %c0 = arith.constant 0 : index
    %c0_0 = arith.constant 0 : index
    %1 = vector.load %arg7[%c0, %c0_0] : memref<32x580xf32, #tpu.memory_space<vmem>>, vector<32x580xf32>
    tpu.vector_store %arg7[%c0, %c0_0], %0 {strides = array<i32>} : memref<32x580xf32, #tpu.memory_space<vmem>>, vector<32x580xf32>,
    %c0_1 = arith.constant 0 : index
    %c0_2 = arith.constant 0 : index
    %2 = vector.load %arg1[%c0_1, %c0_2] : memref<1x324xf32, #tpu.memory_space<vmem>>, vector<1x324xf32>
    %cst_3 = arith.constant 0.000000e+00 : f32
    %3 = vector.broadcast %cst_3 : f32 to vector<32x324xf32>
    %c0_4 = arith.constant 0 : index
    %c0_5 = arith.constant 0 : index
    %c109 = arith.constant 109 : index
    %4 = vector.load %arg2[%c0_4, %c0_5, %c109] : memref<1x32x580xf32, #tpu.memory_space<vmem>>, vector<1x32x324xf32>
    %5 = vector.shape_cast %4 : vector<1x32x324xf32> to vector<32x324xf32>
    %c0_6 = arith.constant 0 : index
    %c0_7 = arith.constant 0 : index
    %c0_8 = arith.constant 0 : index
    %c0_9 = arith.constant 0 : index
    %6 = vector.load %arg3[%c0_6, %c0_7, %c0_8, %c0_9] : memref<6x9x32x32xf32, #tpu.memory_space<vmem>>, vector<1x1x32x32xf32>
    %7 = vector.shape_cast %6 : vector<1x1x32x32xf32> to vector<32x32xf32>
    %cst_10 = arith.constant dense<0.000000e+00> : vector<32x324xf32>
    %8 = tpu.matmul %7, %5, %cst_10 {dimension_numbers = #tpu.dot_dimension_numbers<[1], [0], [0], [1], [0, 0, 1, 1], [], []>} : vector<32x32xf32>, vector<32x324xf32>, vector<32x324xf32> -> vector<32x324xf32>
    %9 = arith.addf %3, %8 : vector<32x324xf32>
    %c0_11 = arith.constant 0 : index
    %c0_12 = arith.constant 0 : index
    %c110 = arith.constant 110 : index
    %10 = vector.load %arg2[%c0_11, %c0_12, %c110] : memref<1x32x580xf32, #tpu.memory_space<vmem>>, vector<1x32x324xf32>
    %11 = vector.shape_cast %10 : vector<1x32x324xf32> to vector<32x324xf32>
    %c0_13 = arith.constant 0 : index
    %c1 = arith.constant 1 : index
    %c0_14 = arith.constant 0 : index
    %c0_15 = arith.constant 0 : index
    %12 = vector.load %arg3[%c0_13, %c1, %c0_14, %c0_15] : memref<6x9x32x32xf32, #tpu.memory_space<vmem>>, vector<1x1x32x32xf32>
    %13 = vector.shape_cast %12 : vector<1x1x32x32xf32> to vector<32x32xf32>
    %cst_16 = arith.constant dense<0.000000e+00> : vector<32x324xf32>
    %14 = tpu.matmul %13, %11, %cst_16 {dimension_numbers = #tpu.dot_dimension_numbers<[1], [0], [0], [1], [0, 0, 1, 1], [], []>} : vector<32x32xf32>, vector<32x324xf32>, vector<32x324xf32> -> vector<32x324xf32>
    %15 = arith.addf %9, %14 : vector<32x324xf32>
    %c0_17 = arith.constant 0 : index
    %c0_18 = arith.constant 0 : index
    %c111 = arith.constant 111 : index
    %16 = vector.load %arg2[%c0_17, %c0_18, %c111] : memref<1x32x580xf32, #tpu.memory_space<vmem>>, vector<1x32x324xf32>
    %17 = vector.shape_cast %16 : vector<1x32x324xf32> to vector<32x324xf32>
    %c0_19 = arith.constant 0 : index
    %c2 = arith.constant 2 : index
    %c0_20 = arith.constant 0 : index
    %c0_21 = arith.constant 0 : index
    %18 = vector.load %arg3[%c0_19, %c2, %c0_20, %c0_21] : memref<6x9x32x32xf32, #tpu.memory_space<vmem>>, vector<1x1x32x32xf32>
    %19 = vector.shape_cast %18 : vector<1x1x32x32xf32> to vector<32x32xf32>
    %cst_22 = arith.constant dense<0.000000e+00> : vector<32x324xf32>
    %20 = tpu.matmul %19, %17, %cst_22 {dimension_numbers = #tpu.dot_dimension_numbers<[1], [0], [0], [1], [0, 0, 1, 1], [], []>} : vector<32x32xf32>, vector<32x324xf32>, vector<32x324xf32> -> vector<32x324xf32>
    %21 = arith.addf %15, %20 : vector<32x324xf32>
    %c0_23 = arith.constant 0 : index
    %c0_24 = arith.constant 0 : index
    %c127 = arith.constant 127 : index
    %22 = vector.load %arg2[%c0_23, %c0_24, %c127] : memref<1x32x580xf32, #tpu.memory_space<vmem>>, vector<1x32x324xf32>
    %23 = vector.shape_cast %22 : vector<1x32x324xf32> to vector<32x324xf32>
    %c0_25 = arith.constant 0 : index
    %c3 = arith.constant 3 : index
    %c0_26 = arith.constant 0 : index
    %c0_27 = arith.constant 0 : index
    %24 = vector.load %arg3[%c0_25, %c3, %c0_26, %c0_27] : memref<6x9x32x32xf32, #tpu.memory_space<vmem>>, vector<1x1x32x32xf32>
    %25 = vector.shape_cast %24 : vector<1x1x32x32xf32> to vector<32x32xf32>
    %cst_28 = arith.constant dense<0.000000e+00> : vector<32x324xf32>
    %26 = tpu.matmul %25, %23, %cst_28 {dimension_numbers = #tpu.dot_dimension_numbers<[1], [0], [0], [1], [0, 0, 1, 1], [], []>} : vector<32x32xf32>, vector<32x324xf32>, vector<32x324xf32> -> vector<32x324xf32>
    %27 = arith.addf %21, %26 : vector<32x324xf32>
    %c0_29 = arith.constant 0 : index
    %c0_30 = arith.constant 0 : index
    %c128 = arith.constant 128 : index
    %28 = vector.load %arg2[%c0_29, %c0_30, %c128] : memref<1x32x580xf32, #tpu.memory_space<vmem>>, vector<1x32x324xf32>
    %29 = vector.shape_cast %28 : vector<1x32x324xf32> to vector<32x324xf32>
    %c0_31 = arith.constant 0 : index
    %c4 = arith.constant 4 : index
    %c0_32 = arith.constant 0 : index
    %c0_33 = arith.constant 0 : index
    %30 = vector.load %arg3[%c0_31, %c4, %c0_32, %c0_33] : memref<6x9x32x32xf32, #tpu.memory_space<vmem>>, vector<1x1x32x32xf32>
    %31 = vector.shape_cast %30 : vector<1x1x32x32xf32> to vector<32x32xf32>
    %cst_34 = arith.constant dense<0.000000e+00> : vector<32x324xf32>
    %32 = tpu.matmul %31, %29, %cst_34 {dimension_numbers = #tpu.dot_dimension_numbers<[1], [0], [0], [1], [0, 0, 1, 1], [], []>} : vector<32x32xf32>, vector<32x324xf32>, vector<32x324xf32> -> vector<32x324xf32>
    %33 = arith.addf %27, %32 : vector<32x324xf32>
    %c0_35 = arith.constant 0 : index
    %c0_36 = arith.constant 0 : index
    %c129 = arith.constant 129 : index
    %34 = vector.load %arg2[%c0_35, %c0_36, %c129] : memref<1x32x580xf32, #tpu.memory_space<vmem>>, vector<1x32x324xf32>
    %35 = vector.shape_cast %34 : vector<1x32x324xf32> to vector<32x324xf32>
    %c0_37 = arith.constant 0 : index
    %c5 = arith.constant 5 : index
    %c0_38 = arith.constant 0 : index
    %c0_39 = arith.constant 0 : index
    %36 = vector.load %arg3[%c0_37, %c5, %c0_38, %c0_39] : memref<6x9x32x32xf32, #tpu.memory_space<vmem>>, vector<1x1x32x32xf32>
    %37 = vector.shape_cast %36 : vector<1x1x32x32xf32> to vector<32x32xf32>
    %cst_40 = arith.constant dense<0.000000e+00> : vector<32x324xf32>
    %38 = tpu.matmul %37, %35, %cst_40 {dimension_numbers = #tpu.dot_dimension_numbers<[1], [0], [0], [1], [0, 0, 1, 1], [], []>} : vector<32x32xf32>, vector<32x324xf32>, vector<32x324xf32> -> vector<32x324xf32>
    %39 = arith.addf %33, %38 : vector<32x324xf32>
    %c0_41 = arith.constant 0 : index
    %c0_42 = arith.constant 0 : index
    %c145 = arith.constant 145 : index
    %40 = vector.load %arg2[%c0_41, %c0_42, %c145] : memref<1x32x580xf32, #tpu.memory_space<vmem>>, vector<1x32x324xf32>
    %41 = vector.shape_cast %40 : vector<1x32x324xf32> to vector<32x324xf32>
    %c0_43 = arith.constant 0 : index
    %c6 = arith.constant 6 : index
    %c0_44 = arith.constant 0 : index
    %c0_45 = arith.constant 0 : index
    %42 = vector.load %arg3[%c0_43, %c6, %c0_44, %c0_45] : memref<6x9x32x32xf32, #tpu.memory_space<vmem>>, vector<1x1x32x32xf32>
    %43 = vector.shape_cast %42 : vector<1x1x32x32xf32> to vector<32x32xf32>
    %cst_46 = arith.constant dense<0.000000e+00> : vector<32x324xf32>
    %44 = tpu.matmul %43, %41, %cst_46 {dimension_numbers = #tpu.dot_dimension_numbers<[1], [0], [0], [1], [0, 0, 1, 1], [], []>} : vector<32x32xf32>, vector<32x324xf32>, vector<32x324xf32> -> vector<32x324xf32>
    %45 = arith.addf %39, %44 : vector<32x324xf32>
    %c0_47 = arith.constant 0 : index
    %c0_48 = arith.constant 0 : index
    %c146 = arith.constant 146 : index
    %46 = vector.load %arg2[%c0_47, %c0_48, %c146] : memref<1x32x580xf32, #tpu.memory_space<vmem>>, vector<1x32x324xf32>
    %47 = vector.shape_cast %46 : vector<1x32x324xf32> to vector<32x324xf32>
    %c0_49 = arith.constant 0 : index
    %c7 = arith.constant 7 : index
    %c0_50 = arith.constant 0 : index
    %c0_51 = arith.constant 0 : index
    %48 = vector.load %arg3[%c0_49, %c7, %c0_50, %c0_51] : memref<6x9x32x32xf32, #tpu.memory_space<vmem>>, vector<1x1x32x32xf32>
    %49 = vector.shape_cast %48 : vector<1x1x32x32xf32> to vector<32x32xf32>
    %cst_52 = arith.constant dense<0.000000e+00> : vector<32x324xf32>
    %50 = tpu.matmul %49, %47, %cst_52 {dimension_numbers = #tpu.dot_dimension_numbers<[1], [0], [0], [1], [0, 0, 1, 1], [], []>} : vector<32x32xf32>, vector<32x324xf32>, vector<32x324xf32> -> vector<32x324xf32>
    %51 = arith.addf %45, %50 : vector<32x324xf32>
    %c0_53 = arith.constant 0 : index
    %c0_54 = arith.constant 0 : index
    %c147 = arith.constant 147 : index
    %52 = vector.load %arg2[%c0_53, %c0_54, %c147] : memref<1x32x580xf32, #tpu.memory_space<vmem>>, vector<1x32x324xf32>
    %53 = vector.shape_cast %52 : vector<1x32x324xf32> to vector<32x324xf32>
    %c0_55 = arith.constant 0 : index
    %c8 = arith.constant 8 : index
    %c0_56 = arith.constant 0 : index
    %c0_57 = arith.constant 0 : index
    %54 = vector.load %arg3[%c0_55, %c8, %c0_56, %c0_57] : memref<6x9x32x32xf32, #tpu.memory_space<vmem>>, vector<1x1x32x32xf32>
    %55 = vector.shape_cast %54 : vector<1x1x32x32xf32> to vector<32x32xf32>
    %cst_58 = arith.constant dense<0.000000e+00> : vector<32x324xf32>
    %56 = tpu.matmul %55, %53, %cst_58 {dimension_numbers = #tpu.dot_dimension_numbers<[1], [0], [0], [1], [0, 0, 1, 1], [], []>} : vector<32x32xf32>, vector<32x324xf32>, vector<32x324xf32> -> vector<32x324xf32>
    %57 = arith.addf %51, %56 : vector<32x324xf32>
    %c0_59 = arith.constant 0 : index
    %c0_60 = arith.constant 0 : index
    %c0_61 = arith.constant 0 : index
    %58 = vector.load %arg4[%c0_59, %c0_60, %c0_61] : memref<6x32x1xf32, #tpu.memory_space<vmem>>, vector<1x32x1xf32>
    %59 = vector.shape_cast %58 : vector<1x32x1xf32> to vector<32x1xf32>
    %60 = vector.broadcast %59 : vector<32x1xf32> to vector<32x324xf32>
    %61 = arith.addf %57, %60 : vector<32x324xf32>
    %c0_62 = arith.constant 0 : index
    %62 = memref.load %arg5[%c0_62] : memref<6xf32, #tpu.memory_space<smem>>
    %cst_63 = arith.constant 0.000000e+00 : f32
    %63 = vector.broadcast %cst_63 : f32 to vector<32x324xf32>
    %64 = arith.cmpf oge, %61, %63 : vector<32x324xf32>
    %65 = vector.broadcast %62 : f32 to vector<32x324xf32>
    %66 = arith.mulf %65, %61 : vector<32x324xf32>
    %67 = arith.select %64, %61, %66 : vector<32x324xi1>, vector<32x324xf32>
    %cst_64 = arith.constant 5.000000e-01 : f32
    %68 = vector.broadcast %cst_64 : f32 to vector<1x324xf32>
    %69 = arith.cmpf ogt, %2, %68 : vector<1x324xf32>
    %cst_65 = arith.constant 0.000000e+00 : f32
    %70 = vector.shape_cast %69 : vector<1x324xi1> to vector<1x324xi1>
    %71 = vector.broadcast %70 : vector<1x324xi1> to vector<32x324xi1>
    %72 = vector.broadcast %cst_65 : f32 to vector<32x324xf32>
    %73 = arith.select %71, %67, %72 : vector<32x324xi1>, vector<32x324xf32>
    %c0_66 = arith.constant 0 : index
    %c128_67 = arith.constant 128 : index
    %74 = vector.load %arg7[%c0_66, %c128_67] : memref<32x580xf32, #tpu.memory_space<vmem>>, vector<32x324xf32>
    tpu.vector_store %arg7[%c0_66, %c128_67], %73 {strides = array<i32>} : memref<32x580xf32, #tpu.memory_space<vmem>>, vector<32x324xf32>,
    %cst_68 = arith.constant 0.000000e+00 : f32
    %75 = vector.broadcast %cst_68 : f32 to vector<32x324xf32>
    %c0_69 = arith.constant 0 : index
    %c109_70 = arith.constant 109 : index
    %76 = vector.load %arg7[%c0_69, %c109_70] : memref<32x580xf32, #tpu.memory_space<vmem>>, vector<32x324xf32>
    %c1_71 = arith.constant 1 : index
    %c0_72 = arith.constant 0 : index
    %c0_73 = arith.constant 0 : index
    %c0_74 = arith.constant 0 : index
    %77 = vector.load %arg3[%c1_71, %c0_72, %c0_73, %c0_74] : memref<6x9x32x32xf32, #tpu.memory_space<vmem>>, vector<1x1x32x32xf32>
    %78 = vector.shape_cast %77 : vector<1x1x32x32xf32> to vector<32x32xf32>
    %cst_75 = arith.constant dense<0.000000e+00> : vector<32x324xf32>
    %79 = tpu.matmul %78, %76, %cst_75 {dimension_numbers = #tpu.dot_dimension_numbers<[1], [0], [0], [1], [0, 0, 1, 1], [], []>} : vector<32x32xf32>, vector<32x324xf32>, vector<32x324xf32> -> vector<32x324xf32>
    %80 = arith.addf %75, %79 : vector<32x324xf32>
    %c0_76 = arith.constant 0 : index
    %c110_77 = arith.constant 110 : index
    %81 = vector.load %arg7[%c0_76, %c110_77] : memref<32x580xf32, #tpu.memory_space<vmem>>, vector<32x324xf32>
    %c1_78 = arith.constant 1 : index
    %c1_79 = arith.constant 1 : index
    %c0_80 = arith.constant 0 : index
    %c0_81 = arith.constant 0 : index
    %82 = vector.load %arg3[%c1_78, %c1_79, %c0_80, %c0_81] : memref<6x9x32x32xf32, #tpu.memory_space<vmem>>, vector<1x1x32x32xf32>
    %83 = vector.shape_cast %82 : vector<1x1x32x32xf32> to vector<32x32xf32>
    %cst_82 = arith.constant dense<0.000000e+00> : vector<32x324xf32>
    %84 = tpu.matmul %83, %81, %cst_82 {dimension_numbers = #tpu.dot_dimension_numbers<[1], [0], [0], [1], [0, 0, 1, 1], [], []>} : vector<32x32xf32>, vector<32x324xf32>, vector<32x324xf32> -> vector<32x324xf32>
    %85 = arith.addf %80, %84 : vector<32x324xf32>
    %c0_83 = arith.constant 0 : index
    %c111_84 = arith.constant 111 : index
    %86 = vector.load %arg7[%c0_83, %c111_84] : memref<32x580xf32, #tpu.memory_space<vmem>>, vector<32x324xf32>
    %c1_85 = arith.constant 1 : index
    %c2_86 = arith.constant 2 : index
    %c0_87 = arith.constant 0 : index
    %c0_88 = arith.constant 0 : index
    %87 = vector.load %arg3[%c1_85, %c2_86, %c0_87, %c0_88] : memref<6x9x32x32xf32, #tpu.memory_space<vmem>>, vector<1x1x32x32xf32>
    %88 = vector.shape_cast %87 : vector<1x1x32x32xf32> to vector<32x32xf32>
    %cst_89 = arith.constant dense<0.000000e+00> : vector<32x324xf32>
    %89 = tpu.matmul %88, %86, %cst_89 {dimension_numbers = #tpu.dot_dimension_numbers<[1], [0], [0], [1], [0, 0, 1, 1], [], []>} : vector<32x32xf32>, vector<32x324xf32>, vector<32x324xf32> -> vector<32x324xf32>
    %90 = arith.addf %85, %89 : vector<32x324xf32>
    %c0_90 = arith.constant 0 : index
    %c127_91 = arith.constant 127 : index
    %91 = vector.load %arg7[%c0_90, %c127_91] : memref<32x580xf32, #tpu.memory_space<vmem>>, vector<32x324xf32>
    %c1_92 = arith.constant 1 : index
    %c3_93 = arith.constant 3 : index
    %c0_94 = arith.constant 0 : index
    %c0_95 = arith.constant 0 : index
    %92 = vector.load %arg3[%c1_92, %c3_93, %c0_94, %c0_95] : memref<6x9x32x32xf32, #tpu.memory_space<vmem>>, vector<1x1x32x32xf32>
    %93 = vector.shape_cast %92 : vector<1x1x32x32xf32> to vector<32x32xf32>
    %cst_96 = arith.constant dense<0.000000e+00> : vector<32x324xf32>
    %94 = tpu.matmul %93, %91, %cst_96 {dimension_numbers = #tpu.dot_dimension_numbers<[1], [0], [0], [1], [0, 0, 1, 1], [], []>} : vector<32x32xf32>, vector<32x324xf32>, vector<32x324xf32> -> vector<32x324xf32>
    %95 = arith.addf %90, %94 : vector<32x324xf32>
    %c0_97 = arith.constant 0 : index
    %c128_98 = arith.constant 128 : index
    %96 = vector.load %arg7[%c0_97, %c128_98] : memref<32x580xf32, #tpu.memory_space<vmem>>, vector<32x324xf32>
    %c1_99 = arith.constant 1 : index
    %c4_100 = arith.constant 4 : index
    %c0_101 = arith.constant 0 : index
    %c0_102 = arith.constant 0 : index
    %97 = vector.load %arg3[%c1_99, %c4_100, %c0_101, %c0_102] : memref<6x9x32x32xf32, #tpu.memory_space<vmem>>, vector<1x1x32x32xf32>
    %98 = vector.shape_cast %97 : vector<1x1x32x32xf32> to vector<32x32xf32>
    %cst_103 = arith.constant dense<0.000000e+00> : vector<32x324xf32>
    %99 = tpu.matmul %98, %96, %cst_103 {dimension_numbers = #tpu.dot_dimension_numbers<[1], [0], [0], [1], [0, 0, 1, 1], [], []>} : vector<32x32xf32>, vector<32x324xf32>, vector<32x324xf32> -> vector<32x324xf32>
    %100 = arith.addf %95, %99 : vector<32x324xf32>
    %c0_104 = arith.constant 0 : index
    %c129_105 = arith.constant 129 : index
    %101 = vector.load %arg7[%c0_104, %c129_105] : memref<32x580xf32, #tpu.memory_space<vmem>>, vector<32x324xf32>
    %c1_106 = arith.constant 1 : index
    %c5_107 = arith.constant 5 : index
    %c0_108 = arith.constant 0 : index
    %c0_109 = arith.constant 0 : index
    %102 = vector.load %arg3[%c1_106, %c5_107, %c0_108, %c0_109] : memref<6x9x32x32xf32, #tpu.memory_space<vmem>>, vector<1x1x32x32xf32>
    %103 = vector.shape_cast %102 : vector<1x1x32x32xf32> to vector<32x32xf32>
    %cst_110 = arith.constant dense<0.000000e+00> : vector<32x324xf32>
    %104 = tpu.matmul %103, %101, %cst_110 {dimension_numbers = #tpu.dot_dimension_numbers<[1], [0], [0], [1], [0, 0, 1, 1], [], []>} : vector<32x32xf32>, vector<32x324xf32>, vector<32x324xf32> -> vector<32x324xf32>
    %105 = arith.addf %100, %104 : vector<32x324xf32>
    %c0_111 = arith.constant 0 : index
    %c145_112 = arith.constant 145 : index
    %106 = vector.load %arg7[%c0_111, %c145_112] : memref<32x580xf32, #tpu.memory_space<vmem>>, vector<32x324xf32>
    %c1_113 = arith.constant 1 : index
    %c6_114 = arith.constant 6 : index
    %c0_115 = arith.constant 0 : index
    %c0_116 = arith.constant 0 : index
    %107 = vector.load %arg3[%c1_113, %c6_114, %c0_115, %c0_116] : memref<6x9x32x32xf32, #tpu.memory_space<vmem>>, vector<1x1x32x32xf32>
    %108 = vector.shape_cast %107 : vector<1x1x32x32xf32> to vector<32x32xf32>
    %cst_117 = arith.constant dense<0.000000e+00> : vector<32x324xf32>
    %109 = tpu.matmul %108, %106, %cst_117 {dimension_numbers = #tpu.dot_dimension_numbers<[1], [0], [0], [1], [0, 0, 1, 1], [], []>} : vector<32x32xf32>, vector<32x324xf32>, vector<32x324xf32> -> vector<32x324xf32>
    %110 = arith.addf %105, %109 : vector<32x324xf32>
    %c0_118 = arith.constant 0 : index
    %c146_119 = arith.constant 146 : index
    %111 = vector.load %arg7[%c0_118, %c146_119] : memref<32x580xf32, #tpu.memory_space<vmem>>, vector<32x324xf32>
    %c1_120 = arith.constant 1 : index
    %c7_121 = arith.constant 7 : index
    %c0_122 = arith.constant 0 : index
    %c0_123 = arith.constant 0 : index
    %112 = vector.load %arg3[%c1_120, %c7_121, %c0_122, %c0_123] : memref<6x9x32x32xf32, #tpu.memory_space<vmem>>, vector<1x1x32x32xf32>
    %113 = vector.shape_cast %112 : vector<1x1x32x32xf32> to vector<32x32xf32>
    %cst_124 = arith.constant dense<0.000000e+00> : vector<32x324xf32>
    %114 = tpu.matmul %113, %111, %cst_124 {dimension_numbers = #tpu.dot_dimension_numbers<[1], [0], [0], [1], [0, 0, 1, 1], [], []>} : vector<32x32xf32>, vector<32x324xf32>, vector<32x324xf32> -> vector<32x324xf32>
    %115 = arith.addf %110, %114 : vector<32x324xf32>
    %c0_125 = arith.constant 0 : index
    %c147_126 = arith.constant 147 : index
    %116 = vector.load %arg7[%c0_125, %c147_126] : memref<32x580xf32, #tpu.memory_space<vmem>>, vector<32x324xf32>
    %c1_127 = arith.constant 1 : index
    %c8_128 = arith.constant 8 : index
    %c0_129 = arith.constant 0 : index
    %c0_130 = arith.constant 0 : index
    %117 = vector.load %arg3[%c1_127, %c8_128, %c0_129, %c0_130] : memref<6x9x32x32xf32, #tpu.memory_space<vmem>>, vector<1x1x32x32xf32>
    %118 = vector.shape_cast %117 : vector<1x1x32x32xf32> to vector<32x32xf32>
    %cst_131 = arith.constant dense<0.000000e+00> : vector<32x324xf32>
    %119 = tpu.matmul %118, %116, %cst_131 {dimension_numbers = #tpu.dot_dimension_numbers<[1], [0], [0], [1], [0, 0, 1, 1], [], []>} : vector<32x32xf32>, vector<32x324xf32>, vector<32x324xf32> -> vector<32x324xf32>
    %120 = arith.addf %115, %119 : vector<32x324xf32>
    %c1_132 = arith.constant 1 : index
    %c0_133 = arith.constant 0 : index
    %c0_134 = arith.constant 0 : index
    %121 = vector.load %arg4[%c1_132, %c0_133, %c0_134] : memref<6x32x1xf32, #tpu.memory_space<vmem>>, vector<1x32x1xf32>
    %122 = vector.shape_cast %121 : vector<1x32x1xf32> to vector<32x1xf32>
    %123 = vector.broadcast %122 : vector<32x1xf32> to vector<32x324xf32>
    %124 = arith.addf %120, %123 : vector<32x324xf32>
    %c1_135 = arith.constant 1 : index
    %125 = memref.load %arg5[%c1_135] : memref<6xf32, #tpu.memory_space<smem>>
    %cst_136 = arith.constant 0.000000e+00 : f32
    %126 = vector.broadcast %cst_136 : f32 to vector<32x324xf32>
    %127 = arith.cmpf oge, %124, %126 : vector<32x324xf32>
    %128 = vector.broadcast %125 : f32 to vector<32x324xf32>
    %129 = arith.mulf %128, %124 : vector<32x324xf32>
    %130 = arith.select %127, %124, %129 : vector<32x324xi1>, vector<32x324xf32>
    %cst_137 = arith.constant 5.000000e-01 : f32
    %131 = vector.broadcast %cst_137 : f32 to vector<1x324xf32>
    %132 = arith.cmpf ogt, %2, %131 : vector<1x324xf32>
    %cst_138 = arith.constant 0.000000e+00 : f32
    %133 = vector.shape_cast %132 : vector<1x324xi1> to vector<1x324xi1>
    %134 = vector.broadcast %133 : vector<1x324xi1> to vector<32x324xi1>
    %135 = vector.broadcast %cst_138 : f32 to vector<32x324xf32>
    %136 = arith.select %134, %130, %135 : vector<32x324xi1>, vector<32x324xf32>
    %c0_139 = arith.constant 0 : index
    %c128_140 = arith.constant 128 : index
    %137 = vector.load %arg7[%c0_139, %c128_140] : memref<32x580xf32, #tpu.memory_space<vmem>>, vector<32x324xf32>
    tpu.vector_store %arg7[%c0_139, %c128_140], %136 {strides = array<i32>} : memref<32x580xf32, #tpu.memory_space<vmem>>, vector<32x324xf32>,
    %cst_141 = arith.constant 0.000000e+00 : f32
    %138 = vector.broadcast %cst_141 : f32 to vector<32x324xf32>
    %c0_142 = arith.constant 0 : index
    %c109_143 = arith.constant 109 : index
    %139 = vector.load %arg7[%c0_142, %c109_143] : memref<32x580xf32, #tpu.memory_space<vmem>>, vector<32x324xf32>
    %c2_144 = arith.constant 2 : index
    %c0_145 = arith.constant 0 : index
    %c0_146 = arith.constant 0 : index
    %c0_147 = arith.constant 0 : index
    %140 = vector.load %arg3[%c2_144, %c0_145, %c0_146, %c0_147] : memref<6x9x32x32xf32, #tpu.memory_space<vmem>>, vector<1x1x32x32xf32>
    %141 = vector.shape_cast %140 : vector<1x1x32x32xf32> to vector<32x32xf32>
    %cst_148 = arith.constant dense<0.000000e+00> : vector<32x324xf32>
    %142 = tpu.matmul %141, %139, %cst_148 {dimension_numbers = #tpu.dot_dimension_numbers<[1], [0], [0], [1], [0, 0, 1, 1], [], []>} : vector<32x32xf32>, vector<32x324xf32>, vector<32x324xf32> -> vector<32x324xf32>
    %143 = arith.addf %138, %142 : vector<32x324xf32>
    %c0_149 = arith.constant 0 : index
    %c110_150 = arith.constant 110 : index
    %144 = vector.load %arg7[%c0_149, %c110_150] : memref<32x580xf32, #tpu.memory_space<vmem>>, vector<32x324xf32>
    %c2_151 = arith.constant 2 : index
    %c1_152 = arith.constant 1 : index
    %c0_153 = arith.constant 0 : index
    %c0_154 = arith.constant 0 : index
    %145 = vector.load %arg3[%c2_151, %c1_152, %c0_153, %c0_154] : memref<6x9x32x32xf32, #tpu.memory_space<vmem>>, vector<1x1x32x32xf32>
    %146 = vector.shape_cast %145 : vector<1x1x32x32xf32> to vector<32x32xf32>
    %cst_155 = arith.constant dense<0.000000e+00> : vector<32x324xf32>
    %147 = tpu.matmul %146, %144, %cst_155 {dimension_numbers = #tpu.dot_dimension_numbers<[1], [0], [0], [1], [0, 0, 1, 1], [], []>} : vector<32x32xf32>, vector<32x324xf32>, vector<32x324xf32> -> vector<32x324xf32>
    %148 = arith.addf %143, %147 : vector<32x324xf32>
    %c0_156 = arith.constant 0 : index
    %c111_157 = arith.constant 111 : index
    %149 = vector.load %arg7[%c0_156, %c111_157] : memref<32x580xf32, #tpu.memory_space<vmem>>, vector<32x324xf32>
    %c2_158 = arith.constant 2 : index
    %c2_159 = arith.constant 2 : index
    %c0_160 = arith.constant 0 : index
    %c0_161 = arith.constant 0 : index
    %150 = vector.load %arg3[%c2_158, %c2_159, %c0_160, %c0_161] : memref<6x9x32x32xf32, #tpu.memory_space<vmem>>, vector<1x1x32x32xf32>
    %151 = vector.shape_cast %150 : vector<1x1x32x32xf32> to vector<32x32xf32>
    %cst_162 = arith.constant dense<0.000000e+00> : vector<32x324xf32>
    %152 = tpu.matmul %151, %149, %cst_162 {dimension_numbers = #tpu.dot_dimension_numbers<[1], [0], [0], [1], [0, 0, 1, 1], [], []>} : vector<32x32xf32>, vector<32x324xf32>, vector<32x324xf32> -> vector<32x324xf32>
    %153 = arith.addf %148, %152 : vector<32x324xf32>
    %c0_163 = arith.constant 0 : index
    %c127_164 = arith.constant 127 : index
    %154 = vector.load %arg7[%c0_163, %c127_164] : memref<32x580xf32, #tpu.memory_space<vmem>>, vector<32x324xf32>
    %c2_165 = arith.constant 2 : index
    %c3_166 = arith.constant 3 : index
    %c0_167 = arith.constant 0 : index
    %c0_168 = arith.constant 0 : index
    %155 = vector.load %arg3[%c2_165, %c3_166, %c0_167, %c0_168] : memref<6x9x32x32xf32, #tpu.memory_space<vmem>>, vector<1x1x32x32xf32>
    %156 = vector.shape_cast %155 : vector<1x1x32x32xf32> to vector<32x32xf32>
    %cst_169 = arith.constant dense<0.000000e+00> : vector<32x324xf32>
    %157 = tpu.matmul %156, %154, %cst_169 {dimension_numbers = #tpu.dot_dimension_numbers<[1], [0], [0], [1], [0, 0, 1, 1], [], []>} : vector<32x32xf32>, vector<32x324xf32>, vector<32x324xf32> -> vector<32x324xf32>
    %158 = arith.addf %153, %157 : vector<32x324xf32>
    %c0_170 = arith.constant 0 : index
    %c128_171 = arith.constant 128 : index
    %159 = vector.load %arg7[%c0_170, %c128_171] : memref<32x580xf32, #tpu.memory_space<vmem>>, vector<32x324xf32>
    %c2_172 = arith.constant 2 : index
    %c4_173 = arith.constant 4 : index
    %c0_174 = arith.constant 0 : index
    %c0_175 = arith.constant 0 : index
    %160 = vector.load %arg3[%c2_172, %c4_173, %c0_174, %c0_175] : memref<6x9x32x32xf32, #tpu.memory_space<vmem>>, vector<1x1x32x32xf32>
    %161 = vector.shape_cast %160 : vector<1x1x32x32xf32> to vector<32x32xf32>
    %cst_176 = arith.constant dense<0.000000e+00> : vector<32x324xf32>
    %162 = tpu.matmul %161, %159, %cst_176 {dimension_numbers = #tpu.dot_dimension_numbers<[1], [0], [0], [1], [0, 0, 1, 1], [], []>} : vector<32x32xf32>, vector<32x324xf32>, vector<32x324xf32> -> vector<32x324xf32>
    %163 = arith.addf %158, %162 : vector<32x324xf32>
    %c0_177 = arith.constant 0 : index
    %c129_178 = arith.constant 129 : index
    %164 = vector.load %arg7[%c0_177, %c129_178] : memref<32x580xf32, #tpu.memory_space<vmem>>, vector<32x324xf32>
    %c2_179 = arith.constant 2 : index
    %c5_180 = arith.constant 5 : index
    %c0_181 = arith.constant 0 : index
    %c0_182 = arith.constant 0 : index
    %165 = vector.load %arg3[%c2_179, %c5_180, %c0_181, %c0_182] : memref<6x9x32x32xf32, #tpu.memory_space<vmem>>, vector<1x1x32x32xf32>
    %166 = vector.shape_cast %165 : vector<1x1x32x32xf32> to vector<32x32xf32>
    %cst_183 = arith.constant dense<0.000000e+00> : vector<32x324xf32>
    %167 = tpu.matmul %166, %164, %cst_183 {dimension_numbers = #tpu.dot_dimension_numbers<[1], [0], [0], [1], [0, 0, 1, 1], [], []>} : vector<32x32xf32>, vector<32x324xf32>, vector<32x324xf32> -> vector<32x324xf32>
    %168 = arith.addf %163, %167 : vector<32x324xf32>
    %c0_184 = arith.constant 0 : index
    %c145_185 = arith.constant 145 : index
    %169 = vector.load %arg7[%c0_184, %c145_185] : memref<32x580xf32, #tpu.memory_space<vmem>>, vector<32x324xf32>
    %c2_186 = arith.constant 2 : index
    %c6_187 = arith.constant 6 : index
    %c0_188 = arith.constant 0 : index
    %c0_189 = arith.constant 0 : index
    %170 = vector.load %arg3[%c2_186, %c6_187, %c0_188, %c0_189] : memref<6x9x32x32xf32, #tpu.memory_space<vmem>>, vector<1x1x32x32xf32>
    %171 = vector.shape_cast %170 : vector<1x1x32x32xf32> to vector<32x32xf32>
    %cst_190 = arith.constant dense<0.000000e+00> : vector<32x324xf32>
    %172 = tpu.matmul %171, %169, %cst_190 {dimension_numbers = #tpu.dot_dimension_numbers<[1], [0], [0], [1], [0, 0, 1, 1], [], []>} : vector<32x32xf32>, vector<32x324xf32>, vector<32x324xf32> -> vector<32x324xf32>
    %173 = arith.addf %168, %172 : vector<32x324xf32>
    %c0_191 = arith.constant 0 : index
    %c146_192 = arith.constant 146 : index
    %174 = vector.load %arg7[%c0_191, %c146_192] : memref<32x580xf32, #tpu.memory_space<vmem>>, vector<32x324xf32>
    %c2_193 = arith.constant 2 : index
    %c7_194 = arith.constant 7 : index
    %c0_195 = arith.constant 0 : index
    %c0_196 = arith.constant 0 : index
    %175 = vector.load %arg3[%c2_193, %c7_194, %c0_195, %c0_196] : memref<6x9x32x32xf32, #tpu.memory_space<vmem>>, vector<1x1x32x32xf32>
    %176 = vector.shape_cast %175 : vector<1x1x32x32xf32> to vector<32x32xf32>
    %cst_197 = arith.constant dense<0.000000e+00> : vector<32x324xf32>
    %177 = tpu.matmul %176, %174, %cst_197 {dimension_numbers = #tpu.dot_dimension_numbers<[1], [0], [0], [1], [0, 0, 1, 1], [], []>} : vector<32x32xf32>, vector<32x324xf32>, vector<32x324xf32> -> vector<32x324xf32>
    %178 = arith.addf %173, %177 : vector<32x324xf32>
    %c0_198 = arith.constant 0 : index
    %c147_199 = arith.constant 147 : index
    %179 = vector.load %arg7[%c0_198, %c147_199] : memref<32x580xf32, #tpu.memory_space<vmem>>, vector<32x324xf32>
    %c2_200 = arith.constant 2 : index
    %c8_201 = arith.constant 8 : index
    %c0_202 = arith.constant 0 : index
    %c0_203 = arith.constant 0 : index
    %180 = vector.load %arg3[%c2_200, %c8_201, %c0_202, %c0_203] : memref<6x9x32x32xf32, #tpu.memory_space<vmem>>, vector<1x1x32x32xf32>
    %181 = vector.shape_cast %180 : vector<1x1x32x32xf32> to vector<32x32xf32>
    %cst_204 = arith.constant dense<0.000000e+00> : vector<32x324xf32>
    %182 = tpu.matmul %181, %179, %cst_204 {dimension_numbers = #tpu.dot_dimension_numbers<[1], [0], [0], [1], [0, 0, 1, 1], [], []>} : vector<32x32xf32>, vector<32x324xf32>, vector<32x324xf32> -> vector<32x324xf32>
    %183 = arith.addf %178, %182 : vector<32x324xf32>
    %c2_205 = arith.constant 2 : index
    %c0_206 = arith.constant 0 : index
    %c0_207 = arith.constant 0 : index
    %184 = vector.load %arg4[%c2_205, %c0_206, %c0_207] : memref<6x32x1xf32, #tpu.memory_space<vmem>>, vector<1x32x1xf32>
    %185 = vector.shape_cast %184 : vector<1x32x1xf32> to vector<32x1xf32>
    %186 = vector.broadcast %185 : vector<32x1xf32> to vector<32x324xf32>
    %187 = arith.addf %183, %186 : vector<32x324xf32>
    %c2_208 = arith.constant 2 : index
    %188 = memref.load %arg5[%c2_208] : memref<6xf32, #tpu.memory_space<smem>>
    %cst_209 = arith.constant 0.000000e+00 : f32
    %189 = vector.broadcast %cst_209 : f32 to vector<32x324xf32>
    %190 = arith.cmpf oge, %187, %189 : vector<32x324xf32>
    %191 = vector.broadcast %188 : f32 to vector<32x324xf32>
    %192 = arith.mulf %191, %187 : vector<32x324xf32>
    %193 = arith.select %190, %187, %192 : vector<32x324xi1>, vector<32x324xf32>
    %cst_210 = arith.constant 5.000000e-01 : f32
    %194 = vector.broadcast %cst_210 : f32 to vector<1x324xf32>
    %195 = arith.cmpf ogt, %2, %194 : vector<1x324xf32>
    %cst_211 = arith.constant 0.000000e+00 : f32
    %196 = vector.shape_cast %195 : vector<1x324xi1> to vector<1x324xi1>
    %197 = vector.broadcast %196 : vector<1x324xi1> to vector<32x324xi1>
    %198 = vector.broadcast %cst_211 : f32 to vector<32x324xf32>
    %199 = arith.select %197, %193, %198 : vector<32x324xi1>, vector<32x324xf32>
    %c0_212 = arith.constant 0 : index
    %c128_213 = arith.constant 128 : index
    %200 = vector.load %arg7[%c0_212, %c128_213] : memref<32x580xf32, #tpu.memory_space<vmem>>, vector<32x324xf32>
    tpu.vector_store %arg7[%c0_212, %c128_213], %199 {strides = array<i32>} : memref<32x580xf32, #tpu.memory_space<vmem>>, vector<32x324xf32>,
    %cst_214 = arith.constant 0.000000e+00 : f32
    %201 = vector.broadcast %cst_214 : f32 to vector<32x324xf32>
    %c0_215 = arith.constant 0 : index
    %c109_216 = arith.constant 109 : index
    %202 = vector.load %arg7[%c0_215, %c109_216] : memref<32x580xf32, #tpu.memory_space<vmem>>, vector<32x324xf32>
    %c3_217 = arith.constant 3 : index
    %c0_218 = arith.constant 0 : index
    %c0_219 = arith.constant 0 : index
    %c0_220 = arith.constant 0 : index
    %203 = vector.load %arg3[%c3_217, %c0_218, %c0_219, %c0_220] : memref<6x9x32x32xf32, #tpu.memory_space<vmem>>, vector<1x1x32x32xf32>
    %204 = vector.shape_cast %203 : vector<1x1x32x32xf32> to vector<32x32xf32>
    %cst_221 = arith.constant dense<0.000000e+00> : vector<32x324xf32>
    %205 = tpu.matmul %204, %202, %cst_221 {dimension_numbers = #tpu.dot_dimension_numbers<[1], [0], [0], [1], [0, 0, 1, 1], [], []>} : vector<32x32xf32>, vector<32x324xf32>, vector<32x324xf32> -> vector<32x324xf32>
    %206 = arith.addf %201, %205 : vector<32x324xf32>
    %c0_222 = arith.constant 0 : index
    %c110_223 = arith.constant 110 : index
    %207 = vector.load %arg7[%c0_222, %c110_223] : memref<32x580xf32, #tpu.memory_space<vmem>>, vector<32x324xf32>
    %c3_224 = arith.constant 3 : index
    %c1_225 = arith.constant 1 : index
    %c0_226 = arith.constant 0 : index
    %c0_227 = arith.constant 0 : index
    %208 = vector.load %arg3[%c3_224, %c1_225, %c0_226, %c0_227] : memref<6x9x32x32xf32, #tpu.memory_space<vmem>>, vector<1x1x32x32xf32>
    %209 = vector.shape_cast %208 : vector<1x1x32x32xf32> to vector<32x32xf32>
    %cst_228 = arith.constant dense<0.000000e+00> : vector<32x324xf32>
    %210 = tpu.matmul %209, %207, %cst_228 {dimension_numbers = #tpu.dot_dimension_numbers<[1], [0], [0], [1], [0, 0, 1, 1], [], []>} : vector<32x32xf32>, vector<32x324xf32>, vector<32x324xf32> -> vector<32x324xf32>
    %211 = arith.addf %206, %210 : vector<32x324xf32>
    %c0_229 = arith.constant 0 : index
    %c111_230 = arith.constant 111 : index
    %212 = vector.load %arg7[%c0_229, %c111_230] : memref<32x580xf32, #tpu.memory_space<vmem>>, vector<32x324xf32>
    %c3_231 = arith.constant 3 : index
    %c2_232 = arith.constant 2 : index
    %c0_233 = arith.constant 0 : index
    %c0_234 = arith.constant 0 : index
    %213 = vector.load %arg3[%c3_231, %c2_232, %c0_233, %c0_234] : memref<6x9x32x32xf32, #tpu.memory_space<vmem>>, vector<1x1x32x32xf32>
    %214 = vector.shape_cast %213 : vector<1x1x32x32xf32> to vector<32x32xf32>
    %cst_235 = arith.constant dense<0.000000e+00> : vector<32x324xf32>
    %215 = tpu.matmul %214, %212, %cst_235 {dimension_numbers = #tpu.dot_dimension_numbers<[1], [0], [0], [1], [0, 0, 1, 1], [], []>} : vector<32x32xf32>, vector<32x324xf32>, vector<32x324xf32> -> vector<32x324xf32>
    %216 = arith.addf %211, %215 : vector<32x324xf32>
    %c0_236 = arith.constant 0 : index
    %c127_237 = arith.constant 127 : index
    %217 = vector.load %arg7[%c0_236, %c127_237] : memref<32x580xf32, #tpu.memory_space<vmem>>, vector<32x324xf32>
    %c3_238 = arith.constant 3 : index
    %c3_239 = arith.constant 3 : index
    %c0_240 = arith.constant 0 : index
    %c0_241 = arith.constant 0 : index
    %218 = vector.load %arg3[%c3_238, %c3_239, %c0_240, %c0_241] : memref<6x9x32x32xf32, #tpu.memory_space<vmem>>, vector<1x1x32x32xf32>
    %219 = vector.shape_cast %218 : vector<1x1x32x32xf32> to vector<32x32xf32>
    %cst_242 = arith.constant dense<0.000000e+00> : vector<32x324xf32>
    %220 = tpu.matmul %219, %217, %cst_242 {dimension_numbers = #tpu.dot_dimension_numbers<[1], [0], [0], [1], [0, 0, 1, 1], [], []>} : vector<32x32xf32>, vector<32x324xf32>, vector<32x324xf32> -> vector<32x324xf32>
    %221 = arith.addf %216, %220 : vector<32x324xf32>
    %c0_243 = arith.constant 0 : index
    %c128_244 = arith.constant 128 : index
    %222 = vector.load %arg7[%c0_243, %c128_244] : memref<32x580xf32, #tpu.memory_space<vmem>>, vector<32x324xf32>
    %c3_245 = arith.constant 3 : index
    %c4_246 = arith.constant 4 : index
    %c0_247 = arith.constant 0 : index
    %c0_248 = arith.constant 0 : index
    %223 = vector.load %arg3[%c3_245, %c4_246, %c0_247, %c0_248] : memref<6x9x32x32xf32, #tpu.memory_space<vmem>>, vector<1x1x32x32xf32>
    %224 = vector.shape_cast %223 : vector<1x1x32x32xf32> to vector<32x32xf32>
    %cst_249 = arith.constant dense<0.000000e+00> : vector<32x324xf32>
    %225 = tpu.matmul %224, %222, %cst_249 {dimension_numbers = #tpu.dot_dimension_numbers<[1], [0], [0], [1], [0, 0, 1, 1], [], []>} : vector<32x32xf32>, vector<32x324xf32>, vector<32x324xf32> -> vector<32x324xf32>
    %226 = arith.addf %221, %225 : vector<32x324xf32>
    %c0_250 = arith.constant 0 : index
    %c129_251 = arith.constant 129 : index
    %227 = vector.load %arg7[%c0_250, %c129_251] : memref<32x580xf32, #tpu.memory_space<vmem>>, vector<32x324xf32>
    %c3_252 = arith.constant 3 : index
    %c5_253 = arith.constant 5 : index
    %c0_254 = arith.constant 0 : index
    %c0_255 = arith.constant 0 : index
    %228 = vector.load %arg3[%c3_252, %c5_253, %c0_254, %c0_255] : memref<6x9x32x32xf32, #tpu.memory_space<vmem>>, vector<1x1x32x32xf32>
    %229 = vector.shape_cast %228 : vector<1x1x32x32xf32> to vector<32x32xf32>
    %cst_256 = arith.constant dense<0.000000e+00> : vector<32x324xf32>
    %230 = tpu.matmul %229, %227, %cst_256 {dimension_numbers = #tpu.dot_dimension_numbers<[1], [0], [0], [1], [0, 0, 1, 1], [], []>} : vector<32x32xf32>, vector<32x324xf32>, vector<32x324xf32> -> vector<32x324xf32>
    %231 = arith.addf %226, %230 : vector<32x324xf32>
    %c0_257 = arith.constant 0 : index
    %c145_258 = arith.constant 145 : index
    %232 = vector.load %arg7[%c0_257, %c145_258] : memref<32x580xf32, #tpu.memory_space<vmem>>, vector<32x324xf32>
    %c3_259 = arith.constant 3 : index
    %c6_260 = arith.constant 6 : index
    %c0_261 = arith.constant 0 : index
    %c0_262 = arith.constant 0 : index
    %233 = vector.load %arg3[%c3_259, %c6_260, %c0_261, %c0_262] : memref<6x9x32x32xf32, #tpu.memory_space<vmem>>, vector<1x1x32x32xf32>
    %234 = vector.shape_cast %233 : vector<1x1x32x32xf32> to vector<32x32xf32>
    %cst_263 = arith.constant dense<0.000000e+00> : vector<32x324xf32>
    %235 = tpu.matmul %234, %232, %cst_263 {dimension_numbers = #tpu.dot_dimension_numbers<[1], [0], [0], [1], [0, 0, 1, 1], [], []>} : vector<32x32xf32>, vector<32x324xf32>, vector<32x324xf32> -> vector<32x324xf32>
    %236 = arith.addf %231, %235 : vector<32x324xf32>
    %c0_264 = arith.constant 0 : index
    %c146_265 = arith.constant 146 : index
    %237 = vector.load %arg7[%c0_264, %c146_265] : memref<32x580xf32, #tpu.memory_space<vmem>>, vector<32x324xf32>
    %c3_266 = arith.constant 3 : index
    %c7_267 = arith.constant 7 : index
    %c0_268 = arith.constant 0 : index
    %c0_269 = arith.constant 0 : index
    %238 = vector.load %arg3[%c3_266, %c7_267, %c0_268, %c0_269] : memref<6x9x32x32xf32, #tpu.memory_space<vmem>>, vector<1x1x32x32xf32>
    %239 = vector.shape_cast %238 : vector<1x1x32x32xf32> to vector<32x32xf32>
    %cst_270 = arith.constant dense<0.000000e+00> : vector<32x324xf32>
    %240 = tpu.matmul %239, %237, %cst_270 {dimension_numbers = #tpu.dot_dimension_numbers<[1], [0], [0], [1], [0, 0, 1, 1], [], []>} : vector<32x32xf32>, vector<32x324xf32>, vector<32x324xf32> -> vector<32x324xf32>
    %241 = arith.addf %236, %240 : vector<32x324xf32>
    %c0_271 = arith.constant 0 : index
    %c147_272 = arith.constant 147 : index
    %242 = vector.load %arg7[%c0_271, %c147_272] : memref<32x580xf32, #tpu.memory_space<vmem>>, vector<32x324xf32>
    %c3_273 = arith.constant 3 : index
    %c8_274 = arith.constant 8 : index
    %c0_275 = arith.constant 0 : index
    %c0_276 = arith.constant 0 : index
    %243 = vector.load %arg3[%c3_273, %c8_274, %c0_275, %c0_276] : memref<6x9x32x32xf32, #tpu.memory_space<vmem>>, vector<1x1x32x32xf32>
    %244 = vector.shape_cast %243 : vector<1x1x32x32xf32> to vector<32x32xf32>
    %cst_277 = arith.constant dense<0.000000e+00> : vector<32x324xf32>
    %245 = tpu.matmul %244, %242, %cst_277 {dimension_numbers = #tpu.dot_dimension_numbers<[1], [0], [0], [1], [0, 0, 1, 1], [], []>} : vector<32x32xf32>, vector<32x324xf32>, vector<32x324xf32> -> vector<32x324xf32>
    %246 = arith.addf %241, %245 : vector<32x324xf32>
    %c3_278 = arith.constant 3 : index
    %c0_279 = arith.constant 0 : index
    %c0_280 = arith.constant 0 : index
    %247 = vector.load %arg4[%c3_278, %c0_279, %c0_280] : memref<6x32x1xf32, #tpu.memory_space<vmem>>, vector<1x32x1xf32>
    %248 = vector.shape_cast %247 : vector<1x32x1xf32> to vector<32x1xf32>
    %249 = vector.broadcast %248 : vector<32x1xf32> to vector<32x324xf32>
    %250 = arith.addf %246, %249 : vector<32x324xf32>
    %c3_281 = arith.constant 3 : index
    %251 = memref.load %arg5[%c3_281] : memref<6xf32, #tpu.memory_space<smem>>
    %cst_282 = arith.constant 0.000000e+00 : f32
    %252 = vector.broadcast %cst_282 : f32 to vector<32x324xf32>
    %253 = arith.cmpf oge, %250, %252 : vector<32x324xf32>
    %254 = vector.broadcast %251 : f32 to vector<32x324xf32>
    %255 = arith.mulf %254, %250 : vector<32x324xf32>
    %256 = arith.select %253, %250, %255 : vector<32x324xi1>, vector<32x324xf32>
    %cst_283 = arith.constant 5.000000e-01 : f32
    %257 = vector.broadcast %cst_283 : f32 to vector<1x324xf32>
    %258 = arith.cmpf ogt, %2, %257 : vector<1x324xf32>
    %cst_284 = arith.constant 0.000000e+00 : f32
    %259 = vector.shape_cast %258 : vector<1x324xi1> to vector<1x324xi1>
    %260 = vector.broadcast %259 : vector<1x324xi1> to vector<32x324xi1>
    %261 = vector.broadcast %cst_284 : f32 to vector<32x324xf32>
    %262 = arith.select %260, %256, %261 : vector<32x324xi1>, vector<32x324xf32>
    %c0_285 = arith.constant 0 : index
    %c128_286 = arith.constant 128 : index
    %263 = vector.load %arg7[%c0_285, %c128_286] : memref<32x580xf32, #tpu.memory_space<vmem>>, vector<32x324xf32>
    tpu.vector_store %arg7[%c0_285, %c128_286], %262 {strides = array<i32>} : memref<32x580xf32, #tpu.memory_space<vmem>>, vector<32x324xf32>,
    %cst_287 = arith.constant 0.000000e+00 : f32
    %264 = vector.broadcast %cst_287 : f32 to vector<32x324xf32>
    %c0_288 = arith.constant 0 : index
    %c109_289 = arith.constant 109 : index
    %265 = vector.load %arg7[%c0_288, %c109_289] : memref<32x580xf32, #tpu.memory_space<vmem>>, vector<32x324xf32>
    %c4_290 = arith.constant 4 : index
    %c0_291 = arith.constant 0 : index
    %c0_292 = arith.constant 0 : index
    %c0_293 = arith.constant 0 : index
    %266 = vector.load %arg3[%c4_290, %c0_291, %c0_292, %c0_293] : memref<6x9x32x32xf32, #tpu.memory_space<vmem>>, vector<1x1x32x32xf32>
    %267 = vector.shape_cast %266 : vector<1x1x32x32xf32> to vector<32x32xf32>
    %cst_294 = arith.constant dense<0.000000e+00> : vector<32x324xf32>
    %268 = tpu.matmul %267, %265, %cst_294 {dimension_numbers = #tpu.dot_dimension_numbers<[1], [0], [0], [1], [0, 0, 1, 1], [], []>} : vector<32x32xf32>, vector<32x324xf32>, vector<32x324xf32> -> vector<32x324xf32>
    %269 = arith.addf %264, %268 : vector<32x324xf32>
    %c0_295 = arith.constant 0 : index
    %c110_296 = arith.constant 110 : index
    %270 = vector.load %arg7[%c0_295, %c110_296] : memref<32x580xf32, #tpu.memory_space<vmem>>, vector<32x324xf32>
    %c4_297 = arith.constant 4 : index
    %c1_298 = arith.constant 1 : index
    %c0_299 = arith.constant 0 : index
    %c0_300 = arith.constant 0 : index
    %271 = vector.load %arg3[%c4_297, %c1_298, %c0_299, %c0_300] : memref<6x9x32x32xf32, #tpu.memory_space<vmem>>, vector<1x1x32x32xf32>
    %272 = vector.shape_cast %271 : vector<1x1x32x32xf32> to vector<32x32xf32>
    %cst_301 = arith.constant dense<0.000000e+00> : vector<32x324xf32>
    %273 = tpu.matmul %272, %270, %cst_301 {dimension_numbers = #tpu.dot_dimension_numbers<[1], [0], [0], [1], [0, 0, 1, 1], [], []>} : vector<32x32xf32>, vector<32x324xf32>, vector<32x324xf32> -> vector<32x324xf32>
    %274 = arith.addf %269, %273 : vector<32x324xf32>
    %c0_302 = arith.constant 0 : index
    %c111_303 = arith.constant 111 : index
    %275 = vector.load %arg7[%c0_302, %c111_303] : memref<32x580xf32, #tpu.memory_space<vmem>>, vector<32x324xf32>
    %c4_304 = arith.constant 4 : index
    %c2_305 = arith.constant 2 : index
    %c0_306 = arith.constant 0 : index
    %c0_307 = arith.constant 0 : index
    %276 = vector.load %arg3[%c4_304, %c2_305, %c0_306, %c0_307] : memref<6x9x32x32xf32, #tpu.memory_space<vmem>>, vector<1x1x32x32xf32>
    %277 = vector.shape_cast %276 : vector<1x1x32x32xf32> to vector<32x32xf32>
    %cst_308 = arith.constant dense<0.000000e+00> : vector<32x324xf32>
    %278 = tpu.matmul %277, %275, %cst_308 {dimension_numbers = #tpu.dot_dimension_numbers<[1], [0], [0], [1], [0, 0, 1, 1], [], []>} : vector<32x32xf32>, vector<32x324xf32>, vector<32x324xf32> -> vector<32x324xf32>
    %279 = arith.addf %274, %278 : vector<32x324xf32>
    %c0_309 = arith.constant 0 : index
    %c127_310 = arith.constant 127 : index
    %280 = vector.load %arg7[%c0_309, %c127_310] : memref<32x580xf32, #tpu.memory_space<vmem>>, vector<32x324xf32>
    %c4_311 = arith.constant 4 : index
    %c3_312 = arith.constant 3 : index
    %c0_313 = arith.constant 0 : index
    %c0_314 = arith.constant 0 : index
    %281 = vector.load %arg3[%c4_311, %c3_312, %c0_313, %c0_314] : memref<6x9x32x32xf32, #tpu.memory_space<vmem>>, vector<1x1x32x32xf32>
    %282 = vector.shape_cast %281 : vector<1x1x32x32xf32> to vector<32x32xf32>
    %cst_315 = arith.constant dense<0.000000e+00> : vector<32x324xf32>
    %283 = tpu.matmul %282, %280, %cst_315 {dimension_numbers = #tpu.dot_dimension_numbers<[1], [0], [0], [1], [0, 0, 1, 1], [], []>} : vector<32x32xf32>, vector<32x324xf32>, vector<32x324xf32> -> vector<32x324xf32>
    %284 = arith.addf %279, %283 : vector<32x324xf32>
    %c0_316 = arith.constant 0 : index
    %c128_317 = arith.constant 128 : index
    %285 = vector.load %arg7[%c0_316, %c128_317] : memref<32x580xf32, #tpu.memory_space<vmem>>, vector<32x324xf32>
    %c4_318 = arith.constant 4 : index
    %c4_319 = arith.constant 4 : index
    %c0_320 = arith.constant 0 : index
    %c0_321 = arith.constant 0 : index
    %286 = vector.load %arg3[%c4_318, %c4_319, %c0_320, %c0_321] : memref<6x9x32x32xf32, #tpu.memory_space<vmem>>, vector<1x1x32x32xf32>
    %287 = vector.shape_cast %286 : vector<1x1x32x32xf32> to vector<32x32xf32>
    %cst_322 = arith.constant dense<0.000000e+00> : vector<32x324xf32>
    %288 = tpu.matmul %287, %285, %cst_322 {dimension_numbers = #tpu.dot_dimension_numbers<[1], [0], [0], [1], [0, 0, 1, 1], [], []>} : vector<32x32xf32>, vector<32x324xf32>, vector<32x324xf32> -> vector<32x324xf32>
    %289 = arith.addf %284, %288 : vector<32x324xf32>
    %c0_323 = arith.constant 0 : index
    %c129_324 = arith.constant 129 : index
    %290 = vector.load %arg7[%c0_323, %c129_324] : memref<32x580xf32, #tpu.memory_space<vmem>>, vector<32x324xf32>
    %c4_325 = arith.constant 4 : index
    %c5_326 = arith.constant 5 : index
    %c0_327 = arith.constant 0 : index
    %c0_328 = arith.constant 0 : index
    %291 = vector.load %arg3[%c4_325, %c5_326, %c0_327, %c0_328] : memref<6x9x32x32xf32, #tpu.memory_space<vmem>>, vector<1x1x32x32xf32>
    %292 = vector.shape_cast %291 : vector<1x1x32x32xf32> to vector<32x32xf32>
    %cst_329 = arith.constant dense<0.000000e+00> : vector<32x324xf32>
    %293 = tpu.matmul %292, %290, %cst_329 {dimension_numbers = #tpu.dot_dimension_numbers<[1], [0], [0], [1], [0, 0, 1, 1], [], []>} : vector<32x32xf32>, vector<32x324xf32>, vector<32x324xf32> -> vector<32x324xf32>
    %294 = arith.addf %289, %293 : vector<32x324xf32>
    %c0_330 = arith.constant 0 : index
    %c145_331 = arith.constant 145 : index
    %295 = vector.load %arg7[%c0_330, %c145_331] : memref<32x580xf32, #tpu.memory_space<vmem>>, vector<32x324xf32>
    %c4_332 = arith.constant 4 : index
    %c6_333 = arith.constant 6 : index
    %c0_334 = arith.constant 0 : index
    %c0_335 = arith.constant 0 : index
    %296 = vector.load %arg3[%c4_332, %c6_333, %c0_334, %c0_335] : memref<6x9x32x32xf32, #tpu.memory_space<vmem>>, vector<1x1x32x32xf32>
    %297 = vector.shape_cast %296 : vector<1x1x32x32xf32> to vector<32x32xf32>
    %cst_336 = arith.constant dense<0.000000e+00> : vector<32x324xf32>
    %298 = tpu.matmul %297, %295, %cst_336 {dimension_numbers = #tpu.dot_dimension_numbers<[1], [0], [0], [1], [0, 0, 1, 1], [], []>} : vector<32x32xf32>, vector<32x324xf32>, vector<32x324xf32> -> vector<32x324xf32>
    %299 = arith.addf %294, %298 : vector<32x324xf32>
    %c0_337 = arith.constant 0 : index
    %c146_338 = arith.constant 146 : index
    %300 = vector.load %arg7[%c0_337, %c146_338] : memref<32x580xf32, #tpu.memory_space<vmem>>, vector<32x324xf32>
    %c4_339 = arith.constant 4 : index
    %c7_340 = arith.constant 7 : index
    %c0_341 = arith.constant 0 : index
    %c0_342 = arith.constant 0 : index
    %301 = vector.load %arg3[%c4_339, %c7_340, %c0_341, %c0_342] : memref<6x9x32x32xf32, #tpu.memory_space<vmem>>, vector<1x1x32x32xf32>
    %302 = vector.shape_cast %301 : vector<1x1x32x32xf32> to vector<32x32xf32>
    %cst_343 = arith.constant dense<0.000000e+00> : vector<32x324xf32>
    %303 = tpu.matmul %302, %300, %cst_343 {dimension_numbers = #tpu.dot_dimension_numbers<[1], [0], [0], [1], [0, 0, 1, 1], [], []>} : vector<32x32xf32>, vector<32x324xf32>, vector<32x324xf32> -> vector<32x324xf32>
    %304 = arith.addf %299, %303 : vector<32x324xf32>
    %c0_344 = arith.constant 0 : index
    %c147_345 = arith.constant 147 : index
    %305 = vector.load %arg7[%c0_344, %c147_345] : memref<32x580xf32, #tpu.memory_space<vmem>>, vector<32x324xf32>
    %c4_346 = arith.constant 4 : index
    %c8_347 = arith.constant 8 : index
    %c0_348 = arith.constant 0 : index
    %c0_349 = arith.constant 0 : index
    %306 = vector.load %arg3[%c4_346, %c8_347, %c0_348, %c0_349] : memref<6x9x32x32xf32, #tpu.memory_space<vmem>>, vector<1x1x32x32xf32>
    %307 = vector.shape_cast %306 : vector<1x1x32x32xf32> to vector<32x32xf32>
    %cst_350 = arith.constant dense<0.000000e+00> : vector<32x324xf32>
    %308 = tpu.matmul %307, %305, %cst_350 {dimension_numbers = #tpu.dot_dimension_numbers<[1], [0], [0], [1], [0, 0, 1, 1], [], []>} : vector<32x32xf32>, vector<32x324xf32>, vector<32x324xf32> -> vector<32x324xf32>
    %309 = arith.addf %304, %308 : vector<32x324xf32>
    %c4_351 = arith.constant 4 : index
    %c0_352 = arith.constant 0 : index
    %c0_353 = arith.constant 0 : index
    %310 = vector.load %arg4[%c4_351, %c0_352, %c0_353] : memref<6x32x1xf32, #tpu.memory_space<vmem>>, vector<1x32x1xf32>
    %311 = vector.shape_cast %310 : vector<1x32x1xf32> to vector<32x1xf32>
    %312 = vector.broadcast %311 : vector<32x1xf32> to vector<32x324xf32>
    %313 = arith.addf %309, %312 : vector<32x324xf32>
    %c4_354 = arith.constant 4 : index
    %314 = memref.load %arg5[%c4_354] : memref<6xf32, #tpu.memory_space<smem>>
    %cst_355 = arith.constant 0.000000e+00 : f32
    %315 = vector.broadcast %cst_355 : f32 to vector<32x324xf32>
    %316 = arith.cmpf oge, %313, %315 : vector<32x324xf32>
    %317 = vector.broadcast %314 : f32 to vector<32x324xf32>
    %318 = arith.mulf %317, %313 : vector<32x324xf32>
    %319 = arith.select %316, %313, %318 : vector<32x324xi1>, vector<32x324xf32>
    %cst_356 = arith.constant 5.000000e-01 : f32
    %320 = vector.broadcast %cst_356 : f32 to vector<1x324xf32>
    %321 = arith.cmpf ogt, %2, %320 : vector<1x324xf32>
    %cst_357 = arith.constant 0.000000e+00 : f32
    %322 = vector.shape_cast %321 : vector<1x324xi1> to vector<1x324xi1>
    %323 = vector.broadcast %322 : vector<1x324xi1> to vector<32x324xi1>
    %324 = vector.broadcast %cst_357 : f32 to vector<32x324xf32>
    %325 = arith.select %323, %319, %324 : vector<32x324xi1>, vector<32x324xf32>
    %c0_358 = arith.constant 0 : index
    %c128_359 = arith.constant 128 : index
    %326 = vector.load %arg7[%c0_358, %c128_359] : memref<32x580xf32, #tpu.memory_space<vmem>>, vector<32x324xf32>
    tpu.vector_store %arg7[%c0_358, %c128_359], %325 {strides = array<i32>} : memref<32x580xf32, #tpu.memory_space<vmem>>, vector<32x324xf32>,
    %cst_360 = arith.constant 0.000000e+00 : f32
    %327 = vector.broadcast %cst_360 : f32 to vector<32x324xf32>
    %c0_361 = arith.constant 0 : index
    %c109_362 = arith.constant 109 : index
    %328 = vector.load %arg7[%c0_361, %c109_362] : memref<32x580xf32, #tpu.memory_space<vmem>>, vector<32x324xf32>
    %c5_363 = arith.constant 5 : index
    %c0_364 = arith.constant 0 : index
    %c0_365 = arith.constant 0 : index
    %c0_366 = arith.constant 0 : index
    %329 = vector.load %arg3[%c5_363, %c0_364, %c0_365, %c0_366] : memref<6x9x32x32xf32, #tpu.memory_space<vmem>>, vector<1x1x32x32xf32>
    %330 = vector.shape_cast %329 : vector<1x1x32x32xf32> to vector<32x32xf32>
    %cst_367 = arith.constant dense<0.000000e+00> : vector<32x324xf32>
    %331 = tpu.matmul %330, %328, %cst_367 {dimension_numbers = #tpu.dot_dimension_numbers<[1], [0], [0], [1], [0, 0, 1, 1], [], []>} : vector<32x32xf32>, vector<32x324xf32>, vector<32x324xf32> -> vector<32x324xf32>
    %332 = arith.addf %327, %331 : vector<32x324xf32>
    %c0_368 = arith.constant 0 : index
    %c110_369 = arith.constant 110 : index
    %333 = vector.load %arg7[%c0_368, %c110_369] : memref<32x580xf32, #tpu.memory_space<vmem>>, vector<32x324xf32>
    %c5_370 = arith.constant 5 : index
    %c1_371 = arith.constant 1 : index
    %c0_372 = arith.constant 0 : index
    %c0_373 = arith.constant 0 : index
    %334 = vector.load %arg3[%c5_370, %c1_371, %c0_372, %c0_373] : memref<6x9x32x32xf32, #tpu.memory_space<vmem>>, vector<1x1x32x32xf32>
    %335 = vector.shape_cast %334 : vector<1x1x32x32xf32> to vector<32x32xf32>
    %cst_374 = arith.constant dense<0.000000e+00> : vector<32x324xf32>
    %336 = tpu.matmul %335, %333, %cst_374 {dimension_numbers = #tpu.dot_dimension_numbers<[1], [0], [0], [1], [0, 0, 1, 1], [], []>} : vector<32x32xf32>, vector<32x324xf32>, vector<32x324xf32> -> vector<32x324xf32>
    %337 = arith.addf %332, %336 : vector<32x324xf32>
    %c0_375 = arith.constant 0 : index
    %c111_376 = arith.constant 111 : index
    %338 = vector.load %arg7[%c0_375, %c111_376] : memref<32x580xf32, #tpu.memory_space<vmem>>, vector<32x324xf32>
    %c5_377 = arith.constant 5 : index
    %c2_378 = arith.constant 2 : index
    %c0_379 = arith.constant 0 : index
    %c0_380 = arith.constant 0 : index
    %339 = vector.load %arg3[%c5_377, %c2_378, %c0_379, %c0_380] : memref<6x9x32x32xf32, #tpu.memory_space<vmem>>, vector<1x1x32x32xf32>
    %340 = vector.shape_cast %339 : vector<1x1x32x32xf32> to vector<32x32xf32>
    %cst_381 = arith.constant dense<0.000000e+00> : vector<32x324xf32>
    %341 = tpu.matmul %340, %338, %cst_381 {dimension_numbers = #tpu.dot_dimension_numbers<[1], [0], [0], [1], [0, 0, 1, 1], [], []>} : vector<32x32xf32>, vector<32x324xf32>, vector<32x324xf32> -> vector<32x324xf32>
    %342 = arith.addf %337, %341 : vector<32x324xf32>
    %c0_382 = arith.constant 0 : index
    %c127_383 = arith.constant 127 : index
    %343 = vector.load %arg7[%c0_382, %c127_383] : memref<32x580xf32, #tpu.memory_space<vmem>>, vector<32x324xf32>
    %c5_384 = arith.constant 5 : index
    %c3_385 = arith.constant 3 : index
    %c0_386 = arith.constant 0 : index
    %c0_387 = arith.constant 0 : index
    %344 = vector.load %arg3[%c5_384, %c3_385, %c0_386, %c0_387] : memref<6x9x32x32xf32, #tpu.memory_space<vmem>>, vector<1x1x32x32xf32>
    %345 = vector.shape_cast %344 : vector<1x1x32x32xf32> to vector<32x32xf32>
    %cst_388 = arith.constant dense<0.000000e+00> : vector<32x324xf32>
    %346 = tpu.matmul %345, %343, %cst_388 {dimension_numbers = #tpu.dot_dimension_numbers<[1], [0], [0], [1], [0, 0, 1, 1], [], []>} : vector<32x32xf32>, vector<32x324xf32>, vector<32x324xf32> -> vector<32x324xf32>
    %347 = arith.addf %342, %346 : vector<32x324xf32>
    %c0_389 = arith.constant 0 : index
    %c128_390 = arith.constant 128 : index
    %348 = vector.load %arg7[%c0_389, %c128_390] : memref<32x580xf32, #tpu.memory_space<vmem>>, vector<32x324xf32>
    %c5_391 = arith.constant 5 : index
    %c4_392 = arith.constant 4 : index
    %c0_393 = arith.constant 0 : index
    %c0_394 = arith.constant 0 : index
    %349 = vector.load %arg3[%c5_391, %c4_392, %c0_393, %c0_394] : memref<6x9x32x32xf32, #tpu.memory_space<vmem>>, vector<1x1x32x32xf32>
    %350 = vector.shape_cast %349 : vector<1x1x32x32xf32> to vector<32x32xf32>
    %cst_395 = arith.constant dense<0.000000e+00> : vector<32x324xf32>
    %351 = tpu.matmul %350, %348, %cst_395 {dimension_numbers = #tpu.dot_dimension_numbers<[1], [0], [0], [1], [0, 0, 1, 1], [], []>} : vector<32x32xf32>, vector<32x324xf32>, vector<32x324xf32> -> vector<32x324xf32>
    %352 = arith.addf %347, %351 : vector<32x324xf32>
    %c0_396 = arith.constant 0 : index
    %c129_397 = arith.constant 129 : index
    %353 = vector.load %arg7[%c0_396, %c129_397] : memref<32x580xf32, #tpu.memory_space<vmem>>, vector<32x324xf32>
    %c5_398 = arith.constant 5 : index
    %c5_399 = arith.constant 5 : index
    %c0_400 = arith.constant 0 : index
    %c0_401 = arith.constant 0 : index
    %354 = vector.load %arg3[%c5_398, %c5_399, %c0_400, %c0_401] : memref<6x9x32x32xf32, #tpu.memory_space<vmem>>, vector<1x1x32x32xf32>
    %355 = vector.shape_cast %354 : vector<1x1x32x32xf32> to vector<32x32xf32>
    %cst_402 = arith.constant dense<0.000000e+00> : vector<32x324xf32>
    %356 = tpu.matmul %355, %353, %cst_402 {dimension_numbers = #tpu.dot_dimension_numbers<[1], [0], [0], [1], [0, 0, 1, 1], [], []>} : vector<32x32xf32>, vector<32x324xf32>, vector<32x324xf32> -> vector<32x324xf32>
    %357 = arith.addf %352, %356 : vector<32x324xf32>
    %c0_403 = arith.constant 0 : index
    %c145_404 = arith.constant 145 : index
    %358 = vector.load %arg7[%c0_403, %c145_404] : memref<32x580xf32, #tpu.memory_space<vmem>>, vector<32x324xf32>
    %c5_405 = arith.constant 5 : index
    %c6_406 = arith.constant 6 : index
    %c0_407 = arith.constant 0 : index
    %c0_408 = arith.constant 0 : index
    %359 = vector.load %arg3[%c5_405, %c6_406, %c0_407, %c0_408] : memref<6x9x32x32xf32, #tpu.memory_space<vmem>>, vector<1x1x32x32xf32>
    %360 = vector.shape_cast %359 : vector<1x1x32x32xf32> to vector<32x32xf32>
    %cst_409 = arith.constant dense<0.000000e+00> : vector<32x324xf32>
    %361 = tpu.matmul %360, %358, %cst_409 {dimension_numbers = #tpu.dot_dimension_numbers<[1], [0], [0], [1], [0, 0, 1, 1], [], []>} : vector<32x32xf32>, vector<32x324xf32>, vector<32x324xf32> -> vector<32x324xf32>
    %362 = arith.addf %357, %361 : vector<32x324xf32>
    %c0_410 = arith.constant 0 : index
    %c146_411 = arith.constant 146 : index
    %363 = vector.load %arg7[%c0_410, %c146_411] : memref<32x580xf32, #tpu.memory_space<vmem>>, vector<32x324xf32>
    %c5_412 = arith.constant 5 : index
    %c7_413 = arith.constant 7 : index
    %c0_414 = arith.constant 0 : index
    %c0_415 = arith.constant 0 : index
    %364 = vector.load %arg3[%c5_412, %c7_413, %c0_414, %c0_415] : memref<6x9x32x32xf32, #tpu.memory_space<vmem>>, vector<1x1x32x32xf32>
    %365 = vector.shape_cast %364 : vector<1x1x32x32xf32> to vector<32x32xf32>
    %cst_416 = arith.constant dense<0.000000e+00> : vector<32x324xf32>
    %366 = tpu.matmul %365, %363, %cst_416 {dimension_numbers = #tpu.dot_dimension_numbers<[1], [0], [0], [1], [0, 0, 1, 1], [], []>} : vector<32x32xf32>, vector<32x324xf32>, vector<32x324xf32> -> vector<32x324xf32>
    %367 = arith.addf %362, %366 : vector<32x324xf32>
    %c0_417 = arith.constant 0 : index
    %c147_418 = arith.constant 147 : index
    %368 = vector.load %arg7[%c0_417, %c147_418] : memref<32x580xf32, #tpu.memory_space<vmem>>, vector<32x324xf32>
    %c5_419 = arith.constant 5 : index
    %c8_420 = arith.constant 8 : index
    %c0_421 = arith.constant 0 : index
    %c0_422 = arith.constant 0 : index
    %369 = vector.load %arg3[%c5_419, %c8_420, %c0_421, %c0_422] : memref<6x9x32x32xf32, #tpu.memory_space<vmem>>, vector<1x1x32x32xf32>
    %370 = vector.shape_cast %369 : vector<1x1x32x32xf32> to vector<32x32xf32>
    %cst_423 = arith.constant dense<0.000000e+00> : vector<32x324xf32>
    %371 = tpu.matmul %370, %368, %cst_423 {dimension_numbers = #tpu.dot_dimension_numbers<[1], [0], [0], [1], [0, 0, 1, 1], [], []>} : vector<32x32xf32>, vector<32x324xf32>, vector<32x324xf32> -> vector<32x324xf32>
    %372 = arith.addf %367, %371 : vector<32x324xf32>
    %c5_424 = arith.constant 5 : index
    %c0_425 = arith.constant 0 : index
    %c0_426 = arith.constant 0 : index
    %373 = vector.load %arg4[%c5_424, %c0_425, %c0_426] : memref<6x32x1xf32, #tpu.memory_space<vmem>>, vector<1x32x1xf32>
    %374 = vector.shape_cast %373 : vector<1x32x1xf32> to vector<32x1xf32>
    %375 = vector.broadcast %374 : vector<32x1xf32> to vector<32x324xf32>
    %376 = arith.addf %372, %375 : vector<32x324xf32>
    %c5_427 = arith.constant 5 : index
    %377 = memref.load %arg5[%c5_427] : memref<6xf32, #tpu.memory_space<smem>>
    %cst_428 = arith.constant 0.000000e+00 : f32
    %378 = vector.broadcast %cst_428 : f32 to vector<32x324xf32>
    %379 = arith.cmpf oge, %376, %378 : vector<32x324xf32>
    %380 = vector.broadcast %377 : f32 to vector<32x324xf32>
    %381 = arith.mulf %380, %376 : vector<32x324xf32>
    %382 = arith.select %379, %376, %381 : vector<32x324xi1>, vector<32x324xf32>
    %cst_429 = arith.constant 5.000000e-01 : f32
    %383 = vector.broadcast %cst_429 : f32 to vector<1x324xf32>
    %384 = arith.cmpf ogt, %2, %383 : vector<1x324xf32>
    %cst_430 = arith.constant 0.000000e+00 : f32
    %385 = vector.shape_cast %384 : vector<1x324xi1> to vector<1x324xi1>
    %386 = vector.broadcast %385 : vector<1x324xi1> to vector<32x324xi1>
    %387 = vector.broadcast %cst_430 : f32 to vector<32x324xf32>
    %388 = arith.select %386, %382, %387 : vector<32x324xi1>, vector<32x324xf32>
    %c0_431 = arith.constant 0 : index
    %c0_432 = arith.constant 0 : index
    %c0_433 = arith.constant 0 : index
    %389 = vector.load %arg6[%c0_431, %c0_432, %c0_433] : memref<1x32x324xf32, #tpu.memory_space<vmem>>, vector<1x32x324xf32>
    %390 = vector.shape_cast %389 : vector<1x32x324xf32> to vector<32x324xf32>
    %391 = vector.shape_cast %388 : vector<32x324xf32> to vector<1x32x324xf32>
    tpu.vector_store %arg6[%c0_431, %c0_432, %c0_433], %391 {strides = array<i32>} : memref<1x32x324xf32, #tpu.memory_space<vmem>>, vector<1x32x324xf32>,
    return
  }
  func.func @transform_0(%arg0: i32) -> (i32, i32) {
    %c0_i32 = arith.constant 0 : i32
    %c0_i32_0 = arith.constant 0 : i32
    %c0_i32_1 = arith.constant 0 : i32
    return %c0_i32, %c0_i32_0 : i32, i32
  }
  func.func @transform_1(%arg0: i32) -> (i32, i32, i32) {
    %c0_i32 = arith.constant 0 : i32
    %c0_i32_0 = arith.constant 0 : i32
    %c0_i32_1 = arith.constant 0 : i32
    return %arg0, %c0_i32, %c0_i32_0 : i32, i32, i32
  }
  func.func @transform_2(%arg0: i32) -> (i32, i32, i32, i32) {
    %c0_i32 = arith.constant 0 : i32
    %c0_i32_0 = arith.constant 0 : i32
    %c0_i32_1 = arith.constant 0 : i32
    %c0_i32_2 = arith.constant 0 : i32
    %c0_i32_3 = arith.constant 0 : i32
    return %c0_i32, %c0_i32_0, %c0_i32_1, %c0_i32_2 : i32, i32, i32, i32
  }
  func.func @transform_3(%arg0: i32) -> (i32, i32, i32) {
    %c0_i32 = arith.constant 0 : i32
    %c0_i32_0 = arith.constant 0 : i32
    %c0_i32_1 = arith.constant 0 : i32
    %c0_i32_2 = arith.constant 0 : i32
    return %c0_i32, %c0_i32_0, %c0_i32_1 : i32, i32, i32
  }
  func.func @transform_4(%arg0: i32) -> i32 {
    %c0_i32 = arith.constant 0 : i32
    %c0_i32_0 = arith.constant 0 : i32
    return %c0_i32 : i32
  }
  func.func @transform_5(%arg0: i32) -> (i32, i32, i32) {
    %c0_i32 = arith.constant 0 : i32
    %c0_i32_0 = arith.constant 0 : i32
    %c0_i32_1 = arith.constant 0 : i32
    return %arg0, %c0_i32, %c0_i32_0 : i32, i32, i32
  }
}

</mosaic_0001>

<bundles_post_ra>
// kernel: tpu_custom_call.1
= control target key start
LH: loop header
LB: loop body
LE: loop exit
PB: predicated region body
PF: predicated region fallthrough
CT: control target
= control target key end

     0   :  { %10 = vsyncpa [#allocation4], 0  ;;  %s22902_s0 = inlined_call_operand.vmem [shape: f32[1,324], index: 0, kind: input, shape index: {}]   ;;  %s22903_s1 = inlined_call_operand.hbm [shape: f32[2,32,580], index: 1, kind: input, shape index: {}]   ;;  %s22904_s2 = inlined_call_operand.hbm [shape: f32[6,9,32,32], index: 2, kind: input, shape index: {}]   ;;  %s22905_s3 = inlined_call_operand.vmem [shape: f32[6,32,1], index: 3, kind: input, shape index: {}]   ;;  %s22906_s4 = inlined_call_operand.vmem [shape: f32[6], index: 4, kind: input, shape index: {}]   ;;  %s22907_s5 = inlined_call_operand.hbm [shape: f32[2,32,324], index: 5, kind: output, shape index: {}]  }
   0x1   :  { %12 = vsyncpa [#allocation4 + $0x1], 0 }
   0x2   :  { %13 = vsyncpa [#allocation8], 0 }
   0x3   :  { %14 = vsyncpa [#allocation6], 0 }
   0x4   :  { %15 = vsyncpa [#allocation5], 0 }
   0x5   :  { %17 = vsyncpa [#allocation5 + $0x1], 0  ;;  %s19563_s18 = smov 0   ;;  %s19565_s19 = smov 0  }
   0x6   :  { %s19567_s20 = smov 0   ;;  %s19569_s21 = smov 0  }
   0x7 LB: > { %s19584_s22 = sadd.s32 4294967295, %s19511_s21   ;;  %s14431_s23 = sadd.s32 4294967294, %s19511_s21   ;;  %s19511_s21 = sphi %s19569_s21, %s23108_s21   ;;  %s19507_s20 = sphi %s19567_s20, %s23107_s20   ;;  %s19503_s19 = sphi %s19565_s19, %s23106_s19   ;;  %s19499_s18 = sphi %s19563_s18, %s23105_s18  }
   0x8   : > { %p64_p0 = scmp.ne.s32.totalorder %s19503_s19, %s19499_s18  ;;  %p22908_p1 = scmp.eq.s32.totalorder %s19584_s22, 0 }
   0x9   : > { %p157_p3 = scmp.eq.s32.totalorder %s14431_s23, 1  ;;  %p14432_p5 = scmp.ge.s32.totalorder %s19511_s21, 1 }
   0xa   : > { %p19593_p4 = por %p22908_p1, %p64_p0  ;;  %p164_p7 = scmp.lt.s32.totalorder %s19511_s21, 3 }
   0xb   : > { %p19598_p6 = por %p157_p3, %p64_p0  ;;  %s19513_s27 = smov [#allocation7]  }
   0xc   : > { %s22940_s24 = scalar_select %p19593_p4, 1, 0 }
   0xd   : > { %s22941_s25 = scalar_select %p19598_p6, 1, 0 }
   0xe   : > { %p19603_p8 = pnand %p14432_p5, %p164_p7  ;;  %s179_s28 = sshll.u32 %s19513_s27, 4  ;;  %s180_s28 = int_to_ptr.vmem [resolvable:$true] %s179_s28 }
   0xf   : > { %s196_s6 = sshll.u32 %s22906_s4, 4  ;;  %s19364_s10 = scalar_lea.hbm %s22904_s2, 27648  ;;  %s19619_s6 = int_to_ptr.vmem [resolvable:$true] %s196_s6 }
  0x10   : > { %s22942_s26 = scalar_select %p19603_p8, 1, 0 }
  0x11   : > { %p17545_p9 = pneg %p19603_p8  ;;  %p19365_p12 = scmp.ne.s32.totalorder %s22904_s2, %s19364_s10 }
  0x12   : > { %p19371_p5 = scmp.lt.u32.totalorder %s19364_s10, %s22904_s2 }
  0x13   : > { %p19615_p11 = pnand %p17545_p9, %p22908_p1 }
  0x15   : > { %p19366_p13 = pneg %p19615_p11 }
  0x17   : > { %p19367_p0 = pnand %p19366_p13, %p19365_p12 }
  0x19   : > { %p19368_p3 = pneg %p19367_p0 }
  0x1b   : > { %p19373_p7 = pnand %p19371_p5, %p19368_p3 }
  0x1d   : > { %19376 = shalt.err (!%p19373_p7)
}
  0x1e   : > { %s19377_s15 = scalar_lea.vmem %s180_s28, 27648  ;;  %p19385_p2 = scmp.lt.s32.totalorder %s180_s28, %s180_s28 }
  0x1f   : > { %p19378_p9 = scmp.ne.s32.totalorder %s180_s28, %s19377_s15  ;;  %p19386_p6 = scmp.lt.s32.totalorder %s19377_s15, %s19377_s15 }
  0x21   : > { %p19380_p10 = pnand %p19378_p9, %p19366_p13  ;;  %p19387_p4 = por %p19386_p6, %p19385_p2 }
  0x23   : > { %p19381_p1 = pneg %p19380_p10 }
  0x25   : > { %p19388_p8 = pnand %p19387_p4, %p19381_p1 }
  0x27   : > { %19391 = shalt.err (!%p19388_p8)
}
  0x28   : > { %s19514_s16 = smov 128   ;;  %s19515_s17 = smov 8  }
  0x29   : > { %17548 = dma.hbm_to_vmem [thread:$0]  (!%p19615_p11), %s22904_s2, 27648, %s180_s28, [#allocation8], %s19514_s16, %s19514_s16, %s19515_s17  }
  0x2a   : > { %s19392_s29 = scalar_lea.vmem %s19619_s6, 16  ;;  %p19400_p1 = scmp.lt.s32.totalorder %s19619_s6, %s19619_s6 }
  0x2b   : > { %p19393_p12 = scmp.ne.s32.totalorder %s19619_s6, %s19392_s29  ;;  %p19401_p4 = scmp.lt.s32.totalorder %s19392_s29, %s19392_s29 }
  0x2d   : > { %p19395_p10 = pnand %p19393_p12, %p19366_p13  ;;  %p19402_p6 = por %p19401_p4, %p19400_p1 }
  0x2f   : > { %p19396_p2 = pneg %p19395_p10 }
  0x31   : > { %p19403_p8 = pnand %p19402_p6, %p19396_p2 }
  0x33   : > { %19406 = shalt.err (!%p19403_p8)
}
  0x34   : > { %s19516_s30 = smov [#allocation9]   ;;  %s19654_s28 = sadd.s32 1, %s19511_s21  }
  0x35   : > { %17551 = dma.vmem_to_smem (!%p19615_p11), %s19619_s6, 16, %s19516_s30, [#allocation6]  }
  0x36   : > { %s51_s8 = sadd.s32 1, %s19507_s20  ;;  %s48_s9 = ssub.s32 %s19511_s21, %s19654_s28 }
  0x37   : > { %p58_p13 = scmp.ne.s32.totalorder %s19507_s20, %s19503_s19  ;;  %p49_p0 = scmp.eq.s32.totalorder %s48_s9, 0 }
  0x38   : > { %p59_p3 = scmp.eq.s32.totalorder %s19511_s21, 0  ;;  %p22944_p5 = scmp.eq.s32.totalorder %s19584_s22, 1 }
  0x39   : > { %p17562_p9 = scmp.lt.s32.totalorder %s19511_s21, 2  ;;  %s207_s11 = sand.u32 1, %s19507_s20  }
  0x3a   : > { %p19664_p7 = por %p22944_p5, %p58_p13  ;;  %p60_p12 = por %p59_p3, %p58_p13 }
  0x3b   : > { %s19670_s10 = scalar_select %p49_p0, %s19507_s20, %s51_s8  }
  0x3c   : > { %s17528_s12 = smul.u32 160, %s207_s11  ;;  %p19674_p11 = pnand %p17562_p9, %p60_p12 }
  0x3d   : > { %s17529_s6 = smul.u32 2560, %s19511_s21  ;;  %s19685_s27 = scalar_lea.sflag [#allocation4], %s207_s11 }
  0x3e   : > { %s211_s17 = scalar_lea.vmem [#allocation3], %s17528_s12  ;;  %p19409_p2 = pneg %p19674_p11 }
  0x3f   : > { %s19681_s16 = scalar_lea.hbm %s22903_s1, %s17529_s6  ;;  %s218_s23 = sshll.u32 %s211_s17, 4  ;;  %s19683_s23 = int_to_ptr.vmem [resolvable:$true] %s218_s23 }
  0x40   : > { %s19407_s29 = scalar_lea.hbm %s19681_s16, 2560  ;;  %s19412_s9 = scalar_lea.hbm %s22903_s1, 5120 }
  0x41   : > { %p19408_p10 = scmp.ne.s32.totalorder %s19681_s16, %s19407_s29  ;;  %p19413_p6 = scmp.lt.u32.totalorder %s19681_s16, %s22903_s1 }
  0x42   : > { %p19414_p8 = scmp.lt.u32.totalorder %s19412_s9, %s19407_s29  ;;  %p19416_p0 = scmp.lt.u32.totalorder %s19407_s29, %s19681_s16 }
  0x43   : > { %p19410_p1 = pnand %p19409_p2, %p19408_p10 }
  0x44   : > { %p19415_p13 = por %p19414_p8, %p19413_p6 }
  0x45   : > { %p19411_p4 = pneg %p19410_p1 }
  0x46   : > { %p19417_p3 = por %p19416_p0, %p19415_p13 }
  0x48   : > { %p19418_p5 = pnand %p19417_p3, %p19411_p4 }
  0x4a   : > { %19421 = shalt.err (!%p19418_p5)
}
  0x4b   : > { %s19422_s11 = scalar_lea.vmem %s19683_s23, 2560  ;;  %s19517_s12 = smov [#allocation3]  }
  0x4c   : > { %p19423_p9 = scmp.ne.s32.totalorder %s19683_s23, %s19422_s11  ;;  %s19427_s15 = sshll.u32 %s19517_s12, 4  ;;  %s19428_s15 = int_to_ptr.vmem [resolvable:$false] %s19427_s15 }
  0x4d   : > { %s19429_s17 = scalar_lea.vmem %s19428_s15, 5120  ;;  %p19430_p1 = scmp.lt.s32.totalorder %s19683_s23, %s19428_s15 }
  0x4e   : > { %p19425_p12 = pnand %p19423_p9, %p19409_p2  ;;  %p19431_p6 = scmp.lt.s32.totalorder %s19429_s17, %s19422_s11 }
  0x50   : > { %p19426_p10 = pneg %p19425_p12  ;;  %p19432_p8 = por %p19431_p6, %p19430_p1 }
  0x52   : > { %p19433_p13 = pnand %p19432_p8, %p19426_p10 }
  0x54   : > { %19436 = shalt.err (!%p19433_p13)
}
  0x55   : > { %s19518_s29 = smov 640   ;;  %s19519_s30 = smov 40  }
  0x56   : > { %17555 = dma.hbm_to_vmem [thread:$0]  (!%p19674_p11), %s19681_s16, 2560, %s19683_s23, %s19685_s27, %s19518_s29, %s19518_s29, %s19519_s30  }
  0x57   : > { %p22947_p2 = scmp.ne.s32.totalorder %s22942_s26, 0 }
  0x59   : > { %230 = sbr.rel (%p22947_p2) target bundleno = 3328 (0xd00), region = 40 }
  0x60   : > { %s19716_s8 = sand.u32 1, %s19503_s19   ;;  %p22948_p4 = scmp.ne.s32.totalorder %s22940_s24, 0 }
  0x61   : > { %s17530_s9 = smul.u32 160, %s19716_s8  ;;  %s233_s6 = scalar_lea.sflag [#allocation4], %s19716_s8 }
  0x63   : > { %s19720_s14 = scalar_lea.vmem [#allocation3], %s17530_s9 }
  0x64   : > { %19482 = dma.done.wait (%p22948_p4), %s233_s6, 2560  }
  0x65   : > { %19484 = vsyncadd (%p22948_p4), %s233_s6, 4294964736  ;;  %p22949_p11 = scmp.eq.s32.totalorder %s19584_s22, 0 }
  0x67   : > { %19486 = dma.done.wait (%p22949_p11), [#allocation8], 27648   ;;  %p22950_p0 = pmov %p22949_p11 }
  0x69   : > { %19488 = vsyncadd (%p22950_p0), [#allocation8], 4294939648  ;;  %p22951_p3 = pmov %p22950_p0 }
  0x6a   : > { %p22952_p5 = pmov %p22950_p0 }
  0x6b   : > { %19490 = dma.done.wait (%p22951_p3), [#allocation6], 16  }
  0x6c   : > { %19492 = vsyncadd (%p22952_p5), [#allocation6], 4294967280 }
  0x6d   : > { %249 = sfence }
  0x6e   : > { %v19735_v0 = vld [vmem:[%s19720_s14 + $0x8] sm:$0xff]  ;;  %v19738_v1 = vld [vmem:[%s19720_s14 + $0x10] sm:$0xff]  ;;  %v294_v2 = vld [vmem:[%s19720_s14] sm:$0xff]  ;;  %s19520_s24 = smov 18   ;;  %v19521_v24 = vmov 0.0   ;;  %s19522_s26 = smov 19  }
  0x6f   : > { %v17616_v3 = vpack.i.bf16 %v19738_v1, %v19735_v0  ;;  %v298_v4 = vld [vmem:[%s19720_s14 + $0x28] sm:$0xff]  ;;  %v19745_v5 = vld [vmem:[%s19720_s14 + $0x30] sm:$0xff]  ;;  %v19748_v6 = vld [vmem:[%s19720_s14 + $0x38] sm:$0xff]  ;;  %469 = vmatprep.mubr.f32.mxu0 %v19521_v24  ;;  %272 = vst [vmem:[#allocation2] sm:$0xff] %v19521_v24  ;;  %s19523_s13 = smov 17   ;;  %vm392_vm0 = vcmask 261120  }
  0x70   : > { %v17626_v7 = vpack.i.bf16 %v298_v4, %v294_v2  ;;  %v19751_v8 = vld [vmem:[%s19720_s14 + $0x58] sm:$0xff]  ;;  %v19754_v9 = vld [vmem:[%s19720_s14 + $0x60] sm:$0xff]  ;;  %v17621_v10 = vpack.i.bf16 %v19748_v6, %v19745_v5  ;;  %v19766_v13 = vld [vmem:[%s19720_s14 + $0x88] sm:$0xff]  ;;  %275 = vst [vmem:[#allocation2 + $0x18] sm:$0xff] %v19521_v24  ;;  %s19524_s16 = smov 1   ;;  %s19525_s23 = smov 127   ;;  %v17761_v28 = vpack.i.bf16 %v19745_v5, %v19735_v0 }
  0x71   : > { %17617 = vrot.lane.b32.xlu0 %v17616_v3, %s19520_s24  ;;  %v17631_v11 = vpack.i.bf16 %v19754_v9, %v19751_v8  ;;  %v19763_v12 = vld [vmem:[%s19720_s14 + $0x80] sm:$0xff]  ;;  %v302_v14 = vld [vmem:[%s19720_s14 + $0x50] sm:$0xff]  ;;  %v306_v15 = vld [vmem:[%s19720_s14 + $0x78] sm:$0xff]  ;;  %281 = vst [vmem:[#allocation2 + $0x40] sm:$0xff] %v19521_v24  ;;  %s19526_s27 = smov 111   ;;  %s19527_s11 = smov 110  }
  0x72   : > { %17627 = vrot.lane.b32.xlu1 %v17626_v7, %s19520_s24  ;;  %v17636_v16 = vpack.i.bf16 %v19766_v13, %v19763_v12  ;;  %v17641_v17 = vpack.i.bf16 %v306_v15, %v302_v14  ;;  %v19775_v18 = vld [vmem:[%s19720_s14 + $0x18] sm:$0xff]  ;;  %v19778_v19 = vld [vmem:[%s19720_s14 + $0x40] sm:$0xff]  ;;  %v19781_v20 = vld [vmem:[%s19720_s14 + $0x68] sm:$0xff]  ;;  %286 = vst [vmem:[#allocation2 + $0x68] sm:$0xff] %v19521_v24  ;;  %v17781_v31 = vpack.i.bf16 %v19763_v12, %v19751_v8  ;;  %s19528_s12 = smov 109   ;;  %vm367_vm1 = vcmask 146432  }
  0x73   : > { %v19784_v21 = vld [vmem:[%s19720_s14 + $0x90] sm:$0xff]  ;;  %v17646_v22 = vpack.i.bf16 %v19778_v19, %v19775_v18  ;;  %291 = vst [vmem:[#allocation2 + $0x90] sm:$0xff] %v19521_v24  ;;  %v19807_v25 = vld [vmem:[#allocation7] sm:$0xff]  ;;  %v17751_v26 = vpack.i.bf16 %v19775_v18, %v19738_v1  ;;  %v17756_v27 = vpack.i.bf16 %v19778_v19, %v19748_v6  ;;  %v17771_v29 = vpack.i.bf16 %v19781_v20, %v19754_v9  ;;  %s2573_s30 = sld [smem:[#allocation9]]  ;;  %s14588_s6 = sld [smem:[#allocation9 + $0x1]] }
  0x74   : > { %v17651_v23 = vpack.i.bf16 %v19784_v21, %v19781_v20  ;;  %15354 = vmatprep.mubr.msk.f32.mxu1 %vm392_vm0, %v19807_v25  ;;  %v17776_v30 = vpack.i.bf16 %v19784_v21, %v19766_v13  ;;  %vm611_vm2 = vcmask 154624   ;;  %vm859_vm3 = vcmask 138240   ;;  %s14665_s15 = sld [smem:[#allocation9 + $0x2]]  ;;  %s14742_s29 = sld [smem:[#allocation9 + $0x3]] }
  0x75   : > { %17622 = vrot.lane.b32.xlu0 %v17621_v10, %s19520_s24  ;;  %vm1119_vm4 = vcmask 7168   ;;  %vm1574_vm5 = vcmask 1039360   ;;  %vm22939_vm6 = vcmask 908288   ;;  %vm22937_vm7 = vcmask 900096   ;;  %s14819_s9 = sld [smem:[#allocation9 + $0x4]]  ;;  %s17531_s14 = smul.u32 96, %s19716_s8 }
  0x76   : > { %17632 = vrot.lane.b32.xlu1 %v17631_v11, %s19520_s24  ;;  %vm22936_vm8 = vcmask 891904   ;;  %vm22911_vm9 = vcmask 556032   ;;  %s17532_s17 = smul.u32 1536, %s19584_s22 }
  0x79   : > { %17637 = vrot.lane.b32.xlu0 %v17636_v16, %s19520_s24 }
  0x7a   : > { %17642 = vrot.lane.b32.xlu1 %v17641_v17, %s19520_s24 }
  0x7d   : > { %17647 = vrot.lane.b32.xlu0 %v17646_v22, %s19520_s24 }
  0x7e   : > { %17652 = vrot.lane.b32.xlu1 %v17651_v23, %s19520_s24 }
  0x81   : > { %17657 = vrot.lane.b32.xlu0 %v17616_v3, %s19522_s26 }
  0x82   : > { %17662 = vrot.lane.b32.xlu1 %v17621_v10, %s19522_s26 }
  0x85   : > { %17667 = vrot.lane.b32.xlu0 %v17626_v7, %s19522_s26 }
  0x86   : > { %17672 = vrot.lane.b32.xlu1 %v17631_v11, %s19522_s26 }
  0x89   : > { %17677 = vrot.lane.b32.xlu0 %v17636_v16, %s19522_s26 }
  0x8a   : > { %17682 = vrot.lane.b32.xlu1 %v17641_v17, %s19522_s26 }
  0x8d   : > { %17687 = vrot.lane.b32.xlu0 %v17616_v3, %s19523_s13 }
  0x8e   : > { %17692 = vrot.lane.b32.xlu1 %v17621_v10, %s19523_s13 }
  0x91   : > { %17697 = vrot.lane.b32.xlu0 %v17626_v7, %s19523_s13 }
  0x92   : > { %17702 = vrot.lane.b32.xlu1 %v17631_v11, %s19523_s13 }
  0x95   : > { %17707 = vrot.lane.b32.xlu0 %v17636_v16, %s19523_s13 }
  0x96   : > { %17712 = vrot.lane.b32.xlu1 %v17641_v17, %s19523_s13 }
  0x99   : > { %17717 = vrot.lane.b32.xlu0 %v17616_v3, %s19524_s16 }
  0x9a   : > { %17722 = vrot.lane.b32.xlu1 %v17621_v10, %s19524_s16  ;;  %v315_v10 = vld [vmem:[#allocation7 + $0x20] sm:$0xff] }
  0x9d   : > { %17727 = vrot.lane.b32.xlu0 %v17626_v7, %s19524_s16 }
  0x9e   : > { %17732 = vrot.lane.b32.xlu1 %v17631_v11, %s19524_s16 }
  0xa1   : > { %17737 = vrot.lane.b32.xlu0 %v17636_v16, %s19524_s16 }
  0xa2   : > { %17742 = vrot.lane.b32.xlu1 %v17641_v17, %s19524_s16 }
  0xa5   : > { %17747 = vrot.lane.b32.xlu0 %v17646_v22, %s19522_s26 }
  0xa6   : > { %17752 = vrot.lane.b32.xlu1 %v17751_v26, %s19525_s23 }
  0xa9   : > { %17757 = vrot.lane.b32.xlu0 %v17756_v27, %s19525_s23 }
  0xaa   : > { %17762 = vrot.lane.b32.xlu1 %v17761_v28, %s19525_s23 }
  0xad   : > { %17767 = vrot.lane.b32.xlu0 %v17651_v23, %s19522_s26 }
  0xae   : > { %17772 = vrot.lane.b32.xlu1 %v17771_v29, %s19525_s23 }
  0xb1   : > { %17777 = vrot.lane.b32.xlu0 %v17776_v30, %s19525_s23 }
  0xb2   : > { %17782 = vrot.lane.b32.xlu1 %v17781_v31, %s19525_s23 }
  0xb5   : > { %17787 = vrot.lane.b32.xlu0 %v17646_v22, %s19523_s13 }
  0xb6   : > { %17792 = vrot.lane.b32.xlu1 %v17651_v23, %s19523_s13 }
  0xb9   : > { %17797 = vrot.lane.b32.xlu0 %v17646_v22, %s19524_s16 }
  0xba   : > { %17802 = vrot.lane.b32.xlu1 %v17751_v26, %s19526_s27 }
  0xbd   : > { %17807 = vrot.lane.b32.xlu0 %v17756_v27, %s19526_s27 }
  0xbe   : > { %17812 = vrot.lane.b32.xlu1 %v17761_v28, %s19526_s27 }
  0xc1   : > { %17817 = vrot.lane.b32.xlu0 %v17651_v23, %s19524_s16 }
  0xc2   : > { %17822 = vrot.lane.b32.xlu1 %v17771_v29, %s19526_s27 }
  0xc5   : > { %17827 = vrot.lane.b32.xlu0 %v17776_v30, %s19526_s27 }
  0xc6   : > { %17832 = vrot.lane.b32.xlu1 %v17781_v31, %s19526_s27 }
  0xc9   : > { %17837 = vrot.lane.b32.xlu0 %v17751_v26, %s19527_s11 }
  0xca   : > { %17842 = vrot.lane.b32.xlu1 %v17756_v27, %s19527_s11 }
  0xcd   : > { %17847 = vrot.lane.b32.xlu0 %v17761_v28, %s19527_s11 }
  0xce   : > { %17852 = vrot.lane.b32.xlu1 %v17771_v29, %s19527_s11 }
  0xd1   : > { %17857 = vrot.lane.b32.xlu0 %v17776_v30, %s19527_s11 }
  0xd2   : > { %17862 = vrot.lane.b32.xlu1 %v17781_v31, %s19527_s11 }
  0xd5   : > { %17867 = vrot.lane.b32.xlu0 %v17751_v26, %s19528_s12 }
  0xd6   : > { %17872 = vrot.lane.b32.xlu1 %v17756_v27, %s19528_s12 }
  0xd9   : > { %17877 = vrot.lane.b32.xlu0 %v17761_v28, %s19528_s12 }
  0xda   : > { %17882 = vrot.lane.b32.xlu1 %v17771_v29, %s19528_s12 }
  0xdd   : > { %17887 = vrot.lane.b32.xlu0 %v17776_v30, %s19528_s12 }
  0xde   : > { %17892 = vrot.lane.b32.xlu1 %v17781_v31, %s19528_s12  ;;  %v316_v31 = vld [vmem:[#allocation7 + $0x28] sm:$0xff] }
  0xe3   : > { %v17618_v32 = vpop.permute.xlu0 %17617 }
  0xe4   : > { %v17628_v33 = vpop.permute.xlu1 %17627  ;;  %v17620_v34 = vunpack.i.h.bf16 %v17618_v32  ;;  %v17619_v35 = vunpack.i.l.bf16 %v17618_v32 }
  0xe5   : > { %v17629_v36 = vunpack.i.l.bf16 %v17628_v33  ;;  %v17630_v38 = vunpack.i.h.bf16 %v17628_v33 }
  0xe6   : > { %v369_v42 = vsel %vm367_vm1, %v17619_v35, %v17620_v34 }
  0xe7   : > { %v17623_v37 = vpop.permute.xlu0 %17622  ;;  %v368_v43 = vsel %vm367_vm1, %v17629_v36, %v17619_v35 }
  0xe8   : > { %v17625_v39 = vunpack.i.h.bf16 %v17623_v37  ;;  %v17624_v40 = vunpack.i.l.bf16 %v17623_v37  ;;  %v17633_v41 = vpop.permute.xlu1 %17632  ;;  %v317_v37 = vld [vmem:[#allocation7 + $0x30] sm:$0xff] }
  0xe9   : > { %v17635_v44 = vunpack.i.h.bf16 %v17633_v41  ;;  %v17634_v45 = vunpack.i.l.bf16 %v17633_v41 }
  0xea   : > { %v372_v46 = vsel %vm367_vm1, %v17624_v40, %v17625_v39  ;;  %v371_v47 = vsel %vm367_vm1, %v17630_v38, %v17624_v40 }
  0xeb   : > { %v17638_v48 = vpop.permute.xlu0 %17637  ;;  %v16088_v49 = vpack.c.bf16 %v372_v46, %v369_v42  ;;  %v16090_v50 = vpack.c.bf16 %v371_v47, %v368_v43  ;;  %v375_v56 = vsel %vm367_vm1, %v17634_v45, %v17635_v44  ;;  %v318_v46 = vld [vmem:[#allocation7 + $0x38] sm:$0xff] }
  0xec   : > { %v17640_v51 = vunpack.i.h.bf16 %v17638_v48  ;;  %v17639_v52 = vunpack.i.l.bf16 %v17638_v48  ;;  %v17643_v53 = vpop.permute.xlu1 %17642 }
  0xed   : > { %v17645_v54 = vunpack.i.h.bf16 %v17643_v53  ;;  %v17644_v55 = vunpack.i.l.bf16 %v17643_v53  ;;  %16089 = vmatprep.subr.bf16.mxu0 %v16088_v49 }
  0xee   : > { %16091 = vmatpush1.bf16.msra.mxu0 %v16090_v50  ;;  %v378_v57 = vsel %vm367_vm1, %v17639_v52, %v17640_v51 }
  0xef   : > { %v17648_v58 = vpop.permute.xlu0 %17647  ;;  %v16092_v59 = vpack.c.bf16 %v378_v57, %v375_v56  ;;  %v374_v60 = vsel %vm367_vm1, %v17644_v55, %v17634_v45  ;;  %v377_v61 = vsel %vm367_vm1, %v17645_v54, %v17639_v52 }
  0xf0   : > { %v17650_v62 = vunpack.i.h.bf16 %v17648_v58  ;;  %v17649_v63 = vunpack.i.l.bf16 %v17648_v58  ;;  %v17653_v2 = vpop.permute.xlu1 %17652  ;;  %v16094_v3 = vpack.c.bf16 %v377_v61, %v374_v60 }
  0xf1   : > { %v17655_v4 = vunpack.i.h.bf16 %v17653_v2  ;;  %v17654_v7 = vunpack.i.l.bf16 %v17653_v2  ;;  %16093 = vmatprep.subr.bf16.mxu0 %v16092_v59 }
  0xf2   : > { %16095 = vmatpush1.bf16.msra.mxu0 %v16094_v3  ;;  %v370_v11 = vsel %vm367_vm1, %v17620_v34, %v17649_v63  ;;  %v373_v14 = vsel %vm367_vm1, %v17625_v39, %v17650_v62 }
  0xf3   : > { %v19874_v15 = vpop.permute.xlu0 %17657  ;;  %v16096_v16 = vpack.c.bf16 %v373_v14, %v370_v11  ;;  %v376_v17 = vsel %vm367_vm1, %v17635_v44, %v17654_v7  ;;  %v379_v22 = vsel %vm367_vm1, %v17640_v51, %v17655_v4 }
  0xf4   : > { %v17660_v23 = vunpack.i.h.bf16 %v19874_v15  ;;  %v17659_v26 = vunpack.i.l.bf16 %v19874_v15  ;;  %v19880_v27 = vpop.permute.xlu1 %17662  ;;  %v16100_v30 = vpack.c.bf16 %v379_v22, %v376_v17  ;;  %v20032_v15 = vld [vmem:[#allocation7 + $0x48] sm:$0xff] }
  0xf5   : > { %v17665_v28 = vunpack.i.h.bf16 %v19880_v27  ;;  %v17664_v29 = vunpack.i.l.bf16 %v19880_v27  ;;  %14440 = vmatmul.mubr.msk.f32.vlgmr.msra.gmra.mrb[0].mxu0 %vm392_vm0, %v315_v10  ;;  %16097 = vmatprep.subr.bf16.mxu0 %v16096_v16 }
  0xf6   : > { %16099 = vmatpush3.bf16.msra.mxu0 %v16096_v16  ;;  %475 = vmatprep.mubr.f32.mxu0 %v19521_v24  ;;  %v613_v32 = vsel %vm611_vm2, %v17659_v26, %v17660_v23 }
  0xf7   : > { %v17668_v33 = vpop.permute.xlu0 %17667  ;;  %16101 = vmatprep.subr.bf16.mxu0 %v16100_v30  ;;  %v616_v34 = vsel %vm611_vm2, %v17664_v29, %v17665_v28 }
  0xf8   : > { %v19892_v35 = vpop.permute.xlu1 %17672  ;;  %v16104_v36 = vpack.c.bf16 %v616_v34, %v613_v32  ;;  %v17670_v38 = vunpack.i.h.bf16 %v17668_v33  ;;  %v17669_v39 = vunpack.i.l.bf16 %v17668_v33 }
  0xf9   : > { %14441 = vmatmul.mubr.msk.f32.gmra.mrb[2].mxu0 %vm392_vm0, %v316_v31  ;;  %v17675_v41 = vunpack.i.h.bf16 %v19892_v35  ;;  %v17674_v42 = vunpack.i.l.bf16 %v19892_v35  ;;  %v20057_v35 = vld [vmem:[#allocation7 + $0x58] sm:$0xff] }
  0xfa   : > { %16103 = vmatpush3.bf16.msra.mxu0 %v16100_v30  ;;  %481 = vmatprep.mubr.f32.mxu0 %v19521_v24  ;;  %v612_v47 = vsel %vm611_vm2, %v17669_v39, %v17659_v26  ;;  %v615_v48 = vsel %vm611_vm2, %v17670_v38, %v17664_v29 }
  0xfb   : > { %v19896_v40 = vpop.permute.xlu0 %17677  ;;  %16105 = vmatprep.subr.bf16.mxu0 %v16104_v36  ;;  %v619_v53 = vsel %vm611_vm2, %v17674_v42, %v17675_v41  ;;  %v16106_v60 = vpack.c.bf16 %v615_v48, %v612_v47  ;;  %v19529_v48 = vmov 0  }
  0xfc   : > { %v17680_v43 = vunpack.i.h.bf16 %v19896_v40  ;;  %v17679_v44 = vunpack.i.l.bf16 %v19896_v40  ;;  %v17683_v45 = vpop.permute.xlu1 %17682  ;;  %17897 = vset.pattern.permute.xlu1 %v19529_v48  ;;  %17896 = vset.pattern.permute.xlu0 %v19529_v48 }
  0xfd   : > { %14442 = vmatmul.mubr.msk.f32.gmra.mrb[4].mxu0 %vm392_vm0, %v317_v37  ;;  %v17685_v55 = vunpack.i.h.bf16 %v17683_v45  ;;  %v17684_v56 = vunpack.i.l.bf16 %v17683_v45 }
  0xfe   : > { %487 = vmatprep.mubr.f32.mxu0 %v19521_v24  ;;  %v622_v54 = vsel %vm611_vm2, %v17679_v44, %v17680_v43 }
  0xff   : > { %v19906_v49 = vpop.permute.xlu0 %17687  ;;  %v16108_v61 = vpack.c.bf16 %v622_v54, %v619_v53  ;;  %v621_v7 = vsel %vm611_vm2, %v17685_v55, %v17679_v44  ;;  %v618_v11 = vsel %vm611_vm2, %v17684_v56, %v17674_v42  ;;  %v2537_v42 = vld [vmem:[%s22905_s3] sm:$0xff] }
 0x100   : > { %v17690_v50 = vunpack.i.h.bf16 %v19906_v49  ;;  %v17689_v51 = vunpack.i.l.bf16 %v19906_v49  ;;  %v19910_v52 = vpop.permute.xlu1 %17692  ;;  %v16110_v33 = vpack.c.bf16 %v621_v7, %v618_v11  ;;  %2543 = vperm.xlu0 %17896, %v2537_v42   ;;  %v19990_v7 = vld [vmem:[#allocation7 + $0x10] sm:$0xff] }
 0x101   : > { %v17695_v57 = vunpack.i.h.bf16 %v19910_v52  ;;  %v17694_v58 = vunpack.i.l.bf16 %v19910_v52  ;;  %14443 = vmatmul.mubr.msk.f32.gmra.mrb[6].mxu0 %vm392_vm0, %v318_v46 }
 0x102   : > { %15340 = vmatprep.mubr.msk.f32.mxu0 %vm392_vm0, %v315_v10  ;;  %v861_v3 = vsel %vm859_vm3, %v17689_v51, %v17690_v50 }
 0x103   : > { %v17698_v59 = vpop.permute.xlu0 %17697  ;;  %v864_v4 = vsel %vm859_vm3, %v17694_v58, %v17695_v57 }
 0x104   : > { %v17700_v62 = vunpack.i.h.bf16 %v17698_v59  ;;  %v17699_v63 = vunpack.i.l.bf16 %v17698_v59  ;;  %v19922_v2 = vpop.permute.xlu1 %17702  ;;  %v16120_v26 = vpack.c.bf16 %v864_v4, %v861_v3  ;;  %v19974_v59 = vld [vmem:[#allocation7 + $0x8] sm:$0xff] }
 0x105   : > { %v17705_v10 = vunpack.i.h.bf16 %v19922_v2  ;;  %v17704_v14 = vunpack.i.l.bf16 %v19922_v2  ;;  %15341 = vmatmul.mubr.msk.f32.vlgmr.msra.gmra.mrb[8].mxu0 %vm392_vm0, %v316_v31  ;;  %v20093_v2 = vld [vmem:[#allocation7 + $0x68] sm:$0xff] }
 0x106   : > { %16107 = vmatpush1.bf16.msra.mxu0 %v16106_v60  ;;  %15343 = vmatprep.mubr.msk.f32.mxu0 %vm392_vm0, %v317_v37  ;;  %v860_v16 = vsel %vm859_vm3, %v17699_v63, %v17689_v51  ;;  %v863_v17 = vsel %vm859_vm3, %v17700_v62, %v17694_v58  ;;  %v2538_v37 = vld [vmem:[%s22905_s3 + $0x8] sm:$0xff]  ;;  %v2539_v58 = vld [vmem:[%s22905_s3 + $0x10] sm:$0xff]  ;;  %v2540_v62 = vld [vmem:[%s22905_s3 + $0x18] sm:$0xff] }
 0x107   : > { %16109 = vmatprep.subr.bf16.mxu0 %v16108_v61  ;;  %v19938_v22 = vpop.permute.xlu0 %17707  ;;  %v867_v31 = vsel %vm859_vm3, %v17704_v14, %v17705_v10  ;;  %v16122_v38 = vpack.c.bf16 %v863_v17, %v860_v16  ;;  %2548 = vperm.xlu1 %17897, %v2538_v37  }
 0x108   : > { %v17710_v29 = vunpack.i.h.bf16 %v19938_v22  ;;  %v17709_v30 = vunpack.i.l.bf16 %v19938_v22  ;;  %v17713_v32 = vpop.permute.xlu1 %17712  ;;  %2558 = vperm.xlu0 %17896, %v2540_v62  }
 0x109   : > { %v17715_v34 = vunpack.i.h.bf16 %v17713_v32  ;;  %v17714_v36 = vunpack.i.l.bf16 %v17713_v32  ;;  %15344 = vmatmul.mubr.msk.f32.gmra.mrb[10].mxu0 %vm392_vm0, %v318_v46 }
 0x10a   : > { %16111 = vmatpush1.bf16.msra.mxu0 %v16110_v33  ;;  %712 = vmatprep.mubr.f32.mxu0 %v19521_v24  ;;  %v870_v39 = vsel %vm859_vm3, %v17709_v30, %v17710_v29 }
 0x10b   : > { %v869_v44 = vsel %vm859_vm3, %v17715_v34, %v17709_v30  ;;  %v866_v45 = vsel %vm859_vm3, %v17714_v36, %v17704_v14  ;;  %v19958_v46 = vpop.permute.xlu0 %17717  ;;  %16121 = vmatprep.subr.bf16.mxu0 %v16120_v26  ;;  %v16124_v47 = vpack.c.bf16 %v870_v39, %v867_v31  ;;  %2553 = vperm.xlu1 %17897, %v2539_v58   ;;  %v20001_v31 = vld [vmem:[#allocation7 + $0x18] sm:$0xff] }
 0x10c   : > { %v17720_v51 = vunpack.i.h.bf16 %v19958_v46  ;;  %v17719_v53 = vunpack.i.l.bf16 %v19958_v46  ;;  %v19963_v54 = vpop.permute.xlu1 %17722  ;;  %v16126_v60 = vpack.c.bf16 %v869_v44, %v866_v45 }
 0x10d   : > { %v17725_v55 = vunpack.i.h.bf16 %v19963_v54  ;;  %v17724_v56 = vunpack.i.l.bf16 %v19963_v54  ;;  %14448 = vmatmul.mubr.msk.f32.vlgmr.msra.gmra.mrb[0].mxu0 %vm392_vm0, %v19807_v25 }
 0x10e   : > { %16123 = vmatpush1.bf16.msra.mxu0 %v16122_v38  ;;  %718 = vmatprep.mubr.f32.mxu0 %v19521_v24  ;;  %v1121_v61 = vsel %vm1119_vm4, %v17719_v53, %v17720_v51 }
 0x10f   : > { %v17728_v25 = vpop.permute.xlu0 %17727  ;;  %16125 = vmatprep.subr.bf16.mxu0 %v16124_v47  ;;  %v1124_v63 = vsel %vm1119_vm4, %v17724_v56, %v17725_v55 }
 0x110   : > { %v19985_v3 = vpop.permute.xlu1 %17732  ;;  %v16136_v4 = vpack.c.bf16 %v1124_v63, %v1121_v61  ;;  %v17730_v11 = vunpack.i.h.bf16 %v17728_v25  ;;  %v17729_v14 = vunpack.i.l.bf16 %v17728_v25 }
 0x111   : > { %14449 = vmatmul.mubr.msk.f32.gmra.mrb[2].mxu0 %vm392_vm0, %v19974_v59  ;;  %v17735_v17 = vunpack.i.h.bf16 %v19985_v3  ;;  %v17734_v26 = vunpack.i.l.bf16 %v19985_v3 }
 0x112   : > { %724 = vmatprep.mubr.f32.mxu0 %v19521_v24  ;;  %16127 = vmatpush1.bf16.msra.mxu0 %v16126_v60  ;;  %v1120_v34 = vsel %vm1119_vm4, %v17729_v14, %v17719_v53  ;;  %v1123_v36 = vsel %vm1119_vm4, %v17730_v11, %v17724_v56  ;;  %v20022_v60 = vld [vmem:[#allocation7 + $0x40] sm:$0xff] }
 0x113   : > { %v19992_v16 = vpop.permute.xlu0 %17737  ;;  %16137 = vmatprep.subr.bf16.mxu0 %v16136_v4  ;;  %v1127_v47 = vsel %vm1119_vm4, %v17734_v26, %v17735_v17  ;;  %v16138_v61 = vpack.c.bf16 %v1123_v36, %v1120_v34 }
 0x114   : > { %v17740_v30 = vunpack.i.h.bf16 %v19992_v16  ;;  %v17739_v32 = vunpack.i.l.bf16 %v19992_v16  ;;  %v17743_v33 = vpop.permute.xlu1 %17742 }
 0x115   : > { %14450 = vmatmul.mubr.msk.f32.gmra.mrb[4].mxu0 %vm392_vm0, %v19990_v7  ;;  %v17745_v37 = vunpack.i.h.bf16 %v17743_v33  ;;  %v17744_v38 = vunpack.i.l.bf16 %v17743_v33 }
 0x116   : > { %730 = vmatprep.mubr.f32.mxu0 %v19521_v24  ;;  %v1130_v58 = vsel %vm1119_vm4, %v17739_v32, %v17740_v30 }
 0x117   : > { %v17748_v39 = vpop.permute.xlu0 %17747  ;;  %v1129_v62 = vsel %vm1119_vm4, %v17745_v37, %v17739_v32  ;;  %v1126_v25 = vsel %vm1119_vm4, %v17744_v38, %v17734_v26  ;;  %v16140_v11 = vpack.c.bf16 %v1130_v58, %v1127_v47  ;;  %v20048_v37 = vld [vmem:[#allocation7 + $0x50] sm:$0xff] }
 0x118   : > { %v17750_v42 = vunpack.i.h.bf16 %v17748_v39  ;;  %v17749_v44 = vunpack.i.l.bf16 %v17748_v39  ;;  %v20005_v45 = vpop.permute.xlu1 %17752 }
 0x119   : > { %14451 = vmatmul.mubr.msk.f32.gmra.mrb[6].mxu0 %vm392_vm0, %v20001_v31  ;;  %v17755_v47 = vunpack.i.h.bf16 %v20005_v45 }
 0x11a   : > { %960 = vmatprep.mubr.f32.mxu0 %v19521_v24  ;;  %v614_v53 = vsel %vm611_vm2, %v17660_v23, %v17749_v44  ;;  %v617_v56 = vsel %vm611_vm2, %v17665_v28, %v17750_v42  ;;  %v16142_v23 = vpack.c.bf16 %v1129_v62, %v1126_v25  ;;  %v16152_v28 = vpack.c.bf16 %v19748_v6, %v19738_v1 }
 0x11b   : > { %v20026_v63 = vpop.permute.xlu0 %17757  ;;  %v16112_v4 = vpack.c.bf16 %v617_v56, %v614_v53  ;;  %v20071_v56 = vld [vmem:[#allocation7 + $0x60] sm:$0xff] }
 0x11c   : > { %v20028_v14 = vpop.permute.xlu1 %17762  ;;  %v17760_v52 = vunpack.i.h.bf16 %v20026_v63 }
 0x11d   : > { %16113 = vmatprep.subr.bf16.mxu1 %v16112_v4  ;;  %14456 = vmatmul.mubr.msk.f32.vlgmr.msra.gmra.mrb[0].mxu0 %vm392_vm0, %v20022_v60 }
 0x11e   : > { %16115 = vmatpush3.bf16.msra.mxu1 %v16112_v4  ;;  %16139 = vmatpush1.bf16.msra.mxu0 %v16138_v61  ;;  %v17754_v61 = vunpack.i.l.bf16 %v20005_v45 }
 0x11f   : > { %v17768_v27 = vpop.permute.xlu0 %17767  ;;  %966 = vmatprep.mubr.f32.mxu0 %v19521_v24  ;;  %16141 = vmatprep.subr.bf16.mxu0 %v16140_v11 }
 0x120   : > { %v17770_v26 = vunpack.i.h.bf16 %v17768_v27  ;;  %v17769_v32 = vunpack.i.l.bf16 %v17768_v27  ;;  %v20037_v33 = vpop.permute.xlu1 %17772 }
 0x121   : > { %14457 = vmatmul.mubr.msk.f32.gmra.mrb[2].mxu0 %vm392_vm0, %v20032_v15 }
 0x122   : > { %972 = vmatprep.mubr.f32.mxu0 %v19521_v24  ;;  %v620_v34 = vsel %vm611_vm2, %v17675_v41, %v17769_v32  ;;  %v623_v36 = vsel %vm611_vm2, %v17680_v43, %v17770_v26  ;;  %16143 = vmatpush1.bf16.msra.mxu0 %v16142_v23  ;;  %v17775_v26 = vunpack.i.h.bf16 %v20037_v33  ;;  %v17774_v32 = vunpack.i.l.bf16 %v20037_v33 }
 0x123   : > { %v20050_v1 = vpop.permute.xlu0 %17777  ;;  %v16116_v6 = vpack.c.bf16 %v623_v36, %v620_v34  ;;  %16153 = vmatprep.subr.bf16.mxu0 %v16152_v28 }
 0x124   : > { %v20052_v38 = vpop.permute.xlu1 %17782  ;;  %v17780_v34 = vunpack.i.h.bf16 %v20050_v1  ;;  %v17779_v36 = vunpack.i.l.bf16 %v20050_v1 }
 0x125   : > { %16117 = vmatprep.subr.bf16.mxu1 %v16116_v6  ;;  %14458 = vmatmul.mubr.msk.f32.gmra.mrb[4].mxu0 %vm392_vm0, %v20048_v37  ;;  %v17784_v16 = vunpack.i.l.bf16 %v20052_v38 }
 0x126   : > { %16119 = vmatpush3.bf16.msra.mxu1 %v16116_v6  ;;  %978 = vmatprep.mubr.f32.mxu0 %v19521_v24 }
 0x127   : > { %v17788_v40 = vpop.permute.xlu0 %17787 }
 0x128   : > { %v17790_v41 = vunpack.i.h.bf16 %v17788_v40  ;;  %v17789_v43 = vunpack.i.l.bf16 %v17788_v40  ;;  %v17793_v39 = vpop.permute.xlu1 %17792 }
 0x129   : > { %v17795_v42 = vunpack.i.h.bf16 %v17793_v39  ;;  %v17794_v44 = vunpack.i.l.bf16 %v17793_v39  ;;  %14459 = vmatmul.mubr.msk.f32.gmra.mrb[6].mxu0 %vm392_vm0, %v20057_v35  ;;  %15355 = vmatmul.mubr.msk.f32.vlgmr.msra.gmra.mrb[0].mxu1 %vm392_vm0, %v19974_v59  ;;  %v16154_v59 = vpack.c.bf16 %v19745_v5, %v19735_v0  ;;  %v16156_v5 = vpack.c.bf16 %v19766_v13, %v19754_v9 }
 0x12a   : > { %1220 = vmatprep.mubr.f32.mxu0 %v19521_v24  ;;  %v862_v58 = vsel %vm859_vm3, %v17690_v50, %v17789_v43  ;;  %v865_v53 = vsel %vm859_vm3, %v17695_v57, %v17790_v41  ;;  %15357 = vmatprep.mubr.msk.f32.mxu1 %vm392_vm0, %v19990_v7  ;;  %v17759_v57 = vunpack.i.l.bf16 %v20026_v63  ;;  %v16158_v9 = vpack.c.bf16 %v19763_v12, %v19751_v8 }
 0x12b   : > { %v17798_v62 = vpop.permute.xlu0 %17797  ;;  %v16128_v25 = vpack.c.bf16 %v865_v53, %v862_v58  ;;  %v868_v49 = vsel %vm859_vm3, %v17705_v10, %v17794_v44  ;;  %v871_v50 = vsel %vm859_vm3, %v17710_v29, %v17795_v42  ;;  %v1576_v13 = vsel %vm1574_vm5, %v17754_v61, %v17755_v47 }
 0x12c   : > { %v17800_v7 = vunpack.i.h.bf16 %v17798_v62  ;;  %v17799_v4 = vunpack.i.l.bf16 %v17798_v62  ;;  %v20086_v11 = vpop.permute.xlu1 %17802  ;;  %v16132_v0 = vpack.c.bf16 %v871_v50, %v868_v49  ;;  %v1578_v46 = vsel %vm1574_vm5, %v17759_v57, %v17760_v52  ;;  %v1344_v49 = vld [vmem:[#allocation7 + $0x88] sm:$0xff] }
 0x12d   : > { %16129 = vmatprep.subr.bf16.mxu1 %v16128_v25  ;;  %14464 = vmatmul.mubr.msk.f32.vlgmr.msra.gmra.mrb[0].mxu0 %vm392_vm0, %v20071_v56  ;;  %v16168_v12 = vpack.c.bf16 %v1578_v46, %v1576_v13  ;;  %v1582_v42 = vsel %vm1574_vm5, %v17779_v36, %v17780_v34  ;;  %v17804_v44 = vunpack.i.l.bf16 %v20086_v11  ;;  %v1579_v62 = vsel %vm1574_vm5, %v17784_v16, %v17774_v32 }
 0x12e   : > { %16131 = vmatpush3.bf16.msra.mxu1 %v16128_v25  ;;  %1226 = vmatprep.mubr.f32.mxu0 %v19521_v24  ;;  %v1122_v10 = vsel %vm1119_vm4, %v17720_v51, %v17799_v4  ;;  %v1125_v22 = vsel %vm1119_vm4, %v17725_v55, %v17800_v7  ;;  %v1085_v55 = vld [vmem:[#allocation7 + $0x70] sm:$0xff]  ;;  %v16176_v4 = vpack.c.bf16 %v17760_v52, %v17755_v47  ;;  %v1346_v52 = vld [vmem:[#allocation7 + $0x98] sm:$0xff] }
 0x12f   : > { %v20101_v29 = vpop.permute.xlu0 %17807  ;;  %16133 = vmatprep.subr.bf16.mxu1 %v16132_v0  ;;  %15358 = vmatmul.mubr.msk.f32.gmra.mrb[2].mxu1 %vm392_vm0, %v20001_v31  ;;  %v16144_v54 = vpack.c.bf16 %v1125_v22, %v1122_v10  ;;  %v17765_v31 = vunpack.i.h.bf16 %v20028_v14  ;;  %v16180_v47 = vpack.c.bf16 %v17780_v34, %v17775_v26 }
 0x130   : > { %16155 = vmatpush1.bf16.msra.mxu0 %v16154_v59  ;;  %15368 = vmatprep.mubr.msk.f32.mxu1 %vm392_vm0, %v20022_v60  ;;  %v20115_v51 = vpop.permute.xlu1 %17812  ;;  %v17764_v60 = vunpack.i.l.bf16 %v20028_v14  ;;  %v1086_v14 = vld [vmem:[#allocation7 + $0x78] sm:$0xff]  ;;  %v16164_v59 = vpack.c.bf16 %v19784_v21, %v19781_v20 }
 0x131   : > { %14465 = vmatmul.mubr.msk.f32.gmra.mrb[2].mxu0 %vm392_vm0, %v20093_v2  ;;  %16157 = vmatprep.subr.bf16.mxu0 %v16156_v5  ;;  %v1577_v43 = vsel %vm1574_vm5, %v17765_v31, %v17759_v57  ;;  %v17814_v10 = vunpack.i.l.bf16 %v20115_v51 }
 0x132   : > { %16135 = vmatpush3.bf16.msra.mxu1 %v16132_v0  ;;  %1232 = vmatprep.mubr.f32.mxu0 %v19521_v24  ;;  %v1575_v39 = vsel %vm1574_vm5, %v17764_v60, %v17754_v61 }
 0x133   : > { %v17818_v8 = vpop.permute.xlu0 %17817  ;;  %16145 = vmatprep.subr.bf16.mxu1 %v16144_v54  ;;  %v16170_v53 = vpack.c.bf16 %v1577_v43, %v1575_v39  ;;  %v1823_v33 = vsel %vm22939_vm6, %v17814_v10, %v17804_v44 }
 0x134   : > { %v17820_v23 = vunpack.i.h.bf16 %v17818_v8  ;;  %v17819_v27 = vunpack.i.l.bf16 %v17818_v8  ;;  %16159 = vmatpush1.bf16.msra.mxu0 %v16158_v9  ;;  %v20122_v28 = vpop.permute.xlu1 %17822  ;;  %v1546_v9 = vld [vmem:[#allocation7 + $0xa0] sm:$0xff] }
 0x135   : > { %15369 = vmatmul.mubr.msk.f32.vlgmr.msra.gmra.mrb[0].mxu1 %vm392_vm0, %v20032_v15  ;;  %14466 = vmatmul.mubr.msk.f32.gmra.mrb[4].mxu0 %vm392_vm0, %v1085_v55  ;;  %v17824_v63 = vunpack.i.l.bf16 %v20122_v28 }
 0x136   : > { %16147 = vmatpush3.bf16.msra.mxu1 %v16144_v54  ;;  %15371 = vmatprep.mubr.msk.f32.mxu1 %vm392_vm0, %v20048_v37  ;;  %v1128_v6 = vsel %vm1119_vm4, %v17735_v17, %v17819_v27  ;;  %v1131_v40 = vsel %vm1119_vm4, %v17740_v30, %v17820_v23  ;;  %v16160_v37 = vpack.c.bf16 %v19778_v19, %v19775_v18  ;;  %v17785_v17 = vunpack.i.h.bf16 %v20052_v38  ;;  %v1547_v23 = vld [vmem:[#allocation7 + $0xa8] sm:$0xff] }
 0x137   : > { %1238 = vmatprep.mubr.f32.mxu0 %v19521_v24  ;;  %v16148_v41 = vpack.c.bf16 %v1131_v40, %v1128_v6  ;;  %16169 = vmatprep.subr.bf16.mxu0 %v16168_v12  ;;  %v20140_v15 = vpop.permute.xlu0 %17827  ;;  %v1580_v30 = vsel %vm1574_vm5, %v17774_v32, %v17775_v26  ;;  %v17810_v18 = vunpack.i.h.bf16 %v20101_v29  ;;  %v17809_v19 = vunpack.i.l.bf16 %v20101_v29 }
 0x138   : > { %v20146_v3 = vpop.permute.xlu1 %17832  ;;  %v17805_v38 = vunpack.i.h.bf16 %v20086_v11  ;;  %v1581_v61 = vsel %vm1574_vm5, %v17785_v17, %v17779_v36  ;;  %v16172_v25 = vpack.c.bf16 %v1582_v42, %v1580_v30  ;;  %v1345_v11 = vld [vmem:[#allocation7 + $0x90] sm:$0xff]  ;;  %v17829_v45 = vunpack.i.l.bf16 %v20140_v15  ;;  %v1794_v17 = vld [vmem:[#allocation7 + $0xc0] sm:$0xff] }
 0x139   : > { %15372 = vmatmul.mubr.msk.f32.gmra.mrb[2].mxu1 %vm392_vm0, %v20057_v35  ;;  %14467 = vmatmul.mubr.msk.f32.gmra.mrb[6].mxu0 %vm392_vm0, %v1086_v14  ;;  %v1343_v35 = vld [vmem:[#allocation7 + $0x80] sm:$0xff]  ;;  %v1826_v57 = vsel %vm22939_vm6, %v17809_v19, %v17810_v18  ;;  %v16174_v21 = vpack.c.bf16 %v1581_v61, %v1579_v62  ;;  %v17830_v22 = vunpack.i.h.bf16 %v20140_v15  ;;  %v17825_v29 = vunpack.i.h.bf16 %v20122_v28  ;;  %v1548_v36 = vld [vmem:[#allocation7 + $0xb0] sm:$0xff]  ;;  %v1549_v15 = vld [vmem:[#allocation7 + $0xb8] sm:$0xff] }
 0x13a   : > { %16149 = vmatprep.subr.bf16.mxu1 %v16148_v41  ;;  %15382 = vmatprep.mubr.msk.f32.mxu1 %vm392_vm0, %v20071_v56  ;;  %v1824_v50 = vsel %vm22939_vm6, %v17804_v44, %v17805_v38  ;;  %v16192_v13 = vpack.c.bf16 %v17810_v18, %v17805_v38  ;;  %v17835_v1 = vunpack.i.h.bf16 %v20146_v3  ;;  %v1795_v38 = vld [vmem:[#allocation7 + $0xc8] sm:$0xff] }
 0x13b   : > { %16151 = vmatpush3.bf16.msra.mxu1 %v16148_v41  ;;  %1423 = vmatprep.mubr.f32.mxu0 %v19521_v24  ;;  %v20166_v58 = vpop.permute.xlu0 %17837  ;;  %v16184_v7 = vpack.c.bf16 %v1826_v57, %v1824_v50  ;;  %v1828_v31 = vsel %vm22939_vm6, %v17824_v63, %v17825_v29  ;;  %v1830_v60 = vsel %vm22939_vm6, %v17829_v45, %v17830_v22  ;;  %v20233_v41 = vld [vmem:[#allocation2] sm:$0xff]  ;;  %v20266_v50 = vld [vmem:[#allocation7 + $0xd8] sm:$0xff] }
 0x13c   : > { %16161 = vmatprep.subr.bf16.mxu1 %v16160_v37  ;;  %v20173_v56 = vpop.permute.xlu1 %17842  ;;  %v17839_v8 = vunpack.i.l.bf16 %v20166_v58  ;;  %v17840_v27 = vunpack.i.h.bf16 %v20166_v58  ;;  %v16196_v32 = vpack.c.bf16 %v17830_v22, %v17825_v29  ;;  %v1829_v34 = vsel %vm22939_vm6, %v17835_v1, %v17829_v45  ;;  %v20251_v58 = vld [vmem:[#allocation7 + $0xd0] sm:$0xff]  ;;  %v2290_v1 = vld [vmem:[#allocation7 + $0x100] sm:$0xff] }
 0x13d   : > { %14472 = vmatmul.mubr.msk.f32.vlgmr.msra.gmra.mrb[0].mxu0 %vm392_vm0, %v1343_v35  ;;  %v17844_v12 = vunpack.i.l.bf16 %v20173_v56  ;;  %v17845_v28 = vunpack.i.h.bf16 %v20173_v56  ;;  %v2044_v29 = vld [vmem:[#allocation7 + $0xf0] sm:$0xff] }
 0x13e   : > { %15383 = vmatmul.mubr.msk.f32.vlgmr.msra.gmra.mrb[0].mxu1 %vm392_vm0, %v20093_v2  ;;  %16171 = vmatpush1.bf16.msra.mxu0 %v16170_v53  ;;  %v17815_v2 = vunpack.i.h.bf16 %v20115_v51  ;;  %v17834_v51 = vunpack.i.l.bf16 %v20146_v3  ;;  %v2072_v6 = vsel %vm22937_vm7, %v17839_v8, %v17840_v27 }
 0x13f   : > { %16163 = vmatpush3.bf16.msra.mxu1 %v16160_v37  ;;  %15385 = vmatprep.mubr.msk.f32.mxu1 %vm392_vm0, %v1085_v55  ;;  %v20180_v20 = vpop.permute.xlu0 %17847  ;;  %v2074_v40 = vsel %vm22937_vm7, %v17844_v12, %v17845_v28  ;;  %v16208_v16 = vpack.c.bf16 %v17845_v28, %v17840_v27 }
 0x140   : > { %1429 = vmatprep.mubr.f32.mxu0 %v19521_v24  ;;  %16165 = vmatprep.subr.bf16.mxu1 %v16164_v59  ;;  %v20192_v5 = vpop.permute.xlu1 %17852  ;;  %v1825_v46 = vsel %vm22939_vm6, %v17815_v2, %v17809_v19  ;;  %v16200_v42 = vpack.c.bf16 %v2074_v40, %v2072_v6  ;;  %v17850_v18 = vunpack.i.h.bf16 %v20180_v20  ;;  %v17849_v19 = vunpack.i.l.bf16 %v20180_v20 }
 0x141   : > { %14473 = vmatmul.mubr.msk.f32.gmra.mrb[2].mxu0 %vm392_vm0, %v1344_v49  ;;  %16173 = vmatprep.subr.bf16.mxu0 %v16172_v25  ;;  %v16186_v26 = vpack.c.bf16 %v1825_v46, %v1823_v33  ;;  %v17855_v3 = vunpack.i.h.bf16 %v20192_v5  ;;  %v2045_v33 = vld [vmem:[#allocation7 + $0xf8] sm:$0xff] }
 0x142   : > { %15386 = vmatmul.mubr.msk.f32.gmra.mrb[2].mxu1 %vm392_vm0, %v1086_v14  ;;  %16175 = vmatpush1.bf16.msra.mxu0 %v16174_v21  ;;  %v16188_v14 = vpack.c.bf16 %v1830_v60, %v1828_v31  ;;  %v2071_v62 = vsel %vm22937_vm7, %v17849_v19, %v17839_v8  ;;  %v2073_v25 = vsel %vm22937_vm7, %v17850_v18, %v17844_v12  ;;  %v20270_v21 = vld [vmem:[#allocation7 + $0xe0] sm:$0xff]  ;;  %v2291_v12 = vld [vmem:[#allocation7 + $0x108] sm:$0xff] }
 0x143   : > { %16167 = vmatpush3.bf16.msra.mxu1 %v16164_v59  ;;  %1435 = vmatprep.mubr.f32.mxu0 %v19521_v24  ;;  %v20190_v0 = vpop.permute.xlu0 %17857 }
 0x144   : > { %16177 = vmatprep.subr.bf16.mxu1 %v16176_v4  ;;  %15396 = vmatprep.mubr.msk.f32.mxu1 %vm392_vm0, %v1343_v35  ;;  %v20216_v55 = vpop.permute.xlu1 %17862  ;;  %v17860_v37 = vunpack.i.h.bf16 %v20190_v0  ;;  %v17859_v56 = vunpack.i.l.bf16 %v20190_v0  ;;  %v16202_v0 = vpack.c.bf16 %v2073_v25, %v2071_v62  ;;  %v20342_v25 = vstv %s2573_s30 }
 0x145   : > { %14474 = vmatmul.mubr.msk.f32.gmra.mrb[4].mxu0 %vm392_vm0, %v1345_v11  ;;  %16185 = vmatprep.subr.bf16.mxu0 %v16184_v7 }
 0x146   : > { %15397 = vmatmul.mubr.msk.f32.vlgmr.msra.gmra.mrb[0].mxu1 %vm392_vm0, %v1344_v49  ;;  %1441 = vmatprep.mubr.f32.mxu0 %v19521_v24  ;;  %v16212_v53 = vpack.c.bf16 %v17860_v37, %v17855_v3  ;;  %v17854_v49 = vunpack.i.l.bf16 %v20192_v5  ;;  %v2078_v45 = vsel %vm22937_vm7, %v17859_v56, %v17860_v37 }
 0x147   : > { %16179 = vmatpush3.bf16.msra.mxu1 %v16176_v4  ;;  %15399 = vmatprep.mubr.msk.f32.mxu1 %vm392_vm0, %v1345_v11  ;;  %v20214_v54 = vpop.permute.xlu0 %17867  ;;  %v17865_v4 = vunpack.i.h.bf16 %v20216_v55  ;;  %v17864_v11 = vunpack.i.l.bf16 %v20216_v55 }
 0x148   : > { %16181 = vmatprep.subr.bf16.mxu1 %v16180_v47  ;;  %v20238_v39 = vpop.permute.xlu1 %17872  ;;  %v17870_v44 = vunpack.i.h.bf16 %v20214_v54  ;;  %v17869_v5 = vunpack.i.l.bf16 %v20214_v54  ;;  %v2076_v10 = vsel %vm22937_vm7, %v17854_v49, %v17855_v3 }
 0x149   : > { %14475 = vmatmul.mubr.msk.f32.gmra.mrb[6].mxu0 %vm392_vm0, %v1346_v52  ;;  %v17875_v35 = vunpack.i.h.bf16 %v20238_v39  ;;  %v17874_v2 = vunpack.i.l.bf16 %v20238_v39  ;;  %v2075_v22 = vsel %vm22937_vm7, %v17864_v11, %v17854_v49 }
 0x14a   : > { %15400 = vmatmul.mubr.msk.f32.gmra.mrb[2].mxu1 %vm392_vm0, %v1346_v52  ;;  %1671 = vmatprep.mubr.f32.mxu0 %v19521_v24  ;;  %v1827_v24 = vsel %vm22939_vm6, %v17834_v51, %v17824_v63  ;;  %v2043_v63 = vld [vmem:[#allocation7 + $0xe8] sm:$0xff]  ;;  %v2077_v52 = vsel %vm22937_vm7, %v17865_v4, %v17859_v56 }
 0x14b   : > { %16183 = vmatpush3.bf16.msra.mxu1 %v16180_v47  ;;  %15410 = vmatprep.mubr.msk.f32.mxu1 %vm392_vm0, %v1546_v9  ;;  %v20236_v43 = vpop.permute.xlu0 %17877  ;;  %v16190_v30 = vpack.c.bf16 %v1829_v34, %v1827_v24  ;;  %v16224_v7 = vpack.c.bf16 %v17875_v35, %v17870_v44  ;;  %v2322_v46 = vsel %vm22936_vm8, %v17874_v2, %v17875_v35 }
 0x14c   : > { %16193 = vmatprep.subr.bf16.mxu1 %v16192_v13  ;;  %v20256_v61 = vpop.permute.xlu1 %17882  ;;  %v16206_v51 = vpack.c.bf16 %v2077_v52, %v2075_v22  ;;  %v17880_v55 = vunpack.i.h.bf16 %v20236_v43  ;;  %v17879_v8 = vunpack.i.l.bf16 %v20236_v43 }
 0x14d   : > { %14480 = vmatmul.mubr.msk.f32.vlgmr.msra.gmra.mrb[0].mxu0 %vm392_vm0, %v1546_v9  ;;  %v17885_v20 = vunpack.i.h.bf16 %v20256_v61  ;;  %v16204_v9 = vpack.c.bf16 %v2078_v45, %v2076_v10  ;;  %v17884_v60 = vunpack.i.l.bf16 %v20256_v61 }
 0x14e   : > { %15411 = vmatmul.mubr.msk.f32.vlgmr.msra.gmra.mrb[0].mxu1 %vm392_vm0, %v1547_v23  ;;  %16187 = vmatpush1.bf16.msra.mxu0 %v16186_v26  ;;  %v2319_v28 = vsel %vm22936_vm8, %v17879_v8, %v17869_v5  ;;  %v2321_v26 = vsel %vm22936_vm8, %v17880_v55, %v17874_v2 }
 0x14f   : > { %16195 = vmatpush3.bf16.msra.mxu1 %v16192_v13  ;;  %1677 = vmatprep.mubr.f32.mxu0 %v20233_v41  ;;  %v20254_v59 = vpop.permute.xlu0 %17887  ;;  %v2320_v13 = vsel %vm22936_vm8, %v17869_v5, %v17870_v44  ;;  %v16218_v6 = vpack.c.bf16 %v2321_v26, %v2319_v28 }
 0x150   : > { %15413 = vmatprep.mubr.msk.f32.mxu1 %vm392_vm0, %v1548_v36  ;;  %16197 = vmatprep.subr.bf16.mxu1 %v16196_v32  ;;  %v17890_v57 = vunpack.i.h.bf16 %v20254_v59  ;;  %v16216_v54 = vpack.c.bf16 %v2322_v46, %v2320_v13  ;;  %v17889_v31 = vunpack.i.l.bf16 %v20254_v59  ;;  %v17893_v27 = vpop.permute.xlu1 %17892 }
 0x151   : > { %14481 = vmatmul.mubr.msk.f32.gmra.mrb[2].mxu0 %vm392_vm0, %v1547_v23  ;;  %16189 = vmatprep.subr.bf16.mxu0 %v16188_v14  ;;  %v2292_v23 = vld [vmem:[#allocation7 + $0x110] sm:$0xff]  ;;  %v17895_v34 = vunpack.i.h.bf16 %v17893_v27  ;;  %v17894_v24 = vunpack.i.l.bf16 %v17893_v27 }
 0x152   : > { %15414 = vmatmul.mubr.msk.f32.gmra.mrb[2].mxu1 %vm392_vm0, %v1549_v15  ;;  %1683 = vmatprep.mubr.f32.mxu0 %v20233_v41  ;;  %v16228_v47 = vpack.c.bf16 %v17890_v57, %v17885_v20  ;;  %v2326_v14 = vsel %vm22936_vm8, %v17889_v31, %v17890_v57 }
 0x153   : > { %16199 = vmatpush3.bf16.msra.mxu1 %v16196_v32  ;;  %15424 = vmatprep.mubr.msk.f32.mxu1 %vm392_vm0, %v1794_v17  ;;  %v2293_v32 = vld [vmem:[#allocation7 + $0x118] sm:$0xff]  ;;  %v2325_v40 = vsel %vm22936_vm8, %v17895_v34, %v17889_v31 }
 0x154   : > { %16209 = vmatprep.subr.bf16.mxu1 %v16208_v16  ;;  %16191 = vmatpush1.bf16.msra.mxu0 %v16190_v30  ;;  %v2613_v30 = vlaneseq }
 0x155   : > { %14482 = vmatmul.mubr.msk.f32.gmra.mrb[4].mxu0 %vm392_vm0, %v1548_v36  ;;  %16201 = vmatprep.subr.bf16.mxu0 %v16200_v42  ;;  %v2324_v36 = vsel %vm22936_vm8, %v17884_v60, %v17885_v20  ;;  %v293_v42 = vld [vmem:[%s22902_s0] sm:$0x7] }
 0x156   : > { %15425 = vmatmul.mubr.msk.f32.vlgmr.msra.gmra.mrb[0].mxu1 %vm392_vm0, %v1795_v38  ;;  %1689 = vmatprep.mubr.f32.mxu0 %v20233_v41  ;;  %v16220_v43 = vpack.c.bf16 %v2326_v14, %v2324_v36  ;;  %v2614_v18 = vshrl.u32 %v2613_v30, 7  ;;  %vm2611_vm10 = vcmp.gt.f32.partialorder %v293_v42, 0.5 }
 0x157   : > { %16211 = vmatpush3.bf16.msra.mxu1 %v16208_v16  ;;  %15427 = vmatprep.mubr.msk.f32.mxu1 %vm392_vm0, %v20251_v58 }
 0x158   : > { %16213 = vmatprep.subr.bf16.mxu1 %v16212_v53  ;;  %v2623_v19 = vsub.s32 2, %v2614_v18  ;;  %v2619_v46 = vsub.s32 1, %v2614_v18 }
 0x159   : > { %14483 = vmatmul.mubr.msk.f32.gmra.mrb[6].mxu0 %vm392_vm0, %v1549_v15  ;;  %v2323_v15 = vsel %vm22936_vm8, %v17894_v24, %v17884_v60 }
 0x15a   : > { %15428 = vmatmul.mubr.msk.f32.gmra.mrb[2].mxu1 %vm392_vm0, %v20266_v50  ;;  %1919 = vmatprep.mubr.f32.mxu0 %v20233_v41  ;;  %v16222_v39 = vpack.c.bf16 %v2325_v40, %v2323_v15 }
 0x15b   : > { %16215 = vmatpush3.bf16.msra.mxu1 %v16212_v53  ;;  %15438 = vmatprep.mubr.msk.f32.mxu1 %vm392_vm0, %v20270_v21 }
 0x15c   : > { %16225 = vmatprep.subr.bf16.mxu1 %v16224_v7 }
 0x15d   : > { %14488 = vmatmul.mubr.msk.f32.vlgmr.msra.gmra.mrb[0].mxu0 %vm392_vm0, %v1794_v17 }
 0x15e   : > { %15439 = vmatmul.mubr.msk.f32.vlgmr.msra.gmra.mrb[0].mxu1 %vm392_vm0, %v2043_v63  ;;  %16203 = vmatpush1.bf16.msra.mxu0 %v16202_v0 }
 0x15f   : > { %16227 = vmatpush3.bf16.msra.mxu1 %v16224_v7  ;;  %1925 = vmatprep.mubr.f32.mxu0 %v20233_v41 }
 0x160   : > { %15441 = vmatprep.mubr.msk.f32.mxu1 %vm392_vm0, %v2044_v29  ;;  %16229 = vmatprep.subr.bf16.mxu1 %v16228_v47 }
 0x161   : > { %14489 = vmatmul.mubr.msk.f32.gmra.mrb[2].mxu0 %vm392_vm0, %v1795_v38  ;;  %16205 = vmatprep.subr.bf16.mxu0 %v16204_v9  ;;  %v2612_v38 = vsel %vm2611_vm10, 1, %v19529_v48 }
 0x162   : > { %15442 = vmatmul.mubr.msk.f32.gmra.mrb[2].mxu1 %vm392_vm0, %v2045_v33  ;;  %1931 = vmatprep.mubr.f32.mxu0 %v20233_v41  ;;  %v20340_v53 = vrot.slane %v2612_v38, %v2623_v19 }
 0x163   : > { %16231 = vmatpush3.bf16.msra.mxu1 %v16228_v47  ;;  %15452 = vmatprep.mubr.msk.f32.mxu1 %vm392_vm0, %v2290_v1 }
 0x164   : > { %16207 = vmatpush1.bf16.msra.mxu0 %v16206_v51  ;;  %22953 = vst [vmem:[#allocation15_spill] sm:$0xff] %v20340_v53  ;;  %vm2627_vm11 = vcmp.eq.s32.totalorder %v20340_v53, 1 }
 0x165   : > { %14490 = vmatmul.mubr.msk.f32.gmra.mrb[4].mxu0 %vm392_vm0, %v20251_v58  ;;  %16217 = vmatprep.subr.bf16.mxu0 %v16216_v54 }
 0x166   : > { %15453 = vmatmul.mubr.msk.f32.vlgmr.msra.gmra.mrb[0].mxu1 %vm392_vm0, %v2291_v12  ;;  %1937 = vmatprep.mubr.f32.mxu0 %v20233_v41 }
 0x167   : > { %15455 = vmatprep.mubr.msk.f32.mxu1 %vm392_vm0, %v2292_v23 }
 0x169   : > { %14491 = vmatmul.mubr.msk.f32.gmra.mrb[6].mxu0 %vm392_vm0, %v20266_v50 }
 0x16a   : > { %15456 = vmatmul.mubr.msk.f32.gmra.mrb[2].mxu1 %vm392_vm0, %v2293_v32  ;;  %2167 = vmatprep.mubr.f32.mxu0 %v20233_v41 }
 0x16d   : > { %14496 = vmatmul.mubr.msk.f32.vlgmr.msra.gmra.mrb[0].mxu0 %vm392_vm0, %v20270_v21 }
 0x16e   : > { %16219 = vmatpush1.bf16.msra.mxu0 %v16218_v6  ;;  %2173 = vmatprep.mubr.f32.mxu0 %v20233_v41 }
 0x16f   : > { %16221 = vmatprep.subr.bf16.mxu0 %v16220_v43 }
 0x171   : > { %14497 = vmatmul.mubr.msk.f32.gmra.mrb[2].mxu0 %vm392_vm0, %v2043_v63 }
 0x172   : > { %2179 = vmatprep.mubr.f32.mxu0 %v20233_v41  ;;  %16223 = vmatpush1.bf16.msra.mxu0 %v16222_v39 }
 0x175   : > { %14498 = vmatmul.mubr.msk.f32.gmra.mrb[4].mxu0 %vm392_vm0, %v2044_v29 }
 0x176   : > { %2185 = vmatprep.mubr.f32.mxu0 %v20233_v41 }
 0x179   : > { %14499 = vmatmul.mubr.msk.f32.gmra.mrb[6].mxu0 %vm392_vm0, %v2045_v33  ;;  %v2615_v33 = vsub.s32 0, %v2614_v18 }
 0x17a   : > { %2415 = vmatprep.mubr.f32.mxu0 %v20233_v41 }
 0x17b   : > { %v20366_v8 = vrot.slane %v2612_v38, %v2615_v33 }
 0x17d   : > { %14504 = vmatmul.mubr.msk.f32.vlgmr.msra.gmra.mrb[0].mxu0 %vm392_vm0, %v2290_v1  ;;  %v20364_v1 = vrot.slane %v2612_v38, %v2619_v46 }
 0x17e   : > { %2421 = vmatprep.mubr.f32.mxu0 %v20233_v41 }
 0x17f   : > { %v2544_v44 = vpop.permute.xlu0 %2543  ;;  %22954 = vst [vmem:[#allocation16_spill] sm:$0xff] %v20364_v1  ;;  %vm22938_vm10 = vcmp.eq.s32.totalorder %v20364_v1, 1 }
 0x181   : > { %14505 = vmatmul.mubr.msk.f32.gmra.mrb[2].mxu0 %vm392_vm0, %v2291_v12 }
 0x182   : > { %2427 = vmatprep.mubr.f32.mxu0 %v20233_v41 }
 0x185   : > { %14506 = vmatmul.mubr.msk.f32.gmra.mrb[4].mxu0 %vm392_vm0, %v2292_v23 }
 0x186   : > { %2433 = vmatprep.mubr.f32.mxu0 %v20233_v41  ;;  %v2549_v35 = vpop.permute.xlu1 %2548 }
 0x187   : > { %v20344_v57 = vpop.permute.xlu0 %2558 }
 0x189   : > { %14507 = vmatmul.mubr.msk.f32.gmra.mrb[6].mxu0 %vm392_vm0, %v2293_v32 }
 0x18a   : > { %2826 = vmatprep.mubr.f32.mxu0 %v20233_v41  ;;  %v2554_v7 = vpop.permute.xlu1 %2553 }
 0x1d8   : > { %v15342_v37 = vpop.f32.mrb[8].mxu0 }
 0x1d9   : > { %v560_v3 = vpop.f32.mrb[9].mxu0 }
 0x1dc   : > { %v15345_v17 = vpop.f32.mrb[10].mxu0 }
 0x1dd   : > { %v570_v16 = vpop.f32.mrb[11].mxu0 }
 0x239   : > { %v15454_v58 = vpop.f32.mrb[0].mxu1 }
 0x23a   : > { %v16952_v59 = vadd.f32 %v15454_v58, %v15342_v37  ;;  %v2506_v61 = vpop.f32.mrb[1].mxu1 }
 0x23b   : > { %v16953_v62 = vadd.f32 %v2506_v61, %v560_v3 }
 0x23c   : > { %v2566_v56 = vadd.f32 %v16952_v59, %v2549_v35 }
 0x23d   : > { %v2563_v49 = vadd.f32 %v16953_v62, %v2544_v44  ;;  %v15457_v50 = vpop.f32.mrb[2].mxu1 }
 0x23e   : > { %vm2579_vm12 = vcmp.ge.f32.partialorder %v2566_v56, 0.0  ;;  %v2592_v48 = vmul.f32 %v20342_v25, %v2566_v56  ;;  %v16954_v20 = vadd.f32 %v15457_v50, %v15345_v17  ;;  %v2516_v21 = vpop.f32.mrb[3].mxu1 }
 0x23f   : > { %vm2576_vm13 = vcmp.ge.f32.partialorder %v2563_v49, 0.0  ;;  %v2589_v4 = vmul.f32 %v20342_v25, %v2563_v49  ;;  %v16955_v11 = vadd.f32 %v2516_v21, %v570_v16 }
 0x240   : > { %v2604_v0 = vsel %vm2579_vm12, %v2566_v56, %v2592_v48  ;;  %v2572_v5 = vadd.f32 %v16954_v20, %v20344_v57 }
 0x241   : > { %v2601_v2 = vsel %vm2576_vm13, %v2563_v49, %v2589_v4  ;;  %v2633_v10 = vsel %vm2627_vm11, %v2604_v0, 0.0  ;;  %v2569_v45 = vadd.f32 %v16955_v11, %v2554_v7 }
 0x242   : > { %v2630_v63 = vsel %vm2627_vm11, %v2601_v2, 0.0  ;;  %2645 = vst.msk [vmem:[#allocation2 + $0x40] sm:$0xff] %vm22911_vm9, %v2633_v10  ;;  %vm2585_vm14 = vcmp.ge.f32.partialorder %v2572_v5, 0.0  ;;  %v2598_v47 = vmul.f32 %v20342_v25, %v2572_v5 }
 0x243   : > { %2642 = vst.msk [vmem:[#allocation2 + $0x18] sm:$0xff] %vm22911_vm9, %v2630_v63  ;;  %vm2582_vm15 = vcmp.ge.f32.partialorder %v2569_v45, 0.0  ;;  %v2595_v52 = vmul.f32 %v20342_v25, %v2569_v45  ;;  %v18023_v63 = vpack.i.bf16 %v20233_v41, %v20233_v41 }
 0x244   : > { %v2610_v22 = vsel %vm2585_vm14, %v2572_v5, %v2598_v47  ;;  %vm2625_vm14 = vcmp.eq.s32.totalorder %v20366_v8, 1  ;;  %v14584_v47 = vld [vmem:[%s22905_s3 + $0x20] sm:$0xff] }
 0x245   : > { %v2639_v29 = vsel %vm2627_vm11, %v2610_v22, 0.0  ;;  %v2607_v9 = vsel %vm2582_vm15, %v2569_v45, %v2595_v52 }
 0x246   : > { %2651 = vst.msk [vmem:[#allocation2 + $0x90] sm:$0xff] %vm22911_vm9, %v2639_v29  ;;  %v2636_v13 = vsel %vm2627_vm11, %v2607_v9, 0.0  ;;  %v14586_v9 = vld [vmem:[%s22905_s3 + $0x30] sm:$0xff] }
 0x247   : > { %2648 = vst.msk [vmem:[#allocation2 + $0x68] sm:$0xff] %vm22911_vm9, %v2636_v13  ;;  %v14585_v13 = vld [vmem:[%s22905_s3 + $0x28] sm:$0xff] }
 0x249   : > { %v20402_v19 = vld [vmem:[#allocation2 + $0x40] sm:$0xff] }
 0x24a   : > { %v20380_v14 = vld [vmem:[#allocation2 + $0x18] sm:$0xff] }
 0x24d   : > { %v20444_v2 = vld [vmem:[#allocation2 + $0x90] sm:$0xff] }
 0x24e   : > { %v20422_v20 = vld [vmem:[#allocation2 + $0x68] sm:$0xff] }
 0x250   : > { %v2417_v51 = vpop.f32.mrb[0].mxu0 }
 0x251   : > { %v2561_v54 = vadd.f32 %v2544_v44, %v2417_v51  ;;  %v2419_v55 = vpop.f32.mrb[1].mxu0 }
 0x252   : > { %v2562_v12 = vadd.f32 %v2544_v44, %v2419_v55 }
 0x253   : > { %v2587_v31 = vmul.f32 %v20342_v25, %v2561_v54  ;;  %vm2574_vm12 = vcmp.ge.f32.partialorder %v2561_v54, 0.0 }
 0x254   : > { %vm2575_vm13 = vcmp.ge.f32.partialorder %v2562_v12, 0.0  ;;  %v2588_v60 = vmul.f32 %v20342_v25, %v2562_v12  ;;  %v2423_v23 = vpop.f32.mrb[2].mxu0 }
 0x255   : > { %v2564_v27 = vadd.f32 %v2549_v35, %v2423_v23  ;;  %v2425_v28 = vpop.f32.mrb[3].mxu0  ;;  %v20374_v34 = vsel %vm2574_vm12, %v2561_v54, %v2587_v31 }
 0x256   : > { %v20372_v26 = vsel %vm2575_vm13, %v2562_v12, %v2588_v60  ;;  %v2565_v32 = vadd.f32 %v2549_v35, %v2425_v28  ;;  %v2628_v3 = vsel %vm2625_vm14, %v20374_v34, 0.0  ;;  %v14587_v12 = vld [vmem:[%s22905_s3 + $0x38] sm:$0xff] }
 0x257   : > { %v2629_v24 = vsel %vm22938_vm10, %v20372_v26, 0.0  ;;  %vm2577_vm15 = vcmp.ge.f32.partialorder %v2564_v27, 0.0  ;;  %v2590_v36 = vmul.f32 %v20342_v25, %v2564_v27 }
 0x258   : > { %vm2578_vm9 = vcmp.ge.f32.partialorder %v2565_v32, 0.0  ;;  %v2591_v6 = vmul.f32 %v20342_v25, %v2565_v32  ;;  %v2429_v40 = vpop.f32.mrb[4].mxu0  ;;  %v20384_v15 = vpack.i.bf16 %v20380_v14, %v2629_v24 }
 0x259   : > { %v20386_v43 = vsel %vm2577_vm15, %v2564_v27, %v2590_v36  ;;  %v2567_v39 = vadd.f32 %v2554_v7, %v2429_v40  ;;  %v2431_v37 = vpop.f32.mrb[5].mxu0 }
 0x25a   : > { %v2631_v17 = vsel %vm2625_vm14, %v20386_v43, 0.0  ;;  %v20394_v16 = vsel %vm2578_vm9, %v2565_v32, %v2591_v6  ;;  %v2568_v30 = vadd.f32 %v2554_v7, %v2431_v37  ;;  %17899 = vrot.lane.b32.xlu1 %v20384_v15, %s19520_s24 }
 0x25b   : > { %v2632_v42 = vsel %vm22938_vm10, %v20394_v16, 0.0  ;;  %vm2580_vm12 = vcmp.ge.f32.partialorder %v2567_v39, 0.0  ;;  %v2593_v18 = vmul.f32 %v20342_v25, %v2567_v39  ;;  %v20404_v38 = vpack.i.bf16 %v2631_v17, %v2628_v3 }
 0x25c   : > { %vm2581_vm13 = vcmp.ge.f32.partialorder %v2568_v30, 0.0  ;;  %v2594_v44 = vmul.f32 %v20342_v25, %v2568_v30  ;;  %v2435_v35 = vpop.f32.mrb[6].mxu0  ;;  %v20408_v58 = vpack.i.bf16 %v20402_v19, %v2632_v42 }
 0x25d   : > { %v20410_v59 = vsel %vm2580_vm12, %v2567_v39, %v2593_v18  ;;  %v2570_v61 = vadd.f32 %v20344_v57, %v2435_v35  ;;  %v2437_v62 = vpop.f32.mrb[7].mxu0  ;;  %vm20709_vm12 = vmpackc.low %vm22938_vm10, %vm22938_vm10 }
 0x25e   : > { %v20413_v56 = vsel %vm2581_vm13, %v2568_v30, %v2594_v44  ;;  %v2571_v49 = vadd.f32 %v20344_v57, %v2437_v62  ;;  %17904 = vrot.lane.b32.xlu0 %v20408_v58, %s19520_s24  ;;  %v20428_v57 = vld [vmem:[#allocation7 + $0x140] sm:$0xff]  ;;  %v2634_v11 = vsel %vm2625_vm14, %v20410_v59, 0.0  ;;  %v20576_v44 = vld [vmem:[#allocation7 + $0x148] sm:$0xff]  ;;  %vm20726_vm13 = vmpackc.low %vm2625_vm14, %vm2625_vm14 }
 0x25f   : > { %v2635_v50 = vsel %vm22938_vm10, %v20413_v56, 0.0  ;;  %vm2583_vm9 = vcmp.ge.f32.partialorder %v2570_v61, 0.0  ;;  %v2596_v48 = vmul.f32 %v20342_v25, %v2570_v61  ;;  %15466 = vmatprep.mubr.msk.f32.mxu1 %vm392_vm0, %v20428_v57 }
 0x260   : > { %vm2584_vm15 = vcmp.ge.f32.partialorder %v2571_v49, 0.0  ;;  %v2597_v21 = vmul.f32 %v20342_v25, %v2571_v49  ;;  %v17908_v7 = vpack.i.bf16 %v20422_v20, %v2635_v50  ;;  %v20588_v50 = vld [vmem:[#allocation7 + $0x150] sm:$0xff] }
 0x261   : > { %v20426_v4 = vsel %vm2583_vm9, %v2570_v61, %v2596_v48 }
 0x262   : > { %v2637_v0 = vsel %vm2625_vm14, %v20426_v4, 0.0  ;;  %v20436_v5 = vsel %vm2584_vm15, %v2571_v49, %v2597_v21  ;;  %17909 = vrot.lane.b32.xlu1 %v17908_v7, %s19520_s24 }
 0x263   : > { %v2638_v25 = vsel %vm22938_vm10, %v20436_v5, 0.0  ;;  %v18003_v10 = vpack.i.bf16 %v2637_v0, %v2634_v11  ;;  %v20598_v0 = vld [vmem:[#allocation7 + $0x158] sm:$0xff] }
 0x264   : > { %v17918_v45 = vpack.i.bf16 %v20444_v2, %v2638_v25 }
 0x266   : > { %17919 = vrot.lane.b32.xlu0 %v17918_v45, %s19520_s24  ;;  %17914 = vrot.lane.b32.xlu1 %v20384_v15, %s19522_s26 }
 0x26a   : > { %17924 = vrot.lane.b32.xlu0 %v20408_v58, %s19522_s26  ;;  %17929 = vrot.lane.b32.xlu1 %v17908_v7, %s19522_s26 }
 0x26e   : > { %17939 = vrot.lane.b32.xlu0 %v17918_v45, %s19522_s26  ;;  %17934 = vrot.lane.b32.xlu1 %v20384_v15, %s19523_s13 }
 0x272   : > { %17944 = vrot.lane.b32.xlu0 %v20408_v58, %s19523_s13  ;;  %17949 = vrot.lane.b32.xlu1 %v17908_v7, %s19523_s13 }
 0x276   : > { %17959 = vrot.lane.b32.xlu0 %v17918_v45, %s19523_s13  ;;  %17954 = vrot.lane.b32.xlu1 %v20384_v15, %s19524_s16 }
 0x27a   : > { %17964 = vrot.lane.b32.xlu0 %v20408_v58, %s19524_s16  ;;  %17969 = vrot.lane.b32.xlu1 %v17908_v7, %s19524_s16 }
 0x27e   : > { %17974 = vrot.lane.b32.xlu0 %v17918_v45, %s19524_s16  ;;  %17979 = vrot.lane.b32.xlu1 %v20384_v15, %s19525_s23 }
 0x282   : > { %17984 = vrot.lane.b32.xlu0 %v20408_v58, %s19525_s23  ;;  %17989 = vrot.lane.b32.xlu1 %v20404_v38, %s19525_s23 }
 0x286   : > { %17994 = vrot.lane.b32.xlu0 %v17908_v7, %s19525_s23  ;;  %17999 = vrot.lane.b32.xlu1 %v17918_v45, %s19525_s23 }
 0x28a   : > { %18004 = vrot.lane.b32.xlu0 %v18003_v10, %s19525_s23  ;;  %18009 = vrot.lane.b32.xlu1 %v20404_v38, %s19520_s24 }
 0x28e   : > { %18014 = vrot.lane.b32.xlu0 %v20384_v15, %s19526_s27  ;;  %18019 = vrot.lane.b32.xlu1 %v20408_v58, %s19526_s27 }
 0x292   : > { %18029 = vrot.lane.b32.xlu1 %v20404_v38, %s19526_s27  ;;  %18024 = vrot.lane.b32.xlu0 %v18023_v63, %s19520_s24 }
 0x296   : > { %18039 = vrot.lane.b32.xlu1 %v17908_v7, %s19526_s27  ;;  %18034 = vrot.lane.b32.xlu0 %v18003_v10, %s19520_s24 }
 0x29a   : > { %18044 = vrot.lane.b32.xlu1 %v18023_v63, %s19520_s24  ;;  %18049 = vrot.lane.b32.xlu0 %v17918_v45, %s19526_s27 }
 0x29e   : > { %18059 = vrot.lane.b32.xlu1 %v20404_v38, %s19522_s26  ;;  %18054 = vrot.lane.b32.xlu0 %v18003_v10, %s19526_s27 }
 0x2a2   : > { %18069 = vrot.lane.b32.xlu1 %v18003_v10, %s19522_s26  ;;  %18064 = vrot.lane.b32.xlu0 %v18023_v63, %s19522_s26 }
 0x2a6   : > { %18079 = vrot.lane.b32.xlu1 %v20384_v15, %s19527_s11  ;;  %18074 = vrot.lane.b32.xlu0 %v18023_v63, %s19522_s26 }
 0x2aa   : > { %18089 = vrot.lane.b32.xlu1 %v20404_v38, %s19527_s11  ;;  %18084 = vrot.lane.b32.xlu0 %v20408_v58, %s19527_s11 }
 0x2ae   : > { %18104 = vrot.lane.b32.xlu1 %v17918_v45, %s19527_s11  ;;  %18094 = vrot.lane.b32.xlu0 %v17908_v7, %s19527_s11 }
 0x2b2   : > { %18109 = vrot.lane.b32.xlu1 %v20404_v38, %s19523_s13  ;;  %18099 = vrot.lane.b32.xlu0 %v18003_v10, %s19527_s11 }
 0x2b6   : > { %18119 = vrot.lane.b32.xlu1 %v18003_v10, %s19523_s13  ;;  %18114 = vrot.lane.b32.xlu0 %v18023_v63, %s19523_s13 }
 0x2ba   : > { %18129 = vrot.lane.b32.xlu1 %v20404_v38, %s19524_s16  ;;  %18124 = vrot.lane.b32.xlu0 %v18023_v63, %s19523_s13 }
 0x2be   : > { %18139 = vrot.lane.b32.xlu1 %v20408_v58, %s19528_s12  ;;  %18134 = vrot.lane.b32.xlu0 %v20384_v15, %s19528_s12 }
 0x2c2   : > { %18149 = vrot.lane.b32.xlu1 %v20404_v38, %s19528_s12  ;;  %18144 = vrot.lane.b32.xlu0 %v18023_v63, %s19524_s16 }
 0x2c6   : > { %18159 = vrot.lane.b32.xlu1 %v17908_v7, %s19528_s12  ;;  %18154 = vrot.lane.b32.xlu0 %v18003_v10, %s19524_s16 }
 0x2ca   : > { %18164 = vrot.lane.b32.xlu1 %v18023_v63, %s19524_s16  ;;  %18169 = vrot.lane.b32.xlu0 %v17918_v45, %s19528_s12 }
 0x2cc   : > { %v20526_v52 = vpop.permute.xlu1 %17899 }
 0x2cd   : > { %v17902_v22 = vunpack.i.h.bf16 %v20526_v52  ;;  %v17901_v29 = vunpack.i.l.bf16 %v20526_v52  ;;  %v16308_v52 = vpack.c.bf16 %v20444_v2, %v20422_v20 }
 0x2ce   : > { %4894 = vperm.xlu1 %17897, %v14584_v47   ;;  %18174 = vrot.lane.b32.xlu0 %v18003_v10, %s19528_s12 }
 0x2cf   : > { %v2728_v54 = vsel %vm367_vm1, %v17901_v29, %v17902_v22  ;;  %v20610_v22 = vld [vmem:[#allocation7 + $0x120] sm:$0xff] }
 0x2d0   : > { %v20537_v46 = vpop.permute.xlu0 %17904 }
 0x2d1   : > { %v17907_v33 = vunpack.i.h.bf16 %v20537_v46  ;;  %v17906_v51 = vunpack.i.l.bf16 %v20537_v46 }
 0x2d2   : > { %4904 = vperm.xlu1 %17897, %v14586_v9   ;;  %4899 = vperm.xlu0 %17896, %v14585_v13  }
 0x2d3   : > { %v2731_v55 = vsel %vm367_vm1, %v17906_v51, %v17907_v33 }
 0x2d4   : > { %v20550_v31 = vpop.permute.xlu1 %17909  ;;  %v16240_v60 = vpack.c.bf16 %v2731_v55, %v2728_v54  ;;  %v20620_v55 = vld [vmem:[#allocation7 + $0x128] sm:$0xff] }
 0x2d5   : > { %v17912_v23 = vunpack.i.h.bf16 %v20550_v31  ;;  %v22926_v27 = vunpack.i.l.bf16 %v20550_v31 }
 0x2d6   : > { %16241 = vmatprep.subr.bf16.mxu1 %v16240_v60  ;;  %4909 = vperm.xlu0 %17896, %v14587_v12  }
 0x2d7   : > { %16243 = vmatpush3.bf16.msra.mxu1 %v16240_v60  ;;  %v2734_v15 = vsel %vm367_vm1, %v22926_v27, %v17912_v23 }
 0x2d8   : > { %v20554_v28 = vpop.permute.xlu0 %17919  ;;  %v20556_v32 = vpop.permute.xlu1 %17914 }
 0x2d9   : > { %v17922_v24 = vunpack.i.h.bf16 %v20554_v28  ;;  %v22924_v36 = vunpack.i.l.bf16 %v20554_v28  ;;  %v17917_v6 = vunpack.i.h.bf16 %v20556_v32  ;;  %v22923_v40 = vunpack.i.l.bf16 %v20556_v32 }
 0x2db   : > { %v2737_v39 = vsel %vm367_vm1, %v22924_v36, %v17922_v24  ;;  %v2970_v35 = vsel %vm611_vm2, %v22923_v40, %v17917_v6  ;;  %v19314_v40 = vpack.c.bf16 %v20426_v4, %v20410_v59 }
 0x2dc   : > { %v20568_v37 = vpop.permute.xlu0 %17924  ;;  %v20570_v3 = vpop.permute.xlu1 %17929  ;;  %v16244_v17 = vpack.c.bf16 %v2737_v39, %v2734_v15  ;;  %v20632_v15 = vld [vmem:[#allocation7 + $0x130] sm:$0xff] }
 0x2dd   : > { %v17927_v30 = vunpack.i.h.bf16 %v20568_v37  ;;  %v22922_v42 = vunpack.i.l.bf16 %v20568_v37  ;;  %v17932_v18 = vunpack.i.h.bf16 %v20570_v3  ;;  %v22921_v38 = vunpack.i.l.bf16 %v20570_v3 }
 0x2de   : > { %16245 = vmatprep.subr.bf16.mxu1 %v16244_v17 }
 0x2df   : > { %16247 = vmatpush3.bf16.msra.mxu1 %v16244_v17  ;;  %v2973_v58 = vsel %vm611_vm2, %v22922_v42, %v17927_v30  ;;  %v2976_v25 = vsel %vm611_vm2, %v22921_v38, %v17932_v18 }
 0x2e0   : > { %v20584_v61 = vpop.permute.xlu0 %17939  ;;  %v20586_v62 = vpop.permute.xlu1 %17934  ;;  %v16256_v49 = vpack.c.bf16 %v2973_v58, %v2970_v35  ;;  %v20642_v35 = vld [vmem:[#allocation7 + $0x138] sm:$0xff] }
 0x2e1   : > { %v17942_v48 = vunpack.i.h.bf16 %v20584_v61  ;;  %v22920_v21 = vunpack.i.l.bf16 %v20584_v61  ;;  %v17937_v7 = vunpack.i.h.bf16 %v20586_v62  ;;  %v22917_v11 = vunpack.i.l.bf16 %v20586_v62 }
 0x2e2   : > { %15467 = vmatmul.mubr.msk.f32.vlgmr.msra.gmra.mrb[4].mxu1 %vm392_vm0, %v20576_v44  ;;  %16257 = vmatprep.subr.bf16.mxu1 %v16256_v49 }
 0x2e3   : > { %16259 = vmatpush3.bf16.msra.mxu1 %v16256_v49  ;;  %15469 = vmatprep.mubr.msk.f32.mxu1 %vm392_vm0, %v20588_v50  ;;  %v2979_v10 = vsel %vm611_vm2, %v22920_v21, %v17942_v48  ;;  %v3217_v12 = vsel %vm859_vm3, %v22917_v11, %v17937_v7  ;;  %v20696_v11 = vld [vmem:[#allocation7 + $0x180] sm:$0xff]  ;;  %v19311_v21 = vpack.c.bf16 %v20436_v5, %v20413_v56 }
 0x2e4   : > { %v20606_v45 = vpop.permute.xlu0 %17944  ;;  %v20608_v63 = vpop.permute.xlu1 %17949  ;;  %v16260_v47 = vpack.c.bf16 %v2979_v10, %v2976_v25  ;;  %v20654_v10 = vld [vmem:[#allocation7 + $0x160] sm:$0xff] }
 0x2e5   : > { %v17947_v9 = vunpack.i.h.bf16 %v20606_v45  ;;  %v22914_v13 = vunpack.i.l.bf16 %v20606_v45  ;;  %v17952_v33 = vunpack.i.h.bf16 %v20608_v63  ;;  %v22913_v54 = vunpack.i.l.bf16 %v20608_v63  ;;  %v3697_v5 = vld [vmem:[#allocation7 + $0x1a0] sm:$0xff] }
 0x2e6   : > { %15470 = vmatmul.mubr.msk.f32.gmra.mrb[6].mxu1 %vm392_vm0, %v20598_v0  ;;  %16261 = vmatprep.subr.bf16.mxu1 %v16260_v47 }
 0x2e7   : > { %16263 = vmatpush3.bf16.msra.mxu1 %v16260_v47  ;;  %15480 = vmatprep.mubr.msk.f32.mxu1 %vm392_vm0, %v20610_v22  ;;  %v3220_v60 = vsel %vm859_vm3, %v22914_v13, %v17947_v9  ;;  %v3223_v58 = vsel %vm859_vm3, %v22913_v54, %v17952_v33  ;;  %v20676_v54 = vld [vmem:[#allocation7 + $0x170] sm:$0xff] }
 0x2e8   : > { %v20628_v23 = vpop.permute.xlu0 %17959  ;;  %v20630_v24 = vpop.permute.xlu1 %17954  ;;  %v16272_v6 = vpack.c.bf16 %v3220_v60, %v3217_v12  ;;  %v20664_v60 = vld [vmem:[#allocation7 + $0x168] sm:$0xff] }
 0x2e9   : > { %v17962_v39 = vunpack.i.h.bf16 %v20628_v23  ;;  %v22912_v17 = vunpack.i.l.bf16 %v20628_v23  ;;  %v17957_v30 = vunpack.i.h.bf16 %v20630_v24  ;;  %v22916_v18 = vunpack.i.l.bf16 %v20630_v24 }
 0x2ea   : > { %15481 = vmatmul.mubr.msk.f32.vlgmr.msra.gmra.mrb[4].mxu1 %vm392_vm0, %v20620_v55  ;;  %16273 = vmatprep.subr.bf16.mxu1 %v16272_v6 }
 0x2eb   : > { %16275 = vmatpush3.bf16.msra.mxu1 %v16272_v6  ;;  %15483 = vmatprep.mubr.msk.f32.mxu1 %vm392_vm0, %v20632_v15  ;;  %v3226_v49 = vsel %vm859_vm3, %v22912_v17, %v17962_v39  ;;  %v3476_v6 = vsel %vm1119_vm4, %v22916_v18, %v17957_v30  ;;  %v20684_v30 = vld [vmem:[#allocation7 + $0x178] sm:$0xff] }
 0x2ec   : > { %v20650_v48 = vpop.permute.xlu0 %17964  ;;  %v20652_v7 = vpop.permute.xlu1 %17969  ;;  %v16276_v25 = vpack.c.bf16 %v3226_v49, %v3223_v58 }
 0x2ed   : > { %v17967_v47 = vunpack.i.h.bf16 %v20650_v48  ;;  %v22915_v9 = vunpack.i.l.bf16 %v20650_v48  ;;  %v17972_v33 = vunpack.i.h.bf16 %v20652_v7  ;;  %v22919_v12 = vunpack.i.l.bf16 %v20652_v7 }
 0x2ee   : > { %15484 = vmatmul.mubr.msk.f32.gmra.mrb[6].mxu1 %vm392_vm0, %v20642_v35  ;;  %16277 = vmatprep.subr.bf16.mxu1 %v16276_v25 }
 0x2ef   : > { %16279 = vmatpush3.bf16.msra.mxu1 %v16276_v25  ;;  %15494 = vmatprep.mubr.msk.f32.mxu1 %vm392_vm0, %v20654_v10  ;;  %v3479_v39 = vsel %vm1119_vm4, %v22915_v9, %v17967_v47  ;;  %v3482_v47 = vsel %vm1119_vm4, %v22919_v12, %v17972_v33 }
 0x2f0   : > { %v20672_v58 = vpop.permute.xlu0 %17974  ;;  %v20674_v49 = vpop.permute.xlu1 %17979  ;;  %v16288_v17 = vpack.c.bf16 %v3479_v39, %v3476_v6 }
 0x2f1   : > { %v17977_v25 = vunpack.i.h.bf16 %v20672_v58  ;;  %v22918_v13 = vunpack.i.l.bf16 %v20672_v58  ;;  %v22929_v59 = vunpack.i.h.bf16 %v20674_v49  ;;  %v17981_v4 = vunpack.i.l.bf16 %v20674_v49 }
 0x2f2   : > { %15495 = vmatmul.mubr.msk.f32.vlgmr.msra.gmra.mrb[4].mxu1 %vm392_vm0, %v20664_v60  ;;  %16289 = vmatprep.subr.bf16.mxu1 %v16288_v17 }
 0x2f3   : > { %16291 = vmatpush3.bf16.msra.mxu1 %v16288_v17  ;;  %15497 = vmatprep.mubr.msk.f32.mxu1 %vm392_vm0, %v20676_v54  ;;  %v3485_v6 = vsel %vm1119_vm4, %v22918_v13, %v17977_v25  ;;  %v20702_v17 = vld [vmem:[#allocation7 + $0x188] sm:$0xff]  ;;  %v22955_v25 = vmov 0  ;;  %v22958_v13 = vmov 0 }
 0x2f4   : > { %v20692_v39 = vpop.permute.xlu0 %17984  ;;  %v20694_v9 = vpop.permute.xlu1 %17989  ;;  %v16292_v18 = vpack.c.bf16 %v3485_v6, %v3482_v47  ;;  %v22956_v25 = vsel %vm20709_vm12, 4294967295, %v22955_v25  ;;  %v19305_v47 = vpack.c.bf16 %v20394_v16, %v20372_v26  ;;  %v20719_v6 = vld [vmem:[#allocation7 + $0x190] sm:$0xff]  ;;  %v22959_v13 = vsel %vm20726_vm13, 4294967295, %v22958_v13  ;;  %v20736_v16 = vld [vmem:[#allocation7 + $0x198] sm:$0xff] }
 0x2f5   : > { %22957 = vst [vmem:[#allocation17_spill] sm:$0xff] %v22956_v25  ;;  %22960 = vst [vmem:[#allocation18_spill] sm:$0xff] %v22959_v13  ;;  %v19308_v26 = vpack.c.bf16 %v20386_v43, %v20374_v34  ;;  %v16304_v34 = vpack.c.bf16 %v20402_v19, %v20380_v14  ;;  %v22925_v43 = vunpack.i.h.bf16 %v20692_v39  ;;  %v17991_v27 = vunpack.i.l.bf16 %v20694_v9 }
 0x2f6   : > { %15498 = vmatmul.mubr.msk.f32.gmra.mrb[6].mxu1 %vm392_vm0, %v20684_v30  ;;  %16293 = vmatprep.subr.bf16.mxu1 %v16292_v18 }
 0x2f7   : > { %16295 = vmatpush3.bf16.msra.mxu1 %v16292_v18  ;;  %15508 = vmatprep.mubr.msk.f32.mxu1 %vm392_vm0, %v20696_v11 }
 0x2f8   : > { %v20704_v33 = vpop.permute.xlu0 %17994  ;;  %19306 = vmatprep.subr.msk.bf16.mxu1 %vm20709_vm12, %v19305_v47  ;;  %v20717_v18 = vpop.permute.xlu1 %17999 }
 0x2fa   : > { %15509 = vmatmul.mubr.msk.f32.vlgmr.msra.gmra.mrb[4].mxu1 %vm392_vm0, %v20702_v17 }
 0x2fb   : > { %19309 = vmatpush1.bf16.msk.msra.mxu1 %vm20726_vm13, %v19308_v26  ;;  %15511 = vmatprep.mubr.msk.f32.mxu1 %vm392_vm0, %v20719_v6  ;;  %v17986_v26 = vunpack.i.l.bf16 %v20692_v39 }
 0x2fc   : > { %v20738_v47 = vpop.permute.xlu0 %18004  ;;  %v18010_v12 = vpop.permute.xlu1 %18009  ;;  %19312 = vmatprep.subr.msk.bf16.mxu1 %vm20709_vm12, %v19311_v21 }
 0x2fd   : > { %v18012_v38 = vunpack.i.h.bf16 %v18010_v12  ;;  %v18011_v42 = vunpack.i.l.bf16 %v18010_v12  ;;  %v3931_v46 = vsel %vm1574_vm5, %v17986_v26, %v22925_v43  ;;  %v3699_v43 = vld [vmem:[#allocation7 + $0x1b0] sm:$0xff] }
 0x2fe   : > { %15512 = vmatmul.mubr.msk.f32.gmra.mrb[6].mxu1 %vm392_vm0, %v20736_v16 }
 0x2ff   : > { %19315 = vmatpush1.bf16.msk.msra.mxu1 %vm20726_vm13, %v19314_v40  ;;  %3777 = vmatprep.mubr.f32.mxu1 %v20233_v41  ;;  %v2727_v56 = vsel %vm367_vm1, %v18011_v42, %v17901_v29  ;;  %v2730_v19 = vsel %vm367_vm1, %v18012_v38, %v17906_v51  ;;  %v3698_v29 = vld [vmem:[#allocation7 + $0x1a8] sm:$0xff] }
 0x300   : > { %v20758_v21 = vpop.permute.xlu0 %18014  ;;  %v20760_v14 = vpop.permute.xlu1 %18019  ;;  %16305 = vmatprep.subr.bf16.mxu1 %v16304_v34  ;;  %v16232_v40 = vpack.c.bf16 %v2730_v19, %v2727_v56  ;;  %v3929_v19 = vsel %vm1574_vm5, %v17981_v4, %v22929_v59 }
 0x301   : > { %v16312_v20 = vpack.c.bf16 %v3931_v46, %v3929_v19  ;;  %v18007_v46 = vunpack.i.h.bf16 %v20738_v47 }
 0x302   : > { %14544 = vmatmul.mubr.msk.f32.vlgmr.msra.gmra.mrb[8].mxu1 %vm392_vm0, %v3697_v5  ;;  %16233 = vmatprep.subr.bf16.mxu0 %v16232_v40  ;;  %v17992_v40 = vunpack.i.h.bf16 %v20694_v9  ;;  %v22961_v9 = vunpack.i.l.bf16 %v20550_v31 }
 0x303   : > { %16307 = vmatpush3.bf16.msra.mxu1 %v16304_v34  ;;  %3783 = vmatprep.mubr.f32.mxu1 %v20233_v41 }
 0x304   : > { %v20774_v51 = vpop.permute.xlu1 %18029  ;;  %16309 = vmatprep.subr.bf16.mxu1 %v16308_v52  ;;  %v18025_v12 = vpop.permute.xlu0 %18024 }
 0x305   : > { %v18027_v36 = vunpack.i.h.bf16 %v18025_v12  ;;  %v18026_v56 = vunpack.i.l.bf16 %v18025_v12 }
 0x306   : > { %14545 = vmatmul.mubr.msk.f32.gmra.mrb[10].mxu1 %vm392_vm0, %v3698_v29 }
 0x307   : > { %v2729_v2 = vsel %vm367_vm1, %v18027_v36, %v18012_v38  ;;  %v2726_v34 = vsel %vm367_vm1, %v18026_v56, %v18011_v42  ;;  %16311 = vmatpush3.bf16.msra.mxu1 %v16308_v52  ;;  %3789 = vmatprep.mubr.f32.mxu1 %v20233_v41  ;;  %v17996_v36 = vunpack.i.l.bf16 %v20704_v33  ;;  %v18001_v38 = vunpack.i.l.bf16 %v20717_v18 }
 0x308   : > { %v20784_v13 = vpop.permute.xlu1 %18039  ;;  %16313 = vmatprep.subr.bf16.mxu1 %v16312_v20  ;;  %v18035_v12 = vpop.permute.xlu0 %18034  ;;  %v16234_v59 = vpack.c.bf16 %v2729_v2, %v2726_v34  ;;  %v22962_v56 = vunpack.i.l.bf16 %v20554_v28  ;;  %v3700_v20 = vld [vmem:[#allocation7 + $0x1b8] sm:$0xff]  ;;  %v3930_v2 = vsel %vm1574_vm5, %v17992_v40, %v17986_v26 }
 0x309   : > { %v18037_v25 = vunpack.i.h.bf16 %v18035_v12  ;;  %v18036_v53 = vunpack.i.l.bf16 %v18035_v12 }
 0x30a   : > { %16235 = vmatpush1.bf16.msra.mxu0 %v16234_v59  ;;  %14546 = vmatmul.mubr.msk.f32.gmra.mrb[12].mxu1 %vm392_vm0, %v3699_v43  ;;  %v3928_v59 = vsel %vm1574_vm5, %v17991_v27, %v17981_v4  ;;  %v22963_v27 = vunpack.i.h.bf16 %v20704_v33  ;;  %v22964_v4 = vunpack.i.h.bf16 %v20717_v18 }
 0x30b   : > { %3795 = vmatprep.mubr.f32.mxu1 %v20233_v41  ;;  %v2733_v52 = vsel %vm367_vm1, %v18036_v53, %v22961_v9  ;;  %v2736_v19 = vsel %vm367_vm1, %v18037_v25, %v22962_v56  ;;  %v18006_v41 = vunpack.i.l.bf16 %v20738_v47  ;;  %v16314_v56 = vpack.c.bf16 %v3930_v2, %v3928_v59 }
 0x30c   : > { %v18045_v34 = vpop.permute.xlu1 %18044  ;;  %v20801_v12 = vpop.permute.xlu0 %18049  ;;  %v16236_v42 = vpack.c.bf16 %v2736_v19, %v2733_v52  ;;  %v3933_v26 = vsel %vm1574_vm5, %v17996_v36, %v22963_v27  ;;  %v3935_v40 = vsel %vm1574_vm5, %v18001_v38, %v22964_v4  ;;  %v22967_v59 = vunpack.i.h.bf16 %v20674_v49  ;;  %v20837_v49 = vld [vmem:[#allocation2] sm:$0xff] }
 0x30d   : > { %v18047_v31 = vunpack.i.h.bf16 %v18045_v34  ;;  %v18046_v1 = vunpack.i.l.bf16 %v18045_v34  ;;  %v3932_v19 = vsel %vm1574_vm5, %v18006_v41, %v17996_v36  ;;  %v22965_v34 = vunpack.i.l.bf16 %v20556_v32 }
 0x30e   : > { %16237 = vmatprep.subr.bf16.mxu0 %v16236_v42  ;;  %14547 = vmatmul.mubr.msk.f32.gmra.mrb[14].mxu1 %vm392_vm0, %v3700_v20  ;;  %v22966_v36 = vunpack.i.l.bf16 %v20568_v37  ;;  %v18017_v32 = vunpack.i.h.bf16 %v20758_v21  ;;  %v18016_v4 = vunpack.i.l.bf16 %v20758_v21  ;;  %v18022_v37 = vunpack.i.h.bf16 %v20760_v14 }
 0x30f   : > { %v2732_v28 = vsel %vm367_vm1, %v18046_v1, %v18036_v53  ;;  %v2735_v9 = vsel %vm367_vm1, %v18047_v31, %v18037_v25  ;;  %15522 = vmatprep.mubr.msk.f32.mxu1 %vm392_vm0, %v3697_v5  ;;  %v3934_v53 = vsel %vm1574_vm5, %v18007_v46, %v18001_v38  ;;  %v16316_v5 = vpack.c.bf16 %v3935_v40, %v3933_v26 }
 0x310   : > { %v18060_v47 = vpop.permute.xlu1 %18059  ;;  %v20815_v52 = vpop.permute.xlu0 %18054  ;;  %v16238_v42 = vpack.c.bf16 %v2735_v9, %v2732_v28  ;;  %v16318_v38 = vpack.c.bf16 %v3934_v53, %v3932_v19 }
 0x311   : > { %v18062_v1 = vunpack.i.h.bf16 %v18060_v47  ;;  %v18061_v25 = vunpack.i.l.bf16 %v18060_v47 }
 0x312   : > { %16239 = vmatpush1.bf16.msra.mxu0 %v16238_v42  ;;  %15523 = vmatmul.mubr.msk.f32.vlgmr.msra.gmra.mrb[4].mxu1 %vm392_vm0, %v3698_v29  ;;  %v22968_v29 = vunpack.i.h.bf16 %v20692_v39  ;;  %v18021_v39 = vunpack.i.l.bf16 %v20760_v14 }
 0x313   : > { %16315 = vmatpush1.bf16.msra.mxu1 %v16314_v56  ;;  %15525 = vmatprep.mubr.msk.f32.mxu1 %vm392_vm0, %v3699_v43  ;;  %v2969_v31 = vsel %vm611_vm2, %v18061_v25, %v22965_v34  ;;  %v2972_v46 = vsel %vm611_vm2, %v18062_v1, %v22966_v36  ;;  %v22969_v56 = vunpack.i.l.bf16 %v20570_v3  ;;  %v22970_v34 = vunpack.i.l.bf16 %v20584_v61 }
 0x314   : > { %16317 = vmatprep.subr.bf16.mxu1 %v16316_v5  ;;  %v18070_v28 = vpop.permute.xlu1 %18069  ;;  %v18065_v2 = vpop.permute.xlu0 %18064  ;;  %v16320_v41 = vpack.c.bf16 %v22968_v29, %v22967_v59  ;;  %v16248_v40 = vpack.c.bf16 %v2972_v46, %v2969_v31  ;;  %v4176_v61 = vsel %vm22939_vm6, %v18016_v4, %v18017_v32  ;;  %v4178_v59 = vsel %vm22939_vm6, %v18021_v39, %v18022_v37 }
 0x315   : > { %v18072_v9 = vunpack.i.h.bf16 %v18070_v28  ;;  %v18071_v27 = vunpack.i.l.bf16 %v18070_v28  ;;  %v18067_v43 = vunpack.i.h.bf16 %v18065_v2  ;;  %v18066_v26 = vunpack.i.l.bf16 %v18065_v2  ;;  %14512 = vmatmul.mubr.msk.f32.vlgmr.msra.gmra.mrb[12].mxu0 %vm392_vm0, %v20428_v57  ;;  %v3900_v57 = vld [vmem:[#allocation7 + $0x1c0] sm:$0xff] }
 0x316   : > { %15526 = vmatmul.mubr.msk.f32.gmra.mrb[6].mxu1 %vm392_vm0, %v3700_v20  ;;  %2832 = vmatprep.mubr.f32.mxu0 %v20837_v49  ;;  %v22971_v28 = vunpack.i.h.bf16 %v20704_v33  ;;  %v22972_v2 = vunpack.i.h.bf16 %v20717_v18 }
 0x317   : > { %v2971_v47 = vsel %vm611_vm2, %v18067_v43, %v18062_v1  ;;  %v2968_v42 = vsel %vm611_vm2, %v18066_v26, %v18061_v25  ;;  %16319 = vmatpush1.bf16.msra.mxu1 %v16318_v38  ;;  %4024 = vmatprep.mubr.f32.mxu1 %v20837_v49  ;;  %v2975_v19 = vsel %vm611_vm2, %v18071_v27, %v22969_v56  ;;  %v3902_v43 = vld [vmem:[#allocation7 + $0x1d0] sm:$0xff]  ;;  %v3903_v56 = vld [vmem:[#allocation7 + $0x1d8] sm:$0xff] }
 0x318   : > { %16249 = vmatprep.subr.bf16.mxu0 %v16248_v40  ;;  %16321 = vmatprep.subr.bf16.mxu1 %v16320_v41  ;;  %v20847_v20 = vpop.permute.xlu1 %18079  ;;  %v18075_v53 = vpop.permute.xlu0 %18074  ;;  %v16250_v5 = vpack.c.bf16 %v2971_v47, %v2968_v42  ;;  %v2978_v1 = vsel %vm611_vm2, %v18072_v9, %v22970_v34  ;;  %v16324_v36 = vpack.c.bf16 %v22972_v2, %v22971_v28  ;;  %v18052_v47 = vunpack.i.h.bf16 %v20801_v12 }
 0x319   : > { %v18077_v31 = vunpack.i.h.bf16 %v18075_v53  ;;  %v18076_v25 = vunpack.i.l.bf16 %v18075_v53  ;;  %14513 = vmatmul.mubr.msk.f32.gmra.mrb[14].mxu0 %vm392_vm0, %v20576_v44  ;;  %v16252_v3 = vpack.c.bf16 %v2978_v1, %v2975_v19  ;;  %v3901_v44 = vld [vmem:[#allocation7 + $0x1c8] sm:$0xff]  ;;  %v18051_v42 = vunpack.i.l.bf16 %v20801_v12 }
 0x31a   : > { %16251 = vmatpush1.bf16.msra.mxu0 %v16250_v5  ;;  %14552 = vmatmul.mubr.msk.f32.vlgmr.msra.gmra.mrb[8].mxu1 %vm392_vm0, %v3900_v57  ;;  %v18042_v19 = vunpack.i.h.bf16 %v20784_v13  ;;  %v18041_v53 = vunpack.i.l.bf16 %v20784_v13  ;;  %v18056_v5 = vunpack.i.l.bf16 %v20815_v52 }
 0x31b   : > { %v2977_v46 = vsel %vm611_vm2, %v18077_v31, %v18072_v9  ;;  %v2974_v38 = vsel %vm611_vm2, %v18076_v25, %v18071_v27  ;;  %16323 = vmatpush3.bf16.msra.mxu1 %v16320_v41  ;;  %2838 = vmatprep.mubr.f32.mxu0 %v20837_v49  ;;  %v16328_v41 = vpack.c.bf16 %v4178_v59, %v4176_v61  ;;  %v18032_v9 = vunpack.i.h.bf16 %v20774_v51 }
 0x31c   : > { %16253 = vmatprep.subr.bf16.mxu0 %v16252_v3  ;;  %16325 = vmatprep.subr.bf16.mxu1 %v16324_v36  ;;  %v20868_v33 = vpop.permute.xlu1 %18089  ;;  %v20870_v18 = vpop.permute.xlu0 %18084  ;;  %v16254_v29 = vpack.c.bf16 %v2977_v46, %v2974_v38  ;;  %v18031_v27 = vunpack.i.l.bf16 %v20774_v51  ;;  %v22973_v31 = vunpack.i.l.bf16 %v20586_v62  ;;  %v4182_v2 = vsel %vm22939_vm6, %v18051_v42, %v18052_v47 }
 0x31d   : > { %14514 = vmatmul.mubr.msk.f32.gmra.mrb[16].mxu0 %vm392_vm0, %v20588_v50  ;;  %4030 = vmatprep.mubr.f32.mxu1 %v20837_v49  ;;  %v4177_v51 = vsel %vm22939_vm6, %v18032_v9, %v18021_v39  ;;  %v4180_v62 = vsel %vm22939_vm6, %v18041_v53, %v18042_v19 }
 0x31e   : > { %16255 = vmatpush1.bf16.msra.mxu0 %v16254_v29  ;;  %14553 = vmatmul.mubr.msk.f32.gmra.mrb[10].mxu1 %vm392_vm0, %v3901_v44  ;;  %v4175_v50 = vsel %vm22939_vm6, %v18031_v27, %v18016_v4 }
 0x31f   : > { %16327 = vmatpush3.bf16.msra.mxu1 %v16324_v36  ;;  %2844 = vmatprep.mubr.f32.mxu0 %v20837_v49  ;;  %v16330_v28 = vpack.c.bf16 %v4177_v51, %v4175_v50  ;;  %v22975_v50 = vunpack.i.l.bf16 %v20608_v63  ;;  %v18087_v63 = vunpack.i.h.bf16 %v20870_v18 }
 0x320   : > { %16329 = vmatprep.subr.bf16.mxu1 %v16328_v41  ;;  %v20879_v26 = vpop.permute.xlu1 %18104  ;;  %v20881_v40 = vpop.permute.xlu0 %18094  ;;  %4036 = vmatprep.mubr.f32.mxu1 %v20837_v49  ;;  %v16332_v41 = vpack.c.bf16 %v4182_v2, %v4180_v62 }
 0x321   : > { %14515 = vmatmul.mubr.msk.f32.gmra.mrb[18].mxu0 %vm392_vm0, %v20598_v0  ;;  %v18057_v0 = vunpack.i.h.bf16 %v20815_v52  ;;  %v22974_v52 = vunpack.i.l.bf16 %v20606_v45 }
 0x322   : > { %14554 = vmatmul.mubr.msk.f32.gmra.mrb[12].mxu1 %vm392_vm0, %v3902_v43  ;;  %3068 = vmatprep.mubr.f32.mxu0 %v20837_v49 }
 0x323   : > { %4042 = vmatprep.mubr.f32.mxu1 %v20837_v49  ;;  %v4181_v36 = vsel %vm22939_vm6, %v18057_v0, %v18051_v42 }
 0x324   : > { %v18110_v34 = vpop.permute.xlu1 %18109  ;;  %v20897_v1 = vpop.permute.xlu0 %18099 }
 0x325   : > { %v18112_v4 = vunpack.i.h.bf16 %v18110_v34  ;;  %v18111_v39 = vunpack.i.l.bf16 %v18110_v34  ;;  %14520 = vmatmul.mubr.msk.f32.vlgmr.msra.gmra.mrb[12].mxu0 %vm392_vm0, %v20610_v22  ;;  %v4179_v22 = vsel %vm22939_vm6, %v18056_v5, %v18041_v53 }
 0x326   : > { %14555 = vmatmul.mubr.msk.f32.gmra.mrb[14].mxu1 %vm392_vm0, %v3903_v56  ;;  %3074 = vmatprep.mubr.f32.mxu0 %v20837_v49  ;;  %v16334_v0 = vpack.c.bf16 %v4181_v36, %v4179_v22  ;;  %v18082_v22 = vunpack.i.h.bf16 %v20847_v20  ;;  %v18081_v36 = vunpack.i.l.bf16 %v20847_v20 }
 0x327   : > { %15536 = vmatprep.mubr.msk.f32.mxu1 %vm392_vm0, %v3900_v57  ;;  %v3216_v25 = vsel %vm859_vm3, %v18111_v39, %v22973_v31  ;;  %v3219_v3 = vsel %vm859_vm3, %v18112_v4, %v22974_v52 }
 0x328   : > { %v18120_v61 = vpop.permute.xlu1 %18119  ;;  %v18115_v46 = vpop.permute.xlu0 %18114  ;;  %v16264_v57 = vpack.c.bf16 %v3219_v3, %v3216_v25  ;;  %v4423_v12 = vsel %vm22937_vm7, %v18081_v36, %v18082_v22 }
 0x329   : > { %v18122_v38 = vunpack.i.h.bf16 %v18120_v61  ;;  %v18121_v45 = vunpack.i.l.bf16 %v18120_v61  ;;  %v18117_v59 = vunpack.i.h.bf16 %v18115_v46  ;;  %v18116_v29 = vunpack.i.l.bf16 %v18115_v46  ;;  %14521 = vmatmul.mubr.msk.f32.gmra.mrb[14].mxu0 %vm392_vm0, %v20620_v55  ;;  %v4148_v61 = vld [vmem:[#allocation7 + $0x1e8] sm:$0xff] }
 0x32a   : > { %16265 = vmatprep.subr.bf16.mxu0 %v16264_v57  ;;  %15537 = vmatmul.mubr.msk.f32.vlgmr.msra.gmra.mrb[4].mxu1 %vm392_vm0, %v3901_v44  ;;  %v22976_v44 = vunpack.i.l.bf16 %v20628_v23  ;;  %v16336_v23 = vpack.c.bf16 %v18022_v37, %v18017_v32  ;;  %v22978_v37 = vunpack.i.l.bf16 %v20650_v48  ;;  %v16340_v48 = vpack.c.bf16 %v18052_v47, %v18042_v19 }
 0x32b   : > { %v3218_v9 = vsel %vm859_vm3, %v18117_v59, %v18112_v4  ;;  %v3215_v27 = vsel %vm859_vm3, %v18116_v29, %v18111_v39  ;;  %16331 = vmatpush1.bf16.msra.mxu1 %v16330_v28  ;;  %3080 = vmatprep.mubr.f32.mxu0 %v20837_v49  ;;  %v3222_v51 = vsel %vm859_vm3, %v18121_v45, %v22975_v50  ;;  %v22977_v28 = vunpack.i.l.bf16 %v20630_v24 }
 0x32c   : > { %16333 = vmatprep.subr.bf16.mxu1 %v16332_v41  ;;  %v18130_v42 = vpop.permute.xlu1 %18129  ;;  %v18125_v53 = vpop.permute.xlu0 %18124  ;;  %15539 = vmatprep.mubr.msk.f32.mxu1 %vm392_vm0, %v3902_v43  ;;  %v16266_v55 = vpack.c.bf16 %v3218_v9, %v3215_v27  ;;  %v3225_v5 = vsel %vm859_vm3, %v18122_v38, %v22976_v44  ;;  %v18086_v43 = vunpack.i.l.bf16 %v20870_v18  ;;  %v18091_v41 = vunpack.i.l.bf16 %v20868_v33  ;;  %v4395_v18 = vld [vmem:[#allocation7 + $0x208] sm:$0xff] }
 0x32d   : > { %v18132_v34 = vunpack.i.h.bf16 %v18130_v42  ;;  %v18131_v4 = vunpack.i.l.bf16 %v18130_v42  ;;  %v18127_v39 = vunpack.i.h.bf16 %v18125_v53  ;;  %v18126_v31 = vunpack.i.l.bf16 %v18125_v53  ;;  %14522 = vmatmul.mubr.msk.f32.gmra.mrb[16].mxu0 %vm392_vm0, %v20632_v15  ;;  %v20943_v15 = vld [vmem:[#allocation7 + $0x1e0] sm:$0xff] }
 0x32e   : > { %16267 = vmatpush1.bf16.msra.mxu0 %v16266_v55  ;;  %15540 = vmatmul.mubr.msk.f32.gmra.mrb[6].mxu1 %vm392_vm0, %v3903_v56  ;;  %v16268_v25 = vpack.c.bf16 %v3225_v5, %v3222_v51  ;;  %v18092_v50 = vunpack.i.h.bf16 %v20868_v33  ;;  %v18097_v51 = vunpack.i.h.bf16 %v20881_v40  ;;  %v18096_v42 = vunpack.i.l.bf16 %v20881_v40  ;;  %v4150_v40 = vld [vmem:[#allocation7 + $0x1f8] sm:$0xff] }
 0x32f   : > { %v3224_v52 = vsel %vm859_vm3, %v18127_v39, %v18122_v38  ;;  %v3221_v3 = vsel %vm859_vm3, %v18126_v31, %v18121_v45  ;;  %16335 = vmatpush1.bf16.msra.mxu1 %v16334_v0  ;;  %3086 = vmatprep.mubr.f32.mxu0 %v20837_v49  ;;  %v3475_v56 = vsel %vm1119_vm4, %v18131_v4, %v22977_v28  ;;  %v4149_v45 = vld [vmem:[#allocation7 + $0x1f0] sm:$0xff]  ;;  %v18107_v53 = vunpack.i.h.bf16 %v20879_v26 }
 0x330   : > { %16269 = vmatprep.subr.bf16.mxu0 %v16268_v25  ;;  %16337 = vmatprep.subr.bf16.mxu1 %v16336_v23  ;;  %v20948_v21 = vpop.permute.xlu1 %18139  ;;  %v20950_v14 = vpop.permute.xlu0 %18134  ;;  %v16270_v32 = vpack.c.bf16 %v3224_v52, %v3221_v3  ;;  %v3478_v2 = vsel %vm1119_vm4, %v18132_v34, %v22978_v37  ;;  %v18106_v55 = vunpack.i.l.bf16 %v20879_v26  ;;  %v22979_v0 = vunpack.i.l.bf16 %v20652_v7 }
 0x331   : > { %14523 = vmatmul.mubr.msk.f32.gmra.mrb[18].mxu0 %vm392_vm0, %v20642_v35  ;;  %4271 = vmatprep.mubr.f32.mxu1 %v20837_v49  ;;  %v16280_v24 = vpack.c.bf16 %v3478_v2, %v3475_v56  ;;  %v4425_v35 = vsel %vm22937_vm7, %v18086_v43, %v18087_v63  ;;  %v22980_v33 = vunpack.i.l.bf16 %v20672_v58  ;;  %v4424_v7 = vsel %vm22937_vm7, %v18092_v50, %v18086_v43 }
 0x332   : > { %16271 = vmatpush1.bf16.msra.mxu0 %v16270_v32  ;;  %14560 = vmatmul.mubr.msk.f32.vlgmr.msra.gmra.mrb[8].mxu1 %vm392_vm0, %v20943_v15  ;;  %v16344_v47 = vpack.c.bf16 %v4425_v35, %v4423_v12  ;;  %v18102_v26 = vunpack.i.h.bf16 %v20897_v1  ;;  %v18101_v58 = vunpack.i.l.bf16 %v20897_v1  ;;  %v4427_v25 = vsel %vm22937_vm7, %v18096_v42, %v18097_v51 }
 0x333   : > { %16339 = vmatpush3.bf16.msra.mxu1 %v16336_v23  ;;  %3315 = vmatprep.mubr.f32.mxu0 %v20837_v49  ;;  %v18142_v32 = vunpack.i.h.bf16 %v20948_v21  ;;  %v18141_v37 = vunpack.i.l.bf16 %v20948_v21  ;;  %v18137_v2 = vunpack.i.h.bf16 %v20950_v14  ;;  %v16356_v20 = vpack.c.bf16 %v18107_v53, %v18097_v51  ;;  %v4642_v51 = vld [vmem:[#allocation7 + $0x228] sm:$0xff] }
 0x334   : > { %16281 = vmatprep.subr.bf16.mxu0 %v16280_v24  ;;  %16341 = vmatprep.subr.bf16.mxu1 %v16340_v48  ;;  %v20972_v46 = vpop.permute.xlu1 %18149  ;;  %v18145_v57 = vpop.permute.xlu0 %18144  ;;  %v4428_v3 = vsel %vm22937_vm7, %v18102_v26, %v18106_v55  ;;  %v4426_v28 = vsel %vm22937_vm7, %v18101_v58, %v18096_v42  ;;  %v4643_v42 = vld [vmem:[#allocation7 + $0x230] sm:$0xff]  ;;  %v21091_v58 = vstv %s14588_s6  ;;  %s14896_s6 = sld [smem:[#allocation9 + $0x5]] }
 0x335   : > { %v18147_v62 = vunpack.i.h.bf16 %v18145_v57  ;;  %v18146_v13 = vunpack.i.l.bf16 %v18145_v57  ;;  %14528 = vmatmul.mubr.msk.f32.vlgmr.msra.gmra.mrb[12].mxu0 %vm392_vm0, %v20654_v10  ;;  %4277 = vmatprep.mubr.f32.mxu1 %v20837_v49  ;;  %v4672_v21 = vsel %vm22936_vm8, %v18141_v37, %v18142_v32  ;;  %v18152_v24 = vunpack.i.h.bf16 %v20972_v46  ;;  %v4397_v57 = vld [vmem:[#allocation7 + $0x218] sm:$0xff] }
 0x336   : > { %14561 = vmatmul.mubr.msk.f32.gmra.mrb[10].mxu1 %vm392_vm0, %v4148_v61  ;;  %3321 = vmatprep.mubr.f32.mxu0 %v20837_v49 }
 0x337   : > { %v3477_v19 = vsel %vm1119_vm4, %v18147_v62, %v18132_v34  ;;  %v3474_v38 = vsel %vm1119_vm4, %v18146_v13, %v18131_v4  ;;  %16343 = vmatpush3.bf16.msra.mxu1 %v16340_v48  ;;  %4283 = vmatprep.mubr.f32.mxu1 %v20837_v49  ;;  %v4422_v4 = vsel %vm22937_vm7, %v18091_v41, %v18081_v36  ;;  %v18136_v36 = vunpack.i.l.bf16 %v20950_v14 }
 0x338   : > { %16345 = vmatprep.subr.bf16.mxu1 %v16344_v47  ;;  %v20984_v59 = vpop.permute.xlu1 %18159  ;;  %v18155_v10 = vpop.permute.xlu0 %18154  ;;  %v16282_v29 = vpack.c.bf16 %v3477_v19, %v3474_v38  ;;  %v16346_v1 = vpack.c.bf16 %v4424_v7, %v4422_v4  ;;  %v18151_v48 = vunpack.i.l.bf16 %v20972_v46  ;;  %v4671_v12 = vsel %vm22936_vm8, %v18152_v24, %v18141_v37 }
 0x339   : > { %v18157_v9 = vunpack.i.h.bf16 %v18155_v10  ;;  %v18156_v27 = vunpack.i.l.bf16 %v18155_v10  ;;  %14529 = vmatmul.mubr.msk.f32.gmra.mrb[14].mxu0 %vm392_vm0, %v20664_v60  ;;  %v18162_v62 = vunpack.i.h.bf16 %v20984_v59  ;;  %v18161_v13 = vunpack.i.l.bf16 %v20984_v59 }
 0x33a   : > { %16283 = vmatpush1.bf16.msra.mxu0 %v16282_v29  ;;  %14562 = vmatmul.mubr.msk.f32.gmra.mrb[12].mxu1 %vm392_vm0, %v4149_v45 }
 0x33b   : > { %3327 = vmatprep.mubr.f32.mxu0 %v20837_v49  ;;  %4289 = vmatprep.mubr.f32.mxu1 %v20837_v49  ;;  %v3481_v60 = vsel %vm1119_vm4, %v18156_v27, %v22979_v0  ;;  %v3484_v44 = vsel %vm1119_vm4, %v18157_v9, %v22980_v33 }
 0x33c   : > { %v18165_v5 = vpop.permute.xlu1 %18164  ;;  %v16284_v34 = vpack.c.bf16 %v3484_v44, %v3481_v60  ;;  %v18170_v14 = vpop.permute.xlu0 %18169 }
 0x33d   : > { %v18167_v39 = vunpack.i.h.bf16 %v18165_v5  ;;  %v18166_v31 = vunpack.i.l.bf16 %v18165_v5  ;;  %14530 = vmatmul.mubr.msk.f32.gmra.mrb[16].mxu0 %vm392_vm0, %v20676_v54  ;;  %v4429_v54 = vsel %vm22937_vm7, %v18106_v55, %v18107_v53  ;;  %v4644_v53 = vld [vmem:[#allocation7 + $0x238] sm:$0xff]  ;;  %v21087_v55 = vpack.i.bf16 %v20837_v49, %v20837_v49 }
 0x33e   : > { %16285 = vmatprep.subr.bf16.mxu0 %v16284_v34  ;;  %14563 = vmatmul.mubr.msk.f32.gmra.mrb[14].mxu1 %vm392_vm0, %v4150_v40  ;;  %v16348_v56 = vpack.c.bf16 %v4429_v54, %v4427_v25 }
 0x33f   : > { %v3480_v23 = vsel %vm1119_vm4, %v18166_v31, %v18156_v27  ;;  %v3483_v52 = vsel %vm1119_vm4, %v18167_v39, %v18157_v9  ;;  %3333 = vmatprep.mubr.f32.mxu0 %v20837_v49  ;;  %15550 = vmatprep.mubr.msk.f32.mxu1 %vm392_vm0, %v20943_v15  ;;  %v16350_v15 = vpack.c.bf16 %v4428_v3, %v4426_v28  ;;  %v4641_v27 = vld [vmem:[#allocation7 + $0x220] sm:$0xff] }
 0x340   : > { %v16286_v43 = vpack.c.bf16 %v3483_v52, %v3480_v23  ;;  %v18175_v35 = vpop.permute.xlu0 %18174  ;;  %v16368_v9 = vpack.c.bf16 %v18142_v32, %v18137_v2  ;;  %18179 = vrot.lane.b32.xlu1 %v21087_v55, %s19520_s24 }
 0x341   : > { %14531 = vmatmul.mubr.msk.f32.gmra.mrb[18].mxu0 %vm392_vm0, %v20684_v30  ;;  %v16352_v30 = vpack.c.bf16 %v18087_v63, %v18082_v22  ;;  %v4670_v63 = vsel %vm22936_vm8, %v18136_v36, %v18137_v2  ;;  %v4396_v22 = vld [vmem:[#allocation7 + $0x210] sm:$0xff]  ;;  %v18177_v47 = vunpack.i.h.bf16 %v18175_v35  ;;  %v18176_v46 = vunpack.i.l.bf16 %v18175_v35 }
 0x342   : > { %16287 = vmatpush1.bf16.msra.mxu0 %v16286_v43  ;;  %15551 = vmatmul.mubr.msk.f32.vlgmr.msra.gmra.mrb[4].mxu1 %vm392_vm0, %v4148_v61  ;;  %v18171_v61 = vunpack.i.l.bf16 %v18170_v14 }
 0x343   : > { %16347 = vmatpush1.bf16.msra.mxu1 %v16346_v1  ;;  %3574 = vmatprep.mubr.f32.mxu0 %v20837_v49  ;;  %v4673_v10 = vsel %vm22936_vm8, %v18176_v46, %v18161_v13 }
 0x344   : > { %16349 = vmatprep.subr.bf16.mxu1 %v16348_v56  ;;  %15553 = vmatprep.mubr.msk.f32.mxu1 %vm392_vm0, %v4149_v45  ;;  %v4674_v45 = vsel %vm22936_vm8, %v18161_v13, %v18162_v62  ;;  %v4675_v29 = vsel %vm22936_vm8, %v18177_v47, %v18171_v61 }
 0x345   : > { %14536 = vmatmul.mubr.msk.f32.vlgmr.msra.gmra.mrb[12].mxu0 %vm392_vm0, %v20696_v11  ;;  %v4394_v11 = vld [vmem:[#allocation7 + $0x200] sm:$0xff]  ;;  %v16366_v41 = vpack.c.bf16 %v4675_v29, %v4673_v10 }
 0x346   : > { %15554 = vmatmul.mubr.msk.f32.gmra.mrb[6].mxu1 %vm392_vm0, %v4150_v40  ;;  %3580 = vmatprep.mubr.f32.mxu0 %v20837_v49 }
 0x347   : > { %16351 = vmatpush1.bf16.msra.mxu1 %v16350_v15  ;;  %4518 = vmatprep.mubr.f32.mxu1 %v20837_v49 }
 0x348   : > { %16353 = vmatprep.subr.bf16.mxu1 %v16352_v30 }
 0x349   : > { %14537 = vmatmul.mubr.msk.f32.gmra.mrb[14].mxu0 %vm392_vm0, %v20702_v17  ;;  %v16360_v17 = vpack.c.bf16 %v4672_v21, %v4670_v63 }
 0x34a   : > { %14568 = vmatmul.mubr.msk.f32.vlgmr.msra.gmra.mrb[8].mxu1 %vm392_vm0, %v4394_v11  ;;  %3586 = vmatprep.mubr.f32.mxu0 %v20837_v49 }
 0x34b   : > { %16355 = vmatpush3.bf16.msra.mxu1 %v16352_v30  ;;  %4524 = vmatprep.mubr.f32.mxu1 %v20837_v49 }
 0x34c   : > { %16357 = vmatprep.subr.bf16.mxu1 %v16356_v20 }
 0x34d   : > { %14538 = vmatmul.mubr.msk.f32.gmra.mrb[16].mxu0 %vm392_vm0, %v20719_v6  ;;  %v18172_v6 = vunpack.i.h.bf16 %v18170_v14  ;;  %v4895_v26 = vpop.permute.xlu1 %4894 }
 0x34e   : > { %14569 = vmatmul.mubr.msk.f32.gmra.mrb[10].mxu1 %vm392_vm0, %v4395_v18  ;;  %3592 = vmatprep.mubr.f32.mxu0 %v20837_v49 }
 0x34f   : > { %16359 = vmatpush3.bf16.msra.mxu1 %v16356_v20  ;;  %4530 = vmatprep.mubr.f32.mxu1 %v20837_v49  ;;  %v4676_v19 = vsel %vm22936_vm8, %v18171_v61, %v18172_v6  ;;  %v16372_v50 = vpack.c.bf16 %v18172_v6, %v18162_v62 }
 0x350   : > { %16361 = vmatprep.subr.bf16.mxu1 %v16360_v17  ;;  %v16364_v59 = vpack.c.bf16 %v4676_v19, %v4674_v45 }
 0x351   : > { %14539 = vmatmul.mubr.msk.f32.gmra.mrb[18].mxu0 %vm392_vm0, %v20736_v16  ;;  %v4669_v16 = vsel %vm22936_vm8, %v18151_v48, %v18136_v36  ;;  %v4900_v3 = vpop.permute.xlu0 %4899  ;;  %v4905_v14 = vpop.permute.xlu1 %4904 }
 0x352   : > { %14570 = vmatmul.mubr.msk.f32.gmra.mrb[12].mxu1 %vm392_vm0, %v4396_v22  ;;  %5160 = vmatprep.mubr.f32.mxu0 %v20837_v49  ;;  %v16362_v38 = vpack.c.bf16 %v4671_v12, %v4669_v16 }
 0x353   : > { %4536 = vmatprep.mubr.f32.mxu1 %v20837_v49 }
 0x355   : > { %v4910_v46 = vpop.permute.xlu0 %4909 }
 0x356   : > { %14571 = vmatmul.mubr.msk.f32.gmra.mrb[14].mxu1 %vm392_vm0, %v4397_v57 }
 0x357   : > { %15564 = vmatprep.mubr.msk.f32.mxu1 %vm392_vm0, %v4394_v11  ;;  %v22981_v11 = vld [vmem:[#allocation16_spill] sm:$0xff] }
 0x35a   : > { %15565 = vmatmul.mubr.msk.f32.vlgmr.msra.gmra.mrb[4].mxu1 %vm392_vm0, %v4395_v18 }
 0x35b   : > { %16363 = vmatpush1.bf16.msra.mxu1 %v16362_v38  ;;  %15567 = vmatprep.mubr.msk.f32.mxu1 %vm392_vm0, %v4396_v22 }
 0x35c   : > { %16365 = vmatprep.subr.bf16.mxu1 %v16364_v59 }
 0x35e   : > { %15568 = vmatmul.mubr.msk.f32.gmra.mrb[6].mxu1 %vm392_vm0, %v4397_v57 }
 0x35f   : > { %16367 = vmatpush1.bf16.msra.mxu1 %v16366_v41  ;;  %4765 = vmatprep.mubr.f32.mxu1 %v20837_v49 }
 0x360   : > { %16369 = vmatprep.subr.bf16.mxu1 %v16368_v9 }
 0x362   : > { %14576 = vmatmul.mubr.msk.f32.vlgmr.msra.gmra.mrb[8].mxu1 %vm392_vm0, %v4641_v27 }
 0x363   : > { %16371 = vmatpush3.bf16.msra.mxu1 %v16368_v9  ;;  %4771 = vmatprep.mubr.f32.mxu1 %v20837_v49 }
 0x364   : > { %16373 = vmatprep.subr.bf16.mxu1 %v16372_v50 }
 0x366   : > { %14577 = vmatmul.mubr.msk.f32.gmra.mrb[10].mxu1 %vm392_vm0, %v4642_v51 }
 0x367   : > { %16375 = vmatpush3.bf16.msra.mxu1 %v16372_v50  ;;  %4777 = vmatprep.mubr.f32.mxu1 %v20837_v49 }
 0x36a   : > { %14578 = vmatmul.mubr.msk.f32.gmra.mrb[12].mxu1 %vm392_vm0, %v4643_v42 }
 0x36b   : > { %4783 = vmatprep.mubr.f32.mxu1 %v20837_v49 }
 0x36e   : > { %14579 = vmatmul.mubr.msk.f32.gmra.mrb[14].mxu1 %vm392_vm0, %v4644_v53 }
 0x36f   : > { %15578 = vmatprep.mubr.msk.f32.mxu1 %vm392_vm0, %v4641_v27 }
 0x372   : > { %15579 = vmatmul.mubr.msk.f32.vlgmr.msra.gmra.mrb[4].mxu1 %vm392_vm0, %v4642_v51 }
 0x373   : > { %15581 = vmatprep.mubr.msk.f32.mxu1 %vm392_vm0, %v4643_v42 }
 0x376   : > { %15582 = vmatmul.mubr.msk.f32.gmra.mrb[6].mxu1 %vm392_vm0, %v4644_v53 }
 0x377   : > { %7494 = vmatprep.mubr.f32.mxu1 %v20837_v49 }
 0x418   : > { %v3576_v0 = vpop.f32.mrb[12].mxu0 }
 0x419   : > { %v3578_v60 = vpop.f32.mrb[13].mxu0 }
 0x41c   : > { %v3582_v33 = vpop.f32.mrb[14].mxu0 }
 0x41d   : > { %v3584_v44 = vpop.f32.mrb[15].mxu0 }
 0x420   : > { %v3588_v40 = vpop.f32.mrb[16].mxu0 }
 0x421   : > { %v3590_v5 = vpop.f32.mrb[17].mxu0 }
 0x424   : > { %v3594_v34 = vpop.f32.mrb[18].mxu0 }
 0x425   : > { %v3596_v4 = vpop.f32.mrb[19].mxu0 }
 0x435   : > { %v4767_v39 = vpop.f32.mrb[8].mxu1 }
 0x436   : > { %v16956_v31 = vadd.f32 %v4767_v39, %v3576_v0  ;;  %v4769_v7 = vpop.f32.mrb[9].mxu1 }
 0x437   : > { %v16957_v49 = vadd.f32 %v4769_v7, %v3578_v60 }
 0x438   : > { %v4912_v25 = vadd.f32 %v16956_v31, %v4895_v26 }
 0x439   : > { %v4913_v23 = vadd.f32 %v16957_v49, %v4895_v26  ;;  %v4773_v52 = vpop.f32.mrb[10].mxu1 }
 0x43a   : > { %vm4925_vm9 = vcmp.ge.f32.partialorder %v4912_v25, 0.0  ;;  %v4938_v54 = vmul.f32 %v21091_v58, %v4912_v25  ;;  %v16958_v43 = vadd.f32 %v4773_v52, %v3582_v33  ;;  %v4775_v1 = vpop.f32.mrb[11].mxu1 }
 0x43b   : > { %vm4926_vm15 = vcmp.ge.f32.partialorder %v4913_v23, 0.0  ;;  %v4939_v28 = vmul.f32 %v21091_v58, %v4913_v23  ;;  %v16959_v56 = vadd.f32 %v4775_v1, %v3584_v44 }
 0x43c   : > { %v21095_v15 = vsel %vm4925_vm9, %v4912_v25, %v4938_v54  ;;  %v4915_v30 = vadd.f32 %v16958_v43, %v4900_v3 }
 0x43d   : > { %v4962_v32 = vsel %vm2625_vm14, %v21095_v15, 0.0  ;;  %v21100_v37 = vsel %vm4926_vm15, %v4913_v23, %v4939_v28  ;;  %v4916_v2 = vadd.f32 %v16959_v56, %v4900_v3  ;;  %v4779_v36 = vpop.f32.mrb[12].mxu1 }
 0x43e   : > { %v21105_v20 = vsel %vm22938_vm10, %v21100_v37, 0.0  ;;  %vm4928_vm8 = vcmp.ge.f32.partialorder %v4915_v30, 0.0  ;;  %v4941_v18 = vmul.f32 %v21091_v58, %v4915_v30  ;;  %v16960_v63 = vadd.f32 %v4779_v36, %v3588_v40  ;;  %v4781_v21 = vpop.f32.mrb[13].mxu1 }
 0x43f   : > { %vm4929_vm9 = vcmp.ge.f32.partialorder %v4916_v2, 0.0  ;;  %v4942_v17 = vmul.f32 %v21091_v58, %v4916_v2  ;;  %v16961_v22 = vadd.f32 %v4781_v21, %v3590_v5  ;;  %v21110_v24 = vpack.i.bf16 %v21105_v20, %v4962_v32 }
 0x440   : > { %v21112_v48 = vsel %vm4928_vm8, %v4915_v30, %v4941_v18  ;;  %v4918_v6 = vadd.f32 %v16960_v63, %v4905_v14 }
 0x441   : > { %v4965_v61 = vsel %vm2625_vm14, %v21112_v48, 0.0  ;;  %v21117_v35 = vsel %vm4929_vm9, %v4916_v2, %v4942_v17  ;;  %v4919_v57 = vadd.f32 %v16961_v22, %v4905_v14  ;;  %v4785_v62 = vpop.f32.mrb[14].mxu1  ;;  %18184 = vrot.lane.b32.xlu1 %v21110_v24, %s19520_s24 }
 0x442   : > { %v21124_v13 = vsel %vm22938_vm10, %v21117_v35, 0.0  ;;  %vm4931_vm15 = vcmp.ge.f32.partialorder %v4918_v6, 0.0  ;;  %v4944_v16 = vmul.f32 %v21091_v58, %v4918_v6  ;;  %v16962_v12 = vadd.f32 %v4785_v62, %v3594_v34  ;;  %v4787_v47 = vpop.f32.mrb[15].mxu1 }
 0x443   : > { %vm4932_vm8 = vcmp.ge.f32.partialorder %v4919_v57, 0.0  ;;  %v4945_v19 = vmul.f32 %v21091_v58, %v4919_v57  ;;  %v16963_v38 = vadd.f32 %v4787_v47, %v3596_v4  ;;  %v21129_v45 = vpack.i.bf16 %v21124_v13, %v4965_v61 }
 0x444   : > { %v21131_v10 = vsel %vm4931_vm15, %v4918_v6, %v4944_v16  ;;  %v4921_v29 = vadd.f32 %v16962_v12, %v4910_v46  ;;  %v21133_v59 = vpack.i.bf16 %v4965_v61, %v4962_v32 }
 0x445   : > { %v4968_v41 = vsel %vm2625_vm14, %v21131_v10, 0.0  ;;  %v21138_v9 = vsel %vm4932_vm8, %v4919_v57, %v4945_v19  ;;  %v4922_v27 = vadd.f32 %v16963_v38, %v4910_v46  ;;  %v15580_v50 = vpop.f32.mrb[4].mxu1  ;;  %18189 = vrot.lane.b32.xlu0 %v21129_v45, %s19520_s24 }
 0x446   : > { %v21145_v51 = vsel %vm22938_vm10, %v21138_v9, 0.0  ;;  %vm4934_vm9 = vcmp.ge.f32.partialorder %v4921_v29, 0.0  ;;  %v4947_v42 = vmul.f32 %v21091_v58, %v4921_v29  ;;  %v4917_v53 = vadd.f32 %v15580_v50, %v4900_v3  ;;  %v4856_v0 = vpop.f32.mrb[5].mxu1 }
 0x447   : > { %vm4935_vm15 = vcmp.ge.f32.partialorder %v4922_v27, 0.0  ;;  %v4948_v60 = vmul.f32 %v21091_v58, %v4922_v27  ;;  %v4914_v33 = vadd.f32 %v4895_v26, %v4856_v0  ;;  %v18193_v44 = vpack.i.bf16 %v21145_v51, %v4968_v41 }
 0x448   : > { %v21150_v40 = vsel %vm4934_vm9, %v4921_v29, %v4947_v42  ;;  %vm4930_vm8 = vcmp.ge.f32.partialorder %v4917_v53, 0.0  ;;  %v4943_v5 = vmul.f32 %v21091_v58, %v4917_v53  ;;  %vm22983_vm9 = vcmask 556032   ;;  %v14662_v42 = vld [vmem:[%s22905_s3 + $0x48] sm:$0xff] }
 0x449   : > { %v4971_v34 = vsel %vm2625_vm14, %v21150_v40, 0.0  ;;  %v21156_v4 = vsel %vm4935_vm15, %v4922_v27, %v4948_v60  ;;  %vm4927_vm7 = vcmp.ge.f32.partialorder %v4914_v33, 0.0  ;;  %v4940_v39 = vmul.f32 %v21091_v58, %v4914_v33  ;;  %v15583_v31 = vpop.f32.mrb[6].mxu1  ;;  %18194 = vrot.lane.b32.xlu0 %v18193_v44, %s19520_s24 }
 0x44a   : > { %v4972_v7 = vsel %vm22938_vm10, %v21156_v4, 0.0  ;;  %v4955_v26 = vsel %vm4930_vm8, %v4917_v53, %v4943_v5  ;;  %v4923_v49 = vadd.f32 %v15583_v31, %v4910_v46  ;;  %v4866_v25 = vpop.f32.mrb[7].mxu1  ;;  %v21163_v23 = vpack.i.bf16 %v4971_v34, %v4968_v41  ;;  %vm22984_vm10 = vmmov %vm22983_vm9  ;;  %v14661_v46 = vld [vmem:[%s22905_s3 + $0x40] sm:$0xff]  ;;  %v14663_v53 = vld [vmem:[%s22905_s3 + $0x50] sm:$0xff] }
 0x44b   : > { %v4967_v54 = vsel %vm2627_vm11, %v4955_v26, 0.0  ;;  %v4952_v43 = vsel %vm4927_vm7, %v4914_v33, %v4940_v39  ;;  %v4920_v1 = vadd.f32 %v4905_v14, %v4866_v25  ;;  %v18198_v3 = vpack.i.bf16 %v4972_v7, %v4971_v34  ;;  %vm22985_vm7 = vmmov %vm22983_vm9  ;;  %v14664_v5 = vld [vmem:[%s22905_s3 + $0x58] sm:$0xff] }
 0x44c   : > { %4979 = vst.msk [vmem:[#allocation2 + $0x40] sm:$0xff] %vm22983_vm9, %v4967_v54  ;;  %v4964_v28 = vsel %vm2627_vm11, %v4952_v43, 0.0  ;;  %vm4936_vm15 = vcmp.ge.f32.partialorder %v4923_v49, 0.0  ;;  %v4949_v56 = vmul.f32 %v21091_v58, %v4923_v49  ;;  %vm22986_vm9 = vmmov %vm22985_vm7 }
 0x44d   : > { %4976 = vst.msk [vmem:[#allocation2 + $0x18] sm:$0xff] %vm22984_vm10, %v4964_v28  ;;  %vm4933_vm8 = vcmp.ge.f32.partialorder %v4920_v1, 0.0  ;;  %v4946_v30 = vmul.f32 %v21091_v58, %v4920_v1  ;;  %18204 = vrot.lane.b32.xlu0 %v21087_v55, %s19520_s24  ;;  %18199 = vrot.lane.b32.xlu1 %v18198_v3, %s19520_s24  ;;  %vm22989_vm10 = vcmask 900096  }
 0x44e   : > { %v4961_v32 = vsel %vm4936_vm15, %v4923_v49, %v4949_v56  ;;  %vm22990_vm15 = vmmov %vm22989_vm10 }
 0x44f   : > { %v4973_v2 = vsel %vm2627_vm11, %v4961_v32, 0.0  ;;  %v4958_v36 = vsel %vm4933_vm8, %v4920_v1, %v4946_v30  ;;  %v5008_v1 = vld [vmem:[#allocation7 + $0x260] sm:$0xff]  ;;  %v5009_v32 = vld [vmem:[#allocation7 + $0x268] sm:$0xff]  ;;  %vm22991_vm8 = vmmov %vm22989_vm10 }
 0x450   : > { %4985 = vst.msk [vmem:[#allocation2 + $0x90] sm:$0xff] %vm22985_vm7, %v4973_v2  ;;  %v4970_v18 = vsel %vm2627_vm11, %v4958_v36, 0.0  ;;  %v21292_v30 = vld [vmem:[#allocation2] sm:$0xff]  ;;  %vm22992_vm7 = vmmov %vm22991_vm8 }
 0x451   : > { %4982 = vst.msk [vmem:[#allocation2 + $0x68] sm:$0xff] %vm22986_vm9, %v4970_v18  ;;  %vm22993_vm9 = vmmov %vm22992_vm7 }
 0x453   : > { %v21182_v63 = vld [vmem:[#allocation2 + $0x40] sm:$0xff] }
 0x454   : > { %v21184_v58 = vld [vmem:[#allocation2 + $0x18] sm:$0xff] }
 0x455   : > { %v18208_v21 = vpack.i.bf16 %v21182_v63, %v21184_v58  ;;  %v18338_v6 = vpack.i.bf16 %v21184_v58, %v21105_v20  ;;  %v18180_v20 = vpop.permute.xlu1 %18179 }
 0x456   : > { %v18182_v62 = vunpack.i.h.bf16 %v18180_v20 }
 0x457   : > { %18209 = vrot.lane.b32.xlu1 %v18208_v21, %s19520_s24  ;;  %v21189_v14 = vld [vmem:[#allocation2 + $0x90] sm:$0xff] }
 0x458   : > { %v21191_v17 = vld [vmem:[#allocation2 + $0x68] sm:$0xff]  ;;  %v18353_v61 = vpack.i.bf16 %v21189_v14, %v4972_v7 }
 0x459   : > { %v18218_v22 = vpack.i.bf16 %v21189_v14, %v21191_v17 }
 0x45b   : > { %18219 = vrot.lane.b32.xlu0 %v18218_v22, %s19520_s24  ;;  %18214 = vrot.lane.b32.xlu1 %v21110_v24, %s19522_s26 }
 0x45f   : > { %18224 = vrot.lane.b32.xlu0 %v21129_v45, %s19522_s26  ;;  %18229 = vrot.lane.b32.xlu1 %v21087_v55, %s19522_s26 }
 0x463   : > { %18234 = vrot.lane.b32.xlu0 %v18193_v44, %s19522_s26  ;;  %18239 = vrot.lane.b32.xlu1 %v18198_v3, %s19522_s26 }
 0x467   : > { %18244 = vrot.lane.b32.xlu0 %v21087_v55, %s19522_s26  ;;  %18249 = vrot.lane.b32.xlu1 %v18208_v21, %s19522_s26 }
 0x46b   : > { %18259 = vrot.lane.b32.xlu0 %v18218_v22, %s19522_s26  ;;  %18254 = vrot.lane.b32.xlu1 %v21110_v24, %s19523_s13 }
 0x46f   : > { %18264 = vrot.lane.b32.xlu0 %v21129_v45, %s19523_s13  ;;  %18269 = vrot.lane.b32.xlu1 %v21087_v55, %s19523_s13 }
 0x473   : > { %18274 = vrot.lane.b32.xlu0 %v18193_v44, %s19523_s13  ;;  %18279 = vrot.lane.b32.xlu1 %v18198_v3, %s19523_s13 }
 0x477   : > { %18284 = vrot.lane.b32.xlu0 %v21087_v55, %s19523_s13  ;;  %18289 = vrot.lane.b32.xlu1 %v18208_v21, %s19523_s13 }
 0x47b   : > { %18299 = vrot.lane.b32.xlu0 %v18218_v22, %s19523_s13  ;;  %18294 = vrot.lane.b32.xlu1 %v21110_v24, %s19524_s16  ;;  %v18343_v24 = vpack.i.bf16 %v21182_v63, %v21124_v13  ;;  %v18181_v13 = vunpack.i.l.bf16 %v18180_v20 }
 0x47f   : > { %18304 = vrot.lane.b32.xlu0 %v21129_v45, %s19524_s16  ;;  %18309 = vrot.lane.b32.xlu1 %v21087_v55, %s19524_s16 }
 0x483   : > { %18314 = vrot.lane.b32.xlu0 %v18193_v44, %s19524_s16  ;;  %18319 = vrot.lane.b32.xlu1 %v18198_v3, %s19524_s16 }
 0x487   : > { %18324 = vrot.lane.b32.xlu0 %v21087_v55, %s19524_s16  ;;  %18329 = vrot.lane.b32.xlu1 %v18208_v21, %s19524_s16  ;;  %v18358_v55 = vpack.i.bf16 %v21191_v17, %v21145_v51 }
 0x48b   : > { %18334 = vrot.lane.b32.xlu0 %v18218_v22, %s19524_s16  ;;  %18339 = vrot.lane.b32.xlu1 %v18338_v6, %s19525_s23 }
 0x48f   : > { %18344 = vrot.lane.b32.xlu0 %v18343_v24, %s19525_s23  ;;  %18349 = vrot.lane.b32.xlu1 %v21133_v59, %s19525_s23 }
 0x493   : > { %18359 = vrot.lane.b32.xlu0 %v18358_v55, %s19525_s23  ;;  %18354 = vrot.lane.b32.xlu1 %v18353_v61, %s19525_s23 }
 0x497   : > { %18364 = vrot.lane.b32.xlu0 %v21163_v23, %s19525_s23  ;;  %18369 = vrot.lane.b32.xlu1 %v18338_v6, %s19526_s27 }
 0x49b   : > { %18374 = vrot.lane.b32.xlu0 %v18343_v24, %s19526_s27  ;;  %18379 = vrot.lane.b32.xlu1 %v21133_v59, %s19526_s27 }
 0x49f   : > { %18389 = vrot.lane.b32.xlu0 %v18358_v55, %s19526_s27  ;;  %18384 = vrot.lane.b32.xlu1 %v18353_v61, %s19526_s27 }
 0x4a3   : > { %18394 = vrot.lane.b32.xlu0 %v21163_v23, %s19526_s27  ;;  %18399 = vrot.lane.b32.xlu1 %v18338_v6, %s19527_s11 }
 0x4a7   : > { %18404 = vrot.lane.b32.xlu0 %v18343_v24, %s19527_s11  ;;  %18409 = vrot.lane.b32.xlu1 %v21133_v59, %s19527_s11 }
 0x4ab   : > { %18419 = vrot.lane.b32.xlu0 %v18358_v55, %s19527_s11  ;;  %18414 = vrot.lane.b32.xlu1 %v18353_v61, %s19527_s11 }
 0x4af   : > { %18424 = vrot.lane.b32.xlu0 %v21163_v23, %s19527_s11  ;;  %18429 = vrot.lane.b32.xlu1 %v18338_v6, %s19528_s12 }
 0x4b3   : > { %18434 = vrot.lane.b32.xlu0 %v18343_v24, %s19528_s12  ;;  %18439 = vrot.lane.b32.xlu1 %v21133_v59, %s19528_s12  ;;  %v18185_v57 = vpop.permute.xlu1 %18184 }
 0x4b4   : > { %v18187_v16 = vunpack.i.h.bf16 %v18185_v57  ;;  %v18186_v12 = vunpack.i.l.bf16 %v18185_v57 }
 0x4b6   : > { %v5060_v45 = vsel %vm367_vm1, %v18181_v13, %v18186_v12  ;;  %v5061_v59 = vsel %vm367_vm1, %v18186_v12, %v18187_v16 }
 0x4b7   : > { %18449 = vrot.lane.b32.xlu0 %v18358_v55, %s19528_s12  ;;  %18444 = vrot.lane.b32.xlu1 %v18353_v61, %s19528_s12  ;;  %v18190_v47 = vpop.permute.xlu0 %18189  ;;  %v5010_v55 = vld [vmem:[#allocation7 + $0x270] sm:$0xff] }
 0x4b8   : > { %v18192_v19 = vunpack.i.h.bf16 %v18190_v47  ;;  %v18191_v38 = vunpack.i.l.bf16 %v18190_v47 }
 0x4ba   : > { %v5063_v29 = vsel %vm367_vm1, %v18182_v62, %v18191_v38  ;;  %v5064_v41 = vsel %vm367_vm1, %v18191_v38, %v18192_v19 }
 0x4bb   : > { %18454 = vrot.lane.b32.xlu0 %v21163_v23, %s19528_s12  ;;  %7228 = vperm.xlu1 %17897, %v14661_v46   ;;  %v18195_v27 = vpop.permute.xlu0 %18194  ;;  %v16376_v50 = vpack.c.bf16 %v5064_v41, %v5061_v59  ;;  %v16378_v51 = vpack.c.bf16 %v5063_v29, %v5060_v45  ;;  %v5011_v45 = vld [vmem:[#allocation7 + $0x278] sm:$0xff] }
 0x4bc   : > { %v18197_v0 = vunpack.i.h.bf16 %v18195_v27  ;;  %v18196_v60 = vunpack.i.l.bf16 %v18195_v27 }
 0x4bd   : > { %16377 = vmatprep.subr.bf16.mxu0 %v16376_v50 }
 0x4be   : > { %16379 = vmatpush1.bf16.msra.mxu0 %v16378_v51  ;;  %v5067_v25 = vsel %vm367_vm1, %v18196_v60, %v18197_v0 }
 0x4bf   : > { %7233 = vperm.xlu0 %17896, %v14662_v42   ;;  %7238 = vperm.xlu1 %17897, %v14663_v53   ;;  %v18205_v33 = vpop.permute.xlu0 %18204  ;;  %v18200_v44 = vpop.permute.xlu1 %18199 }
 0x4c0   : > { %v18207_v34 = vunpack.i.h.bf16 %v18205_v33  ;;  %v18206_v39 = vunpack.i.l.bf16 %v18205_v33  ;;  %v18202_v31 = vunpack.i.h.bf16 %v18200_v44  ;;  %v18201_v7 = vunpack.i.l.bf16 %v18200_v44 }
 0x4c2   : > { %v5066_v26 = vsel %vm367_vm1, %v18206_v39, %v18196_v60  ;;  %v5069_v49 = vsel %vm367_vm1, %v18207_v34, %v18201_v7  ;;  %v5070_v23 = vsel %vm367_vm1, %v18201_v7, %v18202_v31 }
 0x4c3   : > { %7243 = vperm.xlu0 %17896, %v14664_v5   ;;  %v16380_v54 = vpack.c.bf16 %v5070_v23, %v5067_v25  ;;  %v16382_v43 = vpack.c.bf16 %v5069_v49, %v5066_v26 }
 0x4c5   : > { %16381 = vmatprep.subr.bf16.mxu0 %v16380_v54 }
 0x4c6   : > { %16383 = vmatpush1.bf16.msra.mxu0 %v16382_v43 }
 0x4c9   : > { %v18210_v3 = vpop.permute.xlu1 %18209  ;;  %14589 = vmatmul.mubr.msk.f32.vlgmr.msra.gmra.mrb[20].mxu0 %vm392_vm0, %v5008_v1 }
 0x4ca   : > { %v18212_v28 = vunpack.i.h.bf16 %v18210_v3  ;;  %v18211_v56 = vunpack.i.l.bf16 %v18210_v3  ;;  %5166 = vmatprep.mubr.f32.mxu0 %v21292_v30 }
 0x4cc   : > { %v5062_v2 = vsel %vm367_vm1, %v18187_v16, %v18211_v56  ;;  %v5065_v36 = vsel %vm367_vm1, %v18192_v19, %v18212_v28 }
 0x4cd   : > { %v18220_v18 = vpop.permute.xlu0 %18219  ;;  %v18215_v21 = vpop.permute.xlu1 %18214  ;;  %v16384_v22 = vpack.c.bf16 %v5065_v36, %v5062_v2  ;;  %14590 = vmatmul.mubr.msk.f32.gmra.mrb[22].mxu0 %vm392_vm0, %v5009_v32 }
 0x4ce   : > { %v18222_v6 = vunpack.i.h.bf16 %v18220_v18  ;;  %v18221_v24 = vunpack.i.l.bf16 %v18220_v18  ;;  %5172 = vmatprep.mubr.f32.mxu0 %v21292_v30  ;;  %v18217_v61 = vunpack.i.h.bf16 %v18215_v21  ;;  %v18216_v20 = vunpack.i.l.bf16 %v18215_v21  ;;  %v5003_v21 = vld [vmem:[#allocation7 + $0x240] sm:$0xff] }
 0x4cf   : > { %16385 = vmatprep.subr.bf16.mxu0 %v16384_v22 }
 0x4d0   : > { %16387 = vmatpush3.bf16.msra.mxu0 %v16384_v22  ;;  %v5068_v57 = vsel %vm367_vm1, %v18197_v0, %v18221_v24  ;;  %v5071_v62 = vsel %vm367_vm1, %v18202_v31, %v18222_v6  ;;  %v5303_v29 = vsel %vm611_vm2, %v18216_v20, %v18217_v61 }
 0x4d1   : > { %v18225_v13 = vpop.permute.xlu0 %18224  ;;  %v18230_v16 = vpop.permute.xlu1 %18229  ;;  %v16388_v12 = vpack.c.bf16 %v5071_v62, %v5068_v57  ;;  %14591 = vmatmul.mubr.msk.f32.gmra.mrb[24].mxu0 %vm392_vm0, %v5010_v55 }
 0x4d2   : > { %v18227_v47 = vunpack.i.h.bf16 %v18225_v13  ;;  %v18226_v46 = vunpack.i.l.bf16 %v18225_v13  ;;  %v18232_v19 = vunpack.i.h.bf16 %v18230_v16  ;;  %v18231_v38 = vunpack.i.l.bf16 %v18230_v16  ;;  %5178 = vmatprep.mubr.f32.mxu0 %v21292_v30  ;;  %v5004_v16 = vld [vmem:[#allocation7 + $0x248] sm:$0xff] }
 0x4d3   : > { %16389 = vmatprep.subr.bf16.mxu0 %v16388_v12 }
 0x4d4   : > { %16391 = vmatpush3.bf16.msra.mxu0 %v16388_v12  ;;  %v5306_v59 = vsel %vm611_vm2, %v18226_v46, %v18227_v47  ;;  %v5305_v41 = vsel %vm611_vm2, %v18232_v19, %v18226_v46  ;;  %v5302_v27 = vsel %vm611_vm2, %v18231_v38, %v18216_v20 }
 0x4d5   : > { %v18235_v50 = vpop.permute.xlu0 %18234  ;;  %v18240_v51 = vpop.permute.xlu1 %18239  ;;  %v16392_v42 = vpack.c.bf16 %v5306_v59, %v5303_v29  ;;  %14592 = vmatmul.mubr.msk.f32.gmra.mrb[26].mxu0 %vm392_vm0, %v5011_v45  ;;  %v16394_v44 = vpack.c.bf16 %v5305_v41, %v5302_v27 }
 0x4d6   : > { %v18237_v53 = vunpack.i.h.bf16 %v18235_v50  ;;  %v18236_v0 = vunpack.i.l.bf16 %v18235_v50  ;;  %v18242_v60 = vunpack.i.h.bf16 %v18240_v51  ;;  %v18241_v33 = vunpack.i.l.bf16 %v18240_v51  ;;  %15592 = vmatprep.mubr.msk.f32.mxu0 %vm392_vm0, %v5008_v1 }
 0x4d7   : > { %16393 = vmatprep.subr.bf16.mxu0 %v16392_v42 }
 0x4d8   : > { %v5309_v5 = vsel %vm611_vm2, %v18236_v0, %v18237_v53  ;;  %v5312_v34 = vsel %vm611_vm2, %v18241_v33, %v18242_v60 }
 0x4d9   : > { %v18245_v39 = vpop.permute.xlu0 %18244  ;;  %v18250_v31 = vpop.permute.xlu1 %18249  ;;  %15593 = vmatmul.mubr.msk.f32.vlgmr.msra.gmra.mrb[28].mxu0 %vm392_vm0, %v5009_v32  ;;  %v16396_v7 = vpack.c.bf16 %v5312_v34, %v5309_v5 }
 0x4da   : > { %v18247_v26 = vunpack.i.h.bf16 %v18245_v39  ;;  %v18246_v49 = vunpack.i.l.bf16 %v18245_v39  ;;  %v18252_v25 = vunpack.i.h.bf16 %v18250_v31  ;;  %v18251_v23 = vunpack.i.l.bf16 %v18250_v31  ;;  %16395 = vmatpush1.bf16.msra.mxu0 %v16394_v44  ;;  %15595 = vmatprep.mubr.msk.f32.mxu0 %vm392_vm0, %v5010_v55 }
 0x4db   : > { %16397 = vmatprep.subr.bf16.mxu0 %v16396_v7 }
 0x4dc   : > { %v5308_v54 = vsel %vm611_vm2, %v18246_v49, %v18236_v0  ;;  %v5311_v43 = vsel %vm611_vm2, %v18247_v26, %v18241_v33  ;;  %v5304_v1 = vsel %vm611_vm2, %v18217_v61, %v18251_v23  ;;  %v5307_v3 = vsel %vm611_vm2, %v18227_v47, %v18252_v25 }
 0x4dd   : > { %v18260_v28 = vpop.permute.xlu0 %18259  ;;  %v21317_v56 = vpop.permute.xlu1 %18254  ;;  %15596 = vmatmul.mubr.msk.f32.gmra.mrb[30].mxu0 %vm392_vm0, %v5011_v45  ;;  %v16398_v32 = vpack.c.bf16 %v5311_v43, %v5308_v54  ;;  %v16400_v2 = vpack.c.bf16 %v5307_v3, %v5304_v1  ;;  %v5005_v45 = vld [vmem:[#allocation7 + $0x250] sm:$0xff] }
 0x4de   : > { %v18262_v36 = vunpack.i.h.bf16 %v18260_v28  ;;  %v18261_v18 = vunpack.i.l.bf16 %v18260_v28  ;;  %5402 = vmatprep.mubr.f32.mxu0 %v21292_v30  ;;  %v18257_v22 = vunpack.i.h.bf16 %v21317_v56  ;;  %v18256_v6 = vunpack.i.l.bf16 %v21317_v56 }
 0x4df   : > { %16399 = vmatpush1.bf16.msra.mxu0 %v16398_v32 }
 0x4e0   : > { %16401 = vmatprep.subr.bf16.mxu0 %v16400_v2  ;;  %v5310_v24 = vsel %vm611_vm2, %v18237_v53, %v18261_v18  ;;  %v5313_v55 = vsel %vm611_vm2, %v18242_v60, %v18262_v36  ;;  %v5550_v12 = vsel %vm859_vm3, %v18256_v6, %v18257_v22  ;;  %v5006_v53 = vld [vmem:[#allocation7 + $0x258] sm:$0xff] }
 0x4e1   : > { %v18265_v61 = vpop.permute.xlu0 %18264  ;;  %v18270_v20 = vpop.permute.xlu1 %18269  ;;  %v16404_v57 = vpack.c.bf16 %v5313_v55, %v5310_v24 }
 0x4e2   : > { %v18267_v62 = vunpack.i.h.bf16 %v18265_v61  ;;  %v18266_v13 = vunpack.i.l.bf16 %v18265_v61  ;;  %14597 = vmatmul.mubr.msk.f32.vlgmr.msra.gmra.mrb[20].mxu0 %vm392_vm0, %v5003_v21  ;;  %v18272_v59 = vunpack.i.h.bf16 %v18270_v20  ;;  %v18271_v41 = vunpack.i.l.bf16 %v18270_v20 }
 0x4e3   : > { %16403 = vmatpush3.bf16.msra.mxu0 %v16400_v2  ;;  %5408 = vmatprep.mubr.f32.mxu0 %v21292_v30 }
 0x4e4   : > { %16405 = vmatprep.subr.bf16.mxu0 %v16404_v57  ;;  %v5553_v47 = vsel %vm859_vm3, %v18266_v13, %v18267_v62  ;;  %v5552_v60 = vsel %vm859_vm3, %v18272_v59, %v18266_v13  ;;  %v5549_v33 = vsel %vm859_vm3, %v18271_v41, %v18256_v6  ;;  %v5513_v6 = vld [vmem:[#allocation7 + $0x280] sm:$0xff] }
 0x4e5   : > { %v18275_v46 = vpop.permute.xlu0 %18274  ;;  %v16408_v19 = vpack.c.bf16 %v5553_v47, %v5550_v12  ;;  %v18280_v38 = vpop.permute.xlu1 %18279  ;;  %v16410_v49 = vpack.c.bf16 %v5552_v60, %v5549_v33 }
 0x4e6   : > { %14598 = vmatmul.mubr.msk.f32.gmra.mrb[22].mxu0 %vm392_vm0, %v5004_v16  ;;  %v18277_v27 = vunpack.i.h.bf16 %v18275_v46  ;;  %v18276_v50 = vunpack.i.l.bf16 %v18275_v46  ;;  %v18282_v51 = vunpack.i.h.bf16 %v18280_v38  ;;  %v18281_v42 = vunpack.i.l.bf16 %v18280_v38 }
 0x4e7   : > { %16407 = vmatpush3.bf16.msra.mxu0 %v16404_v57  ;;  %5414 = vmatprep.mubr.f32.mxu0 %v21292_v30 }
 0x4e8   : > { %16409 = vmatprep.subr.bf16.mxu0 %v16408_v19  ;;  %v5556_v7 = vsel %vm859_vm3, %v18276_v50, %v18277_v27  ;;  %v5559_v26 = vsel %vm859_vm3, %v18281_v42, %v18282_v51  ;;  %v5515_v19 = vld [vmem:[#allocation7 + $0x290] sm:$0xff] }
 0x4e9   : > { %v18285_v29 = vpop.permute.xlu0 %18284  ;;  %v18290_v0 = vpop.permute.xlu1 %18289  ;;  %v16412_v43 = vpack.c.bf16 %v5559_v26, %v5556_v7 }
 0x4ea   : > { %14599 = vmatmul.mubr.msk.f32.gmra.mrb[24].mxu0 %vm392_vm0, %v5005_v45  ;;  %v18287_v44 = vunpack.i.h.bf16 %v18285_v29  ;;  %v18286_v5 = vunpack.i.l.bf16 %v18285_v29  ;;  %v18292_v39 = vunpack.i.h.bf16 %v18290_v0  ;;  %v18291_v31 = vunpack.i.l.bf16 %v18290_v0 }
 0x4eb   : > { %5420 = vmatprep.mubr.f32.mxu0 %v21292_v30 }
 0x4ec   : > { %v5555_v25 = vsel %vm859_vm3, %v18286_v5, %v18276_v50  ;;  %v5558_v23 = vsel %vm859_vm3, %v18287_v44, %v18281_v42  ;;  %v5551_v28 = vsel %vm859_vm3, %v18257_v22, %v18291_v31  ;;  %v5554_v56 = vsel %vm859_vm3, %v18267_v62, %v18292_v39  ;;  %v5514_v62 = vld [vmem:[#allocation7 + $0x288] sm:$0xff] }
 0x4ed   : > { %v18300_v34 = vpop.permute.xlu0 %18299  ;;  %v21341_v54 = vpop.permute.xlu1 %18294  ;;  %v16414_v2 = vpack.c.bf16 %v5558_v23, %v5555_v25  ;;  %v16416_v36 = vpack.c.bf16 %v5554_v56, %v5551_v28  ;;  %v5772_v56 = vld [vmem:[#allocation7 + $0x2a0] sm:$0xff] }
 0x4ee   : > { %14600 = vmatmul.mubr.msk.f32.gmra.mrb[26].mxu0 %vm392_vm0, %v5006_v53  ;;  %v18302_v1 = vunpack.i.h.bf16 %v18300_v34  ;;  %v18301_v3 = vunpack.i.l.bf16 %v18300_v34  ;;  %v18297_v61 = vunpack.i.h.bf16 %v21341_v54  ;;  %v18296_v20 = vunpack.i.l.bf16 %v21341_v54 }
 0x4ef   : > { %15606 = vmatprep.mubr.msk.f32.mxu0 %vm392_vm0, %v5003_v21 }
 0x4f0   : > { %v5557_v24 = vsel %vm859_vm3, %v18277_v27, %v18301_v3  ;;  %v5560_v22 = vsel %vm859_vm3, %v18282_v51, %v18302_v1  ;;  %v5809_v12 = vsel %vm1119_vm4, %v18296_v20, %v18297_v61  ;;  %v5516_v51 = vld [vmem:[#allocation7 + $0x298] sm:$0xff] }
 0x4f1   : > { %v21347_v32 = vpop.permute.xlu0 %18304  ;;  %v18310_v55 = vpop.permute.xlu1 %18309  ;;  %v16420_v57 = vpack.c.bf16 %v5560_v22, %v5557_v24  ;;  %v5775_v22 = vld [vmem:[#allocation7 + $0x2b8] sm:$0xff]  ;;  %v13034_v24 = vld [vmem:[#allocation7 + $0x628] sm:$0xff] }
 0x4f2   : > { %15607 = vmatmul.mubr.msk.f32.vlgmr.msra.gmra.mrb[28].mxu0 %vm392_vm0, %v5004_v16  ;;  %v18307_v18 = vunpack.i.h.bf16 %v21347_v32  ;;  %v18306_v21 = vunpack.i.l.bf16 %v21347_v32  ;;  %v18312_v38 = vunpack.i.h.bf16 %v18310_v55 }
 0x4f3   : > { %16411 = vmatpush1.bf16.msra.mxu0 %v16410_v49  ;;  %15609 = vmatprep.mubr.msk.f32.mxu0 %vm392_vm0, %v5005_v45  ;;  %v18311_v45 = vunpack.i.l.bf16 %v18310_v55  ;;  %v19320_v55 = vpack.c.bf16 %v21112_v48, %v21095_v15 }
 0x4f4   : > { %16413 = vmatprep.subr.bf16.mxu0 %v16412_v43  ;;  %v5812_v13 = vsel %vm1119_vm4, %v18306_v21, %v18307_v18 }
 0x4f5   : > { %v18315_v16 = vpop.permute.xlu0 %18314  ;;  %v18320_v47 = vpop.permute.xlu1 %18319  ;;  %v16424_v46 = vpack.c.bf16 %v5812_v13, %v5809_v12  ;;  %v5808_v0 = vsel %vm1119_vm4, %v18311_v45, %v18296_v20  ;;  %v19323_v20 = vpack.c.bf16 %v21156_v4, %v21138_v9  ;;  %v6031_v13 = vld [vmem:[#allocation7 + $0x2c0] sm:$0xff] }
 0x4f6   : > { %15610 = vmatmul.mubr.msk.f32.gmra.mrb[30].mxu0 %vm392_vm0, %v5006_v53  ;;  %v18317_v59 = vunpack.i.h.bf16 %v18315_v16  ;;  %v18316_v41 = vunpack.i.l.bf16 %v18315_v16  ;;  %v18322_v27 = vunpack.i.h.bf16 %v18320_v47  ;;  %v18321_v50 = vunpack.i.l.bf16 %v18320_v47 }
 0x4f7   : > { %16415 = vmatpush1.bf16.msra.mxu0 %v16414_v2  ;;  %5649 = vmatprep.mubr.f32.mxu0 %v21292_v30  ;;  %v5811_v53 = vsel %vm1119_vm4, %v18312_v38, %v18306_v21  ;;  %v5774_v21 = vld [vmem:[#allocation7 + $0x2b0] sm:$0xff] }
 0x4f8   : > { %16417 = vmatprep.subr.bf16.mxu0 %v16416_v36  ;;  %v5815_v34 = vsel %vm1119_vm4, %v18316_v41, %v18317_v59  ;;  %v5818_v39 = vsel %vm1119_vm4, %v18321_v50, %v18322_v27  ;;  %v16426_v7 = vpack.c.bf16 %v5811_v53, %v5808_v0 }
 0x4f9   : > { %v18325_v29 = vpop.permute.xlu0 %18324  ;;  %v18330_v42 = vpop.permute.xlu1 %18329  ;;  %v16428_v25 = vpack.c.bf16 %v5818_v39, %v5815_v34 }
 0x4fa   : > { %14605 = vmatmul.mubr.msk.f32.vlgmr.msra.gmra.mrb[20].mxu0 %vm392_vm0, %v5513_v6  ;;  %v18327_v60 = vunpack.i.h.bf16 %v18325_v29  ;;  %v18326_v33 = vunpack.i.l.bf16 %v18325_v29  ;;  %v18332_v44 = vunpack.i.h.bf16 %v18330_v42  ;;  %v18331_v5 = vunpack.i.l.bf16 %v18330_v42 }
 0x4fb   : > { %16419 = vmatpush3.bf16.msra.mxu0 %v16416_v36  ;;  %5655 = vmatprep.mubr.f32.mxu0 %v21292_v30 }
 0x4fc   : > { %16421 = vmatprep.subr.bf16.mxu0 %v16420_v57  ;;  %v5814_v26 = vsel %vm1119_vm4, %v18326_v33, %v18316_v41  ;;  %v5817_v49 = vsel %vm1119_vm4, %v18327_v60, %v18321_v50  ;;  %v5810_v43 = vsel %vm1119_vm4, %v18297_v61, %v18331_v5  ;;  %v5813_v1 = vsel %vm1119_vm4, %v18307_v18, %v18332_v44  ;;  %v5773_v18 = vld [vmem:[#allocation7 + $0x2a8] sm:$0xff] }
 0x4fd   : > { %v18335_v31 = vpop.permute.xlu0 %18334  ;;  %v16430_v3 = vpack.c.bf16 %v5817_v49, %v5814_v26  ;;  %v16432_v28 = vpack.c.bf16 %v5813_v1, %v5810_v43 }
 0x4fe   : > { %14606 = vmatmul.mubr.msk.f32.gmra.mrb[22].mxu0 %vm392_vm0, %v5514_v62  ;;  %v18337_v23 = vunpack.i.h.bf16 %v18335_v31  ;;  %v18336_v54 = vunpack.i.l.bf16 %v18335_v31 }
 0x4ff   : > { %16423 = vmatpush3.bf16.msra.mxu0 %v16420_v57  ;;  %5661 = vmatprep.mubr.f32.mxu0 %v21292_v30  ;;  %v16448_v57 = vpack.c.bf16 %v21182_v63, %v21184_v58  ;;  %v16452_v63 = vpack.c.bf16 %v21189_v14, %v21191_v17 }
 0x500   : > { %16425 = vmatprep.subr.bf16.mxu0 %v16424_v46  ;;  %v5816_v32 = vsel %vm1119_vm4, %v18317_v59, %v18336_v54  ;;  %v5819_v2 = vsel %vm1119_vm4, %v18322_v27, %v18337_v23  ;;  %v6033_v46 = vld [vmem:[#allocation7 + $0x2d0] sm:$0xff]  ;;  %v6034_v27 = vld [vmem:[#allocation7 + $0x2d8] sm:$0xff]  ;;  %v6234_v23 = vld [vmem:[#allocation7 + $0x2e0] sm:$0xff] }
 0x501   : > { %v16436_v36 = vpack.c.bf16 %v5819_v2, %v5816_v32 }
 0x502   : > { %14607 = vmatmul.mubr.msk.f32.gmra.mrb[24].mxu0 %vm392_vm0, %v5515_v19 }
 0x503   : > { %5667 = vmatprep.mubr.f32.mxu0 %v21292_v30 }
 0x506   : > { %14608 = vmatmul.mubr.msk.f32.gmra.mrb[26].mxu0 %vm392_vm0, %v5516_v51 }
 0x507   : > { %15620 = vmatprep.mubr.msk.f32.mxu0 %vm392_vm0, %v5513_v6  ;;  %v19317_v6 = vpack.c.bf16 %v21117_v35, %v21100_v37  ;;  %v21399_v37 = vpop.permute.xlu1 %18339  ;;  %v18345_v35 = vpop.permute.xlu0 %18344 }
 0x508   : > { %v18347_v15 = vunpack.i.h.bf16 %v18345_v35  ;;  %v18346_v48 = vunpack.i.l.bf16 %v18345_v35  ;;  %v18342_v9 = vunpack.i.h.bf16 %v21399_v37  ;;  %v18341_v4 = vunpack.i.l.bf16 %v21399_v37 }
 0x50a   : > { %15621 = vmatmul.mubr.msk.f32.vlgmr.msra.gmra.mrb[28].mxu0 %vm392_vm0, %v5514_v62  ;;  %v19326_v62 = vpack.c.bf16 %v21150_v40, %v21131_v10  ;;  %v6032_v10 = vld [vmem:[#allocation7 + $0x2c8] sm:$0xff]  ;;  %v6265_v40 = vsel %vm1574_vm5, %v18346_v48, %v18347_v15  ;;  %v6263_v12 = vsel %vm1574_vm5, %v18341_v4, %v18342_v9  ;;  %v16464_v26 = vpack.c.bf16 %v18347_v15, %v18342_v9  ;;  %v6237_v15 = vld [vmem:[#allocation7 + $0x2f8] sm:$0xff] }
 0x50b   : > { %16427 = vmatpush1.bf16.msra.mxu0 %v16426_v7  ;;  %15623 = vmatprep.mubr.msk.f32.mxu0 %vm392_vm0, %v5515_v19  ;;  %v18350_v16 = vpop.permute.xlu1 %18349  ;;  %v18360_v58 = vpop.permute.xlu0 %18359  ;;  %v16456_v47 = vpack.c.bf16 %v6265_v40, %v6263_v12 }
 0x50c   : > { %16429 = vmatprep.subr.bf16.mxu0 %v16428_v25  ;;  %v18352_v14 = vunpack.i.h.bf16 %v18350_v16  ;;  %v18351_v17 = vunpack.i.l.bf16 %v18350_v16  ;;  %v18362_v38 = vunpack.i.h.bf16 %v18360_v58  ;;  %v18361_v45 = vunpack.i.l.bf16 %v18360_v58 }
 0x50e   : > { %15624 = vmatmul.mubr.msk.f32.gmra.mrb[30].mxu0 %vm392_vm0, %v5516_v51  ;;  %v6264_v50 = vsel %vm1574_vm5, %v18352_v14, %v18346_v48  ;;  %v6262_v51 = vsel %vm1574_vm5, %v18351_v17, %v18341_v4  ;;  %v6267_v0 = vsel %vm1574_vm5, %v18361_v45, %v18362_v38 }
 0x50f   : > { %16431 = vmatpush1.bf16.msra.mxu0 %v16430_v3  ;;  %5908 = vmatprep.mubr.f32.mxu0 %v21292_v30  ;;  %v18355_v19 = vpop.permute.xlu1 %18354  ;;  %v18365_v41 = vpop.permute.xlu0 %18364  ;;  %v16458_v33 = vpack.c.bf16 %v6264_v50, %v6262_v51 }
 0x510   : > { %16433 = vmatprep.subr.bf16.mxu0 %v16432_v28  ;;  %v18357_v29 = vunpack.i.h.bf16 %v18355_v19  ;;  %v18356_v59 = vunpack.i.l.bf16 %v18355_v19  ;;  %v18367_v42 = vunpack.i.h.bf16 %v18365_v41  ;;  %v18366_v53 = vunpack.i.l.bf16 %v18365_v41 }
 0x512   : > { %14613 = vmatmul.mubr.msk.f32.vlgmr.msra.gmra.mrb[20].mxu0 %vm392_vm0, %v5772_v56  ;;  %v6269_v60 = vsel %vm1574_vm5, %v18356_v59, %v18357_v29  ;;  %v6266_v44 = vsel %vm1574_vm5, %v18366_v53, %v18361_v45  ;;  %v6268_v5 = vsel %vm1574_vm5, %v18367_v42, %v18356_v59  ;;  %v16468_v3 = vpack.c.bf16 %v18357_v29, %v18362_v38  ;;  %v6481_v38 = vld [vmem:[#allocation7 + $0x300] sm:$0xff] }
 0x513   : > { %16435 = vmatpush3.bf16.msra.mxu0 %v16432_v28  ;;  %5914 = vmatprep.mubr.f32.mxu0 %v21292_v30  ;;  %v16460_v34 = vpack.c.bf16 %v6269_v60, %v6267_v0  ;;  %v18370_v39 = vpop.permute.xlu1 %18369  ;;  %v18375_v31 = vpop.permute.xlu0 %18374  ;;  %v16462_v7 = vpack.c.bf16 %v6268_v5, %v6266_v44  ;;  %v6235_v28 = vld [vmem:[#allocation7 + $0x2e8] sm:$0xff]  ;;  %v6483_v0 = vld [vmem:[#allocation7 + $0x310] sm:$0xff] }
 0x514   : > { %16437 = vmatprep.subr.bf16.mxu0 %v16436_v36  ;;  %v18377_v49 = vunpack.i.h.bf16 %v18375_v31  ;;  %v18376_v25 = vunpack.i.l.bf16 %v18375_v31  ;;  %v18372_v54 = vunpack.i.h.bf16 %v18370_v39  ;;  %v18371_v43 = vunpack.i.l.bf16 %v18370_v39 }
 0x516   : > { %14614 = vmatmul.mubr.msk.f32.gmra.mrb[22].mxu0 %vm392_vm0, %v5773_v18  ;;  %v6510_v2 = vsel %vm22939_vm6, %v18371_v43, %v18372_v54  ;;  %v16480_v19 = vpack.c.bf16 %v18377_v49, %v18372_v54 }
 0x517   : > { %16439 = vmatpush3.bf16.msra.mxu0 %v16436_v36  ;;  %5920 = vmatprep.mubr.f32.mxu0 %v21292_v30  ;;  %v18380_v1 = vpop.permute.xlu1 %18379  ;;  %v18390_v32 = vpop.permute.xlu0 %18389 }
 0x518   : > { %19318 = vmatprep.subr.msk.bf16.mxu0 %vm20709_vm12, %v19317_v6  ;;  %v18382_v6 = vunpack.i.h.bf16 %v18380_v1  ;;  %v18391_v37 = vunpack.i.l.bf16 %v18390_v32 }
 0x51a   : > { %14615 = vmatmul.mubr.msk.f32.gmra.mrb[24].mxu0 %vm392_vm0, %v5774_v21  ;;  %v6511_v48 = vsel %vm22939_vm6, %v18382_v6, %v18376_v25 }
 0x51b   : > { %5926 = vmatprep.mubr.f32.mxu0 %v21292_v30 }
 0x51e   : > { %14616 = vmatmul.mubr.msk.f32.gmra.mrb[26].mxu0 %vm392_vm0, %v5775_v22 }
 0x51f   : > { %15634 = vmatprep.mubr.msk.f32.mxu0 %vm392_vm0, %v5772_v56  ;;  %v6512_v56 = vsel %vm22939_vm6, %v18376_v25, %v18377_v49 }
 0x520   : > { %v16472_v36 = vpack.c.bf16 %v6512_v56, %v6510_v2 }
 0x522   : > { %15635 = vmatmul.mubr.msk.f32.vlgmr.msra.gmra.mrb[28].mxu0 %vm392_vm0, %v5773_v18  ;;  %v6236_v18 = vld [vmem:[#allocation7 + $0x2f0] sm:$0xff] }
 0x523   : > { %19321 = vmatpush1.bf16.msk.msra.mxu0 %vm20726_vm13, %v19320_v55  ;;  %15637 = vmatprep.mubr.msk.f32.mxu0 %vm392_vm0, %v5774_v21  ;;  %v18385_v21 = vpop.permute.xlu1 %18384  ;;  %v18392_v55 = vunpack.i.h.bf16 %v18390_v32 }
 0x524   : > { %19324 = vmatprep.subr.msk.bf16.mxu0 %vm20709_vm12, %v19323_v20  ;;  %v18387_v35 = vunpack.i.h.bf16 %v18385_v21  ;;  %v18386_v20 = vunpack.i.l.bf16 %v18385_v21 }
 0x525   : > { %v6514_v4 = vsel %vm22939_vm6, %v18391_v37, %v18392_v55 }
 0x526   : > { %15638 = vmatmul.mubr.msk.f32.gmra.mrb[30].mxu0 %vm392_vm0, %v5775_v22  ;;  %v18381_v22 = vunpack.i.l.bf16 %v18380_v1  ;;  %v6516_v16 = vsel %vm22939_vm6, %v18386_v20, %v18387_v35  ;;  %v16484_v41 = vpack.c.bf16 %v18387_v35, %v18392_v55  ;;  %v6728_v55 = vld [vmem:[#allocation7 + $0x320] sm:$0xff] }
 0x527   : > { %19327 = vmatpush1.bf16.msk.msra.mxu0 %vm20726_vm13, %v19326_v62  ;;  %6111 = vmatprep.mubr.f32.mxu0 %v21292_v30  ;;  %v16476_v58 = vpack.c.bf16 %v6516_v16, %v6514_v4  ;;  %v18400_v12 = vpop.permute.xlu1 %18399  ;;  %v6730_v4 = vld [vmem:[#allocation7 + $0x330] sm:$0xff] }
 0x528   : > { %16449 = vmatprep.subr.bf16.mxu0 %v16448_v57  ;;  %v6509_v62 = vsel %vm22939_vm6, %v18381_v22, %v18371_v43  ;;  %v18402_v45 = vunpack.i.h.bf16 %v18400_v12  ;;  %v18401_v29 = vunpack.i.l.bf16 %v18400_v12 }
 0x52a   : > { %14621 = vmatmul.mubr.msk.f32.vlgmr.msra.gmra.mrb[20].mxu0 %vm392_vm0, %v6031_v13  ;;  %v6757_v42 = vsel %vm22990_vm15, %v18401_v29, %v18402_v45  ;;  %vm22995_vm15 = vmmov %vm22992_vm7 }
 0x52b   : > { %16451 = vmatpush3.bf16.msra.mxu0 %v16448_v57  ;;  %6117 = vmatprep.mubr.f32.mxu0 %v21292_v30  ;;  %v18395_v57 = vpop.permute.xlu0 %18394  ;;  %v18410_v59 = vpop.permute.xlu1 %18409 }
 0x52c   : > { %16453 = vmatprep.subr.bf16.mxu0 %v16452_v63  ;;  %v18396_v9 = vunpack.i.l.bf16 %v18395_v57  ;;  %v18411_v44 = vunpack.i.l.bf16 %v18410_v59 }
 0x52e   : > { %14622 = vmatmul.mubr.msk.f32.gmra.mrb[22].mxu0 %vm392_vm0, %v6032_v10  ;;  %v6756_v25 = vsel %vm22992_vm7, %v18411_v44, %v18401_v29  ;;  %v6977_v44 = vld [vmem:[#allocation7 + $0x350] sm:$0xff] }
 0x52f   : > { %16455 = vmatpush3.bf16.msra.mxu0 %v16452_v63  ;;  %6123 = vmatprep.mubr.f32.mxu0 %v21292_v30  ;;  %v16474_v63 = vpack.c.bf16 %v6511_v48, %v6509_v62  ;;  %v18415_v60 = vpop.permute.xlu1 %18414 }
 0x530   : > { %16457 = vmatprep.subr.bf16.mxu0 %v16456_v47  ;;  %v18405_v47 = vpop.permute.xlu0 %18404  ;;  %v18417_v39 = vunpack.i.h.bf16 %v18415_v60  ;;  %v18416_v31 = vunpack.i.l.bf16 %v18415_v60 }
 0x531   : > { %v18407_v14 = vunpack.i.h.bf16 %v18405_v47  ;;  %v18406_v17 = vunpack.i.l.bf16 %v18405_v47 }
 0x532   : > { %14623 = vmatmul.mubr.msk.f32.gmra.mrb[24].mxu0 %vm392_vm0, %v6033_v46 }
 0x533   : > { %6129 = vmatprep.mubr.f32.mxu0 %v21292_v30  ;;  %v6759_v50 = vsel %vm22989_vm10, %v18406_v17, %v18407_v14  ;;  %vm22994_vm10 = vmmov %vm22992_vm7  ;;  %v18430_v2 = vpop.permute.xlu1 %18429  ;;  %v16496_v21 = vpack.c.bf16 %v18407_v14, %v18402_v45 }
 0x534   : > { %v18420_v51 = vpop.permute.xlu0 %18419  ;;  %v16488_v53 = vpack.c.bf16 %v6759_v50, %v6757_v42  ;;  %v6763_v1 = vsel %vm22994_vm10, %v18416_v31, %v18417_v39  ;;  %v18431_v35 = vunpack.i.l.bf16 %v18430_v2 }
 0x535   : > { %v18422_v5 = vunpack.i.h.bf16 %v18420_v51 }
 0x536   : > { %14624 = vmatmul.mubr.msk.f32.gmra.mrb[26].mxu0 %vm392_vm0, %v6034_v27 }
 0x537   : > { %15648 = vmatprep.mubr.msk.f32.mxu0 %vm392_vm0, %v6031_v13  ;;  %v18397_v13 = vunpack.i.h.bf16 %v18395_v57  ;;  %v16500_v57 = vpack.c.bf16 %v18417_v39, %v18422_v5 }
 0x539   : > { %v6515_v40 = vsel %vm22939_vm6, %v18397_v13, %v18386_v20  ;;  %v18440_v20 = vpop.permute.xlu1 %18439 }
 0x53a   : > { %15649 = vmatmul.mubr.msk.f32.vlgmr.msra.gmra.mrb[28].mxu0 %vm392_vm0, %v6032_v10  ;;  %v6513_v10 = vsel %vm22939_vm6, %v18396_v9, %v18391_v37  ;;  %vm22996_vm6 = vmmov %vm22992_vm7  ;;  %v18432_v37 = vunpack.i.h.bf16 %v18430_v2 }
 0x53b   : > { %16459 = vmatpush1.bf16.msra.mxu0 %v16458_v33  ;;  %15651 = vmatprep.mubr.msk.f32.mxu0 %vm392_vm0, %v6033_v46  ;;  %v16478_v46 = vpack.c.bf16 %v6515_v40, %v6513_v10  ;;  %v18412_v33 = vunpack.i.h.bf16 %v18410_v59  ;;  %v18441_v10 = vunpack.i.l.bf16 %v18440_v20 }
 0x53c   : > { %16461 = vmatprep.subr.bf16.mxu0 %v16460_v34  ;;  %v18421_v34 = vunpack.i.l.bf16 %v18420_v51 }
 0x53d   : > { %v6758_v49 = vsel %vm22991_vm8, %v18412_v33, %v18406_v17  ;;  %v18445_v16 = vpop.permute.xlu1 %18444  ;;  %v6976_v33 = vld [vmem:[#allocation7 + $0x348] sm:$0xff] }
 0x53e   : > { %15652 = vmatmul.mubr.msk.f32.gmra.mrb[30].mxu0 %vm392_vm0, %v6034_v27  ;;  %v6482_v27 = vld [vmem:[#allocation7 + $0x308] sm:$0xff]  ;;  %v6761_v43 = vsel %vm22993_vm9, %v18421_v34, %v18422_v5  ;;  %v18447_v12 = vunpack.i.h.bf16 %v18445_v16  ;;  %v18446_v47 = vunpack.i.l.bf16 %v18445_v16  ;;  %v6978_v5 = vld [vmem:[#allocation7 + $0x358] sm:$0xff] }
 0x53f   : > { %16463 = vmatpush1.bf16.msra.mxu0 %v16462_v7  ;;  %6358 = vmatprep.mubr.f32.mxu0 %v21292_v30  ;;  %v18425_v7 = vpop.permute.xlu0 %18424  ;;  %v16492_v32 = vpack.c.bf16 %v6763_v1, %v6761_v43 }
 0x540   : > { %16465 = vmatprep.subr.bf16.mxu0 %v16464_v26  ;;  %v18426_v54 = vunpack.i.l.bf16 %v18425_v7 }
 0x541   : > { %v7229_v39 = vpop.permute.xlu1 %7228 }
 0x542   : > { %14629 = vmatmul.mubr.msk.f32.vlgmr.msra.gmra.mrb[20].mxu0 %vm392_vm0, %v6234_v23 }
 0x543   : > { %16467 = vmatpush3.bf16.msra.mxu0 %v16464_v26  ;;  %6364 = vmatprep.mubr.f32.mxu0 %v21292_v30  ;;  %v6484_v26 = vld [vmem:[#allocation7 + $0x318] sm:$0xff] }
 0x544   : > { %16469 = vmatprep.subr.bf16.mxu0 %v16468_v3 }
 0x546   : > { %14630 = vmatmul.mubr.msk.f32.gmra.mrb[22].mxu0 %vm392_vm0, %v6235_v28 }
 0x547   : > { %16471 = vmatpush3.bf16.msra.mxu0 %v16468_v3  ;;  %6370 = vmatprep.mubr.f32.mxu0 %v21292_v30  ;;  %v16490_v3 = vpack.c.bf16 %v6758_v49, %v6756_v25 }
 0x548   : > { %16473 = vmatprep.subr.bf16.mxu0 %v16472_v36  ;;  %v18435_v36 = vpop.permute.xlu0 %18434 }
 0x549   : > { %v18437_v6 = vunpack.i.h.bf16 %v18435_v36  ;;  %v18436_v22 = vunpack.i.l.bf16 %v18435_v36 }
 0x54a   : > { %14631 = vmatmul.mubr.msk.f32.gmra.mrb[24].mxu0 %vm392_vm0, %v6236_v18 }
 0x54b   : > { %6376 = vmatprep.mubr.f32.mxu0 %v21292_v30 }
 0x54c   : > { %v18450_v62 = vpop.permute.xlu0 %18449 }
 0x54d   : > { %v18452_v40 = vunpack.i.h.bf16 %v18450_v62 }
 0x54e   : > { %14632 = vmatmul.mubr.msk.f32.gmra.mrb[26].mxu0 %vm392_vm0, %v6237_v15 }
 0x54f   : > { %15662 = vmatprep.mubr.msk.f32.mxu0 %vm392_vm0, %v6234_v23  ;;  %v18427_v23 = vunpack.i.h.bf16 %v18425_v7  ;;  %v16516_v60 = vpack.c.bf16 %v18447_v12, %v18452_v40  ;;  %v21515_v7 = vstv %s14665_s15  ;;  %s22800_s15 = scalar_lea.vmem [#allocation10], %s17531_s14 }
 0x551   : > { %v6762_v56 = vsel %vm22996_vm6, %v18427_v23, %v18416_v31  ;;  %vm22997_vm6 = vcmask 891904  }
 0x552   : > { %15663 = vmatmul.mubr.msk.f32.vlgmr.msra.gmra.mrb[28].mxu0 %vm392_vm0, %v6235_v28  ;;  %v6760_v28 = vsel %vm22995_vm15, %v18426_v54, %v18421_v34  ;;  %v7006_v48 = vsel %vm22997_vm6, %v18436_v22, %v18437_v6  ;;  %vm22998_vm8 = vmmov %vm22997_vm6  ;;  %v21511_v34 = vpack.i.bf16 %v21292_v30, %v21292_v30 }
 0x553   : > { %16475 = vmatpush1.bf16.msra.mxu0 %v16474_v63  ;;  %15665 = vmatprep.mubr.msk.f32.mxu0 %vm392_vm0, %v6236_v18  ;;  %v16494_v18 = vpack.c.bf16 %v6762_v56, %v6760_v28  ;;  %v7004_v13 = vsel %vm22998_vm8, %v18431_v35, %v18432_v37  ;;  %v18442_v63 = vunpack.i.h.bf16 %v18440_v20  ;;  %vm22999_vm7 = vmmov %vm22997_vm6 }
 0x554   : > { %16477 = vmatprep.subr.bf16.mxu0 %v16476_v58  ;;  %v16504_v9 = vpack.c.bf16 %v7006_v48, %v7004_v13  ;;  %v18451_v58 = vunpack.i.l.bf16 %v18450_v62  ;;  %vm23000_vm9 = vmmov %vm22997_vm6  ;;  %18459 = vrot.lane.b32.xlu1 %v21511_v34, %s19520_s24 }
 0x555   : > { %v7005_v14 = vsel %vm22999_vm7, %v18442_v63, %v18436_v22  ;;  %v7003_v17 = vsel %vm23000_vm9, %v18441_v10, %v18431_v35  ;;  %vm23001_vm10 = vmmov %vm22997_vm6 }
 0x556   : > { %15666 = vmatmul.mubr.msk.f32.gmra.mrb[30].mxu0 %vm392_vm0, %v6237_v15  ;;  %v6729_v15 = vld [vmem:[#allocation7 + $0x328] sm:$0xff]  ;;  %v7008_v29 = vsel %vm23001_vm10, %v18451_v58, %v18452_v40  ;;  %vm23002_vm15 = vmmov %vm22997_vm6  ;;  %vm23004_vm10 = vcmp.eq.s32.totalorder %v22981_v11, 1 }
 0x557   : > { %16479 = vmatpush1.bf16.msra.mxu0 %v16478_v46  ;;  %6605 = vmatprep.mubr.f32.mxu0 %v21292_v30  ;;  %v18455_v46 = vpop.permute.xlu0 %18454  ;;  %v7010_v59 = vsel %vm23002_vm15, %v18446_v47, %v18447_v12  ;;  %vm23003_vm8 = vmmov %vm22997_vm6 }
 0x558   : > { %16481 = vmatprep.subr.bf16.mxu0 %v16480_v19  ;;  %v18456_v45 = vunpack.i.l.bf16 %v18455_v46  ;;  %v16508_v51 = vpack.c.bf16 %v7010_v59, %v7008_v29 }
 0x55a   : > { %14637 = vmatmul.mubr.msk.f32.vlgmr.msra.gmra.mrb[20].mxu0 %vm392_vm0, %v6481_v38 }
 0x55b   : > { %16483 = vmatpush3.bf16.msra.mxu0 %v16480_v19  ;;  %6611 = vmatprep.mubr.f32.mxu0 %v21292_v30  ;;  %v6731_v19 = vld [vmem:[#allocation7 + $0x338] sm:$0xff]  ;;  %v7234_v54 = vpop.permute.xlu0 %7233 }
 0x55c   : > { %16485 = vmatprep.subr.bf16.mxu0 %v16484_v41 }
 0x55e   : > { %14638 = vmatmul.mubr.msk.f32.gmra.mrb[22].mxu0 %vm392_vm0, %v6482_v27 }
 0x55f   : > { %16487 = vmatpush3.bf16.msra.mxu0 %v16484_v41  ;;  %6617 = vmatprep.mubr.f32.mxu0 %v21292_v30  ;;  %v16506_v41 = vpack.c.bf16 %v7005_v14, %v7003_v17 }
 0x560   : > { %16489 = vmatprep.subr.bf16.mxu0 %v16488_v53  ;;  %v16512_v53 = vpack.c.bf16 %v18437_v6, %v18432_v37 }
 0x562   : > { %14639 = vmatmul.mubr.msk.f32.gmra.mrb[24].mxu0 %vm392_vm0, %v6483_v0 }
 0x563   : > { %6623 = vmatprep.mubr.f32.mxu0 %v21292_v30 }
 0x566   : > { %14640 = vmatmul.mubr.msk.f32.gmra.mrb[26].mxu0 %vm392_vm0, %v6484_v26 }
 0x567   : > { %15676 = vmatprep.mubr.msk.f32.mxu0 %vm392_vm0, %v6481_v38  ;;  %v18457_v38 = vunpack.i.h.bf16 %v18455_v46 }
 0x569   : > { %v7009_v50 = vsel %vm23003_vm8, %v18457_v38, %v18446_v47  ;;  %vm23005_vm8 = vmmov %vm23004_vm10 }
 0x56a   : > { %15677 = vmatmul.mubr.msk.f32.vlgmr.msra.gmra.mrb[28].mxu0 %vm392_vm0, %v6482_v27  ;;  %v7007_v27 = vsel %vm22997_vm6, %v18456_v45, %v18451_v58 }
 0x56b   : > { %16491 = vmatpush1.bf16.msra.mxu0 %v16490_v3  ;;  %15679 = vmatprep.mubr.msk.f32.mxu0 %vm392_vm0, %v6483_v0  ;;  %v16510_v42 = vpack.c.bf16 %v7009_v50, %v7007_v27  ;;  %v6975_v0 = vld [vmem:[#allocation7 + $0x340] sm:$0xff] }
 0x56c   : > { %16493 = vmatprep.subr.bf16.mxu0 %v16492_v32 }
 0x56e   : > { %15680 = vmatmul.mubr.msk.f32.gmra.mrb[30].mxu0 %vm392_vm0, %v6484_v26 }
 0x56f   : > { %16495 = vmatpush1.bf16.msra.mxu0 %v16494_v18  ;;  %6852 = vmatprep.mubr.f32.mxu0 %v21292_v30 }
 0x570   : > { %16497 = vmatprep.subr.bf16.mxu0 %v16496_v21 }
 0x572   : > { %14645 = vmatmul.mubr.msk.f32.vlgmr.msra.gmra.mrb[20].mxu0 %vm392_vm0, %v6728_v55 }
 0x573   : > { %16499 = vmatpush3.bf16.msra.mxu0 %v16496_v21  ;;  %6858 = vmatprep.mubr.f32.mxu0 %v21292_v30  ;;  %v7239_v21 = vpop.permute.xlu1 %7238 }
 0x574   : > { %16501 = vmatprep.subr.bf16.mxu0 %v16500_v57 }
 0x576   : > { %14646 = vmatmul.mubr.msk.f32.gmra.mrb[22].mxu0 %vm392_vm0, %v6729_v15 }
 0x577   : > { %16503 = vmatpush3.bf16.msra.mxu0 %v16500_v57  ;;  %6864 = vmatprep.mubr.f32.mxu0 %v21292_v30 }
 0x578   : > { %16505 = vmatprep.subr.bf16.mxu0 %v16504_v9 }
 0x57a   : > { %14647 = vmatmul.mubr.msk.f32.gmra.mrb[24].mxu0 %vm392_vm0, %v6730_v4 }
 0x57b   : > { %6870 = vmatprep.mubr.f32.mxu0 %v21292_v30 }
 0x57e   : > { %14648 = vmatmul.mubr.msk.f32.gmra.mrb[26].mxu0 %vm392_vm0, %v6731_v19 }
 0x57f   : > { %15690 = vmatprep.mubr.msk.f32.mxu0 %vm392_vm0, %v6728_v55 }
 0x582   : > { %15691 = vmatmul.mubr.msk.f32.vlgmr.msra.gmra.mrb[28].mxu0 %vm392_vm0, %v6729_v15 }
 0x583   : > { %16507 = vmatpush1.bf16.msra.mxu0 %v16506_v41  ;;  %15693 = vmatprep.mubr.msk.f32.mxu0 %vm392_vm0, %v6730_v4  ;;  %v7244_v4 = vpop.permute.xlu0 %7243 }
 0x584   : > { %16509 = vmatprep.subr.bf16.mxu0 %v16508_v51 }
 0x586   : > { %15694 = vmatmul.mubr.msk.f32.gmra.mrb[30].mxu0 %vm392_vm0, %v6731_v19 }
 0x587   : > { %16511 = vmatpush1.bf16.msra.mxu0 %v16510_v42  ;;  %7099 = vmatprep.mubr.f32.mxu0 %v21292_v30 }
 0x588   : > { %16513 = vmatprep.subr.bf16.mxu0 %v16512_v53 }
 0x58a   : > { %14653 = vmatmul.mubr.msk.f32.vlgmr.msra.gmra.mrb[20].mxu0 %vm392_vm0, %v6975_v0 }
 0x58b   : > { %16515 = vmatpush3.bf16.msra.mxu0 %v16512_v53  ;;  %7105 = vmatprep.mubr.f32.mxu0 %v21292_v30 }
 0x58c   : > { %16517 = vmatprep.subr.bf16.mxu0 %v16516_v60 }
 0x58e   : > { %14654 = vmatmul.mubr.msk.f32.gmra.mrb[22].mxu0 %vm392_vm0, %v6976_v33 }
 0x58f   : > { %16519 = vmatpush3.bf16.msra.mxu0 %v16516_v60  ;;  %7111 = vmatprep.mubr.f32.mxu0 %v21292_v30 }
 0x592   : > { %14655 = vmatmul.mubr.msk.f32.gmra.mrb[24].mxu0 %vm392_vm0, %v6977_v44 }
 0x593   : > { %7117 = vmatprep.mubr.f32.mxu0 %v21292_v30 }
 0x596   : > { %14656 = vmatmul.mubr.msk.f32.gmra.mrb[26].mxu0 %vm392_vm0, %v6978_v5 }
 0x597   : > { %15704 = vmatprep.mubr.msk.f32.mxu0 %vm392_vm0, %v6975_v0 }
 0x59a   : > { %15705 = vmatmul.mubr.msk.f32.vlgmr.msra.gmra.mrb[28].mxu0 %vm392_vm0, %v6976_v33 }
 0x59b   : > { %15707 = vmatprep.mubr.msk.f32.mxu0 %vm392_vm0, %v6977_v44 }
 0x59e   : > { %15708 = vmatmul.mubr.msk.f32.gmra.mrb[30].mxu0 %vm392_vm0, %v6978_v5 }
 0x59f   : > { %9828 = vmatprep.mubr.f32.mxu0 %v21292_v30 }
 0x65d   : > { %v7101_v31 = vpop.f32.mrb[20].mxu0 }
 0x65e   : > { %v7246_v26 = vadd.f32 %v7229_v39, %v7101_v31  ;;  %v7103_v49 = vpop.f32.mrb[21].mxu0 }
 0x65f   : > { %v7247_v25 = vadd.f32 %v7229_v39, %v7103_v49 }
 0x660   : > { %vm7259_vm7 = vcmp.ge.f32.partialorder %v7246_v26, 0.0  ;;  %v7272_v23 = vmul.f32 %v21515_v7, %v7246_v26 }
 0x661   : > { %vm7260_vm9 = vcmp.ge.f32.partialorder %v7247_v25, 0.0  ;;  %v7273_v43 = vmul.f32 %v21515_v7, %v7247_v25  ;;  %v7107_v30 = vpop.f32.mrb[22].mxu0 }
 0x662   : > { %v21519_v1 = vsel %vm7259_vm7, %v7246_v26, %v7272_v23  ;;  %v7249_v3 = vadd.f32 %v7234_v54, %v7107_v30  ;;  %v7109_v28 = vpop.f32.mrb[23].mxu0 }
 0x663   : > { %v7296_v56 = vsel %vm2625_vm14, %v21519_v1, 0.0  ;;  %v21524_v32 = vsel %vm7260_vm9, %v7247_v25, %v7273_v43  ;;  %v7250_v2 = vadd.f32 %v7234_v54, %v7109_v28 }
 0x664   : > { %v21529_v36 = vsel %vm23004_vm10, %v21524_v32, 0.0  ;;  %vm7262_vm15 = vcmp.ge.f32.partialorder %v7249_v3, 0.0  ;;  %v7275_v18 = vmul.f32 %v21515_v7, %v7249_v3  ;;  %vm23006_vm10 = vmmov %vm23005_vm8 }
 0x665   : > { %vm7263_vm6 = vcmp.ge.f32.partialorder %v7250_v2, 0.0  ;;  %v7276_v6 = vmul.f32 %v21515_v7, %v7250_v2  ;;  %v7113_v22 = vpop.f32.mrb[24].mxu0  ;;  %v21534_v55 = vpack.i.bf16 %v21529_v36, %v7296_v56 }
 0x666   : > { %v21536_v37 = vsel %vm7262_vm15, %v7249_v3, %v7275_v18  ;;  %v7252_v35 = vadd.f32 %v7239_v21, %v7113_v22  ;;  %v7115_v20 = vpop.f32.mrb[25].mxu0 }
 0x667   : > { %v7299_v57 = vsel %vm2625_vm14, %v21536_v37, 0.0  ;;  %v21541_v15 = vsel %vm7263_vm6, %v7250_v2, %v7276_v6  ;;  %v7253_v48 = vadd.f32 %v7239_v21, %v7115_v20  ;;  %18464 = vrot.lane.b32.xlu1 %v21534_v55, %s19520_s24 }
 0x668   : > { %v21548_v62 = vsel %vm23005_vm8, %v21541_v15, 0.0  ;;  %vm7265_vm7 = vcmp.ge.f32.partialorder %v7252_v35, 0.0  ;;  %v7278_v13 = vmul.f32 %v21515_v7, %v7252_v35  ;;  %v21551_v9 = vpack.i.bf16 %v7299_v57, %v7296_v56 }
 0x669   : > { %vm7266_vm9 = vcmp.ge.f32.partialorder %v7253_v48, 0.0  ;;  %v7279_v16 = vmul.f32 %v21515_v7, %v7253_v48  ;;  %v7119_v63 = vpop.f32.mrb[26].mxu0  ;;  %v21555_v10 = vpack.i.bf16 %v21548_v62, %v7299_v57 }
 0x66a   : > { %v21557_v40 = vsel %vm7265_vm7, %v7252_v35, %v7278_v13  ;;  %v7255_v58 = vadd.f32 %v7244_v4, %v7119_v63  ;;  %v7121_v12 = vpop.f32.mrb[27].mxu0 }
 0x66b   : > { %v7302_v47 = vsel %vm2625_vm14, %v21557_v40, 0.0  ;;  %v21562_v46 = vsel %vm7266_vm9, %v7253_v48, %v7279_v16  ;;  %v7256_v19 = vadd.f32 %v7244_v4, %v7121_v12  ;;  %18469 = vrot.lane.b32.xlu0 %v21555_v10, %s19520_s24 }
 0x66c   : > { %v21569_v14 = vsel %vm23006_vm10, %v21562_v46, 0.0  ;;  %vm7268_vm15 = vcmp.ge.f32.partialorder %v7255_v58, 0.0  ;;  %v7281_v17 = vmul.f32 %v21515_v7, %v7255_v58  ;;  %vm23007_vm10 = vcmask 556032  }
 0x66d   : > { %vm7269_vm6 = vcmp.ge.f32.partialorder %v7256_v19, 0.0  ;;  %v7282_v38 = vmul.f32 %v21515_v7, %v7256_v19  ;;  %v15706_v45 = vpop.f32.mrb[28].mxu0  ;;  %v21574_v29 = vpack.i.bf16 %v21569_v14, %v7302_v47 }
 0x66e   : > { %v21576_v59 = vsel %vm7268_vm15, %v7255_v58, %v7281_v17  ;;  %v7251_v41 = vadd.f32 %v15706_v45, %v7234_v54  ;;  %v7190_v27 = vpop.f32.mrb[29].mxu0 }
 0x66f   : > { %v7305_v50 = vsel %vm2625_vm14, %v21576_v59, 0.0  ;;  %v21581_v51 = vsel %vm7269_vm6, %v7256_v19, %v7282_v38  ;;  %v7248_v42 = vadd.f32 %v7229_v39, %v7190_v27  ;;  %18474 = vrot.lane.b32.xlu0 %v21574_v29, %s19520_s24  ;;  %vm23008_vm6 = vmmov %vm23007_vm10 }
 0x670   : > { %v21588_v53 = vsel %vm23005_vm8, %v21581_v51, 0.0  ;;  %vm7264_vm7 = vcmp.ge.f32.partialorder %v7251_v41, 0.0  ;;  %v7277_v0 = vmul.f32 %v21515_v7, %v7251_v41  ;;  %v21591_v60 = vpack.i.bf16 %v7305_v50, %v7302_v47  ;;  %v14738_v47 = vld [vmem:[%s22905_s3 + $0x60] sm:$0xff] }
 0x671   : > { %vm7261_vm9 = vcmp.ge.f32.partialorder %v7248_v42, 0.0  ;;  %v7274_v33 = vmul.f32 %v21515_v7, %v7248_v42  ;;  %v15709_v44 = vpop.f32.mrb[30].mxu0  ;;  %v18478_v5 = vpack.i.bf16 %v21588_v53, %v7305_v50 }
 0x672   : > { %v7289_v39 = vsel %vm7264_vm7, %v7251_v41, %v7277_v0  ;;  %v7257_v31 = vadd.f32 %v15709_v44, %v7244_v4  ;;  %v7200_v26 = vpop.f32.mrb[31].mxu0  ;;  %vm23009_vm7 = vmmov %vm23008_vm6  ;;  %v14739_v41 = vld [vmem:[%s22905_s3 + $0x68] sm:$0xff] }
 0x673   : > { %v7301_v49 = vsel %vm2627_vm11, %v7289_v39, 0.0  ;;  %v7286_v25 = vsel %vm7261_vm9, %v7248_v42, %v7274_v33  ;;  %v7254_v23 = vadd.f32 %v7239_v21, %v7200_v26  ;;  %18484 = vrot.lane.b32.xlu0 %v21511_v34, %s19520_s24  ;;  %18479 = vrot.lane.b32.xlu1 %v18478_v5, %s19520_s24  ;;  %vm23010_vm9 = vmmov %vm23008_vm6 }
 0x674   : > { %7313 = vst.msk [vmem:[#allocation2 + $0x40] sm:$0xff] %vm23007_vm10, %v7301_v49  ;;  %v7298_v54 = vsel %vm2627_vm11, %v7286_v25, 0.0  ;;  %vm7270_vm15 = vcmp.ge.f32.partialorder %v7257_v31, 0.0  ;;  %v7283_v43 = vmul.f32 %v21515_v7, %v7257_v31  ;;  %vm23011_vm10 = vcmask 908288  }
 0x675   : > { %7310 = vst.msk [vmem:[#allocation2 + $0x18] sm:$0xff] %vm23008_vm6, %v7298_v54  ;;  %vm7267_vm8 = vcmp.ge.f32.partialorder %v7254_v23, 0.0  ;;  %v7280_v30 = vmul.f32 %v21515_v7, %v7254_v23  ;;  %v7342_v54 = vld [vmem:[#allocation7 + $0x380] sm:$0xff]  ;;  %vm23013_vm6 = vmmov %vm23011_vm10 }
 0x676   : > { %v7295_v3 = vsel %vm7270_vm15, %v7257_v31, %v7283_v43  ;;  %v21726_v43 = vld [vmem:[#allocation2] sm:$0xff]  ;;  %vm23012_vm15 = vmmov %vm23011_vm10 }
 0x677   : > { %v7307_v28 = vsel %vm2627_vm11, %v7295_v3, 0.0  ;;  %v7292_v56 = vsel %vm7267_vm8, %v7254_v23, %v7280_v30  ;;  %v7343_v30 = vld [vmem:[#allocation7 + $0x388] sm:$0xff]  ;;  %vm23014_vm8 = vmmov %vm23013_vm6 }
 0x678   : > { %7319 = vst.msk [vmem:[#allocation2 + $0x90] sm:$0xff] %vm23009_vm7, %v7307_v28  ;;  %v7304_v2 = vsel %vm2627_vm11, %v7292_v56, 0.0  ;;  %vm23015_vm7 = vmmov %vm23013_vm6 }
 0x679   : > { %7316 = vst.msk [vmem:[#allocation2 + $0x68] sm:$0xff] %vm23010_vm9, %v7304_v2  ;;  %vm23016_vm9 = vmmov %vm23013_vm6 }
 0x67b   : > { %v21612_v18 = vld [vmem:[#allocation2 + $0x40] sm:$0xff] }
 0x67c   : > { %v21614_v21 = vld [vmem:[#allocation2 + $0x18] sm:$0xff]  ;;  %v18623_v20 = vpack.i.bf16 %v21612_v18, %v21548_v62 }
 0x67d   : > { %v18488_v6 = vpack.i.bf16 %v21612_v18, %v21614_v21 }
 0x67f   : > { %18489 = vrot.lane.b32.xlu1 %v18488_v6, %s19520_s24  ;;  %v21619_v7 = vld [vmem:[#allocation2 + $0x90] sm:$0xff] }
 0x680   : > { %v21621_v22 = vld [vmem:[#allocation2 + $0x68] sm:$0xff]  ;;  %v18633_v57 = vpack.i.bf16 %v21619_v7, %v21588_v53 }
 0x681   : > { %v18498_v35 = vpack.i.bf16 %v21619_v7, %v21621_v22 }
 0x683   : > { %18494 = vrot.lane.b32.xlu1 %v21534_v55, %s19522_s26  ;;  %18499 = vrot.lane.b32.xlu0 %v18498_v35, %s19520_s24 }
 0x687   : > { %18509 = vrot.lane.b32.xlu1 %v21511_v34, %s19522_s26  ;;  %18504 = vrot.lane.b32.xlu0 %v21555_v10, %s19522_s26 }
 0x68b   : > { %18519 = vrot.lane.b32.xlu1 %v18478_v5, %s19522_s26  ;;  %18514 = vrot.lane.b32.xlu0 %v21574_v29, %s19522_s26 }
 0x68f   : > { %18529 = vrot.lane.b32.xlu1 %v18488_v6, %s19522_s26  ;;  %18524 = vrot.lane.b32.xlu0 %v21511_v34, %s19522_s26 }
 0x693   : > { %18534 = vrot.lane.b32.xlu1 %v21534_v55, %s19523_s13  ;;  %18539 = vrot.lane.b32.xlu0 %v18498_v35, %s19522_s26 }
 0x697   : > { %18549 = vrot.lane.b32.xlu1 %v21511_v34, %s19523_s13  ;;  %18544 = vrot.lane.b32.xlu0 %v21555_v10, %s19523_s13 }
 0x69b   : > { %18559 = vrot.lane.b32.xlu1 %v18478_v5, %s19523_s13  ;;  %18554 = vrot.lane.b32.xlu0 %v21574_v29, %s19523_s13 }
 0x69f   : > { %18569 = vrot.lane.b32.xlu1 %v18488_v6, %s19523_s13  ;;  %18564 = vrot.lane.b32.xlu0 %v21511_v34, %s19523_s13 }
 0x6a3   : > { %18574 = vrot.lane.b32.xlu1 %v21534_v55, %s19524_s16  ;;  %18579 = vrot.lane.b32.xlu0 %v18498_v35, %s19523_s13  ;;  %v18618_v55 = vpack.i.bf16 %v21614_v21, %v21529_v36  ;;  %v18460_v36 = vpop.permute.xlu1 %18459 }
 0x6a4   : > { %v18462_v62 = vunpack.i.h.bf16 %v18460_v36  ;;  %v18461_v13 = vunpack.i.l.bf16 %v18460_v36 }
 0x6a7   : > { %18589 = vrot.lane.b32.xlu1 %v21511_v34, %s19524_s16  ;;  %18584 = vrot.lane.b32.xlu0 %v21555_v10, %s19524_s16 }
 0x6ab   : > { %18599 = vrot.lane.b32.xlu1 %v18478_v5, %s19524_s16  ;;  %18594 = vrot.lane.b32.xlu0 %v21574_v29, %s19524_s16  ;;  %v14740_v29 = vld [vmem:[%s22905_s3 + $0x70] sm:$0xff] }
 0x6af   : > { %18609 = vrot.lane.b32.xlu1 %v18488_v6, %s19524_s16  ;;  %18604 = vrot.lane.b32.xlu0 %v21511_v34, %s19524_s16  ;;  %v18638_v34 = vpack.i.bf16 %v21621_v22, %v21569_v14 }
 0x6b3   : > { %18619 = vrot.lane.b32.xlu1 %v18618_v55, %s19525_s23  ;;  %18614 = vrot.lane.b32.xlu0 %v18498_v35, %s19524_s16  ;;  %v7344_v35 = vld [vmem:[#allocation7 + $0x390] sm:$0xff] }
 0x6b7   : > { %18629 = vrot.lane.b32.xlu1 %v21551_v9, %s19525_s23  ;;  %18624 = vrot.lane.b32.xlu0 %v18623_v20, %s19525_s23 }
 0x6bb   : > { %18634 = vrot.lane.b32.xlu1 %v18633_v57, %s19525_s23  ;;  %18639 = vrot.lane.b32.xlu0 %v18638_v34, %s19525_s23 }
 0x6bf   : > { %18649 = vrot.lane.b32.xlu1 %v18618_v55, %s19526_s27  ;;  %18644 = vrot.lane.b32.xlu0 %v21591_v60, %s19525_s23 }
 0x6c3   : > { %18659 = vrot.lane.b32.xlu1 %v21551_v9, %s19526_s27  ;;  %18654 = vrot.lane.b32.xlu0 %v18623_v20, %s19526_s27 }
 0x6c7   : > { %18664 = vrot.lane.b32.xlu1 %v18633_v57, %s19526_s27  ;;  %18669 = vrot.lane.b32.xlu0 %v18638_v34, %s19526_s27 }
 0x6cb   : > { %18679 = vrot.lane.b32.xlu1 %v18618_v55, %s19527_s11  ;;  %18674 = vrot.lane.b32.xlu0 %v21591_v60, %s19526_s27 }
 0x6cf   : > { %18689 = vrot.lane.b32.xlu1 %v21551_v9, %s19527_s11  ;;  %18684 = vrot.lane.b32.xlu0 %v18623_v20, %s19527_s11 }
 0x6d3   : > { %18694 = vrot.lane.b32.xlu1 %v18633_v57, %s19527_s11  ;;  %18699 = vrot.lane.b32.xlu0 %v18638_v34, %s19527_s11 }
 0x6d7   : > { %18709 = vrot.lane.b32.xlu1 %v18618_v55, %s19528_s12  ;;  %18704 = vrot.lane.b32.xlu0 %v21591_v60, %s19527_s11 }
 0x6d9   : > { %v18465_v48 = vpop.permute.xlu1 %18464 }
 0x6da   : > { %v18467_v4 = vunpack.i.h.bf16 %v18465_v48  ;;  %v18466_v16 = vunpack.i.l.bf16 %v18465_v48 }
 0x6db   : > { %18719 = vrot.lane.b32.xlu1 %v21551_v9, %s19528_s12  ;;  %18714 = vrot.lane.b32.xlu0 %v18623_v20, %s19528_s12 }
 0x6dc   : > { %v7394_v12 = vsel %vm367_vm1, %v18461_v13, %v18466_v16  ;;  %v7395_v19 = vsel %vm367_vm1, %v18466_v16, %v18467_v4  ;;  %v7345_v16 = vld [vmem:[#allocation7 + $0x398] sm:$0xff] }
 0x6dd   : > { %v18470_v63 = vpop.permute.xlu0 %18469 }
 0x6de   : > { %v18472_v10 = vunpack.i.h.bf16 %v18470_v63  ;;  %v18471_v58 = vunpack.i.l.bf16 %v18470_v63 }
 0x6df   : > { %18724 = vrot.lane.b32.xlu1 %v18633_v57, %s19528_s12  ;;  %18729 = vrot.lane.b32.xlu0 %v18638_v34, %s19528_s12 }
 0x6e0   : > { %v7397_v9 = vsel %vm367_vm1, %v18462_v62, %v18471_v58  ;;  %v7398_v14 = vsel %vm367_vm1, %v18471_v58, %v18472_v10 }
 0x6e1   : > { %v18475_v17 = vpop.permute.xlu0 %18474  ;;  %v16520_v38 = vpack.c.bf16 %v7398_v14, %v7395_v19  ;;  %v16522_v45 = vpack.c.bf16 %v7397_v9, %v7394_v12 }
 0x6e2   : > { %v18477_v27 = vunpack.i.h.bf16 %v18475_v17  ;;  %v18476_v50 = vunpack.i.l.bf16 %v18475_v17 }
 0x6e3   : > { %9562 = vperm.xlu1 %17897, %v14738_v47   ;;  %18734 = vrot.lane.b32.xlu0 %v21591_v60, %s19528_s12  ;;  %v14741_v60 = vld [vmem:[%s22905_s3 + $0x78] sm:$0xff] }
 0x6e4   : > { %16521 = vmatprep.subr.bf16.mxu1 %v16520_v38  ;;  %v7401_v26 = vsel %vm367_vm1, %v18476_v50, %v18477_v27 }
 0x6e5   : > { %16523 = vmatpush1.bf16.msra.mxu1 %v16522_v45  ;;  %v18485_v42 = vpop.permute.xlu0 %18484  ;;  %v18480_v53 = vpop.permute.xlu1 %18479 }
 0x6e6   : > { %v18487_v0 = vunpack.i.h.bf16 %v18485_v42  ;;  %v18486_v33 = vunpack.i.l.bf16 %v18485_v42  ;;  %v18482_v44 = vunpack.i.h.bf16 %v18480_v53  ;;  %v18481_v5 = vunpack.i.l.bf16 %v18480_v53 }
 0x6e7   : > { %9572 = vperm.xlu1 %17897, %v14740_v29   ;;  %9567 = vperm.xlu0 %17896, %v14739_v41  }
 0x6e8   : > { %v7400_v39 = vsel %vm367_vm1, %v18486_v33, %v18476_v50  ;;  %v7403_v31 = vsel %vm367_vm1, %v18487_v0, %v18481_v5  ;;  %v7404_v49 = vsel %vm367_vm1, %v18481_v5, %v18482_v44 }
 0x6e9   : > { %v16524_v25 = vpack.c.bf16 %v7404_v49, %v7401_v26  ;;  %v16526_v23 = vpack.c.bf16 %v7403_v31, %v7400_v39 }
 0x6eb   : > { %9577 = vperm.xlu0 %17896, %v14741_v60   ;;  %16525 = vmatprep.subr.bf16.mxu1 %v16524_v25 }
 0x6ec   : > { %16527 = vmatpush1.bf16.msra.mxu1 %v16526_v23 }
 0x6ef   : > { %14666 = vmatmul.mubr.msk.f32.vlgmr.msra.gmra.mrb[16].mxu1 %vm392_vm0, %v7342_v54 }
 0x6f0   : > { %7500 = vmatprep.mubr.f32.mxu1 %v21726_v43 }
 0x6f1   : > { %v18490_v3 = vpop.permute.xlu1 %18489 }
 0x6f2   : > { %v18492_v28 = vunpack.i.h.bf16 %v18490_v3  ;;  %v18491_v56 = vunpack.i.l.bf16 %v18490_v3 }
 0x6f3   : > { %14667 = vmatmul.mubr.msk.f32.gmra.mrb[18].mxu1 %vm392_vm0, %v7343_v30 }
 0x6f4   : > { %v7396_v2 = vsel %vm367_vm1, %v18467_v4, %v18491_v56  ;;  %v7399_v6 = vsel %vm367_vm1, %v18472_v10, %v18492_v28  ;;  %7506 = vmatprep.mubr.f32.mxu1 %v21726_v43 }
 0x6f5   : > { %v18495_v55 = vpop.permute.xlu1 %18494  ;;  %v18500_v20 = vpop.permute.xlu0 %18499  ;;  %v16528_v57 = vpack.c.bf16 %v7399_v6, %v7396_v2 }
 0x6f6   : > { %v18502_v34 = vunpack.i.h.bf16 %v18500_v20  ;;  %v18501_v36 = vunpack.i.l.bf16 %v18500_v20  ;;  %v18497_v48 = vunpack.i.h.bf16 %v18495_v55  ;;  %v18496_v62 = vunpack.i.l.bf16 %v18495_v55 }
 0x6f7   : > { %16529 = vmatprep.subr.bf16.mxu1 %v16528_v57  ;;  %14668 = vmatmul.mubr.msk.f32.gmra.mrb[20].mxu1 %vm392_vm0, %v7344_v35 }
 0x6f8   : > { %16531 = vmatpush3.bf16.msra.mxu1 %v16528_v57  ;;  %v7402_v13 = vsel %vm367_vm1, %v18477_v27, %v18501_v36  ;;  %v7405_v4 = vsel %vm367_vm1, %v18482_v44, %v18502_v34  ;;  %7512 = vmatprep.mubr.f32.mxu1 %v21726_v43  ;;  %v7637_v14 = vsel %vm611_vm2, %v18496_v62, %v18497_v48  ;;  %v7337_v57 = vld [vmem:[#allocation7 + $0x360] sm:$0xff] }
 0x6f9   : > { %v18510_v63 = vpop.permute.xlu1 %18509  ;;  %v18505_v10 = vpop.permute.xlu0 %18504  ;;  %v16532_v58 = vpack.c.bf16 %v7405_v4, %v7402_v13 }
 0x6fa   : > { %v18512_v12 = vunpack.i.h.bf16 %v18510_v63  ;;  %v18511_v47 = vunpack.i.l.bf16 %v18510_v63  ;;  %v18507_v9 = vunpack.i.h.bf16 %v18505_v10  ;;  %v18506_v19 = vunpack.i.l.bf16 %v18505_v10 }
 0x6fb   : > { %16533 = vmatprep.subr.bf16.mxu1 %v16532_v58  ;;  %14669 = vmatmul.mubr.msk.f32.gmra.mrb[22].mxu1 %vm392_vm0, %v7345_v16 }
 0x6fc   : > { %v7636_v17 = vsel %vm611_vm2, %v18511_v47, %v18496_v62  ;;  %v7639_v38 = vsel %vm611_vm2, %v18512_v12, %v18506_v19  ;;  %16535 = vmatpush3.bf16.msra.mxu1 %v16532_v58  ;;  %v7640_v45 = vsel %vm611_vm2, %v18506_v19, %v18507_v9  ;;  %15718 = vmatprep.mubr.msk.f32.mxu1 %vm392_vm0, %v7342_v54  ;;  %v7338_v58 = vld [vmem:[#allocation7 + $0x368] sm:$0xff] }
 0x6fd   : > { %v18520_v29 = vpop.permute.xlu1 %18519  ;;  %v18515_v41 = vpop.permute.xlu0 %18514  ;;  %v16536_v27 = vpack.c.bf16 %v7640_v45, %v7637_v14  ;;  %v16538_v50 = vpack.c.bf16 %v7639_v38, %v7636_v17  ;;  %v7339_v17 = vld [vmem:[#allocation7 + $0x370] sm:$0xff] }
 0x6fe   : > { %v18522_v42 = vunpack.i.h.bf16 %v18520_v29  ;;  %v18521_v53 = vunpack.i.l.bf16 %v18520_v29  ;;  %v18517_v0 = vunpack.i.h.bf16 %v18515_v41  ;;  %v18516_v33 = vunpack.i.l.bf16 %v18515_v41 }
 0x6ff   : > { %16537 = vmatprep.subr.bf16.mxu1 %v16536_v27  ;;  %15719 = vmatmul.mubr.msk.f32.vlgmr.msra.gmra.mrb[24].mxu1 %vm392_vm0, %v7343_v30 }
 0x700   : > { %16539 = vmatpush1.bf16.msra.mxu1 %v16538_v50  ;;  %v7643_v44 = vsel %vm611_vm2, %v18516_v33, %v18517_v0  ;;  %v7646_v5 = vsel %vm611_vm2, %v18521_v53, %v18522_v42  ;;  %15721 = vmatprep.mubr.msk.f32.mxu1 %vm392_vm0, %v7344_v35 }
 0x701   : > { %v18530_v60 = vpop.permute.xlu1 %18529  ;;  %v18525_v39 = vpop.permute.xlu0 %18524  ;;  %v16540_v31 = vpack.c.bf16 %v7646_v5, %v7643_v44 }
 0x702   : > { %v18532_v26 = vunpack.i.h.bf16 %v18530_v60  ;;  %v18531_v49 = vunpack.i.l.bf16 %v18530_v60  ;;  %v18527_v25 = vunpack.i.h.bf16 %v18525_v39  ;;  %v18526_v23 = vunpack.i.l.bf16 %v18525_v39 }
 0x703   : > { %16541 = vmatprep.subr.bf16.mxu1 %v16540_v31  ;;  %15722 = vmatmul.mubr.msk.f32.gmra.mrb[26].mxu1 %vm392_vm0, %v7345_v16 }
 0x704   : > { %v7645_v54 = vsel %vm611_vm2, %v18527_v25, %v18521_v53  ;;  %v7642_v30 = vsel %vm611_vm2, %v18526_v23, %v18516_v33  ;;  %v7638_v3 = vsel %vm611_vm2, %v18497_v48, %v18531_v49  ;;  %v7641_v28 = vsel %vm611_vm2, %v18507_v9, %v18532_v26  ;;  %7736 = vmatprep.mubr.f32.mxu1 %v21726_v43  ;;  %v7340_v53 = vld [vmem:[#allocation7 + $0x378] sm:$0xff] }
 0x705   : > { %v21753_v56 = vpop.permute.xlu1 %18534  ;;  %v18540_v2 = vpop.permute.xlu0 %18539  ;;  %v16542_v6 = vpack.c.bf16 %v7645_v54, %v7642_v30  ;;  %v16544_v35 = vpack.c.bf16 %v7641_v28, %v7638_v3 }
 0x706   : > { %v18542_v55 = vunpack.i.h.bf16 %v18540_v2  ;;  %v18541_v20 = vunpack.i.l.bf16 %v18540_v2  ;;  %v18537_v34 = vunpack.i.h.bf16 %v21753_v56  ;;  %v18536_v36 = vunpack.i.l.bf16 %v21753_v56 }
 0x707   : > { %16543 = vmatpush1.bf16.msra.mxu1 %v16542_v6 }
 0x708   : > { %16545 = vmatprep.subr.bf16.mxu1 %v16544_v35  ;;  %v7644_v48 = vsel %vm611_vm2, %v18517_v0, %v18541_v20  ;;  %v7647_v62 = vsel %vm611_vm2, %v18522_v42, %v18542_v55  ;;  %v7884_v12 = vsel %vm859_vm3, %v18536_v36, %v18537_v34 }
 0x709   : > { %v18550_v13 = vpop.permute.xlu1 %18549  ;;  %v18545_v4 = vpop.permute.xlu0 %18544  ;;  %v16548_v16 = vpack.c.bf16 %v7647_v62, %v7644_v48  ;;  %v7847_v62 = vld [vmem:[#allocation7 + $0x3a0] sm:$0xff] }
 0x70a   : > { %v18547_v63 = vunpack.i.h.bf16 %v18545_v4  ;;  %v18546_v10 = vunpack.i.l.bf16 %v18545_v4  ;;  %14674 = vmatmul.mubr.msk.f32.vlgmr.msra.gmra.mrb[16].mxu1 %vm392_vm0, %v7337_v57  ;;  %v18552_v45 = vunpack.i.h.bf16 %v18550_v13  ;;  %v18551_v29 = vunpack.i.l.bf16 %v18550_v13 }
 0x70b   : > { %16547 = vmatpush3.bf16.msra.mxu1 %v16544_v35  ;;  %7742 = vmatprep.mubr.f32.mxu1 %v21726_v43 }
 0x70c   : > { %16549 = vmatprep.subr.bf16.mxu1 %v16548_v16  ;;  %v7887_v47 = vsel %vm859_vm3, %v18546_v10, %v18547_v63  ;;  %v7883_v33 = vsel %vm859_vm3, %v18551_v29, %v18536_v36  ;;  %v7886_v44 = vsel %vm859_vm3, %v18552_v45, %v18546_v10 }
 0x70d   : > { %v18555_v9 = vpop.permute.xlu0 %18554  ;;  %v16552_v19 = vpack.c.bf16 %v7887_v47, %v7884_v12  ;;  %v18560_v14 = vpop.permute.xlu1 %18559  ;;  %v16554_v23 = vpack.c.bf16 %v7886_v44, %v7883_v33 }
 0x70e   : > { %14675 = vmatmul.mubr.msk.f32.gmra.mrb[18].mxu1 %vm392_vm0, %v7338_v58  ;;  %v18562_v41 = vunpack.i.h.bf16 %v18560_v14  ;;  %v18561_v27 = vunpack.i.l.bf16 %v18560_v14  ;;  %v18557_v50 = vunpack.i.h.bf16 %v18555_v9  ;;  %v18556_v42 = vunpack.i.l.bf16 %v18555_v9 }
 0x70f   : > { %16551 = vmatpush3.bf16.msra.mxu1 %v16548_v16  ;;  %7748 = vmatprep.mubr.f32.mxu1 %v21726_v43 }
 0x710   : > { %16553 = vmatprep.subr.bf16.mxu1 %v16552_v19  ;;  %v7890_v49 = vsel %vm859_vm3, %v18556_v42, %v18557_v50  ;;  %v7893_v25 = vsel %vm859_vm3, %v18561_v27, %v18562_v41 }
 0x711   : > { %v18565_v38 = vpop.permute.xlu0 %18564  ;;  %v18570_v0 = vpop.permute.xlu1 %18569  ;;  %v16556_v28 = vpack.c.bf16 %v7893_v25, %v7890_v49 }
 0x712   : > { %14676 = vmatmul.mubr.msk.f32.gmra.mrb[20].mxu1 %vm392_vm0, %v7339_v17  ;;  %v18567_v5 = vunpack.i.h.bf16 %v18565_v38  ;;  %v18566_v60 = vunpack.i.l.bf16 %v18565_v38  ;;  %v18572_v31 = vunpack.i.h.bf16 %v18570_v0  ;;  %v18571_v26 = vunpack.i.l.bf16 %v18570_v0 }
 0x713   : > { %7754 = vmatprep.mubr.f32.mxu1 %v21726_v43 }
 0x714   : > { %v7892_v54 = vsel %vm859_vm3, %v18567_v5, %v18561_v27  ;;  %v7889_v30 = vsel %vm859_vm3, %v18566_v60, %v18556_v42  ;;  %v7885_v6 = vsel %vm859_vm3, %v18537_v34, %v18571_v26  ;;  %v7888_v35 = vsel %vm859_vm3, %v18547_v63, %v18572_v31 }
 0x715   : > { %v18580_v39 = vpop.permute.xlu0 %18579  ;;  %v21775_v3 = vpop.permute.xlu1 %18574  ;;  %v16558_v20 = vpack.c.bf16 %v7892_v54, %v7889_v30 }
 0x716   : > { %14677 = vmatmul.mubr.msk.f32.gmra.mrb[22].mxu1 %vm392_vm0, %v7340_v53  ;;  %v18582_v56 = vunpack.i.h.bf16 %v18580_v39  ;;  %v18581_v2 = vunpack.i.l.bf16 %v18580_v39  ;;  %v18577_v16 = vunpack.i.h.bf16 %v21775_v3  ;;  %v18576_v63 = vunpack.i.l.bf16 %v21775_v3 }
 0x717   : > { %15732 = vmatprep.mubr.msk.f32.mxu1 %vm392_vm0, %v7337_v57  ;;  %v16560_v57 = vpack.c.bf16 %v7888_v35, %v7885_v6 }
 0x718   : > { %v7891_v13 = vsel %vm859_vm3, %v18557_v50, %v18581_v2  ;;  %v7894_v34 = vsel %vm859_vm3, %v18562_v41, %v18582_v56  ;;  %v8143_v9 = vsel %vm1119_vm4, %v18576_v63, %v18577_v16 }
 0x719   : > { %v21781_v55 = vpop.permute.xlu0 %18584  ;;  %v18590_v4 = vpop.permute.xlu1 %18589  ;;  %v16564_v10 = vpack.c.bf16 %v7894_v34, %v7891_v13  ;;  %v8108_v13 = vld [vmem:[#allocation7 + $0x3d0] sm:$0xff]  ;;  %v19329_v34 = vpack.c.bf16 %v21541_v15, %v21524_v32 }
 0x71a   : > { %15733 = vmatmul.mubr.msk.f32.vlgmr.msra.gmra.mrb[24].mxu1 %vm392_vm0, %v7338_v58  ;;  %v18587_v36 = vunpack.i.h.bf16 %v21781_v55  ;;  %v18586_v48 = vunpack.i.l.bf16 %v21781_v55  ;;  %v7848_v58 = vld [vmem:[#allocation7 + $0x3a8] sm:$0xff]  ;;  %v18592_v38 = vunpack.i.h.bf16 %v18590_v4  ;;  %v18591_v45 = vunpack.i.l.bf16 %v18590_v4  ;;  %v8109_v4 = vld [vmem:[#allocation7 + $0x3d8] sm:$0xff] }
 0x71b   : > { %16555 = vmatpush1.bf16.msra.mxu1 %v16554_v23  ;;  %15735 = vmatprep.mubr.msk.f32.mxu1 %vm392_vm0, %v7339_v17  ;;  %v7849_v17 = vld [vmem:[#allocation7 + $0x3b0] sm:$0xff] }
 0x71c   : > { %16557 = vmatprep.subr.bf16.mxu1 %v16556_v28  ;;  %v8146_v12 = vsel %vm1119_vm4, %v18586_v48, %v18587_v36  ;;  %v8142_v33 = vsel %vm1119_vm4, %v18591_v45, %v18576_v63  ;;  %v8145_v44 = vsel %vm1119_vm4, %v18592_v38, %v18586_v48  ;;  %v19335_v63 = vpack.c.bf16 %v21581_v51, %v21562_v46 }
 0x71d   : > { %v18595_v47 = vpop.permute.xlu0 %18594  ;;  %v18600_v19 = vpop.permute.xlu1 %18599  ;;  %v16568_v14 = vpack.c.bf16 %v8146_v12, %v8143_v9  ;;  %v16570_v23 = vpack.c.bf16 %v8145_v44, %v8142_v33  ;;  %v8365_v12 = vld [vmem:[#allocation7 + $0x3e0] sm:$0xff] }
 0x71e   : > { %15736 = vmatmul.mubr.msk.f32.gmra.mrb[26].mxu1 %vm392_vm0, %v7340_v53  ;;  %v18602_v41 = vunpack.i.h.bf16 %v18600_v19  ;;  %v18601_v27 = vunpack.i.l.bf16 %v18600_v19  ;;  %v18597_v50 = vunpack.i.h.bf16 %v18595_v47  ;;  %v18596_v42 = vunpack.i.l.bf16 %v18595_v47  ;;  %v7850_v53 = vld [vmem:[#allocation7 + $0x3b8] sm:$0xff] }
 0x71f   : > { %16559 = vmatpush1.bf16.msra.mxu1 %v16558_v20  ;;  %7983 = vmatprep.mubr.f32.mxu1 %v21726_v43  ;;  %v8106_v20 = vld [vmem:[#allocation7 + $0x3c0] sm:$0xff] }
 0x720   : > { %16561 = vmatprep.subr.bf16.mxu1 %v16560_v57  ;;  %v8149_v26 = vsel %vm1119_vm4, %v18596_v42, %v18597_v50  ;;  %v8152_v49 = vsel %vm1119_vm4, %v18601_v27, %v18602_v41 }
 0x721   : > { %v18605_v29 = vpop.permute.xlu0 %18604  ;;  %v18610_v0 = vpop.permute.xlu1 %18609  ;;  %v16572_v3 = vpack.c.bf16 %v8152_v49, %v8149_v26 }
 0x722   : > { %14682 = vmatmul.mubr.msk.f32.vlgmr.msra.gmra.mrb[16].mxu1 %vm392_vm0, %v7847_v62  ;;  %v18607_v5 = vunpack.i.h.bf16 %v18605_v29  ;;  %v18606_v60 = vunpack.i.l.bf16 %v18605_v29  ;;  %v18612_v39 = vunpack.i.h.bf16 %v18610_v0  ;;  %v18611_v31 = vunpack.i.l.bf16 %v18610_v0 }
 0x723   : > { %16563 = vmatpush3.bf16.msra.mxu1 %v16560_v57  ;;  %7989 = vmatprep.mubr.f32.mxu1 %v21726_v43 }
 0x724   : > { %16565 = vmatprep.subr.bf16.mxu1 %v16564_v10  ;;  %v8151_v54 = vsel %vm1119_vm4, %v18607_v5, %v18601_v27  ;;  %v8148_v30 = vsel %vm1119_vm4, %v18606_v60, %v18596_v42  ;;  %v8144_v2 = vsel %vm1119_vm4, %v18577_v16, %v18611_v31  ;;  %v8147_v6 = vsel %vm1119_vm4, %v18587_v36, %v18612_v39  ;;  %v8107_v36 = vld [vmem:[#allocation7 + $0x3c8] sm:$0xff] }
 0x725   : > { %v18615_v25 = vpop.permute.xlu0 %18614  ;;  %v16574_v35 = vpack.c.bf16 %v8151_v54, %v8148_v30  ;;  %v16576_v55 = vpack.c.bf16 %v8147_v6, %v8144_v2  ;;  %v19332_v16 = vpack.c.bf16 %v21536_v37, %v21519_v1  ;;  %v21833_v32 = vpop.permute.xlu1 %18619 }
 0x726   : > { %14683 = vmatmul.mubr.msk.f32.gmra.mrb[18].mxu1 %vm392_vm0, %v7848_v58  ;;  %v18617_v28 = vunpack.i.h.bf16 %v18615_v25  ;;  %v18616_v56 = vunpack.i.l.bf16 %v18615_v25  ;;  %v18622_v46 = vunpack.i.h.bf16 %v21833_v32  ;;  %v18621_v51 = vunpack.i.l.bf16 %v21833_v32 }
 0x727   : > { %16567 = vmatpush3.bf16.msra.mxu1 %v16564_v10  ;;  %7995 = vmatprep.mubr.f32.mxu1 %v21726_v43  ;;  %v16592_v10 = vpack.c.bf16 %v21612_v18, %v21614_v21  ;;  %v16596_v18 = vpack.c.bf16 %v21619_v7, %v21621_v22 }
 0x728   : > { %16569 = vmatprep.subr.bf16.mxu1 %v16568_v14  ;;  %v8150_v57 = vsel %vm1119_vm4, %v18597_v50, %v18616_v56  ;;  %v8153_v48 = vsel %vm1119_vm4, %v18602_v41, %v18617_v28  ;;  %v8597_v9 = vsel %vm1574_vm5, %v18621_v51, %v18622_v46  ;;  %v8367_v14 = vld [vmem:[#allocation7 + $0x3f0] sm:$0xff]  ;;  %v8368_v50 = vld [vmem:[#allocation7 + $0x3f8] sm:$0xff]  ;;  %v8568_v28 = vld [vmem:[#allocation7 + $0x400] sm:$0xff] }
 0x729   : > { %v18625_v15 = vpop.permute.xlu0 %18624  ;;  %v18630_v47 = vpop.permute.xlu1 %18629 }
 0x72a   : > { %14684 = vmatmul.mubr.msk.f32.gmra.mrb[20].mxu1 %vm392_vm0, %v7849_v17  ;;  %v18627_v1 = vunpack.i.h.bf16 %v18625_v15  ;;  %v18626_v37 = vunpack.i.l.bf16 %v18625_v15  ;;  %v18632_v7 = vunpack.i.h.bf16 %v18630_v47  ;;  %v18631_v22 = vunpack.i.l.bf16 %v18630_v47 }
 0x72b   : > { %8001 = vmatprep.mubr.f32.mxu1 %v21726_v43 }
 0x72c   : > { %v8596_v42 = vsel %vm1574_vm5, %v18631_v22, %v18621_v51  ;;  %v16608_v54 = vpack.c.bf16 %v18627_v1, %v18622_v46 }
 0x72d   : > { %v18640_v21 = vpop.permute.xlu0 %18639 }
 0x72e   : > { %14685 = vmatmul.mubr.msk.f32.gmra.mrb[22].mxu1 %vm392_vm0, %v7850_v53  ;;  %v18642_v29 = vunpack.i.h.bf16 %v18640_v21  ;;  %v18641_v41 = vunpack.i.l.bf16 %v18640_v21 }
 0x72f   : > { %15746 = vmatprep.mubr.msk.f32.mxu1 %vm392_vm0, %v7847_v62  ;;  %v16580_v62 = vpack.c.bf16 %v8153_v48, %v8150_v57 }
 0x730   : > { %v8601_v44 = vsel %vm1574_vm5, %v18641_v41, %v18642_v29 }
 0x731   : > { %v18645_v27 = vpop.permute.xlu0 %18644 }
 0x732   : > { %15747 = vmatmul.mubr.msk.f32.vlgmr.msra.gmra.mrb[24].mxu1 %vm392_vm0, %v7848_v58  ;;  %v19338_v58 = vpack.c.bf16 %v21576_v59, %v21557_v40  ;;  %v8366_v40 = vld [vmem:[#allocation7 + $0x3e8] sm:$0xff]  ;;  %v8599_v59 = vsel %vm1574_vm5, %v18626_v37, %v18627_v1  ;;  %v18647_v0 = vunpack.i.h.bf16 %v18645_v27  ;;  %v18646_v33 = vunpack.i.l.bf16 %v18645_v27  ;;  %v8571_v1 = vld [vmem:[#allocation7 + $0x418] sm:$0xff] }
 0x733   : > { %16571 = vmatpush1.bf16.msra.mxu1 %v16570_v23  ;;  %15749 = vmatprep.mubr.msk.f32.mxu1 %vm392_vm0, %v7849_v17  ;;  %v16600_v19 = vpack.c.bf16 %v8599_v59, %v8597_v9  ;;  %v18635_v17 = vpop.permute.xlu1 %18634 }
 0x734   : > { %16573 = vmatprep.subr.bf16.mxu1 %v16572_v3  ;;  %v18637_v38 = vunpack.i.h.bf16 %v18635_v17  ;;  %v18636_v45 = vunpack.i.l.bf16 %v18635_v17  ;;  %v8600_v31 = vsel %vm1574_vm5, %v18646_v33, %v18641_v41 }
 0x735   : > { %v18655_v25 = vpop.permute.xlu0 %18654 }
 0x736   : > { %15750 = vmatmul.mubr.msk.f32.gmra.mrb[26].mxu1 %vm392_vm0, %v7850_v53  ;;  %v8598_v53 = vsel %vm1574_vm5, %v18632_v7, %v18626_v37  ;;  %v8603_v5 = vsel %vm1574_vm5, %v18636_v45, %v18637_v38  ;;  %v8602_v39 = vsel %vm1574_vm5, %v18647_v0, %v18636_v45  ;;  %v18657_v30 = vunpack.i.h.bf16 %v18655_v25 }
 0x737   : > { %16575 = vmatpush1.bf16.msra.mxu1 %v16574_v35  ;;  %8242 = vmatprep.mubr.f32.mxu1 %v21726_v43  ;;  %v16602_v60 = vpack.c.bf16 %v8598_v53, %v8596_v42  ;;  %v16604_v26 = vpack.c.bf16 %v8603_v5, %v8601_v44  ;;  %v18650_v49 = vpop.permute.xlu1 %18649  ;;  %v16606_v23 = vpack.c.bf16 %v8602_v39, %v8600_v31  ;;  %v18656_v3 = vunpack.i.l.bf16 %v18655_v25  ;;  %v8817_v44 = vld [vmem:[#allocation7 + $0x430] sm:$0xff] }
 0x738   : > { %16577 = vmatprep.subr.bf16.mxu1 %v16576_v55  ;;  %v18652_v56 = vunpack.i.h.bf16 %v18650_v49  ;;  %v18651_v2 = vunpack.i.l.bf16 %v18650_v49  ;;  %v16612_v35 = vpack.c.bf16 %v18637_v38, %v18642_v29  ;;  %v8815_v38 = vld [vmem:[#allocation7 + $0x420] sm:$0xff] }
 0x739   : > { %v18670_v57 = vpop.permute.xlu0 %18669 }
 0x73a   : > { %14690 = vmatmul.mubr.msk.f32.vlgmr.msra.gmra.mrb[16].mxu1 %vm392_vm0, %v8106_v20  ;;  %v8844_v48 = vsel %vm23012_vm15, %v18651_v2, %v18652_v56  ;;  %v18672_v15 = vunpack.i.h.bf16 %v18670_v57  ;;  %vm23018_vm15 = vmmov %vm23013_vm6  ;;  %v16624_v17 = vpack.c.bf16 %v18657_v30, %v18652_v56 }
 0x73b   : > { %16579 = vmatpush3.bf16.msra.mxu1 %v16576_v55  ;;  %8248 = vmatprep.mubr.f32.mxu1 %v21726_v43  ;;  %v18660_v6 = vpop.permute.xlu1 %18659  ;;  %v8569_v55 = vld [vmem:[#allocation7 + $0x408] sm:$0xff] }
 0x73c   : > { %16581 = vmatprep.subr.bf16.mxu1 %v16580_v62 }
 0x73e   : > { %14691 = vmatmul.mubr.msk.f32.gmra.mrb[18].mxu1 %vm392_vm0, %v8107_v36 }
 0x73f   : > { %16583 = vmatpush3.bf16.msra.mxu1 %v16580_v62  ;;  %8254 = vmatprep.mubr.f32.mxu1 %v21726_v43 }
 0x740   : > { %19330 = vmatprep.subr.msk.bf16.mxu1 %vm20709_vm12, %v19329_v34  ;;  %v18662_v34 = vunpack.i.h.bf16 %v18660_v6 }
 0x742   : > { %14692 = vmatmul.mubr.msk.f32.gmra.mrb[20].mxu1 %vm392_vm0, %v8108_v13 }
 0x743   : > { %8260 = vmatprep.mubr.f32.mxu1 %v21726_v43 }
 0x746   : > { %14693 = vmatmul.mubr.msk.f32.gmra.mrb[22].mxu1 %vm392_vm0, %v8109_v4 }
 0x747   : > { %15760 = vmatprep.mubr.msk.f32.mxu1 %vm392_vm0, %v8106_v20  ;;  %v8846_v20 = vsel %vm23011_vm10, %v18656_v3, %v18657_v30  ;;  %vm23017_vm10 = vmmov %vm23013_vm6 }
 0x748   : > { %v16616_v62 = vpack.c.bf16 %v8846_v20, %v8844_v48 }
 0x74a   : > { %15761 = vmatmul.mubr.msk.f32.vlgmr.msra.gmra.mrb[24].mxu1 %vm392_vm0, %v8107_v36  ;;  %v8570_v36 = vld [vmem:[#allocation7 + $0x410] sm:$0xff] }
 0x74b   : > { %19333 = vmatpush1.bf16.msk.msra.mxu1 %vm20726_vm13, %v19332_v16  ;;  %15763 = vmatprep.mubr.msk.f32.mxu1 %vm392_vm0, %v8108_v13  ;;  %v18665_v13 = vpop.permute.xlu1 %18664 }
 0x74c   : > { %19336 = vmatprep.subr.msk.bf16.mxu1 %vm20709_vm12, %v19335_v63  ;;  %v18667_v16 = vunpack.i.h.bf16 %v18665_v13  ;;  %v18666_v32 = vunpack.i.l.bf16 %v18665_v13  ;;  %v18671_v63 = vunpack.i.l.bf16 %v18670_v57 }
 0x74e   : > { %15764 = vmatmul.mubr.msk.f32.gmra.mrb[26].mxu1 %vm392_vm0, %v8109_v4  ;;  %v18661_v4 = vunpack.i.l.bf16 %v18660_v6  ;;  %v8848_v51 = vsel %vm23015_vm7, %v18671_v63, %v18672_v15  ;;  %v8850_v47 = vsel %vm23016_vm9, %v18666_v32, %v18667_v16  ;;  %v16628_v27 = vpack.c.bf16 %v18667_v16, %v18672_v15  ;;  %v9062_v16 = vld [vmem:[#allocation7 + $0x440] sm:$0xff] }
 0x74f   : > { %19339 = vmatpush1.bf16.msk.msra.mxu1 %vm20726_vm13, %v19338_v58  ;;  %8445 = vmatprep.mubr.f32.mxu1 %v21726_v43  ;;  %v8845_v58 = vsel %vm23014_vm8, %v18662_v34, %v18656_v3  ;;  %v16620_v21 = vpack.c.bf16 %v8850_v47, %v8848_v51  ;;  %v18680_v9 = vpop.permute.xlu1 %18679  ;;  %v9064_v51 = vld [vmem:[#allocation7 + $0x450] sm:$0xff] }
 0x750   : > { %16593 = vmatprep.subr.bf16.mxu1 %v16592_v10  ;;  %v8843_v37 = vsel %vm23013_vm6, %v18661_v4, %v18651_v2  ;;  %v18682_v45 = vunpack.i.h.bf16 %v18680_v9  ;;  %v18681_v29 = vunpack.i.l.bf16 %v18680_v9  ;;  %vm23019_vm6 = vcmask 900096  }
 0x751   : > { %vm23020_vm8 = vmmov %vm23019_vm6 }
 0x752   : > { %14698 = vmatmul.mubr.msk.f32.vlgmr.msra.gmra.mrb[16].mxu1 %vm392_vm0, %v8365_v12  ;;  %v9091_v0 = vsel %vm23020_vm8, %v18681_v29, %v18682_v45  ;;  %vm23021_vm7 = vmmov %vm23019_vm6 }
 0x753   : > { %16595 = vmatpush3.bf16.msra.mxu1 %v16592_v10  ;;  %8451 = vmatprep.mubr.f32.mxu1 %v21726_v43  ;;  %v18675_v10 = vpop.permute.xlu0 %18674  ;;  %v18690_v41 = vpop.permute.xlu1 %18689  ;;  %vm23022_vm9 = vmmov %vm23019_vm6 }
 0x754   : > { %16597 = vmatprep.subr.bf16.mxu1 %v16596_v18  ;;  %v18676_v46 = vunpack.i.l.bf16 %v18675_v10  ;;  %v18691_v39 = vunpack.i.l.bf16 %v18690_v41  ;;  %vm23025_vm8 = vmmov %vm23019_vm6 }
 0x756   : > { %14699 = vmatmul.mubr.msk.f32.gmra.mrb[18].mxu1 %vm392_vm0, %v8366_v40  ;;  %v8847_v59 = vsel %vm23018_vm15, %v18676_v46, %v18671_v63  ;;  %v9090_v30 = vsel %vm23021_vm7, %v18691_v39, %v18681_v29  ;;  %vm23024_vm15 = vmmov %vm23019_vm6  ;;  %vm23026_vm7 = vcmask 891904   ;;  %v9311_v39 = vld [vmem:[#allocation7 + $0x470] sm:$0xff] }
 0x757   : > { %16599 = vmatpush3.bf16.msra.mxu1 %v16596_v18  ;;  %8457 = vmatprep.mubr.f32.mxu1 %v21726_v43  ;;  %v16618_v18 = vpack.c.bf16 %v8845_v58, %v8843_v37  ;;  %v18695_v5 = vpop.permute.xlu1 %18694 }
 0x758   : > { %16601 = vmatprep.subr.bf16.mxu1 %v16600_v19  ;;  %v18685_v19 = vpop.permute.xlu0 %18684  ;;  %v18697_v31 = vunpack.i.h.bf16 %v18695_v5 }
 0x759   : > { %v18687_v7 = vunpack.i.h.bf16 %v18685_v19  ;;  %v18686_v22 = vunpack.i.l.bf16 %v18685_v19 }
 0x75a   : > { %14700 = vmatmul.mubr.msk.f32.gmra.mrb[20].mxu1 %vm392_vm0, %v8367_v14 }
 0x75b   : > { %8463 = vmatprep.mubr.f32.mxu1 %v21726_v43  ;;  %v9093_v42 = vsel %vm23019_vm6, %v18686_v22, %v18687_v7  ;;  %v18710_v48 = vpop.permute.xlu1 %18709  ;;  %v16640_v13 = vpack.c.bf16 %v18687_v7, %v18682_v45 }
 0x75c   : > { %v18700_v53 = vpop.permute.xlu0 %18699  ;;  %v16632_v33 = vpack.c.bf16 %v9093_v42, %v9091_v0  ;;  %v18711_v15 = vunpack.i.l.bf16 %v18710_v48 }
 0x75d   : > { %v18702_v49 = vunpack.i.h.bf16 %v18700_v53  ;;  %v18701_v25 = vunpack.i.l.bf16 %v18700_v53 }
 0x75e   : > { %14701 = vmatmul.mubr.msk.f32.gmra.mrb[22].mxu1 %vm392_vm0, %v8368_v50 }
 0x75f   : > { %15774 = vmatprep.mubr.msk.f32.mxu1 %vm392_vm0, %v8365_v12  ;;  %v18677_v12 = vunpack.i.h.bf16 %v18675_v10  ;;  %v18720_v63 = vpop.permute.xlu1 %18719  ;;  %v16644_v10 = vpack.c.bf16 %v18697_v31, %v18702_v49 }
 0x762   : > { %15775 = vmatmul.mubr.msk.f32.vlgmr.msra.gmra.mrb[24].mxu1 %vm392_vm0, %v8366_v40  ;;  %v8849_v40 = vsel %vm23017_vm10, %v18677_v12, %v18666_v32  ;;  %vm23023_vm10 = vmmov %vm23019_vm6  ;;  %v18712_v32 = vunpack.i.h.bf16 %v18710_v48 }
 0x763   : > { %16603 = vmatpush1.bf16.msra.mxu1 %v16602_v60  ;;  %15777 = vmatprep.mubr.msk.f32.mxu1 %vm392_vm0, %v8367_v14  ;;  %v16622_v14 = vpack.c.bf16 %v8849_v40, %v8847_v59  ;;  %v18692_v60 = vunpack.i.h.bf16 %v18690_v41  ;;  %v9095_v2 = vsel %vm23023_vm10, %v18701_v25, %v18702_v49  ;;  %v18725_v47 = vpop.permute.xlu1 %18724  ;;  %v18721_v40 = vunpack.i.l.bf16 %v18720_v63  ;;  %vm23028_vm10 = vmmov %vm23026_vm7 }
 0x764   : > { %16605 = vmatprep.subr.bf16.mxu1 %v16604_v26  ;;  %v18696_v26 = vunpack.i.l.bf16 %v18695_v5  ;;  %v18727_v59 = vunpack.i.h.bf16 %v18725_v47 }
 0x765   : > { %v9092_v3 = vsel %vm23022_vm9, %v18692_v60, %v18686_v22  ;;  %vm23027_vm9 = vmmov %vm23026_vm7  ;;  %v9337_v7 = vsel %vm23028_vm10, %v18721_v40, %v18711_v15  ;;  %v9310_v60 = vld [vmem:[#allocation7 + $0x468] sm:$0xff] }
 0x766   : > { %15778 = vmatmul.mubr.msk.f32.gmra.mrb[26].mxu1 %vm392_vm0, %v8368_v50  ;;  %v8816_v50 = vld [vmem:[#allocation7 + $0x428] sm:$0xff]  ;;  %v9097_v6 = vsel %vm23024_vm15, %v18696_v26, %v18697_v31  ;;  %v9338_v12 = vsel %vm23027_vm9, %v18711_v15, %v18712_v32  ;;  %vm23029_vm15 = vmmov %vm23026_vm7  ;;  %v9312_v31 = vld [vmem:[#allocation7 + $0x478] sm:$0xff] }
 0x767   : > { %16607 = vmatpush1.bf16.msra.mxu1 %v16606_v23  ;;  %8692 = vmatprep.mubr.f32.mxu1 %v21726_v43  ;;  %v18705_v23 = vpop.permute.xlu0 %18704  ;;  %v16636_v57 = vpack.c.bf16 %v9097_v6, %v9095_v2  ;;  %v9563_v49 = vpop.permute.xlu1 %9562 }
 0x768   : > { %16609 = vmatprep.subr.bf16.mxu1 %v16608_v54  ;;  %v18706_v56 = vunpack.i.l.bf16 %v18705_v23 }
 0x76a   : > { %14706 = vmatmul.mubr.msk.f32.vlgmr.msra.gmra.mrb[16].mxu1 %vm392_vm0, %v8568_v28  ;;  %v9094_v20 = vsel %vm23025_vm8, %v18706_v56, %v18701_v25 }
 0x76b   : > { %16611 = vmatpush3.bf16.msra.mxu1 %v16608_v54  ;;  %8698 = vmatprep.mubr.f32.mxu1 %v21726_v43  ;;  %v8818_v54 = vld [vmem:[#allocation7 + $0x438] sm:$0xff] }
 0x76c   : > { %16613 = vmatprep.subr.bf16.mxu1 %v16612_v35 }
 0x76e   : > { %14707 = vmatmul.mubr.msk.f32.gmra.mrb[18].mxu1 %vm392_vm0, %v8569_v55 }
 0x76f   : > { %16615 = vmatpush3.bf16.msra.mxu1 %v16612_v35  ;;  %8704 = vmatprep.mubr.f32.mxu1 %v21726_v43  ;;  %v16634_v35 = vpack.c.bf16 %v9092_v3, %v9090_v30 }
 0x770   : > { %16617 = vmatprep.subr.bf16.mxu1 %v16616_v62  ;;  %v18715_v62 = vpop.permute.xlu0 %18714 }
 0x771   : > { %v18717_v34 = vunpack.i.h.bf16 %v18715_v62  ;;  %v18716_v4 = vunpack.i.l.bf16 %v18715_v62 }
 0x772   : > { %14708 = vmatmul.mubr.msk.f32.gmra.mrb[20].mxu1 %vm392_vm0, %v8570_v36 }
 0x773   : > { %8710 = vmatprep.mubr.f32.mxu1 %v21726_v43  ;;  %v9340_v37 = vsel %vm23026_vm7, %v18716_v4, %v18717_v34 }
 0x774   : > { %v18730_v58 = vpop.permute.xlu0 %18729  ;;  %v16648_v46 = vpack.c.bf16 %v9340_v37, %v9338_v12 }
 0x775   : > { %v18732_v9 = vunpack.i.h.bf16 %v18730_v58  ;;  %v18731_v19 = vunpack.i.l.bf16 %v18730_v58 }
 0x776   : > { %14709 = vmatmul.mubr.msk.f32.gmra.mrb[22].mxu1 %vm392_vm0, %v8571_v1 }
 0x777   : > { %15788 = vmatprep.mubr.msk.f32.mxu1 %vm392_vm0, %v8568_v28  ;;  %v18707_v28 = vunpack.i.h.bf16 %v18705_v23  ;;  %v16660_v5 = vpack.c.bf16 %v18727_v59, %v18732_v9  ;;  %v21949_v23 = vstv %s14742_s29  ;;  %s14336_s29 = sshll.u32 %s22800_s15, 4  ;;  %s22852_s29 = int_to_ptr.vmem [resolvable:$true] %s14336_s29 }
 0x77a   : > { %15789 = vmatmul.mubr.msk.f32.vlgmr.msra.gmra.mrb[24].mxu1 %vm392_vm0, %v8569_v55  ;;  %v9096_v55 = vsel %vm23019_vm6, %v18707_v28, %v18696_v26  ;;  %vm23030_vm6 = vmmov %vm23026_vm7  ;;  %v21945_v26 = vpack.i.bf16 %v21726_v43, %v21726_v43 }
 0x77b   : > { %16619 = vmatpush1.bf16.msra.mxu1 %v16618_v18  ;;  %15791 = vmatprep.mubr.msk.f32.mxu1 %vm392_vm0, %v8570_v36  ;;  %v16638_v36 = vpack.c.bf16 %v9096_v55, %v9094_v20  ;;  %v18722_v18 = vunpack.i.h.bf16 %v18720_v63  ;;  %v9342_v29 = vsel %vm23030_vm6, %v18731_v19, %v18732_v9  ;;  %vm23031_vm8 = vmmov %vm23030_vm6 }
 0x77c   : > { %16621 = vmatprep.subr.bf16.mxu1 %v16620_v21  ;;  %v18726_v21 = vunpack.i.l.bf16 %v18725_v47  ;;  %vm23032_vm7 = vmmov %vm23030_vm6  ;;  %18739 = vrot.lane.b32.xlu1 %v21945_v26, %s19520_s24 }
 0x77d   : > { %v9339_v22 = vsel %vm23029_vm15, %v18722_v18, %v18716_v4  ;;  %vm23033_vm9 = vmmov %vm23030_vm6  ;;  %vm23034_vm6 = vcmp.eq.s32.totalorder %v22981_v11, 1 }
 0x77e   : > { %15792 = vmatmul.mubr.msk.f32.gmra.mrb[26].mxu1 %vm392_vm0, %v8571_v1  ;;  %v9063_v1 = vld [vmem:[#allocation7 + $0x448] sm:$0xff]  ;;  %v9344_v41 = vsel %vm23031_vm8, %v18726_v21, %v18727_v59 }
 0x77f   : > { %16623 = vmatpush1.bf16.msra.mxu1 %v16622_v14  ;;  %8939 = vmatprep.mubr.f32.mxu1 %v21726_v43  ;;  %v18735_v14 = vpop.permute.xlu0 %18734  ;;  %v16652_v53 = vpack.c.bf16 %v9344_v41, %v9342_v29 }
 0x780   : > { %16625 = vmatprep.subr.bf16.mxu1 %v16624_v17  ;;  %v18736_v45 = vunpack.i.l.bf16 %v18735_v14 }
 0x782   : > { %14714 = vmatmul.mubr.msk.f32.vlgmr.msra.gmra.mrb[16].mxu1 %vm392_vm0, %v8815_v38  ;;  %v9341_v42 = vsel %vm23033_vm9, %v18736_v45, %v18731_v19  ;;  %vm23035_vm9 = vmmov %vm23034_vm6 }
 0x783   : > { %16627 = vmatpush3.bf16.msra.mxu1 %v16624_v17  ;;  %8945 = vmatprep.mubr.f32.mxu1 %v21726_v43  ;;  %v9065_v17 = vld [vmem:[#allocation7 + $0x458] sm:$0xff]  ;;  %v9568_v56 = vpop.permute.xlu0 %9567 }
 0x784   : > { %16629 = vmatprep.subr.bf16.mxu1 %v16628_v27 }
 0x786   : > { %14715 = vmatmul.mubr.msk.f32.gmra.mrb[18].mxu1 %vm392_vm0, %v8816_v50 }
 0x787   : > { %16631 = vmatpush3.bf16.msra.mxu1 %v16628_v27  ;;  %8951 = vmatprep.mubr.f32.mxu1 %v21726_v43  ;;  %v16650_v27 = vpack.c.bf16 %v9339_v22, %v9337_v7 }
 0x788   : > { %16633 = vmatprep.subr.bf16.mxu1 %v16632_v33  ;;  %v16656_v33 = vpack.c.bf16 %v18717_v34, %v18712_v32 }
 0x78a   : > { %14716 = vmatmul.mubr.msk.f32.gmra.mrb[20].mxu1 %vm392_vm0, %v8817_v44 }
 0x78b   : > { %8957 = vmatprep.mubr.f32.mxu1 %v21726_v43 }
 0x78e   : > { %14717 = vmatmul.mubr.msk.f32.gmra.mrb[22].mxu1 %vm392_vm0, %v8818_v54 }
 0x78f   : > { %15802 = vmatprep.mubr.msk.f32.mxu1 %vm392_vm0, %v8815_v38  ;;  %v18737_v38 = vunpack.i.h.bf16 %v18735_v14 }
 0x792   : > { %15803 = vmatmul.mubr.msk.f32.vlgmr.msra.gmra.mrb[24].mxu1 %vm392_vm0, %v8816_v50  ;;  %v9343_v50 = vsel %vm23032_vm7, %v18737_v38, %v18726_v21 }
 0x793   : > { %16635 = vmatpush1.bf16.msra.mxu1 %v16634_v35  ;;  %15805 = vmatprep.mubr.msk.f32.mxu1 %vm392_vm0, %v8817_v44  ;;  %v16654_v0 = vpack.c.bf16 %v9343_v50, %v9341_v42  ;;  %v9309_v44 = vld [vmem:[#allocation7 + $0x460] sm:$0xff] }
 0x794   : > { %16637 = vmatprep.subr.bf16.mxu1 %v16636_v57 }
 0x796   : > { %15806 = vmatmul.mubr.msk.f32.gmra.mrb[26].mxu1 %vm392_vm0, %v8818_v54 }
 0x797   : > { %16639 = vmatpush1.bf16.msra.mxu1 %v16638_v36  ;;  %9186 = vmatprep.mubr.f32.mxu1 %v21726_v43 }
 0x798   : > { %16641 = vmatprep.subr.bf16.mxu1 %v16640_v13 }
 0x79a   : > { %14722 = vmatmul.mubr.msk.f32.vlgmr.msra.gmra.mrb[16].mxu1 %vm392_vm0, %v9062_v16 }
 0x79b   : > { %16643 = vmatpush3.bf16.msra.mxu1 %v16640_v13  ;;  %9192 = vmatprep.mubr.f32.mxu1 %v21726_v43  ;;  %v9573_v13 = vpop.permute.xlu1 %9572 }
 0x79c   : > { %16645 = vmatprep.subr.bf16.mxu1 %v16644_v10 }
 0x79e   : > { %14723 = vmatmul.mubr.msk.f32.gmra.mrb[18].mxu1 %vm392_vm0, %v9063_v1 }
 0x79f   : > { %16647 = vmatpush3.bf16.msra.mxu1 %v16644_v10  ;;  %9198 = vmatprep.mubr.f32.mxu1 %v21726_v43 }
 0x7a0   : > { %16649 = vmatprep.subr.bf16.mxu1 %v16648_v46 }
 0x7a2   : > { %14724 = vmatmul.mubr.msk.f32.gmra.mrb[20].mxu1 %vm392_vm0, %v9064_v51 }
 0x7a3   : > { %9204 = vmatprep.mubr.f32.mxu1 %v21726_v43 }
 0x7a6   : > { %14725 = vmatmul.mubr.msk.f32.gmra.mrb[22].mxu1 %vm392_vm0, %v9065_v17 }
 0x7a7   : > { %15816 = vmatprep.mubr.msk.f32.mxu1 %vm392_vm0, %v9062_v16 }
 0x7aa   : > { %15817 = vmatmul.mubr.msk.f32.vlgmr.msra.gmra.mrb[24].mxu1 %vm392_vm0, %v9063_v1 }
 0x7ab   : > { %16651 = vmatpush1.bf16.msra.mxu1 %v16650_v27  ;;  %15819 = vmatprep.mubr.msk.f32.mxu1 %vm392_vm0, %v9064_v51  ;;  %v9578_v51 = vpop.permute.xlu0 %9577 }
 0x7ac   : > { %16653 = vmatprep.subr.bf16.mxu1 %v16652_v53 }
 0x7ae   : > { %15820 = vmatmul.mubr.msk.f32.gmra.mrb[26].mxu1 %vm392_vm0, %v9065_v17 }
 0x7af   : > { %16655 = vmatpush1.bf16.msra.mxu1 %v16654_v0  ;;  %9433 = vmatprep.mubr.f32.mxu1 %v21726_v43 }
 0x7b0   : > { %16657 = vmatprep.subr.bf16.mxu1 %v16656_v33 }
 0x7b2   : > { %14730 = vmatmul.mubr.msk.f32.vlgmr.msra.gmra.mrb[16].mxu1 %vm392_vm0, %v9309_v44 }
 0x7b3   : > { %16659 = vmatpush3.bf16.msra.mxu1 %v16656_v33  ;;  %9439 = vmatprep.mubr.f32.mxu1 %v21726_v43 }
 0x7b4   : > { %16661 = vmatprep.subr.bf16.mxu1 %v16660_v5 }
 0x7b6   : > { %14731 = vmatmul.mubr.msk.f32.gmra.mrb[18].mxu1 %vm392_vm0, %v9310_v60 }
 0x7b7   : > { %16663 = vmatpush3.bf16.msra.mxu1 %v16660_v5  ;;  %9445 = vmatprep.mubr.f32.mxu1 %v21726_v43 }
 0x7ba   : > { %14732 = vmatmul.mubr.msk.f32.gmra.mrb[20].mxu1 %vm392_vm0, %v9311_v39 }
 0x7bb   : > { %9451 = vmatprep.mubr.f32.mxu1 %v21726_v43 }
 0x7be   : > { %14733 = vmatmul.mubr.msk.f32.gmra.mrb[22].mxu1 %vm392_vm0, %v9312_v31 }
 0x7bf   : > { %15830 = vmatprep.mubr.msk.f32.mxu1 %vm392_vm0, %v9309_v44 }
 0x7c2   : > { %15831 = vmatmul.mubr.msk.f32.vlgmr.msra.gmra.mrb[24].mxu1 %vm392_vm0, %v9310_v60 }
 0x7c3   : > { %15833 = vmatprep.mubr.msk.f32.mxu1 %vm392_vm0, %v9311_v39 }
 0x7c6   : > { %15834 = vmatmul.mubr.msk.f32.gmra.mrb[26].mxu1 %vm392_vm0, %v9312_v31 }
 0x7c7   : > { %12162 = vmatprep.mubr.f32.mxu1 %v21726_v43 }
 0x885   : > { %v9435_v25 = vpop.f32.mrb[16].mxu1 }
 0x886   : > { %v9580_v54 = vadd.f32 %v9563_v49, %v9435_v25  ;;  %v9437_v30 = vpop.f32.mrb[17].mxu1 }
 0x887   : > { %v9581_v3 = vadd.f32 %v9563_v49, %v9437_v30 }
 0x888   : > { %vm9593_vm10 = vcmp.ge.f32.partialorder %v9580_v54, 0.0  ;;  %v9606_v28 = vmul.f32 %v21949_v23, %v9580_v54 }
 0x889   : > { %vm9594_vm15 = vcmp.ge.f32.partialorder %v9581_v3, 0.0  ;;  %v9607_v2 = vmul.f32 %v21949_v23, %v9581_v3  ;;  %v9441_v43 = vpop.f32.mrb[18].mxu1 }
 0x88a   : > { %v21953_v6 = vsel %vm9593_vm10, %v9580_v54, %v9606_v28  ;;  %v9583_v35 = vadd.f32 %v9568_v56, %v9441_v43  ;;  %v9443_v55 = vpop.f32.mrb[19].mxu1 }
 0x88b   : > { %v9630_v20 = vsel %vm2625_vm14, %v21953_v6, 0.0  ;;  %v21958_v57 = vsel %vm9594_vm15, %v9581_v3, %v9607_v2  ;;  %v9584_v48 = vadd.f32 %v9568_v56, %v9443_v55 }
 0x88c   : > { %v21963_v62 = vsel %vm23034_vm6, %v21958_v57, 0.0  ;;  %vm9596_vm8 = vcmp.ge.f32.partialorder %v9583_v35, 0.0  ;;  %v9609_v36 = vmul.f32 %v21949_v23, %v9583_v35 }
 0x88d   : > { %vm9597_vm7 = vcmp.ge.f32.partialorder %v9584_v48, 0.0  ;;  %v9610_v34 = vmul.f32 %v21949_v23, %v9584_v48  ;;  %v9447_v4 = vpop.f32.mrb[20].mxu1  ;;  %v21968_v16 = vpack.i.bf16 %v21963_v62, %v9630_v20 }
 0x88e   : > { %v21970_v32 = vsel %vm9596_vm8, %v9583_v35, %v9609_v36  ;;  %v9586_v15 = vadd.f32 %v9573_v13, %v9447_v4  ;;  %v9449_v63 = vpop.f32.mrb[21].mxu1 }
 0x88f   : > { %v9633_v10 = vsel %vm2625_vm14, %v21970_v32, 0.0  ;;  %v21975_v1 = vsel %vm9597_vm7, %v9584_v48, %v9610_v34  ;;  %v9587_v37 = vadd.f32 %v9573_v13, %v9449_v63  ;;  %18744 = vrot.lane.b32.xlu1 %v21968_v16, %s19520_s24 }
 0x890   : > { %v21982_v58 = vsel %vm23035_vm9, %v21975_v1, 0.0  ;;  %vm9599_vm10 = vcmp.ge.f32.partialorder %v9586_v15, 0.0  ;;  %v9612_v12 = vmul.f32 %v21949_v23, %v9586_v15  ;;  %v21985_v46 = vpack.i.bf16 %v9633_v10, %v9630_v20  ;;  %vm23036_vm9 = vmmov %vm23034_vm6 }
 0x891   : > { %vm9600_vm15 = vcmp.ge.f32.partialorder %v9587_v37, 0.0  ;;  %v9613_v47 = vmul.f32 %v21949_v23, %v9587_v37  ;;  %v9453_v18 = vpop.f32.mrb[22].mxu1  ;;  %v21989_v40 = vpack.i.bf16 %v21982_v58, %v9633_v10 }
 0x892   : > { %v21991_v59 = vsel %vm9599_vm10, %v9586_v15, %v9612_v12  ;;  %v9589_v21 = vadd.f32 %v9578_v51, %v9453_v18  ;;  %v9455_v9 = vpop.f32.mrb[23].mxu1 }
 0x893   : > { %v9636_v19 = vsel %vm2625_vm14, %v21991_v59, 0.0  ;;  %v21996_v14 = vsel %vm9600_vm15, %v9587_v37, %v9613_v47  ;;  %v9590_v17 = vadd.f32 %v9578_v51, %v9455_v9  ;;  %18749 = vrot.lane.b32.xlu0 %v21989_v40, %s19520_s24 }
 0x894   : > { %v22003_v7 = vsel %vm23034_vm6, %v21996_v14, 0.0  ;;  %vm9602_vm8 = vcmp.ge.f32.partialorder %v9589_v21, 0.0  ;;  %v9615_v22 = vmul.f32 %v21949_v23, %v9589_v21  ;;  %vm23037_vm6 = vcmask 556032  }
 0x895   : > { %vm9603_vm7 = vcmp.ge.f32.partialorder %v9590_v17, 0.0  ;;  %v9616_v38 = vmul.f32 %v21949_v23, %v9590_v17  ;;  %v15832_v45 = vpop.f32.mrb[24].mxu1  ;;  %v22008_v29 = vpack.i.bf16 %v22003_v7, %v9636_v19 }
 0x896   : > { %v22010_v41 = vsel %vm9602_vm8, %v9589_v21, %v9615_v22  ;;  %v9585_v27 = vadd.f32 %v15832_v45, %v9568_v56  ;;  %v9524_v50 = vpop.f32.mrb[25].mxu1 }
 0x897   : > { %v9639_v42 = vsel %vm2625_vm14, %v22010_v41, 0.0  ;;  %v22015_v53 = vsel %vm9603_vm7, %v9590_v17, %v9616_v38  ;;  %v9582_v0 = vadd.f32 %v9563_v49, %v9524_v50  ;;  %18754 = vrot.lane.b32.xlu0 %v22008_v29, %s19520_s24  ;;  %vm23038_vm7 = vmmov %vm23037_vm6 }
 0x898   : > { %v22022_v33 = vsel %vm23036_vm9, %v22015_v53, 0.0  ;;  %vm9598_vm10 = vcmp.ge.f32.partialorder %v9585_v27, 0.0  ;;  %v9611_v44 = vmul.f32 %v21949_v23, %v9585_v27  ;;  %v22025_v5 = vpack.i.bf16 %v9639_v42, %v9636_v19  ;;  %v14815_v19 = vld [vmem:[%s22905_s3 + $0x80] sm:$0xff] }
 0x899   : > { %vm9595_vm15 = vcmp.ge.f32.partialorder %v9582_v0, 0.0  ;;  %v9608_v60 = vmul.f32 %v21949_v23, %v9582_v0  ;;  %v15835_v39 = vpop.f32.mrb[26].mxu1  ;;  %v18758_v31 = vpack.i.bf16 %v22022_v33, %v9639_v42 }
 0x89a   : > { %v9623_v49 = vsel %vm9598_vm10, %v9585_v27, %v9611_v44  ;;  %v9591_v25 = vadd.f32 %v15835_v39, %v9578_v51  ;;  %v9534_v54 = vpop.f32.mrb[27].mxu1  ;;  %vm23039_vm10 = vmmov %vm23037_vm6  ;;  %v14816_v27 = vld [vmem:[%s22905_s3 + $0x88] sm:$0xff] }
 0x89b   : > { %v9635_v30 = vsel %vm2627_vm11, %v9623_v49, 0.0  ;;  %v9620_v3 = vsel %vm9595_vm15, %v9582_v0, %v9608_v60  ;;  %v9588_v28 = vadd.f32 %v9573_v13, %v9534_v54  ;;  %18764 = vrot.lane.b32.xlu0 %v21945_v26, %s19520_s24  ;;  %18759 = vrot.lane.b32.xlu1 %v18758_v31, %s19520_s24  ;;  %vm23040_vm15 = vmmov %vm23037_vm6 }
 0x89c   : > { %9647 = vst.msk [vmem:[#allocation2 + $0x40] sm:$0xff] %vm23037_vm6, %v9635_v30  ;;  %v9632_v56 = vsel %vm2627_vm11, %v9620_v3, 0.0  ;;  %vm9604_vm8 = vcmp.ge.f32.partialorder %v9591_v25, 0.0  ;;  %v9617_v2 = vmul.f32 %v21949_v23, %v9591_v25  ;;  %vm23041_vm6 = vcmask 908288  }
 0x89d   : > { %9644 = vst.msk [vmem:[#allocation2 + $0x18] sm:$0xff] %vm23038_vm7, %v9632_v56  ;;  %vm9601_vm9 = vcmp.ge.f32.partialorder %v9588_v28, 0.0  ;;  %v9614_v43 = vmul.f32 %v21949_v23, %v9588_v28  ;;  %v9676_v56 = vld [vmem:[#allocation7 + $0x4a0] sm:$0xff]  ;;  %vm23043_vm7 = vmmov %vm23041_vm6 }
 0x89e   : > { %v9629_v35 = vsel %vm9604_vm8, %v9591_v25, %v9617_v2  ;;  %v22160_v2 = vld [vmem:[#allocation2] sm:$0xff]  ;;  %vm23042_vm8 = vmmov %vm23041_vm6 }
 0x89f   : > { %v9641_v55 = vsel %vm2627_vm11, %v9629_v35, 0.0  ;;  %v9626_v20 = vsel %vm9601_vm9, %v9588_v28, %v9614_v43  ;;  %v9677_v43 = vld [vmem:[#allocation7 + $0x4a8] sm:$0xff]  ;;  %vm23044_vm9 = vmmov %vm23041_vm6 }
 0x8a0   : > { %9653 = vst.msk [vmem:[#allocation2 + $0x90] sm:$0xff] %vm23039_vm10, %v9641_v55  ;;  %v9638_v48 = vsel %vm2627_vm11, %v9626_v20, 0.0  ;;  %vm23045_vm10 = vmmov %vm23041_vm6 }
 0x8a1   : > { %9650 = vst.msk [vmem:[#allocation2 + $0x68] sm:$0xff] %vm23040_vm15, %v9638_v48  ;;  %vm23046_vm15 = vmmov %vm23041_vm6 }
 0x8a3   : > { %v22046_v36 = vld [vmem:[#allocation2 + $0x40] sm:$0xff] }
 0x8a4   : > { %v22048_v13 = vld [vmem:[#allocation2 + $0x18] sm:$0xff]  ;;  %v18903_v63 = vpack.i.bf16 %v22046_v36, %v21982_v58 }
 0x8a5   : > { %v18768_v34 = vpack.i.bf16 %v22046_v36, %v22048_v13 }
 0x8a7   : > { %18769 = vrot.lane.b32.xlu1 %v18768_v34, %s19520_s24  ;;  %v22053_v23 = vld [vmem:[#allocation2 + $0x90] sm:$0xff] }
 0x8a8   : > { %v22055_v4 = vld [vmem:[#allocation2 + $0x68] sm:$0xff]  ;;  %v18913_v10 = vpack.i.bf16 %v22053_v23, %v22022_v33 }
 0x8a9   : > { %v18778_v15 = vpack.i.bf16 %v22053_v23, %v22055_v4 }
 0x8ab   : > { %18774 = vrot.lane.b32.xlu1 %v21968_v16, %s19522_s26  ;;  %18779 = vrot.lane.b32.xlu0 %v18778_v15, %s19520_s24 }
 0x8af   : > { %18789 = vrot.lane.b32.xlu1 %v21945_v26, %s19522_s26  ;;  %18784 = vrot.lane.b32.xlu0 %v21989_v40, %s19522_s26 }
 0x8b3   : > { %18799 = vrot.lane.b32.xlu1 %v18758_v31, %s19522_s26  ;;  %18794 = vrot.lane.b32.xlu0 %v22008_v29, %s19522_s26 }
 0x8b7   : > { %18809 = vrot.lane.b32.xlu1 %v18768_v34, %s19522_s26  ;;  %18804 = vrot.lane.b32.xlu0 %v21945_v26, %s19522_s26 }
 0x8bb   : > { %18814 = vrot.lane.b32.xlu1 %v21968_v16, %s19523_s13  ;;  %18819 = vrot.lane.b32.xlu0 %v18778_v15, %s19522_s26 }
 0x8bf   : > { %18829 = vrot.lane.b32.xlu1 %v21945_v26, %s19523_s13  ;;  %18824 = vrot.lane.b32.xlu0 %v21989_v40, %s19523_s13 }
 0x8c3   : > { %18839 = vrot.lane.b32.xlu1 %v18758_v31, %s19523_s13  ;;  %18834 = vrot.lane.b32.xlu0 %v22008_v29, %s19523_s13 }
 0x8c7   : > { %18849 = vrot.lane.b32.xlu1 %v18768_v34, %s19523_s13  ;;  %18844 = vrot.lane.b32.xlu0 %v21945_v26, %s19523_s13 }
 0x8cb   : > { %18854 = vrot.lane.b32.xlu1 %v21968_v16, %s19524_s16  ;;  %18859 = vrot.lane.b32.xlu0 %v18778_v15, %s19523_s13  ;;  %v18898_v16 = vpack.i.bf16 %v22048_v13, %v21963_v62  ;;  %v18740_v62 = vpop.permute.xlu1 %18739 }
 0x8cc   : > { %v18742_v58 = vunpack.i.h.bf16 %v18740_v62  ;;  %v18741_v12 = vunpack.i.l.bf16 %v18740_v62 }
 0x8cf   : > { %18869 = vrot.lane.b32.xlu1 %v21945_v26, %s19524_s16  ;;  %18864 = vrot.lane.b32.xlu0 %v21989_v40, %s19524_s16 }
 0x8d3   : > { %18879 = vrot.lane.b32.xlu1 %v18758_v31, %s19524_s16  ;;  %18874 = vrot.lane.b32.xlu0 %v22008_v29, %s19524_s16  ;;  %v14817_v29 = vld [vmem:[%s22905_s3 + $0x90] sm:$0xff] }
 0x8d7   : > { %18889 = vrot.lane.b32.xlu1 %v18768_v34, %s19524_s16  ;;  %18884 = vrot.lane.b32.xlu0 %v21945_v26, %s19524_s16  ;;  %v18918_v26 = vpack.i.bf16 %v22055_v4, %v22003_v7 }
 0x8db   : > { %18899 = vrot.lane.b32.xlu1 %v18898_v16, %s19525_s23  ;;  %18894 = vrot.lane.b32.xlu0 %v18778_v15, %s19524_s16  ;;  %v9678_v15 = vld [vmem:[#allocation7 + $0x4b0] sm:$0xff] }
 0x8df   : > { %18909 = vrot.lane.b32.xlu1 %v21985_v46, %s19525_s23  ;;  %18904 = vrot.lane.b32.xlu0 %v18903_v63, %s19525_s23 }
 0x8e3   : > { %18914 = vrot.lane.b32.xlu1 %v18913_v10, %s19525_s23  ;;  %18919 = vrot.lane.b32.xlu0 %v18918_v26, %s19525_s23 }
 0x8e7   : > { %18929 = vrot.lane.b32.xlu1 %v18898_v16, %s19526_s27  ;;  %18924 = vrot.lane.b32.xlu0 %v22025_v5, %s19525_s23 }
 0x8eb   : > { %18939 = vrot.lane.b32.xlu1 %v21985_v46, %s19526_s27  ;;  %18934 = vrot.lane.b32.xlu0 %v18903_v63, %s19526_s27 }
 0x8ef   : > { %18944 = vrot.lane.b32.xlu1 %v18913_v10, %s19526_s27  ;;  %18949 = vrot.lane.b32.xlu0 %v18918_v26, %s19526_s27 }
 0x8f3   : > { %18959 = vrot.lane.b32.xlu1 %v18898_v16, %s19527_s11  ;;  %18954 = vrot.lane.b32.xlu0 %v22025_v5, %s19526_s27 }
 0x8f7   : > { %18969 = vrot.lane.b32.xlu1 %v21985_v46, %s19527_s11  ;;  %18964 = vrot.lane.b32.xlu0 %v18903_v63, %s19527_s11 }
 0x8fb   : > { %18974 = vrot.lane.b32.xlu1 %v18913_v10, %s19527_s11  ;;  %18979 = vrot.lane.b32.xlu0 %v18918_v26, %s19527_s11 }
 0x8ff   : > { %18989 = vrot.lane.b32.xlu1 %v18898_v16, %s19528_s12  ;;  %18984 = vrot.lane.b32.xlu0 %v22025_v5, %s19527_s11 }
 0x901   : > { %v18745_v37 = vpop.permute.xlu1 %18744 }
 0x902   : > { %v18747_v51 = vunpack.i.h.bf16 %v18745_v37  ;;  %v18746_v47 = vunpack.i.l.bf16 %v18745_v37 }
 0x903   : > { %18999 = vrot.lane.b32.xlu1 %v21985_v46, %s19528_s12  ;;  %18994 = vrot.lane.b32.xlu0 %v18903_v63, %s19528_s12 }
 0x904   : > { %v9728_v9 = vsel %vm367_vm1, %v18741_v12, %v18746_v47  ;;  %v9729_v17 = vsel %vm367_vm1, %v18746_v47, %v18747_v51  ;;  %v9679_v47 = vld [vmem:[#allocation7 + $0x4b8] sm:$0xff] }
 0x905   : > { %v18750_v18 = vpop.permute.xlu0 %18749 }
 0x906   : > { %v18752_v40 = vunpack.i.h.bf16 %v18750_v18  ;;  %v18751_v21 = vunpack.i.l.bf16 %v18750_v18 }
 0x907   : > { %19004 = vrot.lane.b32.xlu1 %v18913_v10, %s19528_s12  ;;  %19009 = vrot.lane.b32.xlu0 %v18918_v26, %s19528_s12 }
 0x908   : > { %v9731_v46 = vsel %vm367_vm1, %v18742_v58, %v18751_v21  ;;  %v9732_v7 = vsel %vm367_vm1, %v18751_v21, %v18752_v40 }
 0x909   : > { %v18755_v22 = vpop.permute.xlu0 %18754  ;;  %v16664_v38 = vpack.c.bf16 %v9732_v7, %v9729_v17  ;;  %v16666_v45 = vpack.c.bf16 %v9731_v46, %v9728_v9 }
 0x90a   : > { %v18757_v50 = vunpack.i.h.bf16 %v18755_v22  ;;  %v18756_v42 = vunpack.i.l.bf16 %v18755_v22 }
 0x90b   : > { %11896 = vperm.xlu1 %17897, %v14815_v19   ;;  %19014 = vrot.lane.b32.xlu0 %v22025_v5, %s19528_s12  ;;  %v14818_v5 = vld [vmem:[%s22905_s3 + $0x98] sm:$0xff] }
 0x90c   : > { %16665 = vmatprep.subr.bf16.mxu0 %v16664_v38  ;;  %v9735_v54 = vsel %vm367_vm1, %v18756_v42, %v18757_v50 }
 0x90d   : > { %16667 = vmatpush1.bf16.msra.mxu0 %v16666_v45  ;;  %v18765_v0 = vpop.permute.xlu0 %18764  ;;  %v18760_v33 = vpop.permute.xlu1 %18759 }
 0x90e   : > { %v18767_v44 = vunpack.i.h.bf16 %v18765_v0  ;;  %v18766_v60 = vunpack.i.l.bf16 %v18765_v0  ;;  %v18762_v39 = vunpack.i.h.bf16 %v18760_v33  ;;  %v18761_v31 = vunpack.i.l.bf16 %v18760_v33 }
 0x90f   : > { %11906 = vperm.xlu1 %17897, %v14817_v29   ;;  %11901 = vperm.xlu0 %17896, %v14816_v27  }
 0x910   : > { %v9734_v49 = vsel %vm367_vm1, %v18766_v60, %v18756_v42  ;;  %v9737_v25 = vsel %vm367_vm1, %v18767_v44, %v18761_v31  ;;  %v9738_v30 = vsel %vm367_vm1, %v18761_v31, %v18762_v39 }
 0x911   : > { %v16668_v3 = vpack.c.bf16 %v9738_v30, %v9735_v54  ;;  %v16670_v28 = vpack.c.bf16 %v9737_v25, %v9734_v49 }
 0x913   : > { %11911 = vperm.xlu0 %17896, %v14818_v5   ;;  %16669 = vmatprep.subr.bf16.mxu0 %v16668_v3 }
 0x914   : > { %16671 = vmatpush1.bf16.msra.mxu0 %v16670_v28 }
 0x917   : > { %14743 = vmatmul.mubr.msk.f32.vlgmr.msra.gmra.mrb[32].mxu0 %vm392_vm0, %v9676_v56 }
 0x918   : > { %9834 = vmatprep.mubr.f32.mxu0 %v22160_v2 }
 0x919   : > { %v18770_v35 = vpop.permute.xlu1 %18769 }
 0x91a   : > { %v18772_v55 = vunpack.i.h.bf16 %v18770_v35  ;;  %v18771_v20 = vunpack.i.l.bf16 %v18770_v35 }
 0x91b   : > { %14744 = vmatmul.mubr.msk.f32.gmra.mrb[34].mxu0 %vm392_vm0, %v9677_v43 }
 0x91c   : > { %v9730_v48 = vsel %vm367_vm1, %v18747_v51, %v18771_v20  ;;  %v9733_v34 = vsel %vm367_vm1, %v18752_v40, %v18772_v55  ;;  %9840 = vmatprep.mubr.f32.mxu0 %v22160_v2 }
 0x91d   : > { %v18775_v16 = vpop.permute.xlu1 %18774  ;;  %v18780_v63 = vpop.permute.xlu0 %18779  ;;  %v16672_v10 = vpack.c.bf16 %v9733_v34, %v9730_v48 }
 0x91e   : > { %v18782_v26 = vunpack.i.h.bf16 %v18780_v63  ;;  %v18781_v62 = vunpack.i.l.bf16 %v18780_v63  ;;  %v18777_v37 = vunpack.i.h.bf16 %v18775_v16  ;;  %v18776_v58 = vunpack.i.l.bf16 %v18775_v16 }
 0x91f   : > { %16673 = vmatprep.subr.bf16.mxu0 %v16672_v10  ;;  %14745 = vmatmul.mubr.msk.f32.gmra.mrb[36].mxu0 %vm392_vm0, %v9678_v15 }
 0x920   : > { %16675 = vmatpush3.bf16.msra.mxu0 %v16672_v10  ;;  %v9736_v12 = vsel %vm367_vm1, %v18757_v50, %v18781_v62  ;;  %v9739_v51 = vsel %vm367_vm1, %v18762_v39, %v18782_v26  ;;  %9846 = vmatprep.mubr.f32.mxu0 %v22160_v2  ;;  %v9971_v7 = vsel %vm611_vm2, %v18776_v58, %v18777_v37  ;;  %v9671_v10 = vld [vmem:[#allocation7 + $0x480] sm:$0xff] }
 0x921   : > { %v18790_v18 = vpop.permute.xlu1 %18789  ;;  %v18785_v40 = vpop.permute.xlu0 %18784  ;;  %v16676_v21 = vpack.c.bf16 %v9739_v51, %v9736_v12 }
 0x922   : > { %v18792_v9 = vunpack.i.h.bf16 %v18790_v18  ;;  %v18791_v19 = vunpack.i.l.bf16 %v18790_v18  ;;  %v18787_v46 = vunpack.i.h.bf16 %v18785_v40  ;;  %v18786_v17 = vunpack.i.l.bf16 %v18785_v40 }
 0x923   : > { %16677 = vmatprep.subr.bf16.mxu0 %v16676_v21  ;;  %14746 = vmatmul.mubr.msk.f32.gmra.mrb[38].mxu0 %vm392_vm0, %v9679_v47 }
 0x924   : > { %v9970_v22 = vsel %vm611_vm2, %v18791_v19, %v18776_v58  ;;  %v9973_v38 = vsel %vm611_vm2, %v18792_v9, %v18786_v17  ;;  %16679 = vmatpush3.bf16.msra.mxu0 %v16676_v21  ;;  %v9974_v45 = vsel %vm611_vm2, %v18786_v17, %v18787_v46  ;;  %15844 = vmatprep.mubr.msk.f32.mxu0 %vm392_vm0, %v9676_v56  ;;  %v9672_v21 = vld [vmem:[#allocation7 + $0x488] sm:$0xff] }
 0x925   : > { %v18800_v29 = vpop.permute.xlu1 %18799  ;;  %v18795_v27 = vpop.permute.xlu0 %18794  ;;  %v16680_v50 = vpack.c.bf16 %v9974_v45, %v9971_v7  ;;  %v16682_v42 = vpack.c.bf16 %v9973_v38, %v9970_v22  ;;  %v9673_v22 = vld [vmem:[#allocation7 + $0x490] sm:$0xff] }
 0x926   : > { %v18802_v0 = vunpack.i.h.bf16 %v18800_v29  ;;  %v18801_v33 = vunpack.i.l.bf16 %v18800_v29  ;;  %v18797_v44 = vunpack.i.h.bf16 %v18795_v27  ;;  %v18796_v60 = vunpack.i.l.bf16 %v18795_v27 }
 0x927   : > { %16681 = vmatprep.subr.bf16.mxu0 %v16680_v50  ;;  %15845 = vmatmul.mubr.msk.f32.vlgmr.msra.gmra.mrb[40].mxu0 %vm392_vm0, %v9677_v43 }
 0x928   : > { %16683 = vmatpush1.bf16.msra.mxu0 %v16682_v42  ;;  %v9977_v39 = vsel %vm611_vm2, %v18796_v60, %v18797_v44  ;;  %v9980_v31 = vsel %vm611_vm2, %v18801_v33, %v18802_v0  ;;  %15847 = vmatprep.mubr.msk.f32.mxu0 %vm392_vm0, %v9678_v15 }
 0x929   : > { %v18810_v5 = vpop.permute.xlu1 %18809  ;;  %v18805_v49 = vpop.permute.xlu0 %18804  ;;  %v16684_v25 = vpack.c.bf16 %v9980_v31, %v9977_v39 }
 0x92a   : > { %v18812_v54 = vunpack.i.h.bf16 %v18810_v5  ;;  %v18811_v30 = vunpack.i.l.bf16 %v18810_v5  ;;  %v18807_v3 = vunpack.i.h.bf16 %v18805_v49  ;;  %v18806_v28 = vunpack.i.l.bf16 %v18805_v49 }
 0x92b   : > { %16685 = vmatprep.subr.bf16.mxu0 %v16684_v25  ;;  %15848 = vmatmul.mubr.msk.f32.gmra.mrb[42].mxu0 %vm392_vm0, %v9679_v47 }
 0x92c   : > { %v9979_v56 = vsel %vm611_vm2, %v18807_v3, %v18801_v33  ;;  %v9976_v43 = vsel %vm611_vm2, %v18806_v28, %v18796_v60  ;;  %v9972_v35 = vsel %vm611_vm2, %v18777_v37, %v18811_v30  ;;  %v9975_v55 = vsel %vm611_vm2, %v18787_v46, %v18812_v54  ;;  %10070 = vmatprep.mubr.f32.mxu0 %v22160_v2  ;;  %v9674_v33 = vld [vmem:[#allocation7 + $0x498] sm:$0xff] }
 0x92d   : > { %v22187_v20 = vpop.permute.xlu1 %18814  ;;  %v18820_v48 = vpop.permute.xlu0 %18819  ;;  %v16686_v34 = vpack.c.bf16 %v9979_v56, %v9976_v43  ;;  %v16688_v15 = vpack.c.bf16 %v9975_v55, %v9972_v35 }
 0x92e   : > { %v18822_v16 = vunpack.i.h.bf16 %v18820_v48  ;;  %v18821_v63 = vunpack.i.l.bf16 %v18820_v48  ;;  %v18817_v26 = vunpack.i.h.bf16 %v22187_v20  ;;  %v18816_v62 = vunpack.i.l.bf16 %v22187_v20 }
 0x92f   : > { %16687 = vmatpush1.bf16.msra.mxu0 %v16686_v34 }
 0x930   : > { %16689 = vmatprep.subr.bf16.mxu0 %v16688_v15  ;;  %v9978_v37 = vsel %vm611_vm2, %v18797_v44, %v18821_v63  ;;  %v9981_v58 = vsel %vm611_vm2, %v18802_v0, %v18822_v16  ;;  %v10218_v9 = vsel %vm859_vm3, %v18816_v62, %v18817_v26 }
 0x931   : > { %v18830_v12 = vpop.permute.xlu1 %18829  ;;  %v18825_v51 = vpop.permute.xlu0 %18824  ;;  %v16692_v47 = vpack.c.bf16 %v9981_v58, %v9978_v37  ;;  %v10181_v58 = vld [vmem:[#allocation7 + $0x4c0] sm:$0xff] }
 0x932   : > { %v18827_v18 = vunpack.i.h.bf16 %v18825_v51  ;;  %v18826_v40 = vunpack.i.l.bf16 %v18825_v51  ;;  %14751 = vmatmul.mubr.msk.f32.vlgmr.msra.gmra.mrb[32].mxu0 %vm392_vm0, %v9671_v10  ;;  %v18832_v45 = vunpack.i.h.bf16 %v18830_v12  ;;  %v18831_v29 = vunpack.i.l.bf16 %v18830_v12 }
 0x933   : > { %16691 = vmatpush3.bf16.msra.mxu0 %v16688_v15  ;;  %10076 = vmatprep.mubr.f32.mxu0 %v22160_v2 }
 0x934   : > { %16693 = vmatprep.subr.bf16.mxu0 %v16692_v47  ;;  %v10221_v19 = vsel %vm859_vm3, %v18826_v40, %v18827_v18  ;;  %v10217_v60 = vsel %vm859_vm3, %v18831_v29, %v18816_v62  ;;  %v10220_v39 = vsel %vm859_vm3, %v18832_v45, %v18826_v40 }
 0x935   : > { %v18835_v46 = vpop.permute.xlu0 %18834  ;;  %v16696_v17 = vpack.c.bf16 %v10221_v19, %v10218_v9  ;;  %v18840_v7 = vpop.permute.xlu1 %18839  ;;  %v16698_v28 = vpack.c.bf16 %v10220_v39, %v10217_v60 }
 0x936   : > { %14752 = vmatmul.mubr.msk.f32.gmra.mrb[34].mxu0 %vm392_vm0, %v9672_v21  ;;  %v18842_v27 = vunpack.i.h.bf16 %v18840_v7  ;;  %v18841_v50 = vunpack.i.l.bf16 %v18840_v7  ;;  %v18837_v42 = vunpack.i.h.bf16 %v18835_v46  ;;  %v18836_v0 = vunpack.i.l.bf16 %v18835_v46 }
 0x937   : > { %16695 = vmatpush3.bf16.msra.mxu0 %v16692_v47  ;;  %10082 = vmatprep.mubr.f32.mxu0 %v22160_v2 }
 0x938   : > { %16697 = vmatprep.subr.bf16.mxu0 %v16696_v17  ;;  %v10224_v30 = vsel %vm859_vm3, %v18836_v0, %v18837_v42  ;;  %v10227_v3 = vsel %vm859_vm3, %v18841_v50, %v18842_v27 }
 0x939   : > { %v18845_v38 = vpop.permute.xlu0 %18844  ;;  %v18850_v44 = vpop.permute.xlu1 %18849  ;;  %v16700_v55 = vpack.c.bf16 %v10227_v3, %v10224_v30 }
 0x93a   : > { %14753 = vmatmul.mubr.msk.f32.gmra.mrb[36].mxu0 %vm392_vm0, %v9673_v22  ;;  %v18847_v31 = vunpack.i.h.bf16 %v18845_v38  ;;  %v18846_v5 = vunpack.i.l.bf16 %v18845_v38  ;;  %v18852_v25 = vunpack.i.h.bf16 %v18850_v44  ;;  %v18851_v54 = vunpack.i.l.bf16 %v18850_v44 }
 0x93b   : > { %10088 = vmatprep.mubr.f32.mxu0 %v22160_v2 }
 0x93c   : > { %v10226_v56 = vsel %vm859_vm3, %v18847_v31, %v18841_v50  ;;  %v10223_v43 = vsel %vm859_vm3, %v18846_v5, %v18836_v0  ;;  %v10219_v34 = vsel %vm859_vm3, %v18817_v26, %v18851_v54  ;;  %v10222_v15 = vsel %vm859_vm3, %v18827_v18, %v18852_v25 }
 0x93d   : > { %v18860_v49 = vpop.permute.xlu0 %18859  ;;  %v22209_v35 = vpop.permute.xlu1 %18854  ;;  %v16702_v63 = vpack.c.bf16 %v10226_v56, %v10223_v43 }
 0x93e   : > { %14754 = vmatmul.mubr.msk.f32.gmra.mrb[38].mxu0 %vm392_vm0, %v9674_v33  ;;  %v18862_v20 = vunpack.i.h.bf16 %v18860_v49  ;;  %v18861_v48 = vunpack.i.l.bf16 %v18860_v49  ;;  %v18857_v47 = vunpack.i.h.bf16 %v22209_v35  ;;  %v18856_v18 = vunpack.i.l.bf16 %v22209_v35 }
 0x93f   : > { %15858 = vmatprep.mubr.msk.f32.mxu0 %vm392_vm0, %v9671_v10  ;;  %v16704_v10 = vpack.c.bf16 %v10222_v15, %v10219_v34 }
 0x940   : > { %v10225_v12 = vsel %vm859_vm3, %v18837_v42, %v18861_v48  ;;  %v10228_v26 = vsel %vm859_vm3, %v18842_v27, %v18862_v20  ;;  %v10477_v46 = vsel %vm1119_vm4, %v18856_v18, %v18857_v47 }
 0x941   : > { %v22215_v16 = vpop.permute.xlu0 %18864  ;;  %v18870_v51 = vpop.permute.xlu1 %18869  ;;  %v16708_v40 = vpack.c.bf16 %v10228_v26, %v10225_v12  ;;  %v10442_v12 = vld [vmem:[#allocation7 + $0x4f0] sm:$0xff]  ;;  %v19341_v26 = vpack.c.bf16 %v21975_v1, %v21958_v57 }
 0x942   : > { %15859 = vmatmul.mubr.msk.f32.vlgmr.msra.gmra.mrb[40].mxu0 %vm392_vm0, %v9672_v21  ;;  %v18867_v62 = vunpack.i.h.bf16 %v22215_v16  ;;  %v18866_v37 = vunpack.i.l.bf16 %v22215_v16  ;;  %v10182_v21 = vld [vmem:[#allocation7 + $0x4c8] sm:$0xff]  ;;  %v18872_v38 = vunpack.i.h.bf16 %v18870_v51  ;;  %v18871_v45 = vunpack.i.l.bf16 %v18870_v51  ;;  %v10443_v51 = vld [vmem:[#allocation7 + $0x4f8] sm:$0xff] }
 0x943   : > { %16699 = vmatpush1.bf16.msra.mxu0 %v16698_v28  ;;  %15861 = vmatprep.mubr.msk.f32.mxu0 %vm392_vm0, %v9673_v22  ;;  %v10183_v22 = vld [vmem:[#allocation7 + $0x4d0] sm:$0xff] }
 0x944   : > { %16701 = vmatprep.subr.bf16.mxu0 %v16700_v55  ;;  %v10480_v9 = vsel %vm1119_vm4, %v18866_v37, %v18867_v62  ;;  %v10476_v60 = vsel %vm1119_vm4, %v18871_v45, %v18856_v18  ;;  %v10479_v39 = vsel %vm1119_vm4, %v18872_v38, %v18866_v37  ;;  %v19347_v18 = vpack.c.bf16 %v22015_v53, %v21996_v14 }
 0x945   : > { %v18875_v19 = vpop.permute.xlu0 %18874  ;;  %v18880_v17 = vpop.permute.xlu1 %18879  ;;  %v16712_v7 = vpack.c.bf16 %v10480_v9, %v10477_v46  ;;  %v16714_v28 = vpack.c.bf16 %v10479_v39, %v10476_v60  ;;  %v10699_v9 = vld [vmem:[#allocation7 + $0x500] sm:$0xff] }
 0x946   : > { %15862 = vmatmul.mubr.msk.f32.gmra.mrb[42].mxu0 %vm392_vm0, %v9674_v33  ;;  %v18882_v27 = vunpack.i.h.bf16 %v18880_v17  ;;  %v18881_v50 = vunpack.i.l.bf16 %v18880_v17  ;;  %v18877_v42 = vunpack.i.h.bf16 %v18875_v19  ;;  %v18876_v0 = vunpack.i.l.bf16 %v18875_v19  ;;  %v10184_v33 = vld [vmem:[#allocation7 + $0x4d8] sm:$0xff] }
 0x947   : > { %16703 = vmatpush1.bf16.msra.mxu0 %v16702_v63  ;;  %10317 = vmatprep.mubr.f32.mxu0 %v22160_v2  ;;  %v10440_v63 = vld [vmem:[#allocation7 + $0x4e0] sm:$0xff] }
 0x948   : > { %16705 = vmatprep.subr.bf16.mxu0 %v16704_v10  ;;  %v10483_v54 = vsel %vm1119_vm4, %v18876_v0, %v18877_v42  ;;  %v10486_v30 = vsel %vm1119_vm4, %v18881_v50, %v18882_v27 }
 0x949   : > { %v18885_v29 = vpop.permute.xlu0 %18884  ;;  %v18890_v44 = vpop.permute.xlu1 %18889  ;;  %v16716_v35 = vpack.c.bf16 %v10486_v30, %v10483_v54 }
 0x94a   : > { %14759 = vmatmul.mubr.msk.f32.vlgmr.msra.gmra.mrb[32].mxu0 %vm392_vm0, %v10181_v58  ;;  %v18887_v31 = vunpack.i.h.bf16 %v18885_v29  ;;  %v18886_v5 = vunpack.i.l.bf16 %v18885_v29  ;;  %v18892_v49 = vunpack.i.h.bf16 %v18890_v44  ;;  %v18891_v25 = vunpack.i.l.bf16 %v18890_v44 }
 0x94b   : > { %16707 = vmatpush3.bf16.msra.mxu0 %v16704_v10  ;;  %10323 = vmatprep.mubr.f32.mxu0 %v22160_v2 }
 0x94c   : > { %16709 = vmatprep.subr.bf16.mxu0 %v16708_v40  ;;  %v10485_v56 = vsel %vm1119_vm4, %v18887_v31, %v18881_v50  ;;  %v10482_v43 = vsel %vm1119_vm4, %v18886_v5, %v18876_v0  ;;  %v10478_v48 = vsel %vm1119_vm4, %v18857_v47, %v18891_v25  ;;  %v10481_v34 = vsel %vm1119_vm4, %v18867_v62, %v18892_v49  ;;  %v10441_v62 = vld [vmem:[#allocation7 + $0x4e8] sm:$0xff] }
 0x94d   : > { %v18895_v3 = vpop.permute.xlu0 %18894  ;;  %v16718_v15 = vpack.c.bf16 %v10485_v56, %v10482_v43  ;;  %v16720_v16 = vpack.c.bf16 %v10481_v34, %v10478_v48  ;;  %v19344_v47 = vpack.c.bf16 %v21970_v32, %v21953_v6  ;;  %v18900_v57 = vpop.permute.xlu1 %18899  ;;  %v19350_v32 = vpack.c.bf16 %v22010_v41, %v21991_v59 }
 0x94e   : > { %14760 = vmatmul.mubr.msk.f32.gmra.mrb[34].mxu0 %vm392_vm0, %v10182_v21  ;;  %v18897_v55 = vunpack.i.h.bf16 %v18895_v3  ;;  %v18896_v20 = vunpack.i.l.bf16 %v18895_v3  ;;  %v18902_v14 = vunpack.i.h.bf16 %v18900_v57  ;;  %v18901_v53 = vunpack.i.l.bf16 %v18900_v57 }
 0x94f   : > { %16711 = vmatpush3.bf16.msra.mxu0 %v16708_v40  ;;  %10329 = vmatprep.mubr.f32.mxu0 %v22160_v2  ;;  %v16736_v40 = vpack.c.bf16 %v22046_v36, %v22048_v13  ;;  %v16740_v36 = vpack.c.bf16 %v22053_v23, %v22055_v4  ;;  %v10700_v13 = vld [vmem:[#allocation7 + $0x508] sm:$0xff] }
 0x950   : > { %16713 = vmatprep.subr.bf16.mxu0 %v16712_v7  ;;  %v10484_v10 = vsel %vm1119_vm4, %v18877_v42, %v18896_v20  ;;  %v10487_v37 = vsel %vm1119_vm4, %v18882_v27, %v18897_v55  ;;  %v10931_v46 = vsel %vm1574_vm5, %v18901_v53, %v18902_v14  ;;  %v10701_v7 = vld [vmem:[#allocation7 + $0x510] sm:$0xff]  ;;  %v10702_v42 = vld [vmem:[#allocation7 + $0x518] sm:$0xff]  ;;  %v10902_v55 = vld [vmem:[#allocation7 + $0x520] sm:$0xff] }
 0x951   : > { %v18905_v1 = vpop.permute.xlu0 %18904  ;;  %v18910_v19 = vpop.permute.xlu1 %18909 }
 0x952   : > { %14761 = vmatmul.mubr.msk.f32.gmra.mrb[36].mxu0 %vm392_vm0, %v10183_v22  ;;  %v18906_v6 = vunpack.i.l.bf16 %v18905_v1  ;;  %v18912_v23 = vunpack.i.h.bf16 %v18910_v19  ;;  %v18911_v4 = vunpack.i.l.bf16 %v18910_v19 }
 0x953   : > { %10335 = vmatprep.mubr.f32.mxu0 %v22160_v2 }
 0x954   : > { %v10930_v0 = vsel %vm1574_vm5, %v18911_v4, %v18901_v53 }
 0x955   : > { %v18920_v41 = vpop.permute.xlu0 %18919 }
 0x956   : > { %14762 = vmatmul.mubr.msk.f32.gmra.mrb[38].mxu0 %vm392_vm0, %v10184_v33  ;;  %v18922_v29 = vunpack.i.h.bf16 %v18920_v41  ;;  %v18921_v27 = vunpack.i.l.bf16 %v18920_v41 }
 0x957   : > { %15872 = vmatprep.mubr.msk.f32.mxu0 %vm392_vm0, %v10181_v58  ;;  %v16724_v58 = vpack.c.bf16 %v10487_v37, %v10484_v10 }
 0x958   : > { %v10935_v39 = vsel %vm1574_vm5, %v18921_v27, %v18922_v29 }
 0x959   : > { %v18925_v50 = vpop.permute.xlu0 %18924 }
 0x95a   : > { %15873 = vmatmul.mubr.msk.f32.vlgmr.msra.gmra.mrb[40].mxu0 %vm392_vm0, %v10182_v21  ;;  %v18907_v21 = vunpack.i.h.bf16 %v18905_v1  ;;  %v18927_v44 = vunpack.i.h.bf16 %v18925_v50  ;;  %v18926_v60 = vunpack.i.l.bf16 %v18925_v50 }
 0x95b   : > { %16715 = vmatpush1.bf16.msra.mxu0 %v16714_v28  ;;  %15875 = vmatprep.mubr.msk.f32.mxu0 %vm392_vm0, %v10183_v22  ;;  %v18915_v22 = vpop.permute.xlu1 %18914 }
 0x95c   : > { %16717 = vmatprep.subr.bf16.mxu0 %v16716_v35  ;;  %v10933_v59 = vsel %vm1574_vm5, %v18906_v6, %v18907_v21  ;;  %v18917_v38 = vunpack.i.h.bf16 %v18915_v22  ;;  %v18916_v45 = vunpack.i.l.bf16 %v18915_v22  ;;  %v10934_v25 = vsel %vm1574_vm5, %v18926_v60, %v18921_v27 }
 0x95d   : > { %v16744_v17 = vpack.c.bf16 %v10933_v59, %v10931_v46  ;;  %v18935_v3 = vpop.permute.xlu0 %18934  ;;  %v16752_v56 = vpack.c.bf16 %v18907_v21, %v18902_v14  ;;  %v10905_v21 = vld [vmem:[#allocation7 + $0x538] sm:$0xff] }
 0x95e   : > { %15876 = vmatmul.mubr.msk.f32.gmra.mrb[42].mxu0 %vm392_vm0, %v10184_v33  ;;  %v10932_v33 = vsel %vm1574_vm5, %v18912_v23, %v18906_v6  ;;  %v10937_v31 = vsel %vm1574_vm5, %v18916_v45, %v18917_v38  ;;  %v10936_v49 = vsel %vm1574_vm5, %v18927_v44, %v18916_v45  ;;  %v18937_v43 = vunpack.i.h.bf16 %v18935_v3 }
 0x95f   : > { %16719 = vmatpush1.bf16.msra.mxu0 %v16718_v15  ;;  %10576 = vmatprep.mubr.f32.mxu0 %v22160_v2  ;;  %v16746_v5 = vpack.c.bf16 %v10932_v33, %v10930_v0  ;;  %v16748_v54 = vpack.c.bf16 %v10937_v31, %v10935_v39  ;;  %v18930_v30 = vpop.permute.xlu1 %18929  ;;  %v16750_v28 = vpack.c.bf16 %v10936_v49, %v10934_v25  ;;  %v18936_v35 = vunpack.i.l.bf16 %v18935_v3  ;;  %v11151_v39 = vld [vmem:[#allocation7 + $0x550] sm:$0xff] }
 0x960   : > { %16721 = vmatprep.subr.bf16.mxu0 %v16720_v16  ;;  %v18932_v20 = vunpack.i.h.bf16 %v18930_v30  ;;  %v18931_v48 = vunpack.i.l.bf16 %v18930_v30  ;;  %v16756_v34 = vpack.c.bf16 %v18917_v38, %v18922_v29  ;;  %v11149_v38 = vld [vmem:[#allocation7 + $0x540] sm:$0xff] }
 0x961   : > { %v18950_v10 = vpop.permute.xlu0 %18949 }
 0x962   : > { %14767 = vmatmul.mubr.msk.f32.vlgmr.msra.gmra.mrb[32].mxu0 %vm392_vm0, %v10440_v63  ;;  %v11178_v37 = vsel %vm23042_vm8, %v18931_v48, %v18932_v20  ;;  %v18952_v1 = vunpack.i.h.bf16 %v18950_v10  ;;  %vm23047_vm8 = vmmov %vm23041_vm6  ;;  %v16768_v22 = vpack.c.bf16 %v18937_v43, %v18932_v20 }
 0x963   : > { %16723 = vmatpush3.bf16.msra.mxu0 %v16720_v16  ;;  %10582 = vmatprep.mubr.f32.mxu0 %v22160_v2  ;;  %v18940_v15 = vpop.permute.xlu1 %18939  ;;  %v10903_v16 = vld [vmem:[#allocation7 + $0x528] sm:$0xff] }
 0x964   : > { %16725 = vmatprep.subr.bf16.mxu0 %v16724_v58 }
 0x966   : > { %14768 = vmatmul.mubr.msk.f32.gmra.mrb[34].mxu0 %vm392_vm0, %v10441_v62 }
 0x967   : > { %16727 = vmatpush3.bf16.msra.mxu0 %v16724_v58  ;;  %10588 = vmatprep.mubr.f32.mxu0 %v22160_v2 }
 0x968   : > { %19342 = vmatprep.subr.msk.bf16.mxu0 %vm20709_vm12, %v19341_v26  ;;  %v18942_v26 = vunpack.i.h.bf16 %v18940_v15 }
 0x96a   : > { %14769 = vmatmul.mubr.msk.f32.gmra.mrb[36].mxu0 %vm392_vm0, %v10442_v12 }
 0x96b   : > { %10594 = vmatprep.mubr.f32.mxu0 %v22160_v2 }
 0x96e   : > { %14770 = vmatmul.mubr.msk.f32.gmra.mrb[38].mxu0 %vm392_vm0, %v10443_v51 }
 0x96f   : > { %15886 = vmatprep.mubr.msk.f32.mxu0 %vm392_vm0, %v10440_v63  ;;  %v11180_v63 = vsel %vm23041_vm6, %v18936_v35, %v18937_v43 }
 0x970   : > { %v16760_v58 = vpack.c.bf16 %v11180_v63, %v11178_v37 }
 0x972   : > { %15887 = vmatmul.mubr.msk.f32.vlgmr.msra.gmra.mrb[40].mxu0 %vm392_vm0, %v10441_v62  ;;  %v10904_v62 = vld [vmem:[#allocation7 + $0x530] sm:$0xff] }
 0x973   : > { %19345 = vmatpush1.bf16.msk.msra.mxu0 %vm20726_vm13, %v19344_v47  ;;  %15889 = vmatprep.mubr.msk.f32.mxu0 %vm392_vm0, %v10442_v12  ;;  %v18945_v12 = vpop.permute.xlu1 %18944 }
 0x974   : > { %19348 = vmatprep.subr.msk.bf16.mxu0 %vm20709_vm12, %v19347_v18  ;;  %v18947_v47 = vunpack.i.h.bf16 %v18945_v12  ;;  %v18946_v57 = vunpack.i.l.bf16 %v18945_v12  ;;  %v18951_v18 = vunpack.i.l.bf16 %v18950_v10 }
 0x976   : > { %15890 = vmatmul.mubr.msk.f32.gmra.mrb[42].mxu0 %vm392_vm0, %v10443_v51  ;;  %v18941_v51 = vunpack.i.l.bf16 %v18940_v15  ;;  %v11182_v53 = vsel %vm23045_vm10, %v18951_v18, %v18952_v1  ;;  %v11184_v19 = vsel %vm23046_vm15, %v18946_v57, %v18947_v47  ;;  %v16772_v27 = vpack.c.bf16 %v18947_v47, %v18952_v1  ;;  %v11396_v47 = vld [vmem:[#allocation7 + $0x560] sm:$0xff] }
 0x977   : > { %19351 = vmatpush1.bf16.msk.msra.mxu0 %vm20726_vm13, %v19350_v32  ;;  %10779 = vmatprep.mubr.f32.mxu0 %v22160_v2  ;;  %v11179_v32 = vsel %vm23044_vm9, %v18942_v26, %v18936_v35  ;;  %v16764_v41 = vpack.c.bf16 %v11184_v19, %v11182_v53  ;;  %v18960_v46 = vpop.permute.xlu1 %18959  ;;  %v11398_v53 = vld [vmem:[#allocation7 + $0x570] sm:$0xff] }
 0x978   : > { %16737 = vmatprep.subr.bf16.mxu0 %v16736_v40  ;;  %v11177_v6 = vsel %vm23043_vm7, %v18941_v51, %v18931_v48  ;;  %v18962_v45 = vunpack.i.h.bf16 %v18960_v46  ;;  %v18961_v29 = vunpack.i.l.bf16 %v18960_v46  ;;  %vm23048_vm7 = vcmask 900096  }
 0x979   : > { %vm23049_vm9 = vmmov %vm23048_vm7 }
 0x97a   : > { %14775 = vmatmul.mubr.msk.f32.vlgmr.msra.gmra.mrb[32].mxu0 %vm392_vm0, %v10699_v9  ;;  %v11425_v44 = vsel %vm23049_vm9, %v18961_v29, %v18962_v45  ;;  %vm23050_vm10 = vmmov %vm23048_vm7 }
 0x97b   : > { %16739 = vmatpush3.bf16.msra.mxu0 %v16736_v40  ;;  %10785 = vmatprep.mubr.f32.mxu0 %v22160_v2  ;;  %v18955_v40 = vpop.permute.xlu0 %18954  ;;  %v18970_v50 = vpop.permute.xlu1 %18969  ;;  %vm23051_vm15 = vmmov %vm23048_vm7 }
 0x97c   : > { %16741 = vmatprep.subr.bf16.mxu0 %v16740_v36  ;;  %v18956_v14 = vunpack.i.l.bf16 %v18955_v40  ;;  %v18971_v49 = vunpack.i.l.bf16 %v18970_v50 }
 0x97e   : > { %14776 = vmatmul.mubr.msk.f32.gmra.mrb[34].mxu0 %vm392_vm0, %v10700_v13  ;;  %v11181_v59 = vsel %vm23047_vm8, %v18956_v14, %v18951_v18  ;;  %v11424_v43 = vsel %vm23050_vm10, %v18971_v49, %v18961_v29  ;;  %vm23056_vm10 = vcmask 891904   ;;  %v11645_v49 = vld [vmem:[#allocation7 + $0x590] sm:$0xff] }
 0x97f   : > { %16743 = vmatpush3.bf16.msra.mxu0 %v16740_v36  ;;  %10791 = vmatprep.mubr.f32.mxu0 %v22160_v2  ;;  %v16762_v36 = vpack.c.bf16 %v11179_v32, %v11177_v6  ;;  %v18975_v31 = vpop.permute.xlu1 %18974 }
 0x980   : > { %16745 = vmatprep.subr.bf16.mxu0 %v16744_v17  ;;  %v18965_v17 = vpop.permute.xlu0 %18964  ;;  %v18977_v25 = vunpack.i.h.bf16 %v18975_v31 }
 0x981   : > { %v18967_v23 = vunpack.i.h.bf16 %v18965_v17  ;;  %v18966_v4 = vunpack.i.l.bf16 %v18965_v17 }
 0x982   : > { %14777 = vmatmul.mubr.msk.f32.gmra.mrb[36].mxu0 %vm392_vm0, %v10701_v7 }
 0x983   : > { %10797 = vmatprep.mubr.f32.mxu0 %v22160_v2  ;;  %v11427_v0 = vsel %vm23048_vm7, %v18966_v4, %v18967_v23  ;;  %v18990_v37 = vpop.permute.xlu1 %18989  ;;  %v16784_v12 = vpack.c.bf16 %v18967_v23, %v18962_v45 }
 0x984   : > { %v18980_v33 = vpop.permute.xlu0 %18979  ;;  %v16776_v60 = vpack.c.bf16 %v11427_v0, %v11425_v44  ;;  %v18991_v1 = vunpack.i.l.bf16 %v18990_v37 }
 0x985   : > { %v18982_v30 = vunpack.i.h.bf16 %v18980_v33  ;;  %v18981_v3 = vunpack.i.l.bf16 %v18980_v33 }
 0x986   : > { %14778 = vmatmul.mubr.msk.f32.gmra.mrb[38].mxu0 %vm392_vm0, %v10702_v42 }
 0x987   : > { %15900 = vmatprep.mubr.msk.f32.mxu0 %vm392_vm0, %v10699_v9  ;;  %v18957_v9 = vunpack.i.h.bf16 %v18955_v40  ;;  %v16788_v18 = vpack.c.bf16 %v18977_v25, %v18982_v30  ;;  %v19000_v40 = vpop.permute.xlu1 %18999 }
 0x98a   : > { %15901 = vmatmul.mubr.msk.f32.vlgmr.msra.gmra.mrb[40].mxu0 %vm392_vm0, %v10700_v13  ;;  %v11183_v13 = vsel %vm23041_vm6, %v18957_v9, %v18946_v57  ;;  %vm23052_vm6 = vmmov %vm23048_vm7  ;;  %v18992_v57 = vunpack.i.h.bf16 %v18990_v37 }
 0x98b   : > { %16747 = vmatpush1.bf16.msra.mxu0 %v16746_v5  ;;  %15903 = vmatprep.mubr.msk.f32.mxu0 %vm392_vm0, %v10701_v7  ;;  %v16766_v7 = vpack.c.bf16 %v11183_v13, %v11181_v59  ;;  %v18972_v5 = vunpack.i.h.bf16 %v18970_v50  ;;  %v11429_v48 = vsel %vm23052_vm6, %v18981_v3, %v18982_v30  ;;  %vm23053_vm8 = vmmov %vm23052_vm6  ;;  %v19005_v19 = vpop.permute.xlu1 %19004  ;;  %v19001_v13 = vunpack.i.l.bf16 %v19000_v40 }
 0x98c   : > { %16749 = vmatprep.subr.bf16.mxu0 %v16748_v54  ;;  %v18976_v54 = vunpack.i.l.bf16 %v18975_v31  ;;  %vm23054_vm7 = vmmov %vm23052_vm6  ;;  %v19007_v59 = vunpack.i.h.bf16 %v19005_v19 }
 0x98d   : > { %v11426_v35 = vsel %vm23051_vm15, %v18972_v5, %v18966_v4  ;;  %vm23055_vm9 = vmmov %vm23052_vm6  ;;  %v11644_v5 = vld [vmem:[#allocation7 + $0x588] sm:$0xff] }
 0x98e   : > { %15904 = vmatmul.mubr.msk.f32.gmra.mrb[42].mxu0 %vm392_vm0, %v10702_v42  ;;  %v11150_v42 = vld [vmem:[#allocation7 + $0x548] sm:$0xff]  ;;  %v16778_v15 = vpack.c.bf16 %v11426_v35, %v11424_v43  ;;  %vm23057_vm15 = vmmov %vm23056_vm10 }
 0x98f   : > { %16751 = vmatpush1.bf16.msra.mxu0 %v16750_v28  ;;  %11026 = vmatprep.mubr.f32.mxu0 %v22160_v2  ;;  %v18985_v28 = vpop.permute.xlu0 %18984  ;;  %v11672_v9 = vsel %vm23057_vm15, %v18991_v1, %v18992_v57  ;;  %vm23058_vm6 = vmmov %vm23056_vm10  ;;  %v11897_v30 = vpop.permute.xlu1 %11896 }
 0x990   : > { %16753 = vmatprep.subr.bf16.mxu0 %v16752_v56  ;;  %v18986_v20 = vunpack.i.l.bf16 %v18985_v28  ;;  %v11671_v23 = vsel %vm23058_vm6, %v19001_v13, %v18991_v1  ;;  %vm23063_vm15 = vmmov %vm23058_vm6 }
 0x992   : > { %14783 = vmatmul.mubr.msk.f32.vlgmr.msra.gmra.mrb[32].mxu0 %vm392_vm0, %v10902_v55  ;;  %v11428_v63 = vsel %vm23055_vm9, %v18986_v20, %v18981_v3  ;;  %vm23061_vm9 = vmmov %vm23058_vm6 }
 0x993   : > { %16755 = vmatpush3.bf16.msra.mxu0 %v16752_v56  ;;  %11032 = vmatprep.mubr.f32.mxu0 %v22160_v2  ;;  %v11152_v56 = vld [vmem:[#allocation7 + $0x558] sm:$0xff] }
 0x994   : > { %16757 = vmatprep.subr.bf16.mxu0 %v16756_v34 }
 0x996   : > { %14784 = vmatmul.mubr.msk.f32.gmra.mrb[34].mxu0 %vm392_vm0, %v10903_v16 }
 0x997   : > { %16759 = vmatpush3.bf16.msra.mxu0 %v16756_v34  ;;  %11038 = vmatprep.mubr.f32.mxu0 %v22160_v2  ;;  %v11431_v34 = vsel %vm23053_vm8, %v18976_v54, %v18977_v25  ;;  %vm23059_vm8 = vmmov %vm23058_vm6  ;;  %v11646_v25 = vld [vmem:[#allocation7 + $0x598] sm:$0xff] }
 0x998   : > { %16761 = vmatprep.subr.bf16.mxu0 %v16760_v58  ;;  %v16780_v10 = vpack.c.bf16 %v11431_v34, %v11429_v48  ;;  %v18995_v58 = vpop.permute.xlu0 %18994 }
 0x999   : > { %v18997_v26 = vunpack.i.h.bf16 %v18995_v58  ;;  %v18996_v51 = vunpack.i.l.bf16 %v18995_v58 }
 0x99a   : > { %14785 = vmatmul.mubr.msk.f32.gmra.mrb[36].mxu0 %vm392_vm0, %v10904_v62 }
 0x99b   : > { %11044 = vmatprep.mubr.f32.mxu0 %v22160_v2  ;;  %v11674_v6 = vsel %vm23056_vm10, %v18996_v51, %v18997_v26  ;;  %vm23062_vm10 = vmmov %vm23058_vm6 }
 0x99c   : > { %v19010_v32 = vpop.permute.xlu0 %19009  ;;  %v16792_v14 = vpack.c.bf16 %v11674_v6, %v11672_v9 }
 0x99d   : > { %v19012_v46 = vunpack.i.h.bf16 %v19010_v32  ;;  %v19011_v17 = vunpack.i.l.bf16 %v19010_v32 }
 0x99e   : > { %14786 = vmatmul.mubr.msk.f32.gmra.mrb[38].mxu0 %vm392_vm0, %v10905_v21 }
 0x99f   : > { %15914 = vmatprep.mubr.msk.f32.mxu0 %vm392_vm0, %v10902_v55  ;;  %v18987_v55 = vunpack.i.h.bf16 %v18985_v28  ;;  %v16804_v31 = vpack.c.bf16 %v19007_v59, %v19012_v46  ;;  %v22378_v28 = vstv %s14819_s9  ;;  %s22848_s9 = scalar_lea.hbm %s22907_s5, %s17532_s17 }
 0x9a2   : > { %15915 = vmatmul.mubr.msk.f32.vlgmr.msra.gmra.mrb[40].mxu0 %vm392_vm0, %v10903_v16  ;;  %v11430_v16 = vsel %vm23054_vm7, %v18987_v55, %v18976_v54  ;;  %vm23060_vm7 = vmmov %vm23058_vm6  ;;  %v22374_v54 = vpack.i.bf16 %v22160_v2, %v22160_v2 }
 0x9a3   : > { %16763 = vmatpush1.bf16.msra.mxu0 %v16762_v36  ;;  %15917 = vmatprep.mubr.msk.f32.mxu0 %vm392_vm0, %v10904_v62  ;;  %v16782_v62 = vpack.c.bf16 %v11430_v16, %v11428_v63  ;;  %v19002_v36 = vunpack.i.h.bf16 %v19000_v40  ;;  %v11676_v29 = vsel %vm23060_vm7, %v19011_v17, %v19012_v46  ;;  %vm23064_vm7 = vcmp.eq.s32.totalorder %v22981_v11, 1 }
 0x9a4   : > { %16765 = vmatprep.subr.bf16.mxu0 %v16764_v41  ;;  %v19006_v41 = vunpack.i.l.bf16 %v19005_v19  ;;  %19019 = vrot.lane.b32.xlu1 %v22374_v54, %s19520_s24 }
 0x9a5   : > { %v11673_v4 = vsel %vm23059_vm8, %v19002_v36, %v18996_v51 }
 0x9a6   : > { %15918 = vmatmul.mubr.msk.f32.gmra.mrb[42].mxu0 %vm392_vm0, %v10905_v21  ;;  %v11397_v21 = vld [vmem:[#allocation7 + $0x568] sm:$0xff]  ;;  %v16794_v50 = vpack.c.bf16 %v11673_v4, %v11671_v23 }
 0x9a7   : > { %16767 = vmatpush1.bf16.msra.mxu0 %v16766_v7  ;;  %11273 = vmatprep.mubr.f32.mxu0 %v22160_v2  ;;  %v19015_v7 = vpop.permute.xlu0 %19014 }
 0x9a8   : > { %16769 = vmatprep.subr.bf16.mxu0 %v16768_v22  ;;  %v19016_v45 = vunpack.i.l.bf16 %v19015_v7 }
 0x9aa   : > { %14791 = vmatmul.mubr.msk.f32.vlgmr.msra.gmra.mrb[32].mxu0 %vm392_vm0, %v11149_v38  ;;  %v11675_v0 = vsel %vm23063_vm15, %v19016_v45, %v19011_v17  ;;  %vm23065_vm15 = vmmov %vm23064_vm7 }
 0x9ab   : > { %16771 = vmatpush3.bf16.msra.mxu0 %v16768_v22  ;;  %11279 = vmatprep.mubr.f32.mxu0 %v22160_v2  ;;  %v11399_v22 = vld [vmem:[#allocation7 + $0x578] sm:$0xff]  ;;  %v11902_v20 = vpop.permute.xlu0 %11901 }
 0x9ac   : > { %16773 = vmatprep.subr.bf16.mxu0 %v16772_v27 }
 0x9ae   : > { %14792 = vmatmul.mubr.msk.f32.gmra.mrb[34].mxu0 %vm392_vm0, %v11150_v42 }
 0x9af   : > { %16775 = vmatpush3.bf16.msra.mxu0 %v16772_v27  ;;  %11285 = vmatprep.mubr.f32.mxu0 %v22160_v2  ;;  %v11678_v27 = vsel %vm23061_vm9, %v19006_v41, %v19007_v59 }
 0x9b0   : > { %16777 = vmatprep.subr.bf16.mxu0 %v16776_v60  ;;  %v16796_v33 = vpack.c.bf16 %v11678_v27, %v11676_v29  ;;  %v16800_v60 = vpack.c.bf16 %v18997_v26, %v18992_v57 }
 0x9b2   : > { %14793 = vmatmul.mubr.msk.f32.gmra.mrb[36].mxu0 %vm392_vm0, %v11151_v39 }
 0x9b3   : > { %11291 = vmatprep.mubr.f32.mxu0 %v22160_v2 }
 0x9b6   : > { %14794 = vmatmul.mubr.msk.f32.gmra.mrb[38].mxu0 %vm392_vm0, %v11152_v56 }
 0x9b7   : > { %15928 = vmatprep.mubr.msk.f32.mxu0 %vm392_vm0, %v11149_v38  ;;  %v19017_v38 = vunpack.i.h.bf16 %v19015_v7 }
 0x9ba   : > { %15929 = vmatmul.mubr.msk.f32.vlgmr.msra.gmra.mrb[40].mxu0 %vm392_vm0, %v11150_v42  ;;  %v11677_v42 = vsel %vm23062_vm10, %v19017_v38, %v19006_v41 }
 0x9bb   : > { %16779 = vmatpush1.bf16.msra.mxu0 %v16778_v15  ;;  %15931 = vmatprep.mubr.msk.f32.mxu0 %vm392_vm0, %v11151_v39  ;;  %v16798_v44 = vpack.c.bf16 %v11677_v42, %v11675_v0  ;;  %v11643_v39 = vld [vmem:[#allocation7 + $0x580] sm:$0xff] }
 0x9bc   : > { %16781 = vmatprep.subr.bf16.mxu0 %v16780_v10 }
 0x9be   : > { %15932 = vmatmul.mubr.msk.f32.gmra.mrb[42].mxu0 %vm392_vm0, %v11152_v56 }
 0x9bf   : > { %16783 = vmatpush1.bf16.msra.mxu0 %v16782_v62  ;;  %11520 = vmatprep.mubr.f32.mxu0 %v22160_v2 }
 0x9c0   : > { %16785 = vmatprep.subr.bf16.mxu0 %v16784_v12 }
 0x9c2   : > { %14799 = vmatmul.mubr.msk.f32.vlgmr.msra.gmra.mrb[32].mxu0 %vm392_vm0, %v11396_v47 }
 0x9c3   : > { %16787 = vmatpush3.bf16.msra.mxu0 %v16784_v12  ;;  %11526 = vmatprep.mubr.f32.mxu0 %v22160_v2  ;;  %v11907_v12 = vpop.permute.xlu1 %11906 }
 0x9c4   : > { %16789 = vmatprep.subr.bf16.mxu0 %v16788_v18 }
 0x9c6   : > { %14800 = vmatmul.mubr.msk.f32.gmra.mrb[34].mxu0 %vm392_vm0, %v11397_v21 }
 0x9c7   : > { %16791 = vmatpush3.bf16.msra.mxu0 %v16788_v18  ;;  %11532 = vmatprep.mubr.f32.mxu0 %v22160_v2 }
 0x9c8   : > { %16793 = vmatprep.subr.bf16.mxu0 %v16792_v14 }
 0x9ca   : > { %14801 = vmatmul.mubr.msk.f32.gmra.mrb[36].mxu0 %vm392_vm0, %v11398_v53 }
 0x9cb   : > { %11538 = vmatprep.mubr.f32.mxu0 %v22160_v2 }
 0x9ce   : > { %14802 = vmatmul.mubr.msk.f32.gmra.mrb[38].mxu0 %vm392_vm0, %v11399_v22 }
 0x9cf   : > { %15942 = vmatprep.mubr.msk.f32.mxu0 %vm392_vm0, %v11396_v47 }
 0x9d2   : > { %15943 = vmatmul.mubr.msk.f32.vlgmr.msra.gmra.mrb[40].mxu0 %vm392_vm0, %v11397_v21 }
 0x9d3   : > { %16795 = vmatpush1.bf16.msra.mxu0 %v16794_v50  ;;  %15945 = vmatprep.mubr.msk.f32.mxu0 %vm392_vm0, %v11398_v53  ;;  %v11912_v53 = vpop.permute.xlu0 %11911 }
 0x9d4   : > { %16797 = vmatprep.subr.bf16.mxu0 %v16796_v33 }
 0x9d6   : > { %15946 = vmatmul.mubr.msk.f32.gmra.mrb[42].mxu0 %vm392_vm0, %v11399_v22 }
 0x9d7   : > { %16799 = vmatpush1.bf16.msra.mxu0 %v16798_v44  ;;  %11767 = vmatprep.mubr.f32.mxu0 %v22160_v2 }
 0x9d8   : > { %16801 = vmatprep.subr.bf16.mxu0 %v16800_v60 }
 0x9da   : > { %14807 = vmatmul.mubr.msk.f32.vlgmr.msra.gmra.mrb[32].mxu0 %vm392_vm0, %v11643_v39 }
 0x9db   : > { %16803 = vmatpush3.bf16.msra.mxu0 %v16800_v60  ;;  %11773 = vmatprep.mubr.f32.mxu0 %v22160_v2 }
 0x9dc   : > { %16805 = vmatprep.subr.bf16.mxu0 %v16804_v31 }
 0x9de   : > { %14808 = vmatmul.mubr.msk.f32.gmra.mrb[34].mxu0 %vm392_vm0, %v11644_v5 }
 0x9df   : > { %16807 = vmatpush3.bf16.msra.mxu0 %v16804_v31  ;;  %11779 = vmatprep.mubr.f32.mxu0 %v22160_v2 }
 0x9e2   : > { %14809 = vmatmul.mubr.msk.f32.gmra.mrb[36].mxu0 %vm392_vm0, %v11645_v49 }
 0x9e3   : > { %11785 = vmatprep.mubr.f32.mxu0 %v22160_v2 }
 0x9e6   : > { %14810 = vmatmul.mubr.msk.f32.gmra.mrb[38].mxu0 %vm392_vm0, %v11646_v25 }
 0x9e7   : > { %15956 = vmatprep.mubr.msk.f32.mxu0 %vm392_vm0, %v11643_v39 }
 0x9ea   : > { %15957 = vmatmul.mubr.msk.f32.vlgmr.msra.gmra.mrb[40].mxu0 %vm392_vm0, %v11644_v5 }
 0x9eb   : > { %15959 = vmatprep.mubr.msk.f32.mxu0 %vm392_vm0, %v11645_v49 }
 0x9ee   : > { %15960 = vmatmul.mubr.msk.f32.gmra.mrb[42].mxu0 %vm392_vm0, %v11646_v25 }
 0xaad   : > { %v11769_v3 = vpop.f32.mrb[32].mxu0 }
 0xaae   : > { %v11914_v56 = vadd.f32 %v11897_v30, %v11769_v3  ;;  %v11771_v43 = vpop.f32.mrb[33].mxu0 }
 0xaaf   : > { %v11915_v35 = vadd.f32 %v11897_v30, %v11771_v43 }
 0xab0   : > { %vm11927_vm6 = vcmp.ge.f32.partialorder %v11914_v56, 0.0  ;;  %v11940_v55 = vmul.f32 %v22378_v28, %v11914_v56 }
 0xab1   : > { %vm11928_vm8 = vcmp.ge.f32.partialorder %v11915_v35, 0.0  ;;  %v11941_v48 = vmul.f32 %v22378_v28, %v11915_v35  ;;  %v11775_v2 = vpop.f32.mrb[34].mxu0 }
 0xab2   : > { %v22382_v34 = vsel %vm11927_vm6, %v11914_v56, %v11940_v55  ;;  %v11917_v15 = vadd.f32 %v11902_v20, %v11775_v2  ;;  %v11777_v16 = vpop.f32.mrb[35].mxu0 }
 0xab3   : > { %v11964_v63 = vsel %vm2625_vm14, %v22382_v34, 0.0  ;;  %v22387_v10 = vsel %vm11928_vm8, %v11915_v35, %v11941_v48  ;;  %v11918_v37 = vadd.f32 %v11902_v20, %v11777_v16 }
 0xab4   : > { %v22392_v58 = vsel %vm23064_vm7, %v22387_v10, 0.0  ;;  %vm11930_vm9 = vcmp.ge.f32.partialorder %v11917_v15, 0.0  ;;  %v11943_v62 = vmul.f32 %v22378_v28, %v11917_v15 }
 0xab5   : > { %vm11931_vm10 = vcmp.ge.f32.partialorder %v11918_v37, 0.0  ;;  %v11944_v26 = vmul.f32 %v22378_v28, %v11918_v37  ;;  %v11781_v51 = vpop.f32.mrb[36].mxu0  ;;  %v22397_v47 = vpack.i.bf16 %v22392_v58, %v11964_v63 }
 0xab6   : > { %v22399_v57 = vsel %vm11930_vm9, %v11917_v15, %v11943_v62  ;;  %v11920_v1 = vadd.f32 %v11907_v12, %v11781_v51  ;;  %v11783_v18 = vpop.f32.mrb[37].mxu0 }
 0xab7   : > { %v11967_v40 = vsel %vm2625_vm14, %v22399_v57, 0.0  ;;  %v22404_v21 = vsel %vm11931_vm10, %v11918_v37, %v11944_v26  ;;  %v11921_v6 = vadd.f32 %v11907_v12, %v11783_v18  ;;  %19024 = vrot.lane.b32.xlu1 %v22397_v47, %s19520_s24 }
 0xab8   : > { %v22411_v32 = vsel %vm23065_vm15, %v22404_v21, 0.0  ;;  %vm11933_vm6 = vcmp.ge.f32.partialorder %v11920_v1, 0.0  ;;  %v11946_v9 = vmul.f32 %v22378_v28, %v11920_v1  ;;  %v22414_v14 = vpack.i.bf16 %v11967_v40, %v11964_v63  ;;  %vm23066_vm15 = vmmov %vm23064_vm7 }
 0xab9   : > { %vm11934_vm8 = vcmp.ge.f32.partialorder %v11921_v6, 0.0  ;;  %v11947_v19 = vmul.f32 %v22378_v28, %v11921_v6  ;;  %v11787_v36 = vpop.f32.mrb[38].mxu0  ;;  %v22418_v13 = vpack.i.bf16 %v22411_v32, %v11967_v40 }
 0xaba   : > { %v22420_v59 = vsel %vm11933_vm6, %v11920_v1, %v11946_v9  ;;  %v11923_v41 = vadd.f32 %v11912_v53, %v11787_v36  ;;  %v11789_v46 = vpop.f32.mrb[39].mxu0 }
 0xabb   : > { %v11970_v17 = vsel %vm2625_vm14, %v22420_v59, 0.0  ;;  %v22425_v7 = vsel %vm11934_vm8, %v11921_v6, %v11947_v19  ;;  %v11924_v22 = vadd.f32 %v11912_v53, %v11789_v46  ;;  %19029 = vrot.lane.b32.xlu0 %v22418_v13, %s19520_s24 }
 0xabc   : > { %v22432_v23 = vsel %vm23064_vm7, %v22425_v7, 0.0  ;;  %vm11936_vm9 = vcmp.ge.f32.partialorder %v11923_v41, 0.0  ;;  %v11949_v4 = vmul.f32 %v22378_v28, %v11923_v41  ;;  %vm23067_vm7 = vcmask 556032  }
 0xabd   : > { %vm11937_vm10 = vcmp.ge.f32.partialorder %v11924_v22, 0.0  ;;  %v11950_v38 = vmul.f32 %v22378_v28, %v11924_v22  ;;  %v15958_v45 = vpop.f32.mrb[40].mxu0  ;;  %v22437_v29 = vpack.i.bf16 %v22432_v23, %v11970_v17 }
 0xabe   : > { %v22439_v27 = vsel %vm11936_vm9, %v11923_v41, %v11949_v4  ;;  %v11919_v50 = vadd.f32 %v15958_v45, %v11902_v20  ;;  %v11858_v42 = vpop.f32.mrb[41].mxu0 }
 0xabf   : > { %v11973_v0 = vsel %vm2625_vm14, %v22439_v27, 0.0  ;;  %v22444_v33 = vsel %vm11937_vm10, %v11924_v22, %v11950_v38  ;;  %v11916_v44 = vadd.f32 %v11897_v30, %v11858_v42  ;;  %19034 = vrot.lane.b32.xlu0 %v22437_v29, %s19520_s24  ;;  %vm23068_vm10 = vmmov %vm23067_vm7  ;;  %v14894_v42 = vld [vmem:[%s22905_s3 + $0xb0] sm:$0xff] }
 0xac0   : > { %v22451_v60 = vsel %vm23066_vm15, %v22444_v33, 0.0  ;;  %vm11932_vm6 = vcmp.ge.f32.partialorder %v11919_v50, 0.0  ;;  %v11945_v39 = vmul.f32 %v22378_v28, %v11919_v50  ;;  %v22454_v31 = vpack.i.bf16 %v11973_v0, %v11970_v17 }
 0xac1   : > { %vm11929_vm8 = vcmp.ge.f32.partialorder %v11916_v44, 0.0  ;;  %v11942_v5 = vmul.f32 %v22378_v28, %v11916_v44  ;;  %v15961_v49 = vpop.f32.mrb[42].mxu0  ;;  %v19038_v25 = vpack.i.bf16 %v22451_v60, %v11973_v0  ;;  %v14893_v0 = vld [vmem:[%s22905_s3 + $0xa8] sm:$0xff] }
 0xac2   : > { %v11957_v30 = vsel %vm11932_vm6, %v11919_v50, %v11945_v39  ;;  %v11925_v3 = vadd.f32 %v15961_v49, %v11912_v53  ;;  %v11868_v56 = vpop.f32.mrb[43].mxu0  ;;  %vm23069_vm6 = vmmov %vm23067_vm7 }
 0xac3   : > { %v11969_v43 = vsel %vm2627_vm11, %v11957_v30, 0.0  ;;  %v11954_v35 = vsel %vm11929_vm8, %v11916_v44, %v11942_v5  ;;  %v11922_v55 = vadd.f32 %v11907_v12, %v11868_v56  ;;  %19044 = vrot.lane.b32.xlu0 %v22374_v54, %s19520_s24  ;;  %19039 = vrot.lane.b32.xlu1 %v19038_v25, %s19520_s24  ;;  %vm23070_vm8 = vmmov %vm23069_vm6 }
 0xac4   : > { %11981 = vst.msk [vmem:[#allocation2 + $0x40] sm:$0xff] %vm23067_vm7, %v11969_v43  ;;  %v11966_v20 = vsel %vm2627_vm11, %v11954_v35, 0.0  ;;  %vm11938_vm9 = vcmp.ge.f32.partialorder %v11925_v3, 0.0  ;;  %v11951_v48 = vmul.f32 %v22378_v28, %v11925_v3 }
 0xac5   : > { %11978 = vst.msk [vmem:[#allocation2 + $0x18] sm:$0xff] %vm23068_vm10, %v11966_v20  ;;  %vm11935_vm15 = vcmp.ge.f32.partialorder %v11922_v55, 0.0  ;;  %v11948_v2 = vmul.f32 %v22378_v28, %v11922_v55 }
 0xac6   : > { %v11963_v15 = vsel %vm11938_vm9, %v11925_v3, %v11951_v48  ;;  %vm23079_vm9 = vcmask 900096  }
 0xac7   : > { %v11975_v16 = vsel %vm2627_vm11, %v11963_v15, 0.0  ;;  %v11960_v63 = vsel %vm11935_vm15, %v11922_v55, %v11948_v2  ;;  %v12010_v2 = vld [vmem:[#allocation7 + $0x5c0] sm:$0xff]  ;;  %vm23080_vm10 = vmmov %vm23079_vm9 }
 0xac8   : > { %11987 = vst.msk [vmem:[#allocation2 + $0x90] sm:$0xff] %vm23069_vm6, %v11975_v16  ;;  %v11972_v37 = vsel %vm2627_vm11, %v11960_v63, 0.0  ;;  %v22577_v15 = vld [vmem:[#allocation2] sm:$0xff]  ;;  %v12011_v16 = vld [vmem:[#allocation7 + $0x5c8] sm:$0xff]  ;;  %vm23081_vm15 = vmmov %vm23079_vm9 }
 0xac9   : > { %11984 = vst.msk [vmem:[#allocation2 + $0x68] sm:$0xff] %vm23070_vm8, %v11972_v37  ;;  %vm23082_vm6 = vmmov %vm23079_vm9 }
 0xaca   : > { %vm23083_vm8 = vmmov %vm23082_vm6 }
 0xacb   : > { %v11995_v62 = vld [vmem:[#allocation2 + $0x40] sm:$0xff] }
 0xacc   : > { %v11991_v12 = vld [vmem:[#allocation2 + $0x18] sm:$0xff]  ;;  %v19183_v6 = vpack.i.bf16 %v11995_v62, %v22411_v32 }
 0xacd   : > { %v19048_v26 = vpack.i.bf16 %v11995_v62, %v11991_v12  ;;  %v22475_v51 = vpack.c.bf16 %v11995_v62, %v11991_v12 }
 0xacf   : > { %19049 = vrot.lane.b32.xlu1 %v19048_v26, %s19520_s24  ;;  %v12003_v28 = vld [vmem:[#allocation2 + $0x90] sm:$0xff] }
 0xad0   : > { %v11999_v1 = vld [vmem:[#allocation2 + $0x68] sm:$0xff]  ;;  %v19193_v9 = vpack.i.bf16 %v12003_v28, %v22451_v60 }
 0xad1   : > { %v19058_v18 = vpack.i.bf16 %v12003_v28, %v11999_v1  ;;  %v22478_v40 = vpack.c.bf16 %v12003_v28, %v11999_v1  ;;  %v19198_v53 = vpack.i.bf16 %v11999_v1, %v22432_v23  ;;  %v14892_v23 = vld [vmem:[%s22905_s3 + $0xa0] sm:$0xff]  ;;  %v12012_v28 = vld [vmem:[#allocation7 + $0x5d0] sm:$0xff] }
 0xad3   : > { %19054 = vrot.lane.b32.xlu1 %v22397_v47, %s19522_s26  ;;  %19059 = vrot.lane.b32.xlu0 %v19058_v18, %s19520_s24  ;;  %s14323_s24 = scalar_lea.sflag [#allocation5], %s19716_s8 }
 0xad7   : > { %19069 = vrot.lane.b32.xlu1 %v22374_v54, %s19522_s26  ;;  %19064 = vrot.lane.b32.xlu0 %v22418_v13, %s19522_s26 }
 0xadb   : > { %19079 = vrot.lane.b32.xlu1 %v19038_v25, %s19522_s26  ;;  %19074 = vrot.lane.b32.xlu0 %v22437_v29, %s19522_s26 }
 0xadf   : > { %19089 = vrot.lane.b32.xlu1 %v19048_v26, %s19522_s26  ;;  %19084 = vrot.lane.b32.xlu0 %v22374_v54, %s19522_s26 }
 0xae3   : > { %19094 = vrot.lane.b32.xlu1 %v22397_v47, %s19523_s13  ;;  %19099 = vrot.lane.b32.xlu0 %v19058_v18, %s19522_s26  ;;  %s19437_s26 = scalar_lea.vmem %s22852_s29, 1536 }
 0xae4   : > { %p19438_p9 = scmp.ne.s32.totalorder %s22852_s29, %s19437_s26 }
 0xae6   : > { %p19439_p12 = pnand %p19438_p9, %p19664_p7 }
 0xae7   : > { %19109 = vrot.lane.b32.xlu1 %v22374_v54, %s19523_s13  ;;  %19104 = vrot.lane.b32.xlu0 %v22418_v13, %s19523_s13 }
 0xae8   : > { %p19440_p10 = pneg %p19439_p12 }
 0xaeb   : > { %19119 = vrot.lane.b32.xlu1 %v19038_v25, %s19523_s13  ;;  %19114 = vrot.lane.b32.xlu0 %v22437_v29, %s19523_s13 }
 0xaef   : > { %19129 = vrot.lane.b32.xlu1 %v19048_v26, %s19523_s13  ;;  %19124 = vrot.lane.b32.xlu0 %v22374_v54, %s19523_s13 }
 0xaf3   : > { %19134 = vrot.lane.b32.xlu1 %v22397_v47, %s19524_s16  ;;  %19139 = vrot.lane.b32.xlu0 %v19058_v18, %s19523_s13  ;;  %v19178_v47 = vpack.i.bf16 %v11991_v12, %v22392_v58  ;;  %s19530_s13 = smov [#allocation10]  }
 0xaf7   : > { %19149 = vrot.lane.b32.xlu1 %v22374_v54, %s19524_s16  ;;  %19144 = vrot.lane.b32.xlu0 %v22418_v13, %s19524_s16 }
 0xafb   : > { %19159 = vrot.lane.b32.xlu1 %v19038_v25, %s19524_s16  ;;  %19154 = vrot.lane.b32.xlu0 %v22437_v29, %s19524_s16 }
 0xaff   : > { %19169 = vrot.lane.b32.xlu1 %v19048_v26, %s19524_s16  ;;  %19164 = vrot.lane.b32.xlu0 %v22374_v54, %s19524_s16  ;;  %v19020_v54 = vpop.permute.xlu1 %19019 }
 0xb00   : > { %v19022_v32 = vunpack.i.h.bf16 %v19020_v54  ;;  %v19021_v19 = vunpack.i.l.bf16 %v19020_v54 }
 0xb03   : > { %19179 = vrot.lane.b32.xlu1 %v19178_v47, %s19525_s23  ;;  %19174 = vrot.lane.b32.xlu0 %v19058_v18, %s19524_s16  ;;  %s19441_s16 = sshll.u32 %s19530_s13, 4  ;;  %s19442_s16 = int_to_ptr.vmem [resolvable:$false] %s19441_s16 }
 0xb04   : > { %p19444_p1 = scmp.lt.s32.totalorder %s22852_s29, %s19442_s16 }
 0xb07   : > { %19189 = vrot.lane.b32.xlu1 %v22414_v14, %s19525_s23  ;;  %19184 = vrot.lane.b32.xlu0 %v19183_v6, %s19525_s23 }
 0xb0b   : > { %19194 = vrot.lane.b32.xlu1 %v19193_v9, %s19525_s23  ;;  %19199 = vrot.lane.b32.xlu0 %v19198_v53, %s19525_s23 }
 0xb0f   : > { %19209 = vrot.lane.b32.xlu1 %v19178_v47, %s19526_s27  ;;  %19204 = vrot.lane.b32.xlu0 %v22454_v31, %s19525_s23  ;;  %s19443_s23 = scalar_lea.vmem %s19442_s16, 3072 }
 0xb10   : > { %p19445_p6 = scmp.lt.s32.totalorder %s19443_s23, %s19437_s26 }
 0xb12   : > { %p19446_p8 = por %p19445_p6, %p19444_p1 }
 0xb13   : > { %19219 = vrot.lane.b32.xlu1 %v22414_v14, %s19526_s27  ;;  %19214 = vrot.lane.b32.xlu0 %v19183_v6, %s19526_s27 }
 0xb14   : > { %p19447_p13 = pnand %p19446_p8, %p19440_p10 }
 0xb17   : > { %19224 = vrot.lane.b32.xlu1 %v19193_v9, %s19526_s27  ;;  %19229 = vrot.lane.b32.xlu0 %v19198_v53, %s19526_s27 }
 0xb1b   : > { %19239 = vrot.lane.b32.xlu1 %v19178_v47, %s19527_s11  ;;  %19234 = vrot.lane.b32.xlu0 %v22454_v31, %s19526_s27 }
 0xb1f   : > { %19249 = vrot.lane.b32.xlu1 %v22414_v14, %s19527_s11  ;;  %19244 = vrot.lane.b32.xlu0 %v19183_v6, %s19527_s11 }
 0xb23   : > { %19254 = vrot.lane.b32.xlu1 %v19193_v9, %s19527_s11  ;;  %19259 = vrot.lane.b32.xlu0 %v19198_v53, %s19527_s11 }
 0xb27   : > { %19269 = vrot.lane.b32.xlu1 %v19178_v47, %s19528_s12  ;;  %19264 = vrot.lane.b32.xlu0 %v22454_v31, %s19527_s11 }
 0xb29   : > { %v19025_v58 = vpop.permute.xlu1 %19024 }
 0xb2a   : > { %v19027_v36 = vunpack.i.h.bf16 %v19025_v58  ;;  %v19026_v13 = vunpack.i.l.bf16 %v19025_v58 }
 0xb2b   : > { %19279 = vrot.lane.b32.xlu1 %v22414_v14, %s19528_s12  ;;  %19274 = vrot.lane.b32.xlu0 %v19183_v6, %s19528_s12 }
 0xb2c   : > { %v12062_v22 = vsel %vm367_vm1, %v19021_v19, %v19026_v13  ;;  %v12063_v4 = vsel %vm367_vm1, %v19026_v13, %v19027_v36  ;;  %v12013_v19 = vld [vmem:[#allocation7 + $0x5d8] sm:$0xff] }
 0xb2d   : > { %v19030_v41 = vpop.permute.xlu0 %19029 }
 0xb2e   : > { %v19032_v46 = vunpack.i.h.bf16 %v19030_v41  ;;  %v19031_v17 = vunpack.i.l.bf16 %v19030_v41 }
 0xb2f   : > { %19284 = vrot.lane.b32.xlu1 %v19193_v9, %s19528_s12  ;;  %19289 = vrot.lane.b32.xlu0 %v19198_v53, %s19528_s12 }
 0xb30   : > { %v12065_v14 = vsel %vm367_vm1, %v19022_v32, %v19031_v17  ;;  %v12066_v38 = vsel %vm367_vm1, %v19031_v17, %v19032_v46 }
 0xb31   : > { %v16810_v45 = vpack.c.bf16 %v12065_v14, %v12062_v22  ;;  %v19035_v29 = vpop.permute.xlu0 %19034  ;;  %v16808_v50 = vpack.c.bf16 %v12066_v38, %v12063_v4 }
 0xb32   : > { %v19037_v44 = vunpack.i.h.bf16 %v19035_v29  ;;  %v19036_v60 = vunpack.i.l.bf16 %v19035_v29 }
 0xb33   : > { %14230 = vperm.xlu1 %17897, %v14892_v23   ;;  %19294 = vrot.lane.b32.xlu0 %v22454_v31, %s19528_s12  ;;  %v14895_v31 = vld [vmem:[%s22905_s3 + $0xb8] sm:$0xff] }
 0xb34   : > { %16809 = vmatprep.subr.bf16.mxu1 %v16808_v50  ;;  %v12069_v35 = vsel %vm367_vm1, %v19036_v60, %v19037_v44 }
 0xb35   : > { %16811 = vmatpush1.bf16.msra.mxu1 %v16810_v45  ;;  %v19045_v39 = vpop.permute.xlu0 %19044  ;;  %v19040_v5 = vpop.permute.xlu1 %19039 }
 0xb36   : > { %v19047_v49 = vunpack.i.h.bf16 %v19045_v39  ;;  %v19046_v25 = vunpack.i.l.bf16 %v19045_v39  ;;  %v19042_v30 = vunpack.i.h.bf16 %v19040_v5  ;;  %v19041_v3 = vunpack.i.l.bf16 %v19040_v5 }
 0xb37   : > { %14240 = vperm.xlu1 %17897, %v14894_v42   ;;  %14235 = vperm.xlu0 %17896, %v14893_v0  }
 0xb38   : > { %v12068_v56 = vsel %vm367_vm1, %v19046_v25, %v19036_v60  ;;  %v12071_v43 = vsel %vm367_vm1, %v19047_v49, %v19041_v3  ;;  %v12072_v55 = vsel %vm367_vm1, %v19041_v3, %v19042_v30 }
 0xb39   : > { %v16814_v20 = vpack.c.bf16 %v12071_v43, %v12068_v56  ;;  %v16812_v48 = vpack.c.bf16 %v12072_v55, %v12069_v35 }
 0xb3b   : > { %14245 = vperm.xlu0 %17896, %v14895_v31   ;;  %16813 = vmatprep.subr.bf16.mxu1 %v16812_v48 }
 0xb3c   : > { %16815 = vmatpush1.bf16.msra.mxu1 %v16814_v20 }
 0xb3f   : > { %14820 = vmatmul.mubr.msk.f32.vlgmr.msra.gmra.mrb[28].mxu1 %vm392_vm0, %v12010_v2 }
 0xb40   : > { %12168 = vmatprep.mubr.f32.mxu1 %v22577_v15 }
 0xb41   : > { %v19050_v63 = vpop.permute.xlu1 %19049 }
 0xb42   : > { %v19052_v37 = vunpack.i.h.bf16 %v19050_v63  ;;  %v19051_v62 = vunpack.i.l.bf16 %v19050_v63 }
 0xb43   : > { %14821 = vmatmul.mubr.msk.f32.gmra.mrb[30].mxu1 %vm392_vm0, %v12011_v16 }
 0xb44   : > { %v12064_v12 = vsel %vm367_vm1, %v19027_v36, %v19051_v62  ;;  %v12067_v26 = vsel %vm367_vm1, %v19032_v46, %v19052_v37  ;;  %12174 = vmatprep.mubr.f32.mxu1 %v22577_v15 }
 0xb45   : > { %v19055_v1 = vpop.permute.xlu1 %19054  ;;  %v19060_v18 = vpop.permute.xlu0 %19059  ;;  %v16816_v47 = vpack.c.bf16 %v12067_v26, %v12064_v12 }
 0xb46   : > { %v19062_v6 = vunpack.i.h.bf16 %v19060_v18  ;;  %v19061_v9 = vunpack.i.l.bf16 %v19060_v18  ;;  %v19057_v53 = vunpack.i.h.bf16 %v19055_v1  ;;  %v19056_v54 = vunpack.i.l.bf16 %v19055_v1  ;;  %v12005_v1 = vld [vmem:[#allocation7 + $0x5a0] sm:$0xff] }
 0xb47   : > { %16817 = vmatprep.subr.bf16.mxu1 %v16816_v47  ;;  %14822 = vmatmul.mubr.msk.f32.gmra.mrb[32].mxu1 %vm392_vm0, %v12012_v28 }
 0xb48   : > { %16819 = vmatpush3.bf16.msra.mxu1 %v16816_v47  ;;  %v12070_v58 = vsel %vm367_vm1, %v19037_v44, %v19061_v9  ;;  %v12073_v32 = vsel %vm367_vm1, %v19042_v30, %v19062_v6  ;;  %12180 = vmatprep.mubr.f32.mxu1 %v22577_v15  ;;  %v12305_v14 = vsel %vm611_vm2, %v19056_v54, %v19057_v53  ;;  %vm23071_vm1 = vcmask 908288  }
 0xb49   : > { %v19070_v36 = vpop.permute.xlu1 %19069  ;;  %v19065_v13 = vpop.permute.xlu0 %19064  ;;  %v16820_v41 = vpack.c.bf16 %v12073_v32, %v12070_v58  ;;  %vm23078_vm7 = vmmov %vm23071_vm1 }
 0xb4a   : > { %v19072_v46 = vunpack.i.h.bf16 %v19070_v36  ;;  %v19071_v17 = vunpack.i.l.bf16 %v19070_v36  ;;  %v19067_v22 = vunpack.i.h.bf16 %v19065_v13  ;;  %v19066_v23 = vunpack.i.l.bf16 %v19065_v13  ;;  %v12006_v36 = vld [vmem:[#allocation7 + $0x5a8] sm:$0xff] }
 0xb4b   : > { %16821 = vmatprep.subr.bf16.mxu1 %v16820_v41  ;;  %14823 = vmatmul.mubr.msk.f32.gmra.mrb[34].mxu1 %vm392_vm0, %v12013_v19 }
 0xb4c   : > { %v12304_v4 = vsel %vm611_vm2, %v19071_v17, %v19056_v54  ;;  %v12307_v38 = vsel %vm611_vm2, %v19072_v46, %v19066_v23  ;;  %16823 = vmatpush3.bf16.msra.mxu1 %v16820_v41  ;;  %v12308_v45 = vsel %vm611_vm2, %v19066_v23, %v19067_v22  ;;  %15970 = vmatprep.mubr.msk.f32.mxu1 %vm392_vm0, %v12010_v2  ;;  %v12007_v23 = vld [vmem:[#allocation7 + $0x5b0] sm:$0xff] }
 0xb4d   : > { %v16826_v29 = vpack.c.bf16 %v12307_v38, %v12304_v4  ;;  %v19080_v50 = vpop.permute.xlu1 %19079  ;;  %v19075_v42 = vpop.permute.xlu0 %19074  ;;  %v16824_v0 = vpack.c.bf16 %v12308_v45, %v12305_v14 }
 0xb4e   : > { %v19082_v44 = vunpack.i.h.bf16 %v19080_v50  ;;  %v19081_v60 = vunpack.i.l.bf16 %v19080_v50  ;;  %v19077_v39 = vunpack.i.h.bf16 %v19075_v42  ;;  %v19076_v5 = vunpack.i.l.bf16 %v19075_v42 }
 0xb4f   : > { %16825 = vmatprep.subr.bf16.mxu1 %v16824_v0  ;;  %15971 = vmatmul.mubr.msk.f32.vlgmr.msra.gmra.mrb[36].mxu1 %vm392_vm0, %v12011_v16  ;;  %v12008_v0 = vld [vmem:[#allocation7 + $0x5b8] sm:$0xff] }
 0xb50   : > { %16827 = vmatpush1.bf16.msra.mxu1 %v16826_v29  ;;  %v12311_v49 = vsel %vm611_vm2, %v19076_v5, %v19077_v39  ;;  %v12314_v25 = vsel %vm611_vm2, %v19081_v60, %v19082_v44  ;;  %15973 = vmatprep.mubr.msk.f32.mxu1 %vm392_vm0, %v12012_v28 }
 0xb51   : > { %v19090_v30 = vpop.permute.xlu1 %19089  ;;  %v19085_v3 = vpop.permute.xlu0 %19084  ;;  %v16828_v31 = vpack.c.bf16 %v12314_v25, %v12311_v49 }
 0xb52   : > { %v19092_v56 = vunpack.i.h.bf16 %v19090_v30  ;;  %v19091_v43 = vunpack.i.l.bf16 %v19090_v30  ;;  %v19087_v35 = vunpack.i.h.bf16 %v19085_v3  ;;  %v19086_v55 = vunpack.i.l.bf16 %v19085_v3 }
 0xb53   : > { %16829 = vmatprep.subr.bf16.mxu1 %v16828_v31  ;;  %15974 = vmatmul.mubr.msk.f32.gmra.mrb[38].mxu1 %vm392_vm0, %v12013_v19 }
 0xb54   : > { %v12313_v20 = vsel %vm611_vm2, %v19087_v35, %v19081_v60  ;;  %v12310_v48 = vsel %vm611_vm2, %v19086_v55, %v19076_v5  ;;  %v12306_v2 = vsel %vm611_vm2, %v19057_v53, %v19091_v43  ;;  %v12309_v16 = vsel %vm611_vm2, %v19067_v22, %v19092_v56  ;;  %12404 = vmatprep.mubr.f32.mxu1 %v22577_v15 }
 0xb55   : > { %v16830_v63 = vpack.c.bf16 %v12313_v20, %v12310_v48  ;;  %v22604_v37 = vpop.permute.xlu1 %19094  ;;  %v19100_v62 = vpop.permute.xlu0 %19099  ;;  %v16832_v12 = vpack.c.bf16 %v12309_v16, %v12306_v2 }
 0xb56   : > { %v19102_v26 = vunpack.i.h.bf16 %v19100_v62  ;;  %v19101_v28 = vunpack.i.l.bf16 %v19100_v62  ;;  %v19097_v18 = vunpack.i.h.bf16 %v22604_v37  ;;  %v19096_v47 = vunpack.i.l.bf16 %v22604_v37 }
 0xb57   : > { %16831 = vmatpush1.bf16.msra.mxu1 %v16830_v63 }
 0xb58   : > { %16833 = vmatprep.subr.bf16.mxu1 %v16832_v12  ;;  %v12312_v6 = vsel %vm611_vm2, %v19077_v39, %v19101_v28  ;;  %v12315_v9 = vsel %vm611_vm2, %v19082_v44, %v19102_v26  ;;  %v12552_v13 = vsel %vm859_vm3, %v19096_v47, %v19097_v18  ;;  %vm23072_vm2 = vmmov %vm23071_vm1 }
 0xb59   : > { %v19110_v53 = vpop.permute.xlu1 %19109  ;;  %v19105_v54 = vpop.permute.xlu0 %19104  ;;  %v16836_v58 = vpack.c.bf16 %v12315_v9, %v12312_v6 }
 0xb5a   : > { %v19107_v32 = vunpack.i.h.bf16 %v19105_v54  ;;  %v19106_v19 = vunpack.i.l.bf16 %v19105_v54  ;;  %14828 = vmatmul.mubr.msk.f32.vlgmr.msra.gmra.mrb[28].mxu1 %vm392_vm0, %v12005_v1  ;;  %v19112_v4 = vunpack.i.h.bf16 %v19110_v53  ;;  %v19111_v38 = vunpack.i.l.bf16 %v19110_v53 }
 0xb5b   : > { %16835 = vmatpush3.bf16.msra.mxu1 %v16832_v12  ;;  %12410 = vmatprep.mubr.f32.mxu1 %v22577_v15 }
 0xb5c   : > { %16837 = vmatprep.subr.bf16.mxu1 %v16836_v58  ;;  %v12555_v41 = vsel %vm859_vm3, %v19106_v19, %v19107_v32  ;;  %v12551_v60 = vsel %vm859_vm3, %v19111_v38, %v19096_v47  ;;  %v12554_v39 = vsel %vm859_vm3, %v19112_v4, %v19106_v19  ;;  %v12515_v47 = vld [vmem:[#allocation7 + $0x5e0] sm:$0xff] }
 0xb5d   : > { %v19115_v46 = vpop.permute.xlu0 %19114  ;;  %v16840_v17 = vpack.c.bf16 %v12555_v41, %v12552_v13  ;;  %v19120_v22 = vpop.permute.xlu1 %19119  ;;  %v16842_v43 = vpack.c.bf16 %v12554_v39, %v12551_v60 }
 0xb5e   : > { %14829 = vmatmul.mubr.msk.f32.gmra.mrb[30].mxu1 %vm392_vm0, %v12006_v36  ;;  %v19122_v45 = vunpack.i.h.bf16 %v19120_v22  ;;  %v19121_v29 = vunpack.i.l.bf16 %v19120_v22  ;;  %v19117_v50 = vunpack.i.h.bf16 %v19115_v46  ;;  %v19116_v42 = vunpack.i.l.bf16 %v19115_v46 }
 0xb5f   : > { %16839 = vmatpush3.bf16.msra.mxu1 %v16836_v58  ;;  %12416 = vmatprep.mubr.f32.mxu1 %v22577_v15 }
 0xb60   : > { %16841 = vmatprep.subr.bf16.mxu1 %v16840_v17  ;;  %v12558_v31 = vsel %vm859_vm3, %v19116_v42, %v19117_v50  ;;  %v12561_v56 = vsel %vm859_vm3, %v19121_v29, %v19122_v45  ;;  %v12517_v17 = vld [vmem:[#allocation7 + $0x5f0] sm:$0xff] }
 0xb61   : > { %v19125_v14 = vpop.permute.xlu0 %19124  ;;  %v19130_v44 = vpop.permute.xlu1 %19129  ;;  %v16844_v48 = vpack.c.bf16 %v12561_v56, %v12558_v31 }
 0xb62   : > { %14830 = vmatmul.mubr.msk.f32.gmra.mrb[32].mxu1 %vm392_vm0, %v12007_v23  ;;  %v19127_v5 = vunpack.i.h.bf16 %v19125_v14  ;;  %v19126_v49 = vunpack.i.l.bf16 %v19125_v14  ;;  %v19132_v30 = vunpack.i.h.bf16 %v19130_v44  ;;  %v19131_v3 = vunpack.i.l.bf16 %v19130_v44 }
 0xb63   : > { %12422 = vmatprep.mubr.f32.mxu1 %v22577_v15 }
 0xb64   : > { %v12560_v35 = vsel %vm859_vm3, %v19127_v5, %v19121_v29  ;;  %v12557_v55 = vsel %vm859_vm3, %v19126_v49, %v19116_v42  ;;  %v12553_v63 = vsel %vm859_vm3, %v19097_v18, %v19131_v3  ;;  %v12556_v37 = vsel %vm859_vm3, %v19107_v32, %v19132_v30  ;;  %v12516_v32 = vld [vmem:[#allocation7 + $0x5e8] sm:$0xff] }
 0xb65   : > { %v19140_v25 = vpop.permute.xlu0 %19139  ;;  %v22626_v20 = vpop.permute.xlu1 %19134  ;;  %v16846_v12 = vpack.c.bf16 %v12560_v35, %v12557_v55  ;;  %v16848_v26 = vpack.c.bf16 %v12556_v37, %v12553_v63  ;;  %v12774_v37 = vld [vmem:[#allocation7 + $0x600] sm:$0xff] }
 0xb66   : > { %14831 = vmatmul.mubr.msk.f32.gmra.mrb[34].mxu1 %vm392_vm0, %v12008_v0  ;;  %v19142_v2 = vunpack.i.h.bf16 %v19140_v25  ;;  %v19141_v16 = vunpack.i.l.bf16 %v19140_v25  ;;  %v19137_v53 = vunpack.i.h.bf16 %v22626_v20  ;;  %v19136_v54 = vunpack.i.l.bf16 %v22626_v20 }
 0xb67   : > { %15984 = vmatprep.mubr.msk.f32.mxu1 %vm392_vm0, %v12005_v1 }
 0xb68   : > { %v12559_v6 = vsel %vm859_vm3, %v19117_v50, %v19141_v16  ;;  %v12562_v18 = vsel %vm859_vm3, %v19122_v45, %v19142_v2  ;;  %v12811_v13 = vsel %vm1119_vm4, %v19136_v54, %v19137_v53  ;;  %v12518_v50 = vld [vmem:[#allocation7 + $0x5f8] sm:$0xff]  ;;  %vm23073_vm3 = vmmov %vm23071_vm1 }
 0xb69   : > { %v22632_v62 = vpop.permute.xlu0 %19144  ;;  %v19150_v9 = vpop.permute.xlu1 %19149  ;;  %v16852_v58 = vpack.c.bf16 %v12562_v18, %v12559_v6  ;;  %v12777_v6 = vld [vmem:[#allocation7 + $0x618] sm:$0xff]  ;;  %v19356_v18 = vpack.c.bf16 %v22399_v57, %v22382_v34  ;;  %v19362_v34 = vpack.c.bf16 %v22439_v27, %v22420_v59  ;;  %v13033_v57 = vld [vmem:[#allocation7 + $0x620] sm:$0xff] }
 0xb6a   : > { %15985 = vmatmul.mubr.msk.f32.vlgmr.msra.gmra.mrb[36].mxu1 %vm392_vm0, %v12006_v36  ;;  %v19147_v28 = vunpack.i.h.bf16 %v22632_v62  ;;  %v19146_v1 = vunpack.i.l.bf16 %v22632_v62  ;;  %v19152_v22 = vunpack.i.h.bf16 %v19150_v9 }
 0xb6b   : > { %16843 = vmatpush1.bf16.msra.mxu1 %v16842_v43  ;;  %15987 = vmatprep.mubr.msk.f32.mxu1 %vm392_vm0, %v12007_v23  ;;  %v19151_v23 = vunpack.i.l.bf16 %v19150_v9  ;;  %v19359_v9 = vpack.c.bf16 %v22444_v33, %v22425_v7 }
 0xb6c   : > { %16845 = vmatprep.subr.bf16.mxu1 %v16844_v48  ;;  %v12814_v19 = vsel %vm1119_vm4, %v19146_v1, %v19147_v28  ;;  %v12813_v44 = vsel %vm1119_vm4, %v19152_v22, %v19146_v1  ;;  %v12776_v1 = vld [vmem:[#allocation7 + $0x610] sm:$0xff] }
 0xb6d   : > { %v19155_v36 = vpop.permute.xlu0 %19154  ;;  %v19160_v41 = vpop.permute.xlu1 %19159  ;;  %v16856_v46 = vpack.c.bf16 %v12814_v19, %v12811_v13  ;;  %v13035_v19 = vld [vmem:[#allocation7 + $0x630] sm:$0xff] }
 0xb6e   : > { %15988 = vmatmul.mubr.msk.f32.gmra.mrb[38].mxu1 %vm392_vm0, %v12008_v0  ;;  %v19162_v4 = vunpack.i.h.bf16 %v19160_v41  ;;  %v19161_v38 = vunpack.i.l.bf16 %v19160_v41  ;;  %v19157_v45 = vunpack.i.h.bf16 %v19155_v36  ;;  %v19156_v29 = vunpack.i.l.bf16 %v19155_v36 }
 0xb6f   : > { %16847 = vmatpush1.bf16.msra.mxu1 %v16846_v12  ;;  %12651 = vmatprep.mubr.f32.mxu1 %v22577_v15  ;;  %v12810_v0 = vsel %vm1119_vm4, %v19151_v23, %v19136_v54 }
 0xb70   : > { %16849 = vmatprep.subr.bf16.mxu1 %v16848_v26  ;;  %v12817_v25 = vsel %vm1119_vm4, %v19156_v29, %v19157_v45  ;;  %v12820_v30 = vsel %vm1119_vm4, %v19161_v38, %v19162_v4  ;;  %v16858_v31 = vpack.c.bf16 %v12813_v44, %v12810_v0 }
 0xb71   : > { %v19165_v14 = vpop.permute.xlu0 %19164  ;;  %v19170_v42 = vpop.permute.xlu1 %19169  ;;  %v16860_v35 = vpack.c.bf16 %v12820_v30, %v12817_v25 }
 0xb72   : > { %14836 = vmatmul.mubr.msk.f32.vlgmr.msra.gmra.mrb[28].mxu1 %vm392_vm0, %v12515_v47  ;;  %v19167_v60 = vunpack.i.h.bf16 %v19165_v14  ;;  %v19166_v39 = vunpack.i.l.bf16 %v19165_v14  ;;  %v19172_v5 = vunpack.i.h.bf16 %v19170_v42  ;;  %v19171_v49 = vunpack.i.l.bf16 %v19170_v42  ;;  %v13036_v14 = vld [vmem:[#allocation7 + $0x638] sm:$0xff] }
 0xb73   : > { %16851 = vmatpush3.bf16.msra.mxu1 %v16848_v26  ;;  %12657 = vmatprep.mubr.f32.mxu1 %v22577_v15 }
 0xb74   : > { %16853 = vmatprep.subr.bf16.mxu1 %v16852_v58  ;;  %v12819_v56 = vsel %vm1119_vm4, %v19167_v60, %v19161_v38  ;;  %v12816_v43 = vsel %vm1119_vm4, %v19166_v39, %v19156_v29  ;;  %v12812_v48 = vsel %vm1119_vm4, %v19137_v53, %v19171_v49  ;;  %v12815_v2 = vsel %vm1119_vm4, %v19147_v28, %v19172_v5  ;;  %v12775_v28 = vld [vmem:[#allocation7 + $0x608] sm:$0xff] }
 0xb75   : > { %v19175_v3 = vpop.permute.xlu0 %19174  ;;  %v16862_v16 = vpack.c.bf16 %v12819_v56, %v12816_v43  ;;  %v16864_v63 = vpack.c.bf16 %v12815_v2, %v12812_v48 }
 0xb76   : > { %14837 = vmatmul.mubr.msk.f32.gmra.mrb[30].mxu1 %vm392_vm0, %v12516_v32  ;;  %v19177_v55 = vunpack.i.h.bf16 %v19175_v3  ;;  %v19176_v20 = vunpack.i.l.bf16 %v19175_v3 }
 0xb77   : > { %16855 = vmatpush3.bf16.msra.mxu1 %v16852_v58  ;;  %12663 = vmatprep.mubr.f32.mxu1 %v22577_v15 }
 0xb78   : > { %16857 = vmatprep.subr.bf16.mxu1 %v16856_v46  ;;  %v12818_v62 = vsel %vm1119_vm4, %v19157_v45, %v19176_v20  ;;  %v12821_v12 = vsel %vm1119_vm4, %v19162_v4, %v19177_v55  ;;  %v13237_v20 = vld [vmem:[#allocation7 + $0x648] sm:$0xff]  ;;  %vm23074_vm4 = vmmov %vm23071_vm1 }
 0xb79   : > { %v16868_v26 = vpack.c.bf16 %v12821_v12, %v12818_v62 }
 0xb7a   : > { %14838 = vmatmul.mubr.msk.f32.gmra.mrb[32].mxu1 %vm392_vm0, %v12517_v17 }
 0xb7b   : > { %12669 = vmatprep.mubr.f32.mxu1 %v22577_v15 }
 0xb7e   : > { %14839 = vmatmul.mubr.msk.f32.gmra.mrb[34].mxu1 %vm392_vm0, %v12518_v50 }
 0xb7f   : > { %15998 = vmatprep.mubr.msk.f32.mxu1 %vm392_vm0, %v12515_v47  ;;  %v19353_v47 = vpack.c.bf16 %v22404_v21, %v22387_v10  ;;  %v19180_v10 = vpop.permute.xlu1 %19179  ;;  %v19185_v21 = vpop.permute.xlu0 %19184 }
 0xb80   : > { %v19187_v53 = vunpack.i.h.bf16 %v19185_v21  ;;  %v19186_v54 = vunpack.i.l.bf16 %v19185_v21  ;;  %v19182_v58 = vunpack.i.h.bf16 %v19180_v10  ;;  %v19181_v7 = vunpack.i.l.bf16 %v19180_v10  ;;  %v13239_v10 = vld [vmem:[#allocation7 + $0x658] sm:$0xff] }
 0xb82   : > { %15999 = vmatmul.mubr.msk.f32.vlgmr.msra.gmra.mrb[36].mxu1 %vm392_vm0, %v12516_v32  ;;  %v13267_v59 = vsel %vm1574_vm5, %v19186_v54, %v19187_v53  ;;  %v13265_v27 = vsel %vm1574_vm5, %v19181_v7, %v19182_v58  ;;  %v16896_v25 = vpack.c.bf16 %v19187_v53, %v19182_v58 }
 0xb83   : > { %16859 = vmatpush1.bf16.msra.mxu1 %v16858_v31  ;;  %16001 = vmatprep.mubr.msk.f32.mxu1 %vm392_vm0, %v12517_v17  ;;  %v19190_v33 = vpop.permute.xlu1 %19189  ;;  %v19200_v61 = vpop.permute.xlu0 %19199  ;;  %v16888_v32 = vpack.c.bf16 %v13267_v59, %v13265_v27  ;;  %v13236_v31 = vld [vmem:[#allocation7 + $0x640] sm:$0xff] }
 0xb84   : > { %16861 = vmatprep.subr.bf16.mxu1 %v16860_v35  ;;  %v19191_v13 = vunpack.i.l.bf16 %v19190_v33  ;;  %v19202_v17 = vunpack.i.h.bf16 %v19200_v61  ;;  %v19201_v22 = vunpack.i.l.bf16 %v19200_v61 }
 0xb86   : > { %16002 = vmatmul.mubr.msk.f32.gmra.mrb[38].mxu1 %vm392_vm0, %v12518_v50  ;;  %v13264_v4 = vsel %vm1574_vm5, %v19191_v13, %v19181_v7  ;;  %v13269_v29 = vsel %vm1574_vm5, %v19201_v22, %v19202_v17 }
 0xb87   : > { %16863 = vmatpush1.bf16.msra.mxu1 %v16862_v16  ;;  %12910 = vmatprep.mubr.f32.mxu1 %v22577_v15  ;;  %v19195_v36 = vpop.permute.xlu1 %19194  ;;  %v19205_v23 = vpop.permute.xlu0 %19204 }
 0xb88   : > { %16865 = vmatprep.subr.bf16.mxu1 %v16864_v63  ;;  %v19197_v41 = vunpack.i.h.bf16 %v19195_v36  ;;  %v19196_v46 = vunpack.i.l.bf16 %v19195_v36  ;;  %v19207_v38 = vunpack.i.h.bf16 %v19205_v23  ;;  %v19206_v45 = vunpack.i.l.bf16 %v19205_v23 }
 0xb8a   : > { %14844 = vmatmul.mubr.msk.f32.vlgmr.msra.gmra.mrb[28].mxu1 %vm392_vm0, %v12774_v37  ;;  %v13271_v50 = vsel %vm1574_vm5, %v19196_v46, %v19197_v41  ;;  %v13270_v0 = vsel %vm1574_vm5, %v19207_v38, %v19196_v46  ;;  %v13268_v44 = vsel %vm1574_vm5, %v19206_v45, %v19201_v22  ;;  %v16900_v35 = vpack.c.bf16 %v19197_v41, %v19202_v17  ;;  %v13484_v22 = vld [vmem:[#allocation7 + $0x668] sm:$0xff]  ;;  %v13485_v38 = vld [vmem:[#allocation7 + $0x670] sm:$0xff] }
 0xb8b   : > { %16867 = vmatpush3.bf16.msra.mxu1 %v16864_v63  ;;  %12916 = vmatprep.mubr.f32.mxu1 %v22577_v15  ;;  %v16892_v60 = vpack.c.bf16 %v13271_v50, %v13269_v29  ;;  %v19210_v39 = vpop.permute.xlu1 %19209  ;;  %v19215_v5 = vpop.permute.xlu0 %19214  ;;  %v16894_v49 = vpack.c.bf16 %v13270_v0, %v13268_v44 }
 0xb8c   : > { %16869 = vmatprep.subr.bf16.mxu1 %v16868_v26  ;;  %v19217_v30 = vunpack.i.h.bf16 %v19215_v5  ;;  %v19216_v3 = vunpack.i.l.bf16 %v19215_v5  ;;  %v19212_v56 = vunpack.i.h.bf16 %v19210_v39  ;;  %v19211_v43 = vunpack.i.l.bf16 %v19210_v39  ;;  %v13486_v5 = vld [vmem:[#allocation7 + $0x678] sm:$0xff] }
 0xb8e   : > { %14845 = vmatmul.mubr.msk.f32.gmra.mrb[30].mxu1 %vm392_vm0, %v12775_v28  ;;  %v13514_v48 = vsel %vm23071_vm1, %v19216_v3, %v19217_v30  ;;  %v13512_v16 = vsel %vm23072_vm2, %v19211_v43, %v19212_v56 }
 0xb8f   : > { %16871 = vmatpush3.bf16.msra.mxu1 %v16868_v26  ;;  %12922 = vmatprep.mubr.f32.mxu1 %v22577_v15  ;;  %v19220_v55 = vpop.permute.xlu1 %19219  ;;  %v19230_v2 = vpop.permute.xlu0 %19229  ;;  %v16904_v63 = vpack.c.bf16 %v13514_v48, %v13512_v16 }
 0xb90   : > { %19354 = vmatprep.subr.msk.bf16.mxu1 %vm20709_vm12, %v19353_v47  ;;  %v19222_v12 = vunpack.i.h.bf16 %v19220_v55  ;;  %v19221_v26 = vunpack.i.l.bf16 %v19220_v55  ;;  %v19232_v47 = vunpack.i.h.bf16 %v19230_v2 }
 0xb92   : > { %14846 = vmatmul.mubr.msk.f32.gmra.mrb[32].mxu1 %vm392_vm0, %v12776_v1  ;;  %v13511_v21 = vsel %vm23073_vm3, %v19221_v26, %v19211_v43 }
 0xb93   : > { %12928 = vmatprep.mubr.f32.mxu1 %v22577_v15  ;;  %v19225_v62 = vpop.permute.xlu1 %19224 }
 0xb96   : > { %14847 = vmatmul.mubr.msk.f32.gmra.mrb[34].mxu1 %vm392_vm0, %v12777_v6 }
 0xb97   : > { %16012 = vmatprep.mubr.msk.f32.mxu1 %vm392_vm0, %v12774_v37  ;;  %v13238_v37 = vld [vmem:[#allocation7 + $0x650] sm:$0xff]  ;;  %v19240_v59 = vpop.permute.xlu1 %19239 }
 0xb98   : > { %v19242_v13 = vunpack.i.h.bf16 %v19240_v59  ;;  %v19241_v41 = vunpack.i.l.bf16 %v19240_v59 }
 0xb9a   : > { %16013 = vmatmul.mubr.msk.f32.vlgmr.msra.gmra.mrb[36].mxu1 %vm392_vm0, %v12775_v28  ;;  %v19227_v28 = vunpack.i.h.bf16 %v19225_v62 }
 0xb9b   : > { %19357 = vmatpush1.bf16.msk.msra.mxu1 %vm20726_vm13, %v19356_v18  ;;  %16015 = vmatprep.mubr.msk.f32.mxu1 %vm392_vm0, %v12776_v1  ;;  %v19226_v1 = vunpack.i.l.bf16 %v19225_v62  ;;  %v19235_v18 = vpop.permute.xlu0 %19234  ;;  %v19250_v17 = vpop.permute.xlu1 %19249 }
 0xb9c   : > { %19360 = vmatprep.subr.msk.bf16.mxu1 %vm20709_vm12, %v19359_v9  ;;  %v13513_v9 = vsel %vm23074_vm4, %v19222_v12, %v19216_v3  ;;  %v19237_v53 = vunpack.i.h.bf16 %v19235_v18  ;;  %vm23076_vm12 = vmmov %vm23071_vm1  ;;  %v16916_v46 = vpack.c.bf16 %v19227_v28, %v19232_v47  ;;  %v19252_v29 = vunpack.i.h.bf16 %v19250_v17  ;;  %v13730_v12 = vld [vmem:[#allocation7 + $0x680] sm:$0xff] }
 0xb9d   : > { %v16906_v58 = vpack.c.bf16 %v13513_v9, %v13511_v21  ;;  %v19251_v50 = vunpack.i.l.bf16 %v19250_v17  ;;  %vm23087_vm4 = vcmask 891904  }
 0xb9e   : > { %16016 = vmatmul.mubr.msk.f32.gmra.mrb[38].mxu1 %vm392_vm0, %v12777_v6  ;;  %v19231_v6 = vunpack.i.l.bf16 %v19230_v2 }
 0xb9f   : > { %19363 = vmatpush1.bf16.msk.msra.mxu1 %vm20726_vm13, %v19362_v34  ;;  %13113 = vmatprep.mubr.f32.mxu1 %v22577_v15  ;;  %vm23077_vm13 = vmmov %vm23071_vm1  ;;  %v19245_v61 = vpop.permute.xlu0 %19244  ;;  %v19255_v45 = vpop.permute.xlu1 %19254 }
 0xba0   : > { %16881 = vmatprep.subr.bf16.mxu1 %v22475_v51  ;;  %v13517_v7 = vsel %vm23077_vm13, %v19237_v53, %v19226_v1  ;;  %v19246_v36 = vunpack.i.l.bf16 %v19245_v61  ;;  %v19256_v0 = vunpack.i.l.bf16 %v19255_v45  ;;  %v13732_v53 = vld [vmem:[#allocation7 + $0x690] sm:$0xff]  ;;  %vm23090_vm13 = vmmov %vm23087_vm4 }
 0xba2   : > { %14852 = vmatmul.mubr.msk.f32.vlgmr.msra.gmra.mrb[28].mxu1 %vm392_vm0, %v13033_v57 }
 0xba3   : > { %16883 = vmatpush3.bf16.msra.mxu1 %v22475_v51  ;;  %13119 = vmatprep.mubr.f32.mxu1 %v22577_v15  ;;  %v19192_v51 = vunpack.i.h.bf16 %v19190_v33  ;;  %v19270_v48 = vpop.permute.xlu1 %19269 }
 0xba4   : > { %16885 = vmatprep.subr.bf16.mxu1 %v22478_v40  ;;  %v19272_v26 = vunpack.i.h.bf16 %v19270_v48 }
 0xba6   : > { %14853 = vmatmul.mubr.msk.f32.gmra.mrb[30].mxu1 %vm392_vm0, %v13034_v24 }
 0xba7   : > { %16887 = vmatpush3.bf16.msra.mxu1 %v22478_v40  ;;  %13125 = vmatprep.mubr.f32.mxu1 %v22577_v15  ;;  %v13266_v40 = vsel %vm1574_vm5, %v19192_v51, %v19186_v54  ;;  %v19236_v54 = vunpack.i.l.bf16 %v19235_v18  ;;  %vm23075_vm5 = vmmov %vm23071_vm1  ;;  %v13483_v51 = vld [vmem:[#allocation7 + $0x660] sm:$0xff] }
 0xba8   : > { %16889 = vmatprep.subr.bf16.mxu1 %v16888_v32  ;;  %v16890_v42 = vpack.c.bf16 %v13266_v40, %v13264_v4  ;;  %v13516_v34 = vsel %vm23075_vm5, %v19231_v6, %v19232_v47  ;;  %v16912_v32 = vpack.c.bf16 %v19217_v30, %v19212_v56  ;;  %v13759_v4 = vsel %vm23080_vm10, %v19241_v41, %v19242_v13  ;;  %vm23084_vm1 = vmmov %vm23082_vm6  ;;  %v19280_v47 = vpop.permute.xlu1 %19279 }
 0xba9   : > { %v13515_v33 = vsel %vm23078_vm7, %v19236_v54, %v19231_v6  ;;  %vm23085_vm2 = vmmov %vm23084_vm1  ;;  %v13731_v6 = vld [vmem:[#allocation7 + $0x688] sm:$0xff] }
 0xbaa   : > { %14854 = vmatmul.mubr.msk.f32.gmra.mrb[32].mxu1 %vm392_vm0, %v13035_v19  ;;  %v16910_v27 = vpack.c.bf16 %v13517_v7, %v13515_v33  ;;  %vm23086_vm3 = vmmov %vm23084_vm1 }
 0xbab   : > { %13131 = vmatprep.mubr.f32.mxu1 %v22577_v15  ;;  %vm23088_vm5 = vmmov %vm23087_vm4 }
 0xbac   : > { %v19285_v54 = vpop.permute.xlu1 %19284  ;;  %vm23091_vm7 = vmmov %vm23087_vm4 }
 0xbad   : > { %v19286_v7 = vunpack.i.l.bf16 %v19285_v54  ;;  %vm23093_vm10 = vmmov %vm23087_vm4 }
 0xbae   : > { %14855 = vmatmul.mubr.msk.f32.gmra.mrb[34].mxu1 %vm392_vm0, %v13036_v14 }
 0xbaf   : > { %16026 = vmatprep.mubr.msk.f32.mxu1 %vm392_vm0, %v13033_v57  ;;  %v13518_v57 = vsel %vm23076_vm12, %v19226_v1, %v19227_v28  ;;  %v19271_v28 = vunpack.i.l.bf16 %v19270_v48  ;;  %vm23089_vm12 = vmmov %vm23087_vm4 }
 0xbb1   : > { %v14006_v21 = vsel %vm23088_vm5, %v19271_v28, %v19272_v26 }
 0xbb2   : > { %16027 = vmatmul.mubr.msk.f32.vlgmr.msra.gmra.mrb[36].mxu1 %vm392_vm0, %v13034_v24  ;;  %v16908_v24 = vpack.c.bf16 %v13518_v57, %v13516_v34  ;;  %v19282_v34 = vunpack.i.h.bf16 %v19280_v47  ;;  %v19281_v57 = vunpack.i.l.bf16 %v19280_v47 }
 0xbb3   : > { %16891 = vmatpush1.bf16.msra.mxu1 %v16890_v42  ;;  %16029 = vmatprep.mubr.msk.f32.mxu1 %vm392_vm0, %v13035_v19  ;;  %v19247_v19 = vunpack.i.h.bf16 %v19245_v61  ;;  %v19257_v42 = vunpack.i.h.bf16 %v19255_v45  ;;  %v13733_v61 = vld [vmem:[#allocation7 + $0x698] sm:$0xff]  ;;  %v13979_v45 = vld [vmem:[#allocation7 + $0x6b0] sm:$0xff] }
 0xbb4   : > { %16893 = vmatprep.subr.bf16.mxu1 %v16892_v60 }
 0xbb5   : > { %v13761_v23 = vsel %vm23079_vm9, %v19246_v36, %v19247_v19  ;;  %v13765_v56 = vsel %vm23084_vm1, %v19256_v0, %v19257_v42  ;;  %vm23092_vm9 = vmmov %vm23087_vm4 }
 0xbb6   : > { %16030 = vmatmul.mubr.msk.f32.gmra.mrb[38].mxu1 %vm392_vm0, %v13036_v14  ;;  %v19260_v14 = vpop.permute.xlu0 %19259  ;;  %v16920_v40 = vpack.c.bf16 %v13761_v23, %v13759_v4  ;;  %v13977_v4 = vld [vmem:[#allocation7 + $0x6a0] sm:$0xff] }
 0xbb7   : > { %16895 = vmatpush1.bf16.msra.mxu1 %v16894_v49  ;;  %13360 = vmatprep.mubr.f32.mxu1 %v22577_v15  ;;  %v19262_v44 = vunpack.i.h.bf16 %v19260_v14  ;;  %v19261_v60 = vunpack.i.l.bf16 %v19260_v14  ;;  %v13758_v49 = vsel %vm23081_vm15, %v19251_v50, %v19241_v41  ;;  %vm23094_vm15 = vmmov %vm23087_vm4  ;;  %v22789_v50 = vpop.permute.xlu1 %14230 }
 0xbb8   : > { %16897 = vmatprep.subr.bf16.mxu1 %v16896_v25 }
 0xbb9   : > { %v16932_v1 = vpack.c.bf16 %v19257_v42, %v19262_v44 }
 0xbba   : > { %14860 = vmatmul.mubr.msk.f32.vlgmr.msra.gmra.mrb[28].mxu1 %vm392_vm0, %v13236_v31  ;;  %v19265_v39 = vpop.permute.xlu0 %19264 }
 0xbbb   : > { %16899 = vmatpush3.bf16.msra.mxu1 %v16896_v25  ;;  %13366 = vmatprep.mubr.f32.mxu1 %v22577_v15  ;;  %v13760_v25 = vsel %vm23082_vm6, %v19252_v29, %v19246_v36  ;;  %v19267_v30 = vunpack.i.h.bf16 %v19265_v39  ;;  %v19266_v3 = vunpack.i.l.bf16 %v19265_v39  ;;  %v13980_v29 = vld [vmem:[#allocation7 + $0x6b8] sm:$0xff]  ;;  %v14241_v48 = vpop.permute.xlu1 %14240 }
 0xbbc   : > { %16901 = vmatprep.subr.bf16.mxu1 %v16900_v35  ;;  %v16922_v43 = vpack.c.bf16 %v13760_v25, %v13758_v49 }
 0xbbd   : > { %v13762_v55 = vsel %vm23086_vm3, %v19266_v3, %v19261_v60 }
 0xbbe   : > { %14861 = vmatmul.mubr.msk.f32.gmra.mrb[30].mxu1 %vm392_vm0, %v13237_v20  ;;  %v19275_v2 = vpop.permute.xlu0 %19274 }
 0xbbf   : > { %16903 = vmatpush3.bf16.msra.mxu1 %v16900_v35  ;;  %13372 = vmatprep.mubr.f32.mxu1 %v22577_v15  ;;  %v13764_v35 = vsel %vm23085_vm2, %v19267_v30, %v19256_v0  ;;  %v19276_v62 = vunpack.i.l.bf16 %v19275_v2  ;;  %v22792_v0 = vstv %s14896_s6 }
 0xbc0   : > { %16905 = vmatprep.subr.bf16.mxu1 %v16904_v63  ;;  %v16926_v16 = vpack.c.bf16 %v13764_v35, %v13762_v55  ;;  %v16928_v63 = vpack.c.bf16 %v19247_v19, %v19242_v13 }
 0xbc2   : > { %14862 = vmatmul.mubr.msk.f32.gmra.mrb[32].mxu1 %vm392_vm0, %v13238_v37 }
 0xbc3   : > { %13378 = vmatprep.mubr.f32.mxu1 %v22577_v15 }
 0xbc6   : > { %14863 = vmatmul.mubr.msk.f32.gmra.mrb[34].mxu1 %vm392_vm0, %v13239_v10 }
 0xbc7   : > { %16040 = vmatprep.mubr.msk.f32.mxu1 %vm392_vm0, %v13236_v31  ;;  %v13763_v31 = vsel %vm23083_vm8, %v19261_v60, %v19262_v44 }
 0xbca   : > { %16041 = vmatmul.mubr.msk.f32.vlgmr.msra.gmra.mrb[36].mxu1 %vm392_vm0, %v13237_v20  ;;  %v16924_v20 = vpack.c.bf16 %v13765_v56, %v13763_v31 }
 0xbcb   : > { %16907 = vmatpush1.bf16.msra.mxu1 %v16906_v58  ;;  %16043 = vmatprep.mubr.msk.f32.mxu1 %vm392_vm0, %v13238_v37  ;;  %v19277_v37 = vunpack.i.h.bf16 %v19275_v2  ;;  %v19287_v58 = vunpack.i.h.bf16 %v19285_v54 }
 0xbcc   : > { %16909 = vmatprep.subr.bf16.mxu1 %v16908_v24 }
 0xbcd   : > { %v14008_v18 = vsel %vm23087_vm4, %v19276_v62, %v19277_v37  ;;  %v14012_v13 = vsel %vm23092_vm9, %v19286_v7, %v19287_v58  ;;  %v16944_v14 = vpack.c.bf16 %v19277_v37, %v19272_v26 }
 0xbce   : > { %16044 = vmatmul.mubr.msk.f32.gmra.mrb[38].mxu1 %vm392_vm0, %v13239_v10  ;;  %v19290_v10 = vpop.permute.xlu0 %19289  ;;  %v16936_v9 = vpack.c.bf16 %v14008_v18, %v14006_v21 }
 0xbcf   : > { %16911 = vmatpush1.bf16.msra.mxu1 %v16910_v27  ;;  %13607 = vmatprep.mubr.f32.mxu1 %v22577_v15  ;;  %v19292_v33 = vunpack.i.h.bf16 %v19290_v10  ;;  %v19291_v24 = vunpack.i.l.bf16 %v19290_v10  ;;  %v14005_v27 = vsel %vm23089_vm12, %v19281_v57, %v19271_v28 }
 0xbd0   : > { %16913 = vmatprep.subr.bf16.mxu1 %v16912_v32 }
 0xbd2   : > { %14868 = vmatmul.mubr.msk.f32.vlgmr.msra.gmra.mrb[28].mxu1 %vm392_vm0, %v13483_v51  ;;  %v19295_v59 = vpop.permute.xlu0 %19294 }
 0xbd3   : > { %16915 = vmatpush3.bf16.msra.mxu1 %v16912_v32  ;;  %13613 = vmatprep.mubr.f32.mxu1 %v22577_v15  ;;  %v14007_v32 = vsel %vm23090_vm13, %v19282_v34, %v19276_v62  ;;  %v19297_v19 = vunpack.i.h.bf16 %v19295_v59  ;;  %v19296_v36 = vunpack.i.l.bf16 %v19295_v59 }
 0xbd4   : > { %16917 = vmatprep.subr.bf16.mxu1 %v16916_v46  ;;  %v16938_v41 = vpack.c.bf16 %v14007_v32, %v14005_v27 }
 0xbd5   : > { %v14009_v17 = vsel %vm23094_vm15, %v19296_v36, %v19291_v24 }
 0xbd6   : > { %14869 = vmatmul.mubr.msk.f32.gmra.mrb[30].mxu1 %vm392_vm0, %v13484_v22 }
 0xbd7   : > { %16919 = vmatpush3.bf16.msra.mxu1 %v16916_v46  ;;  %13619 = vmatprep.mubr.f32.mxu1 %v22577_v15  ;;  %v14011_v46 = vsel %vm23093_vm10, %v19297_v19, %v19286_v7 }
 0xbd8   : > { %16921 = vmatprep.subr.bf16.mxu1 %v16920_v40  ;;  %v16942_v23 = vpack.c.bf16 %v14011_v46, %v14009_v17  ;;  %v16948_v40 = vpack.c.bf16 %v19287_v58, %v19292_v33 }
 0xbda   : > { %14870 = vmatmul.mubr.msk.f32.gmra.mrb[32].mxu1 %vm392_vm0, %v13485_v38 }
 0xbdb   : > { %13625 = vmatprep.mubr.f32.mxu1 %v22577_v15 }
 0xbde   : > { %14871 = vmatmul.mubr.msk.f32.gmra.mrb[34].mxu1 %vm392_vm0, %v13486_v5 }
 0xbdf   : > { %16054 = vmatprep.mubr.msk.f32.mxu1 %vm392_vm0, %v13483_v51  ;;  %v14010_v51 = vsel %vm23091_vm7, %v19291_v24, %v19292_v33 }
 0xbe2   : > { %16055 = vmatmul.mubr.msk.f32.vlgmr.msra.gmra.mrb[36].mxu1 %vm392_vm0, %v13484_v22  ;;  %v16940_v22 = vpack.c.bf16 %v14012_v13, %v14010_v51 }
 0xbe3   : > { %16923 = vmatpush1.bf16.msra.mxu1 %v16922_v43  ;;  %16057 = vmatprep.mubr.msk.f32.mxu1 %vm392_vm0, %v13485_v38  ;;  %v13978_v38 = vld [vmem:[#allocation7 + $0x6a8] sm:$0xff] }
 0xbe4   : > { %16925 = vmatprep.subr.bf16.mxu1 %v16924_v20 }
 0xbe6   : > { %16058 = vmatmul.mubr.msk.f32.gmra.mrb[38].mxu1 %vm392_vm0, %v13486_v5  ;;  %v14236_v5 = vpop.permute.xlu0 %14235 }
 0xbe7   : > { %16927 = vmatpush1.bf16.msra.mxu1 %v16926_v16  ;;  %13854 = vmatprep.mubr.f32.mxu1 %v22577_v15 }
 0xbe8   : > { %16929 = vmatprep.subr.bf16.mxu1 %v16928_v63 }
 0xbea   : > { %14876 = vmatmul.mubr.msk.f32.vlgmr.msra.gmra.mrb[28].mxu1 %vm392_vm0, %v13730_v12 }
 0xbeb   : > { %16931 = vmatpush3.bf16.msra.mxu1 %v16928_v63  ;;  %13860 = vmatprep.mubr.f32.mxu1 %v22577_v15 }
 0xbec   : > { %16933 = vmatprep.subr.bf16.mxu1 %v16932_v1 }
 0xbee   : > { %14877 = vmatmul.mubr.msk.f32.gmra.mrb[30].mxu1 %vm392_vm0, %v13731_v6 }
 0xbef   : > { %16935 = vmatpush3.bf16.msra.mxu1 %v16932_v1  ;;  %13866 = vmatprep.mubr.f32.mxu1 %v22577_v15 }
 0xbf0   : > { %16937 = vmatprep.subr.bf16.mxu1 %v16936_v9 }
 0xbf2   : > { %14878 = vmatmul.mubr.msk.f32.gmra.mrb[32].mxu1 %vm392_vm0, %v13732_v53 }
 0xbf3   : > { %13872 = vmatprep.mubr.f32.mxu1 %v22577_v15 }
 0xbf6   : > { %14879 = vmatmul.mubr.msk.f32.gmra.mrb[34].mxu1 %vm392_vm0, %v13733_v61 }
 0xbf7   : > { %16068 = vmatprep.mubr.msk.f32.mxu1 %vm392_vm0, %v13730_v12 }
 0xbfa   : > { %16069 = vmatmul.mubr.msk.f32.vlgmr.msra.gmra.mrb[36].mxu1 %vm392_vm0, %v13731_v6  ;;  %v14246_v6 = vpop.permute.xlu0 %14245 }
 0xbfb   : > { %16939 = vmatpush1.bf16.msra.mxu1 %v16938_v41  ;;  %16071 = vmatprep.mubr.msk.f32.mxu1 %vm392_vm0, %v13732_v53 }
 0xbfc   : > { %16941 = vmatprep.subr.bf16.mxu1 %v16940_v22 }
 0xbfe   : > { %16072 = vmatmul.mubr.msk.f32.gmra.mrb[38].mxu1 %vm392_vm0, %v13733_v61 }
 0xbff   : > { %16943 = vmatpush1.bf16.msra.mxu1 %v16942_v23  ;;  %14101 = vmatprep.mubr.f32.mxu1 %v22577_v15 }
 0xc00   : > { %16945 = vmatprep.subr.bf16.mxu1 %v16944_v14 }
 0xc02   : > { %14884 = vmatmul.mubr.msk.f32.vlgmr.msra.gmra.mrb[28].mxu1 %vm392_vm0, %v13977_v4 }
 0xc03   : > { %16947 = vmatpush3.bf16.msra.mxu1 %v16944_v14  ;;  %14107 = vmatprep.mubr.f32.mxu1 %v22577_v15 }
 0xc04   : > { %16949 = vmatprep.subr.bf16.mxu1 %v16948_v40 }
 0xc06   : > { %14885 = vmatmul.mubr.msk.f32.gmra.mrb[30].mxu1 %vm392_vm0, %v13978_v38 }
 0xc07   : > { %16951 = vmatpush3.bf16.msra.mxu1 %v16948_v40  ;;  %14113 = vmatprep.mubr.f32.mxu1 %v22577_v15 }
 0xc0a   : > { %14886 = vmatmul.mubr.msk.f32.gmra.mrb[32].mxu1 %vm392_vm0, %v13979_v45 }
 0xc0b   : > { %14119 = vmatprep.mubr.f32.mxu1 %v22577_v15 }
 0xc0e   : > { %14887 = vmatmul.mubr.msk.f32.gmra.mrb[34].mxu1 %vm392_vm0, %v13980_v29 }
 0xc0f   : > { %16082 = vmatprep.mubr.msk.f32.mxu1 %vm392_vm0, %v13977_v4 }
 0xc12   : > { %16083 = vmatmul.mubr.msk.f32.vlgmr.msra.gmra.mrb[36].mxu1 %vm392_vm0, %v13978_v38 }
 0xc13   : > { %16085 = vmatprep.mubr.msk.f32.mxu1 %vm392_vm0, %v13979_v45 }
 0xc16   : > { %16086 = vmatmul.mubr.msk.f32.gmra.mrb[38].mxu1 %vm392_vm0, %v13980_v29  ;;  %vm23095_vm0 = vcmp.eq.s32.totalorder %v22981_v11, 1 }
 0xc17   : > { %vm23096_vm3 = vmmov %vm23095_vm0 }
 0xc18   : > { %vm23097_vm12 = vmmov %vm23095_vm0 }
 0xc19   : > { %vm23098_vm9 = vmmov %vm23095_vm0 }
 0xcd5   : > { %v14103_v42 = vpop.f32.mrb[28].mxu1 }
 0xcd6   : > { %v14248_v15 = vadd.f32 %v22789_v50, %v14103_v42  ;;  %v14105_v44 = vpop.f32.mrb[29].mxu1 }
 0xcd7   : > { %v14249_v60 = vadd.f32 %v22789_v50, %v14105_v44 }
 0xcd8   : > { %vm14261_vm6 = vcmp.ge.f32.partialorder %v14248_v15, 0.0  ;;  %v14274_v39 = vmul.f32 %v22792_v0, %v14248_v15 }
 0xcd9   : > { %vm14262_vm8 = vcmp.ge.f32.partialorder %v14249_v60, 0.0  ;;  %v14275_v49 = vmul.f32 %v22792_v0, %v14249_v60  ;;  %v14109_v25 = vpop.f32.mrb[30].mxu1 }
 0xcda   : > { %v14286_v30 = vsel %vm14261_vm6, %v14248_v15, %v14274_v39  ;;  %v14251_v3 = vadd.f32 %v14236_v5, %v14109_v25  ;;  %v14111_v31 = vpop.f32.mrb[31].mxu1 }
 0xcdb   : > { %v14298_v56 = vsel %vm2625_vm14, %v14286_v30, 0.0  ;;  %v14287_v43 = vsel %vm14262_vm8, %v14249_v60, %v14275_v49  ;;  %v14252_v35 = vadd.f32 %v14236_v5, %v14111_v31 }
 0xcdc   : > { %14310 = vst [vmem:[%s22800_s15] sm:$0xff] %v14298_v56  ;;  %v14299_v55 = vsel %vm23095_vm0, %v14287_v43, 0.0  ;;  %vm14264_vm1 = vcmp.ge.f32.partialorder %v14251_v3, 0.0  ;;  %v14277_v20 = vmul.f32 %v22792_v0, %v14251_v3 }
 0xcdd   : > { %14311 = vst [vmem:[%s22800_s15 + $0x8] sm:$0xff] %v14299_v55  ;;  %vm14265_vm2 = vcmp.ge.f32.partialorder %v14252_v35, 0.0  ;;  %v14278_v2 = vmul.f32 %v22792_v0, %v14252_v35  ;;  %v14115_v16 = vpop.f32.mrb[32].mxu1 }
 0xcde   : > { %v14289_v63 = vsel %vm14264_vm1, %v14251_v3, %v14277_v20  ;;  %v14254_v37 = vadd.f32 %v14241_v48, %v14115_v16  ;;  %v14117_v62 = vpop.f32.mrb[33].mxu1 }
 0xcdf   : > { %v14301_v12 = vsel %vm2625_vm14, %v14289_v63, 0.0  ;;  %v14290_v26 = vsel %vm14265_vm2, %v14252_v35, %v14278_v2  ;;  %v14255_v28 = vadd.f32 %v14241_v48, %v14117_v62 }
 0xce0   : > { %14313 = vst [vmem:[%s22800_s15 + $0x18] sm:$0xff] %v14301_v12  ;;  %v14302_v1 = vsel %vm23096_vm3, %v14290_v26, 0.0  ;;  %vm14267_vm4 = vcmp.ge.f32.partialorder %v14254_v37, 0.0  ;;  %v14280_v47 = vmul.f32 %v22792_v0, %v14254_v37 }
 0xce1   : > { %14314 = vst [vmem:[%s22800_s15 + $0x20] sm:$0xff] %v14302_v1  ;;  %vm14268_vm5 = vcmp.ge.f32.partialorder %v14255_v28, 0.0  ;;  %v14281_v18 = vmul.f32 %v22792_v0, %v14255_v28  ;;  %v14121_v10 = vpop.f32.mrb[34].mxu1 }
 0xce2   : > { %v14292_v21 = vsel %vm14267_vm4, %v14254_v37, %v14280_v47  ;;  %v14257_v9 = vadd.f32 %v14246_v6, %v14121_v10  ;;  %v14123_v53 = vpop.f32.mrb[35].mxu1 }
 0xce3   : > { %v14304_v54 = vsel %vm2625_vm14, %v14292_v21, 0.0  ;;  %v14293_v34 = vsel %vm14268_vm5, %v14255_v28, %v14281_v18  ;;  %v14258_v57 = vadd.f32 %v14246_v6, %v14123_v53 }
 0xce4   : > { %14316 = vst [vmem:[%s22800_s15 + $0x30] sm:$0xff] %v14304_v54  ;;  %v14305_v58 = vsel %vm23097_vm12, %v14293_v34, 0.0  ;;  %vm14270_vm13 = vcmp.ge.f32.partialorder %v14257_v9, 0.0  ;;  %v14283_v7 = vmul.f32 %v22792_v0, %v14257_v9 }
 0xce5   : > { %14317 = vst [vmem:[%s22800_s15 + $0x38] sm:$0xff] %v14305_v58  ;;  %vm14271_vm7 = vcmp.ge.f32.partialorder %v14258_v57, 0.0  ;;  %v14284_v33 = vmul.f32 %v22792_v0, %v14258_v57  ;;  %v16084_v24 = vpop.f32.mrb[36].mxu1 }
 0xce6   : > { %v14295_v59 = vsel %vm14270_vm13, %v14257_v9, %v14283_v7  ;;  %v14253_v61 = vadd.f32 %v16084_v24, %v14236_v5  ;;  %v14192_v27 = vpop.f32.mrb[37].mxu1 }
 0xce7   : > { %v14307_v32 = vsel %vm2625_vm14, %v14295_v59, 0.0  ;;  %v14296_v19 = vsel %vm14271_vm7, %v14258_v57, %v14284_v33  ;;  %v14250_v36 = vadd.f32 %v22789_v50, %v14192_v27  ;;  %vm23099_vm14 = vcmask 556032  }
 0xce8   : > { %14319 = vst [vmem:[%s22800_s15 + $0x48] sm:$0xff] %v14307_v32  ;;  %v14308_v51 = vsel %vm23098_vm9, %v14296_v19, 0.0  ;;  %vm14266_vm10 = vcmp.ge.f32.partialorder %v14253_v61, 0.0  ;;  %v14279_v13 = vmul.f32 %v22792_v0, %v14253_v61  ;;  %vm23100_vm8 = vmmov %vm23099_vm14 }
 0xce9   : > { %14320 = vst [vmem:[%s22800_s15 + $0x50] sm:$0xff] %v14308_v51  ;;  %vm14263_vm15 = vcmp.ge.f32.partialorder %v14250_v36, 0.0  ;;  %v14276_v41 = vmul.f32 %v22792_v0, %v14250_v36  ;;  %v16087_v46 = vpop.f32.mrb[38].mxu1  ;;  %vm23101_vm1 = vmmov %vm23100_vm8 }
 0xcea   : > { %v14291_v8 = vsel %vm14266_vm10, %v14253_v61, %v14279_v13  ;;  %v14259_v17 = vadd.f32 %v16087_v46, %v14246_v6  ;;  %v14202_v22 = vpop.f32.mrb[39].mxu1  ;;  %vm23102_vm2 = vmmov %vm23101_vm1 }
 0xceb   : > { %v14303_v23 = vsel %vm2627_vm11, %v14291_v8, 0.0  ;;  %v14288_v11 = vsel %vm14263_vm15, %v14250_v36, %v14276_v41  ;;  %v14256_v14 = vadd.f32 %v14241_v48, %v14202_v22 }
 0xcec   : > { %14315 = vst.msk [vmem:[%s22800_s15 + $0x28] sm:$0xff] %vm23099_vm14, %v14303_v23  ;;  %v14300_v4 = vsel %vm2627_vm11, %v14288_v11, 0.0  ;;  %vm14272_vm6 = vcmp.ge.f32.partialorder %v14259_v17, 0.0  ;;  %v14285_v40 = vmul.f32 %v22792_v0, %v14259_v17 }
 0xced   : > { %14312 = vst.msk [vmem:[%s22800_s15 + $0x10] sm:$0xff] %vm23100_vm8, %v14300_v4  ;;  %vm14269_vm0 = vcmp.ge.f32.partialorder %v14256_v14, 0.0  ;;  %v14282_v38 = vmul.f32 %v22792_v0, %v14256_v14 }
 0xcee   : > { %v14297_v45 = vsel %vm14272_vm6, %v14259_v17, %v14285_v40 }
 0xcef   : > { %v14309_v29 = vsel %vm2627_vm11, %v14297_v45, 0.0  ;;  %v14294_v50 = vsel %vm14269_vm0, %v14256_v14, %v14282_v38 }
 0xcf0   : > { %14321 = vst.msk [vmem:[%s22800_s15 + $0x58] sm:$0xff] %vm23101_vm1, %v14309_v29  ;;  %v14306_v42 = vsel %vm2627_vm11, %v14294_v50, 0.0 }
 0xcf1   : > { %14318 = vst.msk [vmem:[%s22800_s15 + $0x40] sm:$0xff] %vm23102_vm2, %v14306_v42 }
 0xcf2   : > { %19450 = shalt.err (!%p19447_p13)
}
 0xcf3   : > { %s19451_s27 = scalar_lea.hbm %s22848_s9, 1536  ;;  %s19455_s6 = scalar_lea.hbm %s22907_s5, 3072 }
 0xcf4   : > { %p19452_p2 = scmp.ne.s32.totalorder %s22848_s9, %s19451_s27  ;;  %p19456_p0 = scmp.lt.u32.totalorder %s22848_s9, %s22907_s5 }
 0xcf5   : > { %p19457_p3 = scmp.lt.u32.totalorder %s19455_s6, %s19451_s27  ;;  %p19459_p9 = scmp.lt.u32.totalorder %s19451_s27, %s22848_s9 }
 0xcf6   : > { %p19453_p4 = pnand %p19452_p2, %p19664_p7 }
 0xcf7   : > { %p19458_p5 = por %p19457_p3, %p19456_p0 }
 0xcf8   : > { %p19454_p11 = pneg %p19453_p4 }
 0xcf9   : > { %p19460_p12 = por %p19459_p9, %p19458_p5 }
 0xcfb   : > { %p19461_p10 = pnand %p19460_p12, %p19454_p11 }
 0xcfd   : > { %19464 = shalt.err (!%p19461_p10)
}
 0xcfe   : > { %s19531_s17 = smov 384   ;;  %s19532_s22 = smov 24  }
 0xcff   : > { %17543 = dma.vmem_to_hbm [thread:$0]  (%p19664_p7), %s22852_s29, 1536, %s22848_s9, %s14323_s24, %s19531_s17, %s19531_s17, %s19532_s22  }
 0xd00 PF: > { %s14351_s30 = sand.u32 1, %s19499_s18   ;;  %p23103_p1 = scmp.ne.s32.totalorder %s22941_s25, 0 }
 0xd01   : > { %p23104_p6 = scmp.ge.s32.totalorder %s19511_s21, 2  ;;  %s14352_s26 = scalar_lea.sflag [#allocation5], %s14351_s30 }
 0xd03   : > { %p17557_p8 = pnand %p23104_p6, %p23103_p1 }
 0xd05   : > { %19494 = dma.done.wait (!%p17557_p8), %s14352_s26, 1536  }
 0xd06   : > { %19496 = vsyncadd (!%p17557_p8), %s14352_s26, 4294965760  ;;  %p20_p13 = scmp.ge.s32.totalorder %s19654_s28, 4   ;;  %s23105_s18 = smov %s19503_s19 }
 0xd07   : > { %s23106_s19 = smov %s19507_s20  ;;  %s23107_s20 = smov %s19670_s10 }
 0xd08   : > { %s23108_s21 = smov %s19654_s28  ;;  %22 = sbr.rel (!%p20_p13) target bundleno = 7 (0x7), region = 152 }
 0xd0f   :  { %14357 = vsyncpa [#allocation4], 1 }
 0xd10   :  { %14359 = vsyncpa [#allocation4 + $0x1], 1 }
 0xd11   :  { %14360 = vsyncpa [#allocation8], 1 }
 0xd12   :  { %14361 = vsyncpa [#allocation5], 1 }
 0xd13   :  { %14363 = vsyncpa [#allocation5 + $0x1], 1 }
 0xd14   :  { %14364 = vsyncpa [#allocation6], 1 }
 0xd15   :  { %14366 = vsyncpa [#allocation6 + $0x1], 1 }

</bundles_post_ra>
